<compile_context>
chip_gen: v6e
topology: v6e:2x2x1
jax: 0.10.0
libtpu: 0.0.40
codegen_flags: <defaults>
</compile_context>

<pallas_src>
import functools

import jax
import jax.numpy as jnp
from jax import lax
from jax.experimental import pallas as pl
from jax.experimental.pallas import tpu as pltpu


def _conv_relu_conv_kernel(x_ref, wf1_ref, b1_ref, wf2_ref, b2_ref, o_ref, pad_ref,
                           *, H, W, C):
    # x_ref:   (1, H, W*C)     f32 lane-dense input (one batch element)
    # wf1_ref: (3C, 3C)        bf16 dx-folded weights, conv1:  [dy*C+ci, dx*C+co]
    # b1_ref:  (1, C)          f32 bias, conv1
    # wf2_ref: (3C, 3C)        bf16 dx-folded weights, conv2
    # b2_ref:  (1, W*C)        f32 bias conv2, pre-tiled over W (lane-dense)
    # o_ref:   (1, H, W*C)     f32 lane-dense output
    # pad_ref: (H+2, W+2, C)   bf16 zero-padded activation scratch (reused by both convs)
    Wp = W + 2

    # ---- zero ONLY the 1-pixel border; the interior is fully overwritten every step. ----
    zero_row = jnp.zeros((1, Wp, C), jnp.bfloat16)
    pad_ref[0:1, :, :] = zero_row
    pad_ref[H + 1:H + 2, :, :] = zero_row
    zero_col = jnp.zeros((H, 1, C), jnp.bfloat16)
    pad_ref[1:H + 1, 0:1, :] = zero_col
    pad_ref[1:H + 1, W + 1:W + 2, :] = zero_col

    # ---- interior <- x (bf16 matmul operand; the residual below keeps x in f32). ----
    x_l = x_ref[0]                                                     # (H, W*C) f32
    pad_ref[1:H + 1, 1:W + 1, :] = x_l.astype(jnp.bfloat16).reshape(H, W, C)

    def conv3x3(wf):
        # dy-only im2col: 3 free outer-dim slices of the padded scratch -> K = 3C.
        slab = jnp.concatenate(
            [pad_ref[dy:dy + H, :, :] for dy in range(3)], axis=-1)    # (H, Wp, 3C) bf16
        p = jnp.dot(slab.reshape(H * Wp, 3 * C), wf,
                    preferred_element_type=jnp.float32)                # (H*Wp, 3C) f32
        p = p.reshape(H, Wp, 3 * C)
        # Combine the 3 dx partial sums: output column w needs padded columns w, w+1, w+2.
        # Rows computed on padded edge columns are exactly the zero-padding contributions.
        return (p[:, 0:W, 0:C]
                + p[:, 1:W + 1, C:2 * C]
                + p[:, 2:W + 2, 2 * C:3 * C])                          # (H, W, C) f32

    # ---- conv1 + bias + ReLU, written back into the padded scratch (border stays 0). ----
    y = jnp.maximum(conv3x3(wf1_ref[...]) + b1_ref[...], 0.0)
    pad_ref[1:H + 1, 1:W + 1, :] = y.astype(jnp.bfloat16)

    # ---- conv2, then lane-dense epilogue: bias2 + residual + unmasked store. ----
    z = conv3x3(wf2_ref[...]).reshape(H, W * C)                        # single relayout
    z = z + b2_ref[...] + x_l                                          # full 128-lane VPU ops
    o_ref[...] = z.reshape(1, H, W * C).astype(o_ref.dtype)


def _vmem_limit_bytes(H, W, C):
    """Explicit scoped-VMEM budget (v5e default is only 16 MiB)."""
    Wp = W + 2
    need = (2 * 2 * H * W * C * 4                  # x + out blocks, double-buffered, f32
            + 2 * 2 * (3 * C) * (3 * C) * 2        # two bf16 folded weights, double-buffered
            + 2 * (C + W * C) * 4                  # biases
            + (H + 2) * Wp * C * 2                 # bf16 pad scratch
            + 2 * H * Wp * 3 * C * (2 + 4))        # bf16 slab + f32 matmul result (headroom)
    return max(16 << 20, min(2 * need, 64 << 20))


def conv_relu_conv(x_nchw, params):
    """Forward pass of ConvReluConv. x_nchw: (N, C, H, W) -> (N, C, H, W)."""
    N, C, H, W = x_nchw.shape
    assert (W * C) % 128 == 0, "lane-dense layout requires W*C to be a multiple of 128"

    # NCHW -> NHWC (real transpose) -> (N, H, W*C) lane-dense (free metadata reshape).
    x = jnp.transpose(x_nchw, (0, 2, 3, 1)).reshape(N, H, W * C)

    # Hoisted (once, outside the grid loop): dx-folded weight relayout + bf16 cast,
    # conv2 bias pre-tiled to lane-dense (W*C,).
    wf1 = params["w1"].transpose(0, 2, 1, 3).reshape(3 * C, 3 * C).astype(jnp.bfloat16)
    wf2 = params["w2"].transpose(0, 2, 1, 3).reshape(3 * C, 3 * C).astype(jnp.bfloat16)
    b1 = params["b1"].reshape(1, C)
    b2l = jnp.tile(params["b2"], W).reshape(1, W * C)

    kern = functools.partial(_conv_relu_conv_kernel, H=H, W=W, C=C)
    out = pl.pallas_call(
        kern,
        out_shape=jax.ShapeDtypeStruct((N, H, W * C), x_nchw.dtype),
        grid=(N,),
        in_specs=[
            pl.BlockSpec((1, H, W * C), lambda n: (n, 0, 0)),
            pl.BlockSpec((3 * C, 3 * C), lambda n: (0, 0)),
            pl.BlockSpec((1, C), lambda n: (0, 0)),
            pl.BlockSpec((3 * C, 3 * C), lambda n: (0, 0)),
            pl.BlockSpec((1, W * C), lambda n: (0, 0)),
        ],
        out_specs=pl.BlockSpec((1, H, W * C), lambda n: (n, 0, 0)),
        scratch_shapes=[pltpu.VMEM((H + 2, W + 2, C), jnp.bfloat16)],
        compiler_params=pltpu.CompilerParams(
            dimension_semantics=("parallel",),
            vmem_limit_bytes=_vmem_limit_bytes(H, W, C)),
    )(x, wf1, b1, wf2, b2l)

    out = out.reshape(N, H, W, C)                                      # free metadata reshape
    return jnp.transpose(out, (0, 3, 1, 2))                            # NHWC -> NCHW


def init_params(key, nf=64, bias=True):
    """Mirrors nn.Conv2d(nf, nf, 3, 1, 1) + initialize_weights(..., 0.1)."""
    k0, k1, k2, k3 = jax.random.split(key, 4)
    std = (2.0 / (nf * 9)) ** 0.5 * 0.1
    # PyTorch conv weight is (Cout, Cin, kh, kw); store as (kh, kw, Cin, Cout) for the kernel.
    w1 = jax.random.normal(k0, (nf, nf, 3, 3), jnp.float32) * std
    w2 = jax.random.normal(k1, (nf, nf, 3, 3), jnp.float32) * std
    b1 = (jax.random.normal(k2, (nf,), jnp.float32) * 0.01 if bias
          else jnp.zeros((nf,), jnp.float32))
    b2 = (jax.random.normal(k3, (nf,), jnp.float32) * 0.01 if bias
          else jnp.zeros((nf,), jnp.float32))
    return {"w1": jnp.transpose(w1, (2, 3, 1, 0)), "b1": b1,
            "w2": jnp.transpose(w2, (2, 3, 1, 0)), "b2": b2}


# ---------------- pure-JAX reference (NCHW, matches the PyTorch ops) ----------------
def _ref_conv_nchw(x, w_khkw_cin_cout, b):
    w = jnp.transpose(w_khkw_cin_cout, (3, 2, 0, 1))                   # -> (Cout, Cin, kh, kw)
    y = lax.conv_general_dilated(
        x, w, window_strides=(1, 1), padding=((1, 1), (1, 1)),
        dimension_numbers=("NCHW", "OIHW", "NCHW"))
    return y + b[None, :, None, None]


def reference_forward(x_nchw, params):
    out = jnp.maximum(_ref_conv_nchw(x_nchw, params["w1"], params["b1"]), 0.0)
    out = _ref_conv_nchw(out, params["w2"], params["b2"])
    return x_nchw + out


if __name__ == "__main__":
    key = jax.random.PRNGKey(0)
    kx, kp = jax.random.split(key)
    nf, N, H, W = 64, 2, 16, 16
    x = jax.random.normal(kx, (N, nf, H, W), jnp.float32)
    params = init_params(kp, nf, bias=True)

    out = jax.block_until_ready(conv_relu_conv(x, params))
    ref = jax.block_until_ready(reference_forward(x, params))

    assert out.shape == (N, nf, H, W), out.shape
    err = float(jnp.max(jnp.abs(out - ref)))
    # bf16 matmul inputs with f32 accumulation -> loosened tolerance vs. pure-f32 reference.
    assert err < 2e-2, err

    print("KERNEL_OK")
</pallas_src>

<mosaic_0001>
module attributes {stable_mosaic.version = 11 : i64} {
  func.func @_conv_relu_conv_kernel(%arg0: i32, %arg1: memref<1x16x1024xf32, #tpu.memory_space<vmem>>, %arg2: memref<192x192xbf16, #tpu.memory_space<vmem>>, %arg3: memref<1x64xf32, #tpu.memory_space<vmem>>, %arg4: memref<192x192xbf16, #tpu.memory_space<vmem>>, %arg5: memref<1x1024xf32, #tpu.memory_space<vmem>>, %arg6: memref<1x16x1024xf32, #tpu.memory_space<vmem>>, %arg7: memref<18x18x64xbf16, #tpu.memory_space<vmem>>) attributes {dimension_semantics = [#tpu.dimension_semantics<parallel>], iteration_bounds = array<i64: 2>, scalar_prefetch = 0 : i64, scratch_operands = 1 : i64, tpu.core_type = #tpu.core_type<tc>, window_params = [{transform_indices = @transform_0, window_bounds = array<i64: 1, 16, 1024>}, {pipeline_mode = #tpu.pipeline_mode<synchronous>, transform_indices = @transform_1, window_bounds = array<i64: 192, 192>}, {pipeline_mode = #tpu.pipeline_mode<synchronous>, transform_indices = @transform_2, window_bounds = array<i64: 1, 64>}, {pipeline_mode = #tpu.pipeline_mode<synchronous>, transform_indices = @transform_3, window_bounds = array<i64: 192, 192>}, {pipeline_mode = #tpu.pipeline_mode<synchronous>, transform_indices = @transform_4, window_bounds = array<i64: 1, 1024>}, {transform_indices = @transform_5, window_bounds = array<i64: 1, 16, 1024>}]} {
    %cst = arith.constant 0.000000e+00 : bf16
    %0 = vector.broadcast %cst : bf16 to vector<1x18x64xbf16>
    %c0 = arith.constant 0 : index
    %c0_0 = arith.constant 0 : index
    %c0_1 = arith.constant 0 : index
    %1 = vector.load %arg7[%c0, %c0_0, %c0_1] : memref<18x18x64xbf16, #tpu.memory_space<vmem>>, vector<1x18x64xbf16>
    tpu.vector_store %arg7[%c0, %c0_0, %c0_1], %0 {strides = array<i32>} : memref<18x18x64xbf16, #tpu.memory_space<vmem>>, vector<1x18x64xbf16>,
    %c17 = arith.constant 17 : index
    %c0_2 = arith.constant 0 : index
    %c0_3 = arith.constant 0 : index
    %2 = vector.load %arg7[%c17, %c0_2, %c0_3] : memref<18x18x64xbf16, #tpu.memory_space<vmem>>, vector<1x18x64xbf16>
    tpu.vector_store %arg7[%c17, %c0_2, %c0_3], %0 {strides = array<i32>} : memref<18x18x64xbf16, #tpu.memory_space<vmem>>, vector<1x18x64xbf16>,
    %cst_4 = arith.constant 0.000000e+00 : bf16
    %3 = vector.broadcast %cst_4 : bf16 to vector<16x1x64xbf16>
    %c1 = arith.constant 1 : index
    %c0_5 = arith.constant 0 : index
    %c0_6 = arith.constant 0 : index
    %4 = vector.load %arg7[%c1, %c0_5, %c0_6] : memref<18x18x64xbf16, #tpu.memory_space<vmem>>, vector<16x1x64xbf16>
    tpu.vector_store %arg7[%c1, %c0_5, %c0_6], %3 {strides = array<i32>} : memref<18x18x64xbf16, #tpu.memory_space<vmem>>, vector<16x1x64xbf16>,
    %c1_7 = arith.constant 1 : index
    %c17_8 = arith.constant 17 : index
    %c0_9 = arith.constant 0 : index
    %5 = vector.load %arg7[%c1_7, %c17_8, %c0_9] : memref<18x18x64xbf16, #tpu.memory_space<vmem>>, vector<16x1x64xbf16>
    tpu.vector_store %arg7[%c1_7, %c17_8, %c0_9], %3 {strides = array<i32>} : memref<18x18x64xbf16, #tpu.memory_space<vmem>>, vector<16x1x64xbf16>,
    %c0_10 = arith.constant 0 : index
    %c0_11 = arith.constant 0 : index
    %c0_12 = arith.constant 0 : index
    %6 = vector.load %arg1[%c0_10, %c0_11, %c0_12] : memref<1x16x1024xf32, #tpu.memory_space<vmem>>, vector<1x16x1024xf32>
    %7 = vector.shape_cast %6 : vector<1x16x1024xf32> to vector<16x1024xf32>
    %8 = arith.truncf %7 : vector<16x1024xf32> to vector<16x1024xbf16>
    %9 = vector.shape_cast %8 : vector<16x1024xbf16> to vector<16x16x64xbf16>
    %c1_13 = arith.constant 1 : index
    %c1_14 = arith.constant 1 : index
    %c0_15 = arith.constant 0 : index
    %10 = vector.load %arg7[%c1_13, %c1_14, %c0_15] : memref<18x18x64xbf16, #tpu.memory_space<vmem>>, vector<16x16x64xbf16>
    tpu.vector_store %arg7[%c1_13, %c1_14, %c0_15], %9 {strides = array<i32>} : memref<18x18x64xbf16, #tpu.memory_space<vmem>>, vector<16x16x64xbf16>,
    %c0_16 = arith.constant 0 : index
    %c0_17 = arith.constant 0 : index
    %11 = vector.load %arg2[%c0_16, %c0_17] : memref<192x192xbf16, #tpu.memory_space<vmem>>, vector<192x192xbf16>
    %c0_18 = arith.constant 0 : index
    %c0_19 = arith.constant 0 : index
    %c0_20 = arith.constant 0 : index
    %12 = vector.load %arg7[%c0_18, %c0_19, %c0_20] : memref<18x18x64xbf16, #tpu.memory_space<vmem>>, vector<16x18x64xbf16>
    %c1_21 = arith.constant 1 : index
    %c0_22 = arith.constant 0 : index
    %c0_23 = arith.constant 0 : index
    %13 = vector.load %arg7[%c1_21, %c0_22, %c0_23] : memref<18x18x64xbf16, #tpu.memory_space<vmem>>, vector<16x18x64xbf16>
    %c2 = arith.constant 2 : index
    %c0_24 = arith.constant 0 : index
    %c0_25 = arith.constant 0 : index
    %14 = vector.load %arg7[%c2, %c0_24, %c0_25] : memref<18x18x64xbf16, #tpu.memory_space<vmem>>, vector<16x18x64xbf16>
    %15 = tpu.concatenate %12, %13, %14 in 2 : vector<16x18x64xbf16>, vector<16x18x64xbf16>, vector<16x18x64xbf16> -> vector<16x18x192xbf16>
    %16 = vector.shape_cast %15 : vector<16x18x192xbf16> to vector<288x192xbf16>
    %cst_26 = arith.constant dense<0.000000e+00> : vector<288x192xf32>
    %17 = tpu.matmul %16, %11, %cst_26 {dimension_numbers = #tpu.dot_dimension_numbers<[1], [0], [0], [1], [0, 0, 1, 1], [], []>} : vector<288x192xbf16>, vector<192x192xbf16>, vector<288x192xf32> -> vector<288x192xf32>
    %18 = vector.shape_cast %17 : vector<288x192xf32> to vector<16x18x192xf32>
    %19 = vector.extract_strided_slice %18 {offsets = [0, 0, 0], sizes = [16, 16, 64], strides = [1, 1, 1]} : vector<16x18x192xf32> to vector<16x16x64xf32>
    %20 = vector.extract_strided_slice %18 {offsets = [0, 1, 64], sizes = [16, 16, 64], strides = [1, 1, 1]} : vector<16x18x192xf32> to vector<16x16x64xf32>
    %21 = arith.addf %19, %20 : vector<16x16x64xf32>
    %22 = vector.extract_strided_slice %18 {offsets = [0, 2, 128], sizes = [16, 16, 64], strides = [1, 1, 1]} : vector<16x18x192xf32> to vector<16x16x64xf32>
    %23 = arith.addf %21, %22 : vector<16x16x64xf32>
    %c0_27 = arith.constant 0 : index
    %c0_28 = arith.constant 0 : index
    %24 = vector.load %arg3[%c0_27, %c0_28] : memref<1x64xf32, #tpu.memory_space<vmem>>, vector<1x64xf32>
    %25 = vector.shape_cast %24 : vector<1x64xf32> to vector<1x1x64xf32>
    %26 = vector.broadcast %25 : vector<1x1x64xf32> to vector<16x16x64xf32>
    %27 = arith.addf %23, %26 : vector<16x16x64xf32>
    %cst_29 = arith.constant 0.000000e+00 : f32
    %28 = vector.broadcast %cst_29 : f32 to vector<16x16x64xf32>
    %29 = arith.maximumf %27, %28 : vector<16x16x64xf32>
    %30 = arith.truncf %29 : vector<16x16x64xf32> to vector<16x16x64xbf16>
    %c1_30 = arith.constant 1 : index
    %c1_31 = arith.constant 1 : index
    %c0_32 = arith.constant 0 : index
    %31 = vector.load %arg7[%c1_30, %c1_31, %c0_32] : memref<18x18x64xbf16, #tpu.memory_space<vmem>>, vector<16x16x64xbf16>
    tpu.vector_store %arg7[%c1_30, %c1_31, %c0_32], %30 {strides = array<i32>} : memref<18x18x64xbf16, #tpu.memory_space<vmem>>, vector<16x16x64xbf16>,
    %c0_33 = arith.constant 0 : index
    %c0_34 = arith.constant 0 : index
    %32 = vector.load %arg4[%c0_33, %c0_34] : memref<192x192xbf16, #tpu.memory_space<vmem>>, vector<192x192xbf16>
    %c0_35 = arith.constant 0 : index
    %c0_36 = arith.constant 0 : index
    %c0_37 = arith.constant 0 : index
    %33 = vector.load %arg7[%c0_35, %c0_36, %c0_37] : memref<18x18x64xbf16, #tpu.memory_space<vmem>>, vector<16x18x64xbf16>
    %c1_38 = arith.constant 1 : index
    %c0_39 = arith.constant 0 : index
    %c0_40 = arith.constant 0 : index
    %34 = vector.load %arg7[%c1_38, %c0_39, %c0_40] : memref<18x18x64xbf16, #tpu.memory_space<vmem>>, vector<16x18x64xbf16>
    %c2_41 = arith.constant 2 : index
    %c0_42 = arith.constant 0 : index
    %c0_43 = arith.constant 0 : index
    %35 = vector.load %arg7[%c2_41, %c0_42, %c0_43] : memref<18x18x64xbf16, #tpu.memory_space<vmem>>, vector<16x18x64xbf16>
    %36 = tpu.concatenate %33, %34, %35 in 2 : vector<16x18x64xbf16>, vector<16x18x64xbf16>, vector<16x18x64xbf16> -> vector<16x18x192xbf16>
    %37 = vector.shape_cast %36 : vector<16x18x192xbf16> to vector<288x192xbf16>
    %cst_44 = arith.constant dense<0.000000e+00> : vector<288x192xf32>
    %38 = tpu.matmul %37, %32, %cst_44 {dimension_numbers = #tpu.dot_dimension_numbers<[1], [0], [0], [1], [0, 0, 1, 1], [], []>} : vector<288x192xbf16>, vector<192x192xbf16>, vector<288x192xf32> -> vector<288x192xf32>
    %39 = vector.shape_cast %38 : vector<288x192xf32> to vector<16x18x192xf32>
    %40 = vector.extract_strided_slice %39 {offsets = [0, 0, 0], sizes = [16, 16, 64], strides = [1, 1, 1]} : vector<16x18x192xf32> to vector<16x16x64xf32>
    %41 = vector.extract_strided_slice %39 {offsets = [0, 1, 64], sizes = [16, 16, 64], strides = [1, 1, 1]} : vector<16x18x192xf32> to vector<16x16x64xf32>
    %42 = arith.addf %40, %41 : vector<16x16x64xf32>
    %43 = vector.extract_strided_slice %39 {offsets = [0, 2, 128], sizes = [16, 16, 64], strides = [1, 1, 1]} : vector<16x18x192xf32> to vector<16x16x64xf32>
    %44 = arith.addf %42, %43 : vector<16x16x64xf32>
    %45 = vector.shape_cast %44 : vector<16x16x64xf32> to vector<16x1024xf32>
    %c0_45 = arith.constant 0 : index
    %c0_46 = arith.constant 0 : index
    %46 = vector.load %arg5[%c0_45, %c0_46] : memref<1x1024xf32, #tpu.memory_space<vmem>>, vector<1x1024xf32>
    %47 = vector.broadcast %46 : vector<1x1024xf32> to vector<16x1024xf32>
    %48 = arith.addf %45, %47 : vector<16x1024xf32>
    %49 = arith.addf %48, %7 : vector<16x1024xf32>
    %50 = vector.shape_cast %49 : vector<16x1024xf32> to vector<1x16x1024xf32>
    %c0_47 = arith.constant 0 : index
    %c0_48 = arith.constant 0 : index
    %c0_49 = arith.constant 0 : index
    %51 = vector.load %arg6[%c0_47, %c0_48, %c0_49] : memref<1x16x1024xf32, #tpu.memory_space<vmem>>, vector<1x16x1024xf32>
    tpu.vector_store %arg6[%c0_47, %c0_48, %c0_49], %50 {strides = array<i32>} : memref<1x16x1024xf32, #tpu.memory_space<vmem>>, vector<1x16x1024xf32>,
    return
  }
  func.func @transform_0(%arg0: i32) -> (i32, i32, i32) {
    %c0_i32 = arith.constant 0 : i32
    %c0_i32_0 = arith.constant 0 : i32
    %c0_i32_1 = arith.constant 0 : i32
    return %arg0, %c0_i32, %c0_i32_0 : i32, i32, i32
  }
  func.func @transform_1(%arg0: i32) -> (i32, i32) {
    %c0_i32 = arith.constant 0 : i32
    %c0_i32_0 = arith.constant 0 : i32
    %c0_i32_1 = arith.constant 0 : i32
    return %c0_i32, %c0_i32_0 : i32, i32
  }
  func.func @transform_2(%arg0: i32) -> (i32, i32) {
    %c0_i32 = arith.constant 0 : i32
    %c0_i32_0 = arith.constant 0 : i32
    %c0_i32_1 = arith.constant 0 : i32
    return %c0_i32, %c0_i32_0 : i32, i32
  }
  func.func @transform_3(%arg0: i32) -> (i32, i32) {
    %c0_i32 = arith.constant 0 : i32
    %c0_i32_0 = arith.constant 0 : i32
    %c0_i32_1 = arith.constant 0 : i32
    return %c0_i32, %c0_i32_0 : i32, i32
  }
  func.func @transform_4(%arg0: i32) -> (i32, i32) {
    %c0_i32 = arith.constant 0 : i32
    %c0_i32_0 = arith.constant 0 : i32
    %c0_i32_1 = arith.constant 0 : i32
    return %c0_i32, %c0_i32_0 : i32, i32
  }
  func.func @transform_5(%arg0: i32) -> (i32, i32, i32) {
    %c0_i32 = arith.constant 0 : i32
    %c0_i32_0 = arith.constant 0 : i32
    %c0_i32_1 = arith.constant 0 : i32
    return %arg0, %c0_i32, %c0_i32_0 : i32, i32, i32
  }
}

</mosaic_0001>

<bundles_post_ra>
// kernel: tpu_custom_call.1
= control target key start
LH: loop header
LB: loop body
LE: loop exit
PB: predicated region body
PF: predicated region fallthrough
CT: control target
= control target key end

     0   :  { %10 = vsyncpa [#allocation4], 0  ;;  %s23586_s0 = inlined_call_operand.hbm [shape: f32[2,16,1024], index: 0, kind: input, shape index: {}]   ;;  %s23587_s1 = inlined_call_operand.hbm [shape: bf16[192,192], index: 1, kind: input, shape index: {}]   ;;  %s23588_s2 = inlined_call_operand.vmem [shape: f32[1,64], index: 2, kind: input, shape index: {}]   ;;  %s23589_s3 = inlined_call_operand.hbm [shape: bf16[192,192], index: 3, kind: input, shape index: {}]   ;;  %s23590_s4 = inlined_call_operand.hbm [shape: f32[1,1024], index: 4, kind: input, shape index: {}]   ;;  %s23591_s5 = inlined_call_operand.hbm [shape: f32[2,16,1024], index: 5, kind: output, shape index: {}]  }
   0x1   :  { %12 = vsyncpa [#allocation4 + $0x1], 0 }
   0x2   :  { %13 = vsyncpa [#allocation7], 0 }
   0x3   :  { %14 = vsyncpa [#allocation10], 0 }
   0x4   :  { %15 = vsyncpa [#allocation5], 0 }
   0x5   :  { %17 = vsyncpa [#allocation5 + $0x1], 0  ;;  %s16496_s18 = smov 0   ;;  %s16498_s19 = smov 0  }
   0x6   :  { %s16500_s20 = smov 0   ;;  %s16502_s21 = smov 0  }
   0x7 LB: > { %s16517_s22 = sadd.s32 4294967295, %s16449_s21   ;;  %s15373_s23 = sadd.s32 4294967294, %s16449_s21   ;;  %s16449_s21 = sphi %s16502_s21, %s25040_s21   ;;  %s16445_s20 = sphi %s16500_s20, %s25039_s20   ;;  %s16441_s19 = sphi %s16498_s19, %s25038_s19   ;;  %s16437_s18 = sphi %s16496_s18, %s25037_s18  }
   0x8   : > { %p43_p0 = scmp.ne.s32.totalorder %s16441_s19, %s16437_s18  ;;  %p23592_p1 = scmp.eq.s32.totalorder %s16517_s22, 0 }
   0x9   : > { %p157_p3 = scmp.eq.s32.totalorder %s15373_s23, 1  ;;  %p15374_p5 = scmp.ge.s32.totalorder %s16449_s21, 1 }
   0xa   : > { %p16526_p4 = por %p23592_p1, %p43_p0  ;;  %p164_p7 = scmp.lt.s32.totalorder %s16449_s21, 3 }
   0xb   : > { %p16531_p6 = por %p157_p3, %p43_p0  ;;  %s16451_s27 = smov [#allocation6]  }
   0xc   : > { %s24118_s24 = scalar_select %p16526_p4, 1, 0 }
   0xd   : > { %s24119_s25 = scalar_select %p16531_p6, 1, 0 }
   0xe   : > { %p16536_p8 = pnand %p15374_p5, %p164_p7  ;;  %s176_s28 = sshll.u32 %s16451_s27, 4  ;;  %s177_s28 = int_to_ptr.vmem [resolvable:$true] %s176_s28 }
   0xf   : > { %s16452_s30 = smov [#allocation8]   ;;  %s16453_s7 = smov [#allocation9]  }
  0x10   : > { %s24120_s26 = scalar_select %p16536_p8, 1, 0 }
  0x11   : > { %p15952_p9 = pneg %p16536_p8  ;;  %s192_s6 = sshll.u32 %s16452_s30, 4  ;;  %s193_s6 = int_to_ptr.vmem [resolvable:$true] %s192_s6 }
  0x12   : > { %s206_s8 = sshll.u32 %s16453_s7, 4  ;;  %s16282_s9 = scalar_lea.vmem %s177_s28, 3072  ;;  %s207_s8 = int_to_ptr.vmem [resolvable:$true] %s206_s8 }
  0x13   : > { %p16545_p11 = pnand %p15952_p9, %p23592_p1  ;;  %p16283_p13 = scmp.ne.s32.totalorder %s177_s28, %s16282_s9 }
  0x14   : > { %p16290_p5 = scmp.lt.s32.totalorder %s177_s28, %s177_s28  ;;  %p16291_p7 = scmp.lt.s32.totalorder %s16282_s9, %s16282_s9 }
  0x15   : > { %p16273_p12 = pneg %p16545_p11 }
  0x16   : > { %p16292_p9 = por %p16291_p7, %p16290_p5 }
  0x17   : > { %p16285_p0 = pnand %p16283_p13, %p16273_p12 }
  0x19   : > { %p16286_p3 = pneg %p16285_p0 }
  0x1b   : > { %p16293_p10 = pnand %p16292_p9, %p16286_p3 }
  0x1d   : > { %16296 = shalt.err (!%p16293_p10)
}
  0x1e   : > { %s16454_s10 = smov 128   ;;  %s16455_s11 = smov 8  }
  0x1f   : > { %15955 = dma.hbm_to_vmem [thread:$0]  (!%p16545_p11), %s23587_s1, 3072, %s177_s28, [#allocation7], %s16454_s10, %s16454_s10, %s16455_s11  }
  0x20   : > { %s16308_s14 = scalar_lea.vmem %s193_s6, 3072  ;;  %p16316_p2 = scmp.lt.s32.totalorder %s193_s6, %s193_s6 }
  0x21   : > { %p16309_p1 = scmp.ne.s32.totalorder %s193_s6, %s16308_s14  ;;  %p16317_p6 = scmp.lt.s32.totalorder %s16308_s14, %s16308_s14 }
  0x23   : > { %p16311_p13 = pnand %p16309_p1, %p16273_p12  ;;  %p16318_p5 = por %p16317_p6, %p16316_p2 }
  0x25   : > { %p16312_p0 = pneg %p16311_p13 }
  0x27   : > { %p16319_p3 = pnand %p16318_p5, %p16312_p0 }
  0x29   : > { %16322 = shalt.err (!%p16319_p3)
}
  0x2a   : > { %15958 = dma.hbm_to_vmem [thread:$0]  (!%p16545_p11), %s23589_s3, 3072, %s193_s6, [#allocation7], %s16454_s10, %s16454_s10, %s16455_s11  }
  0x2b   : > { %s16334_s17 = scalar_lea.vmem %s207_s8, 128  ;;  %p16342_p9 = scmp.lt.s32.totalorder %s207_s8, %s207_s8 }
  0x2c   : > { %p16335_p10 = scmp.ne.s32.totalorder %s207_s8, %s16334_s17  ;;  %p16343_p13 = scmp.lt.s32.totalorder %s16334_s17, %s16334_s17 }
  0x2e   : > { %p16337_p7 = pnand %p16335_p10, %p16273_p12  ;;  %p16344_p4 = por %p16343_p13, %p16342_p9 }
  0x30   : > { %p16338_p1 = pneg %p16337_p7 }
  0x32   : > { %p16345_p2 = pnand %p16344_p4, %p16338_p1 }
  0x34   : > { %16348 = shalt.err (!%p16345_p2)
}
  0x35   : > { %15961 = dma.hbm_to_vmem [thread:$0]  (!%p16545_p11), %s23590_s4, 128, %s207_s8, [#allocation10]  }
  0x36   : > { %s16576_s28 = sadd.s32 1, %s16449_s21   ;;  %s30_s29 = sadd.s32 1, %s16445_s20 }
  0x37   : > { %s27_s30 = ssub.s32 %s16449_s21, %s16576_s28  ;;  %p37_p6 = scmp.ne.s32.totalorder %s16445_s20, %s16441_s19 }
  0x38   : > { %p28_p4 = scmp.eq.s32.totalorder %s27_s30, 0  ;;  %p38_p12 = scmp.eq.s32.totalorder %s16449_s21, 0 }
  0x39   : > { %p15973_p0 = scmp.lt.s32.totalorder %s16449_s21, 2  ;;  %p24122_p3 = scmp.eq.s32.totalorder %s16517_s22, 1 }
  0x3a   : > { %s16586_s6 = scalar_select %p28_p4, %s16445_s20, %s30_s29  }
  0x3b   : > { %p39_p5 = por %p38_p12, %p37_p6  ;;  %p16590_p10 = por %p24122_p3, %p37_p6 }
  0x3c   : > { %s217_s9 = sand.u32 1, %s16445_s20   ;;  %s15902_s10 = sshll.u32 %s16449_s21, 11 }
  0x3d   : > { %s24123_s7 = scalar_select %p16590_p10, 1, 0 }
  0x3e   : > { %s15379_s8 = sshll.u32 %s217_s9, 7  ;;  %s16599_s13 = scalar_lea.hbm %s23586_s0, %s15902_s10 }
  0x3f   : > { %s221_s14 = scalar_lea.vmem [#allocation3], %s15379_s8  ;;  %p16601_p11 = pnand %p15973_p0, %p39_p5 }
  0x40   : > { %s228_s15 = sshll.u32 %s221_s14, 4  ;;  %s16607_s17 = scalar_lea.sflag [#allocation4], %s217_s9  ;;  %s16605_s15 = int_to_ptr.vmem [resolvable:$true] %s228_s15 }
  0x41   : > { %s16349_s23 = scalar_lea.hbm %s16599_s13, 2048  ;;  %p16351_p1 = pneg %p16601_p11 }
  0x42   : > { %p16350_p7 = scmp.ne.s32.totalorder %s16599_s13, %s16349_s23  ;;  %s16354_s29 = scalar_lea.hbm %s23586_s0, 4096 }
  0x43   : > { %p16355_p2 = scmp.lt.s32.totalorder %s16599_s13, %s23586_s0  ;;  %p16356_p4 = scmp.lt.s32.totalorder %s16354_s29, %s16349_s23 }
  0x44   : > { %p16352_p9 = pnand %p16351_p1, %p16350_p7 }
  0x45   : > { %p16357_p6 = por %p16356_p4, %p16355_p2 }
  0x46   : > { %p16353_p13 = pneg %p16352_p9 }
  0x48   : > { %p16358_p12 = pnand %p16357_p6, %p16353_p13 }
  0x4a   : > { %16361 = shalt.err (!%p16358_p12)
}
  0x4b   : > { %s16362_s9 = scalar_lea.vmem %s16605_s15, 2048  ;;  %s16456_s11 = smov [#allocation3]  }
  0x4c   : > { %p16363_p0 = scmp.ne.s32.totalorder %s16605_s15, %s16362_s9  ;;  %s16367_s12 = sshll.u32 %s16456_s11, 4  ;;  %s16368_s12 = int_to_ptr.vmem [resolvable:$false] %s16367_s12 }
  0x4d   : > { %s16369_s14 = scalar_lea.vmem %s16368_s12, 4096  ;;  %p16370_p7 = scmp.lt.s32.totalorder %s16605_s15, %s16368_s12 }
  0x4e   : > { %p16365_p5 = pnand %p16363_p0, %p16351_p1  ;;  %p16371_p9 = scmp.lt.s32.totalorder %s16369_s14, %s16362_s9 }
  0x50   : > { %p16366_p3 = pneg %p16365_p5  ;;  %p16372_p10 = por %p16371_p9, %p16370_p7 }
  0x52   : > { %p16373_p8 = pnand %p16372_p10, %p16366_p3 }
  0x54   : > { %16376 = shalt.err (!%p16373_p8)
}
  0x55   : > { %s16457_s23 = smov 1024   ;;  %s16458_s27 = smov 64  }
  0x56   : > { %15965 = dma.hbm_to_vmem [thread:$0]  (!%p16601_p11), %s16599_s13, 2048, %s16605_s15, %s16607_s17, %s16457_s23, %s16457_s23, %s16458_s27  }
  0x57   : > { %p24125_p1 = scmp.ne.s32.totalorder %s24120_s26, 0 }
  0x59   : > { %240 = sbr.rel (%p24125_p1) target bundleno = 1846 (0x736), region = 40 }
  0x5e   : > { %s16631_s30 = sand.u32 1, %s16441_s19   ;;  %p24126_p8 = scmp.ne.s32.totalorder %s24118_s24, 0 }
  0x5f   : > { %s15383_s29 = sshll.u32 %s16631_s30, 7  ;;  %s243_s10 = scalar_lea.sflag [#allocation4], %s16631_s30 }
  0x60   : > { %s16637_s8 = scalar_lea.vmem [#allocation3], %s15383_s29 }
  0x61   : > { %16420 = dma.done.wait (%p24126_p8), %s243_s10, 2048  }
  0x62   : > { %16422 = vsyncadd (%p24126_p8), %s243_s10, 4294965248  ;;  %p24127_p10 = scmp.eq.s32.totalorder %s16517_s22, 0 }
  0x64   : > { %16424 = dma.done.wait (%p24127_p10), [#allocation7], 6144   ;;  %p24128_p11 = pmov %p24127_p10 }
  0x65   : > { %p24129_p13 = pmov %p24127_p10 }
  0x66   : > { %16426 = vsyncadd (%p24128_p11), [#allocation7], 4294961152 }
  0x67   : > { %16428 = dma.done.wait (%p24129_p13), [#allocation10], 128   ;;  %p24130_p2 = pmov %p24127_p10 }
  0x68   : > { %v16652_v0 = vld [vmem:[%s16637_s8 + $0x10] sm:$0xff]  ;;  %v16658_v2 = vld [vmem:[%s16637_s8] sm:$0xff]  ;;  %v16666_v5 = vld [vmem:[%s16637_s8 + $0x18] sm:$0xff]  ;;  %s16459_s24 = smov 64   ;;  %vm289_vm0 = vcmask 516096   ;;  %vm286_vm6 = vcmask 519168  }
  0x69   : > { %16430 = vsyncadd (%p24130_p2), [#allocation10], 4294967168  ;;  %v16655_v1 = vld [vmem:[%s16637_s8 + $0x50] sm:$0xff]  ;;  %v16663_v4 = vld [vmem:[%s16637_s8 + $0x40] sm:$0xff]  ;;  %vm297_vm1 = vsmask.f32 256 }
  0x6a   : > { %v415_v3 = vpack.c.bf16 %v16655_v1, %v16652_v0  ;;  %v16669_v6 = vld [vmem:[%s16637_s8 + $0x58] sm:$0xff]  ;;  %v413_v7 = vpack.c.bf16 %v16663_v4, %v16658_v2  ;;  %v16674_v8 = vld [vmem:[%s16637_s8 + $0x8] sm:$0xff]  ;;  %v16692_v14 = vld [vmem:[%s16637_s8 + $0x20] sm:$0xff]  ;;  %vm347_vm3 = vsmask.f32 7938  ;;  %vm1890_vm9 = vcmask 523264  }
  0x6b   : > { %v16677_v9 = vld [vmem:[%s16637_s8 + $0x48] sm:$0xff]  ;;  %v416_v10 = vpack.c.bf16 %v16669_v6, %v16666_v5  ;;  %v16695_v15 = vld [vmem:[%s16637_s8 + $0x60] sm:$0xff]  ;;  %v16704_v18 = vld [vmem:[%s16637_s8 + $0x38] sm:$0xff]  ;;  %vm837_vm5 = vsmask.f32 4368  ;;  %vm5500_vm10 = vcmask 1040384  }
  0x6c   : > { %430 = vrot.lane.b32.xlu1 %v415_v3, %s16459_s24  ;;  %422 = vrot.lane.b32.xlu0 %v413_v7, %s16459_s24  ;;  %v414_v11 = vpack.c.bf16 %v16677_v9, %v16674_v8  ;;  %v16686_v12 = vld [vmem:[%s16637_s8 + $0x28] sm:$0xff]  ;;  %v417_v17 = vpack.c.bf16 %v16695_v15, %v16692_v14  ;;  %v16707_v19 = vld [vmem:[%s16637_s8 + $0x78] sm:$0xff]  ;;  %v299_v22 = vld [vmem:[#allocation2 + $0xc] sm:$0x1]  ;;  %vm5501_vm11 = vcmask 1042434   ;;  %vm5503_vm13 = vcmask 1044484  }
  0x6d   : > { %v16689_v13 = vld [vmem:[%s16637_s8 + $0x68] sm:$0xff]  ;;  %v16710_v20 = vld [vmem:[%s16637_s8 + $0x30] sm:$0xff]  ;;  %v302_v23 = vld [vmem:[#allocation2 + $0x18] sm:$0x1]  ;;  %v420_v25 = vpack.c.bf16 %v16707_v19, %v16704_v18  ;;  %v15394_v51 = vpack.c.bf16 %v16704_v18, %v16686_v12  ;;  %vm5505_vm15 = vcmask 1046534   ;;  %s23313_s15 = scalar_lea.vmem [#allocation11], %s15383_s29 }
  0x6e   : > { %v418_v16 = vpack.c.bf16 %v16689_v13, %v16686_v12  ;;  %v16713_v21 = vld [vmem:[%s16637_s8 + $0x70] sm:$0xff]  ;;  %v305_v24 = vld [vmem:[#allocation2 + $0x24] sm:$0x1]  ;;  %vm16723_vm2 = vmand %vm289_vm0, %vm297_vm1  ;;  %s15935_s16 = sshll.u32 %s16517_s22, 11  ;;  %s15271_s17 = sshll.u32 %s23313_s15, 4  ;;  %s23541_s17 = int_to_ptr.vmem [resolvable:$true] %s15271_s17 }
  0x6f   : > { %v419_v26 = vpack.c.bf16 %v16713_v21, %v16710_v20  ;;  %v300_v28 = vsel %vm16723_vm2, 0, %v299_v22  ;;  %v303_v29 = vsel %vm16723_vm2, 0, %v302_v23  ;;  %v306_v30 = vsel %vm16723_vm2, 0, %v305_v24  ;;  %v308_v31 = vld [vmem:[#allocation2 + $0x30] sm:$0x1]  ;;  %vm16737_vm4 = vmand %vm289_vm0, %vm347_vm3  ;;  %s23538_s12 = scalar_lea.hbm %s23591_s5, %s15935_s16  ;;  %s15258_s22 = scalar_lea.sflag [#allocation5], %s16631_s30 }
  0x70   : > { %434 = vrot.lane.b32.xlu1 %v416_v10, %s16459_s24  ;;  %426 = vrot.lane.b32.xlu0 %v414_v11, %s16459_s24  ;;  %v311_v32 = vld [vmem:[#allocation2 + $0x3c] sm:$0x1]  ;;  %v314_v33 = vld [vmem:[#allocation2 + $0x48] sm:$0x1]  ;;  %v317_v34 = vld [vmem:[#allocation2 + $0x54] sm:$0x1] }
  0x71   : > { %301 = vst [vmem:[#allocation2 + $0xc] sm:$0x1] %v300_v28  ;;  %304 = vst [vmem:[#allocation2 + $0x18] sm:$0x1] %v303_v29  ;;  %v320_v35 = vld [vmem:[#allocation2 + $0x60] sm:$0x1] }
  0x72   : > { %307 = vst [vmem:[#allocation2 + $0x24] sm:$0x1] %v306_v30  ;;  %v323_v36 = vld [vmem:[#allocation2 + $0x6c] sm:$0x1]  ;;  %v326_v37 = vld [vmem:[#allocation2 + $0x78] sm:$0x1]  ;;  %vm16965_vm7 = vmor %vm297_vm1, %vm837_vm5 }
  0x73   : > { %v329_v38 = vld [vmem:[#allocation2 + $0x84] sm:$0x1]  ;;  %v332_v39 = vld [vmem:[#allocation2 + $0x90] sm:$0x1]  ;;  %v335_v40 = vld [vmem:[#allocation2 + $0x9c] sm:$0x1] }
  0x74   : > { %442 = vrot.lane.b32.xlu1 %v418_v16, %s16459_s24  ;;  %438 = vrot.lane.b32.xlu0 %v417_v17, %s16459_s24  ;;  %v338_v41 = vld [vmem:[#allocation2 + $0xa8] sm:$0x1]  ;;  %v341_v42 = vld [vmem:[#allocation2 + $0xb4] sm:$0x1]  ;;  %v344_v43 = vld [vmem:[#allocation2 + $0xc0] sm:$0x1] }
  0x75   : > { %v349_v44 = vld [vmem:[#allocation2 + $0x14] sm:$0x1]  ;;  %v352_v45 = vld [vmem:[#allocation2 + $0x20] sm:$0x1]  ;;  %v355_v46 = vld [vmem:[#allocation2 + $0x2c] sm:$0x1] }
  0x76   : > { %v358_v47 = vld [vmem:[#allocation2 + $0x38] sm:$0x1]  ;;  %v361_v48 = vld [vmem:[#allocation2 + $0x44] sm:$0x1]  ;;  %v364_v49 = vld [vmem:[#allocation2 + $0x50] sm:$0x1] }
  0x77   : > { %v367_v50 = vld [vmem:[#allocation2 + $0x5c] sm:$0x1]  ;;  %v309_v52 = vsel %vm16723_vm2, 0, %v308_v31  ;;  %v312_v53 = vsel %vm16723_vm2, 0, %v311_v32  ;;  %v315_v54 = vsel %vm16723_vm2, 0, %v314_v33  ;;  %v318_v55 = vsel %vm16723_vm2, 0, %v317_v34  ;;  %vm17140_vm8 = vmand %vm286_vm6, %vm347_vm3 }
  0x78   : > { %450 = vrot.lane.b32.xlu1 %v420_v25, %s16459_s24  ;;  %446 = vrot.lane.b32.xlu0 %v419_v26, %s16459_s24  ;;  %v370_v56 = vld [vmem:[#allocation2 + $0x68] sm:$0x1]  ;;  %v373_v57 = vld [vmem:[#allocation2 + $0x74] sm:$0x1]  ;;  %v376_v58 = vld [vmem:[#allocation2 + $0x80] sm:$0x1] }
  0x79   : > { %310 = vst [vmem:[#allocation2 + $0x30] sm:$0x1] %v309_v52  ;;  %313 = vst [vmem:[#allocation2 + $0x3c] sm:$0x1] %v312_v53  ;;  %v321_v59 = vsel %vm16723_vm2, 0, %v320_v35  ;;  %v324_v60 = vsel %vm16723_vm2, 0, %v323_v36 }
  0x7a   : > { %316 = vst [vmem:[#allocation2 + $0x48] sm:$0x1] %v315_v54  ;;  %319 = vst [vmem:[#allocation2 + $0x54] sm:$0x1] %v318_v55  ;;  %v327_v61 = vsel %vm16723_vm2, 0, %v326_v37  ;;  %v330_v62 = vsel %vm16723_vm2, 0, %v329_v38  ;;  %v15392_v54 = vpack.c.bf16 %v16710_v20, %v16692_v14  ;;  %v15389_v55 = vpack.c.bf16 %v16655_v1, %v16663_v4 }
  0x7b   : > { %v379_v63 = vld [vmem:[#allocation2 + $0x8c] sm:$0x1]  ;;  %322 = vst [vmem:[#allocation2 + $0x60] sm:$0x1] %v321_v59  ;;  %325 = vst [vmem:[#allocation2 + $0x6c] sm:$0x1] %v324_v60 }
  0x7c   : > { %328 = vst [vmem:[#allocation2 + $0x78] sm:$0x1] %v327_v61  ;;  %331 = vst [vmem:[#allocation2 + $0x84] sm:$0x1] %v330_v62  ;;  %v333_v3 = vsel %vm16723_vm2, 0, %v332_v39  ;;  %v336_v7 = vsel %vm16723_vm2, 0, %v335_v40 }
  0x7d   : > { %v339_v10 = vsel %vm16723_vm2, 0, %v338_v41  ;;  %v342_v11 = vsel %vm16723_vm2, 0, %v341_v42  ;;  %v382_v16 = vld [vmem:[#allocation2 + $0x98] sm:$0x1]  ;;  %334 = vst [vmem:[#allocation2 + $0x90] sm:$0x1] %v333_v3  ;;  %vm5502_vm12 = vmor %vm5500_vm10, %vm5501_vm11 }
  0x7e   : > { %337 = vst [vmem:[#allocation2 + $0x9c] sm:$0x1] %v336_v7  ;;  %340 = vst [vmem:[#allocation2 + $0xa8] sm:$0x1] %v339_v10  ;;  %v345_v17 = vsel %vm16723_vm2, 0, %v344_v43  ;;  %v350_v22 = vsel %vm16737_vm4, 0, %v349_v44 }
  0x7f   : > { %343 = vst [vmem:[#allocation2 + $0xb4] sm:$0x1] %v342_v11  ;;  %v353_v23 = vsel %vm16737_vm4, 0, %v352_v45  ;;  %v356_v24 = vsel %vm16737_vm4, 0, %v355_v46  ;;  %v385_v25 = vld [vmem:[#allocation2 + $0xa4] sm:$0x1]  ;;  %v458_v45 = vlaneseq  ;;  %vm5504_vm14 = vmor %vm5502_vm12, %vm5503_vm13 }
  0x80   : > { %346 = vst [vmem:[#allocation2 + $0xc0] sm:$0x1] %v345_v17  ;;  %351 = vst [vmem:[#allocation2 + $0x14] sm:$0x1] %v350_v22  ;;  %v359_v26 = vsel %vm16737_vm4, 0, %v358_v47  ;;  %v362_v28 = vsel %vm16737_vm4, 0, %v361_v48  ;;  %v15388_v48 = vpack.c.bf16 %v16652_v0, %v16658_v2  ;;  %v15391_v0 = vpack.c.bf16 %v16669_v6, %v16677_v9 }
  0x81   : > { %354 = vst [vmem:[#allocation2 + $0x20] sm:$0x1] %v353_v23  ;;  %357 = vst [vmem:[#allocation2 + $0x2c] sm:$0x1] %v356_v24  ;;  %v365_v29 = vsel %vm16737_vm4, 0, %v364_v49  ;;  %v368_v30 = vsel %vm16737_vm4, 0, %v367_v50  ;;  %v15390_v49 = vpack.c.bf16 %v16666_v5, %v16674_v8  ;;  %v15395_v2 = vpack.c.bf16 %v16707_v19, %v16689_v13 }
  0x82   : > { %v388_v31 = vld [vmem:[#allocation2 + $0xb0] sm:$0x1]  ;;  %360 = vst [vmem:[#allocation2 + $0x38] sm:$0x1] %v359_v26  ;;  %363 = vst [vmem:[#allocation2 + $0x44] sm:$0x1] %v362_v28  ;;  %v15393_v5 = vpack.c.bf16 %v16713_v21, %v16695_v15 }
  0x83   : > { %366 = vst [vmem:[#allocation2 + $0x50] sm:$0x1] %v365_v29  ;;  %369 = vst [vmem:[#allocation2 + $0x5c] sm:$0x1] %v368_v30  ;;  %v371_v32 = vsel %vm16737_vm4, 0, %v370_v56  ;;  %v374_v33 = vsel %vm16737_vm4, 0, %v373_v57 }
  0x84   : > { %v377_v34 = vsel %vm16737_vm4, 0, %v376_v58  ;;  %v380_v35 = vsel %vm16737_vm4, 0, %v379_v63  ;;  %v391_v36 = vld [vmem:[#allocation2 + $0xbc] sm:$0x1]  ;;  %372 = vst [vmem:[#allocation2 + $0x68] sm:$0x1] %v371_v32 }
  0x85   : > { %375 = vst [vmem:[#allocation2 + $0x74] sm:$0x1] %v374_v33  ;;  %378 = vst [vmem:[#allocation2 + $0x80] sm:$0x1] %v377_v34  ;;  %v383_v37 = vsel %vm16737_vm4, 0, %v382_v16  ;;  %v386_v38 = vsel %vm16737_vm4, 0, %v385_v25 }
  0x86   : > { %381 = vst [vmem:[#allocation2 + $0x8c] sm:$0x1] %v380_v35  ;;  %v389_v39 = vsel %vm16737_vm4, 0, %v388_v31  ;;  %v392_v40 = vsel %vm16737_vm4, 0, %v391_v36  ;;  %v394_v41 = vld [vmem:[#allocation2 + $0xc8] sm:$0x1] }
  0x87   : > { %384 = vst [vmem:[#allocation2 + $0x98] sm:$0x1] %v383_v37  ;;  %387 = vst [vmem:[#allocation2 + $0xa4] sm:$0x1] %v386_v38  ;;  %v395_v42 = vsel %vm16737_vm4, 0, %v394_v41  ;;  %v16799_v47 = vshrl.u32 %v458_v45, 7 }
  0x88   : > { %390 = vst [vmem:[#allocation2 + $0xb0] sm:$0x1] %v389_v39  ;;  %393 = vst [vmem:[#allocation2 + $0xbc] sm:$0x1] %v392_v40  ;;  %v16460_v43 = vmov 1983009808  }
  0x89   : > { %396 = vst [vmem:[#allocation2 + $0xc8] sm:$0x1] %v395_v42  ;;  %v456_v44 = vunpack.c.l.s4 %v16460_v43  ;;  %24135 = vst [vmem:[#allocation16_spill] sm:$0xff] %v16799_v47  ;;  %v16461_v52 = vmov 1934713408   ;;  %s16377_s14 = scalar_lea.vmem %s23541_s17, 2048 }
  0x8a   : > { %v520_v53 = vunpack.c.l.s4 %v16461_v52  ;;  %p16378_p4 = scmp.ne.s32.totalorder %s23541_s17, %s16377_s14  ;;  %p25034_p6 = scmp.ne.s32.totalorder %s24123_s7, 0 }
  0x8b   : > { %v457_v46 = vunpack.c.0.s8 %v456_v44  ;;  %s16464_s23 = smov [#allocation11]  }
  0x8c   : > { %v521_v12 = vunpack.c.0.s8 %v520_v53  ;;  %p16379_p12 = pnand %p16378_p4, %p25034_p6  ;;  %s16381_s27 = sshll.u32 %s16464_s23, 4  ;;  %s16382_s27 = int_to_ptr.vmem [resolvable:$false] %s16381_s27 }
  0x8d   : > { %v16806_v50 = vsub.s32 %v457_v46, %v16799_v47  ;;  %s16383_s29 = scalar_lea.vmem %s16382_s27, 4096  ;;  %p16384_p5 = scmp.lt.s32.totalorder %s23541_s17, %s16382_s27 }
  0x8e   : > { %v16829_v21 = vsub.s32 %v521_v12, %v16799_v47  ;;  %p16380_p0 = pneg %p16379_p12  ;;  %p16385_p3 = scmp.lt.s32.totalorder %s16383_s29, %s16377_s14 }
  0x8f   : > { %24136 = vst [vmem:[#allocation17_spill] sm:$0xff] %v16806_v50  ;;  %v461_v8 = vrot.slane %v15388_v48, %v16806_v50  ;;  %v477_v56 = vrot.slane %v15390_v49, %v16806_v50  ;;  %v509_v18 = vrot.slane %v15394_v51, %v16806_v50  ;;  %v493_v14 = vrot.slane %v15392_v54, %v16806_v50 }
  0x90   : > { %v468_v1 = vrot.slane %v15389_v55, %v16806_v50  ;;  %v484_v4 = vrot.slane %v15391_v0, %v16806_v50  ;;  %v516_v6 = vrot.slane %v15395_v2, %v16806_v50  ;;  %v500_v9 = vrot.slane %v15393_v5, %v16806_v50  ;;  %24137 = vst [vmem:[#allocation18_spill] sm:$0xff] %v16829_v21  ;;  %p16386_p7 = por %p16385_p3, %p16384_p5 }
  0x91   : > { %v517_v15 = vcombine.low %v461_v8, %v477_v56  ;;  %v518_v20 = vcombine.high %v461_v8, %v477_v56  ;;  %v549_v57 = vcombine.low %v493_v14, %v509_v18  ;;  %v550_v58 = vcombine.high %v493_v14, %v509_v18 }
  0x92   : > { %v533_v59 = vcombine.low %v468_v1, %v484_v4  ;;  %v534_v60 = vcombine.high %v468_v1, %v484_v4  ;;  %v565_v61 = vcombine.low %v500_v9, %v516_v6  ;;  %v566_v62 = vcombine.high %v500_v9, %v516_v6  ;;  %p16387_p9 = pnand %p16386_p7, %p16380_p0 }
  0x93   : > { %v525_v7 = vrot.slane %v517_v15, %v16829_v21  ;;  %v532_v10 = vrot.slane %v518_v20, %v16829_v21  ;;  %v557_v11 = vrot.slane %v549_v57, %v16829_v21  ;;  %v564_v16 = vrot.slane %v550_v58, %v16829_v21 }
  0x94   : > { %v541_v22 = vrot.slane %v533_v59, %v16829_v21  ;;  %v548_v23 = vrot.slane %v534_v60, %v16829_v21  ;;  %v573_v24 = vrot.slane %v565_v61, %v16829_v21  ;;  %v580_v25 = vrot.slane %v566_v62, %v16829_v21 }
  0x95   : > { %v16840_v33 = vcombine.low %v525_v7, %v557_v11  ;;  %v16842_v34 = vcombine.high %v525_v7, %v557_v11  ;;  %v16844_v35 = vcombine.low %v532_v10, %v564_v16  ;;  %v16846_v37 = vcombine.high %v532_v10, %v564_v16 }
  0x96   : > { %v16848_v38 = vcombine.low %v541_v22, %v573_v24  ;;  %v16850_v39 = vcombine.high %v541_v22, %v573_v24  ;;  %v16852_v40 = vcombine.low %v548_v23, %v580_v25  ;;  %v16857_v48 = vcombine.high %v548_v23, %v580_v25  ;;  %v16055_v25 = vld [vmem:[#allocation6 + $0x74] ss:$8 sps:$4 sm:$0xff]  }
  0x97   : > { %v728_v0 = vshrl.u32 %v16840_v33, 16  ;;  %v734_v2 = vshrl.u32 %v16842_v34, 16  ;;  %v740_v18 = vshrl.u32 %v16844_v35, 16  ;;  %v746_v14 = vshrl.u32 %v16846_v37, 16  ;;  %4439 = vmatprep.subr.bf16.mxu0 %v16055_v25 }
  0x98   : > { %v752_v15 = vshrl.u32 %v16848_v38, 16  ;;  %v758_v20 = vshrl.u32 %v16850_v39, 16 }
  0xde   : > { %v431_v13 = vpop.permute.xlu1 %430  ;;  %v423_v19 = vpop.permute.xlu0 %422 }
  0xdf   : > { %v589_v28 = vcombine.low %v423_v19, %v431_v13  ;;  %v590_v31 = vcombine.high %v423_v19, %v431_v13 }
  0xe1   : > { %v597_v41 = vrot.slane %v589_v28, %v16806_v50  ;;  %v604_v46 = vrot.slane %v590_v31, %v16806_v50  ;;  %v16058_v28 = vld [vmem:[#allocation6 + $0x64] ss:$8 sps:$4 sm:$0xff]  }
  0xe2   : > { %v435_v63 = vpop.permute.xlu1 %434  ;;  %v427_v3 = vpop.permute.xlu0 %426 }
  0xe3   : > { %v605_v17 = vcombine.low %v427_v3, %v435_v63  ;;  %v606_v29 = vcombine.high %v427_v3, %v435_v63  ;;  %v764_v63 = vshrl.u32 %v16852_v40, 16  ;;  %v770_v3 = vshrl.u32 %v16857_v48, 16 }
  0xe5   : > { %v613_v32 = vrot.slane %v605_v17, %v16806_v50  ;;  %v620_v42 = vrot.slane %v606_v29, %v16806_v50 }
  0xe6   : > { %v443_v26 = vpop.permute.xlu1 %442  ;;  %v439_v30 = vpop.permute.xlu0 %438 }
  0xe7   : > { %v653_v53 = vcombine.low %v597_v41, %v613_v32  ;;  %v654_v51 = vcombine.high %v597_v41, %v613_v32  ;;  %v669_v56 = vcombine.low %v604_v46, %v620_v42  ;;  %v670_v12 = vcombine.high %v604_v46, %v620_v42 }
  0xe9   : > { %v661_v13 = vrot.slane %v653_v53, %v16829_v21  ;;  %v668_v19 = vrot.slane %v654_v51, %v16829_v21  ;;  %v677_v61 = vrot.slane %v669_v56, %v16829_v21  ;;  %v684_v62 = vrot.slane %v670_v12, %v16829_v21 }
  0xea   : > { %v451_v36 = vpop.permute.xlu1 %450  ;;  %v447_v45 = vpop.permute.xlu0 %446 }
  0xeb   : > { %v637_v43 = vcombine.low %v443_v26, %v451_v36  ;;  %v638_v44 = vcombine.high %v443_v26, %v451_v36  ;;  %v621_v49 = vcombine.low %v439_v30, %v447_v45  ;;  %v622_v52 = vcombine.high %v439_v30, %v447_v45  ;;  %v16057_v26 = vld [vmem:[#allocation6 + $0x70] ss:$8 sps:$4 sm:$0xff]  }
  0xec   : > { %4440 = vmatpush1.bf16.msra.mxu0 %v16057_v26 }
  0xed   : > { %v645_v54 = vrot.slane %v637_v43, %v16806_v50  ;;  %v652_v55 = vrot.slane %v638_v44, %v16806_v50  ;;  %v629_v5 = vrot.slane %v621_v49, %v16806_v50  ;;  %v636_v8 = vrot.slane %v622_v52, %v16806_v50  ;;  %v16060_v52 = vld [vmem:[#allocation6 + $0x60] ss:$8 sps:$4 sm:$0xff]   ;;  %4441 = vmatprep.subr.bf16.mxu0 %v16058_v28 }
  0xef   : > { %v685_v1 = vcombine.low %v629_v5, %v645_v54  ;;  %v686_v4 = vcombine.high %v629_v5, %v645_v54  ;;  %v701_v6 = vcombine.low %v636_v8, %v652_v55  ;;  %v702_v9 = vcombine.high %v636_v8, %v652_v55  ;;  %v16061_v54 = vld [vmem:[#allocation6 + $0x54] ss:$8 sps:$4 sm:$0xff]  }
  0xf0   : > { %4442 = vmatpush1.bf16.msra.mxu0 %v16060_v52 }
  0xf1   : > { %v693_v57 = vrot.slane %v685_v1, %v16829_v21  ;;  %v700_v58 = vrot.slane %v686_v4, %v16829_v21  ;;  %v709_v59 = vrot.slane %v701_v6, %v16829_v21  ;;  %v716_v60 = vrot.slane %v702_v9, %v16829_v21  ;;  %4443 = vmatprep.subr.bf16.mxu0 %v16061_v54  ;;  %v16064_v6 = vld [vmem:[#allocation6 + $0x44] ss:$8 sps:$4 sm:$0xff]  }
  0xf3   : > { %v717_v7 = vcombine.low %v661_v13, %v693_v57  ;;  %v718_v10 = vcombine.high %v661_v13, %v693_v57  ;;  %v719_v11 = vcombine.low %v668_v19, %v700_v58  ;;  %v720_v16 = vcombine.high %v668_v19, %v700_v58 }
  0xf4   : > { %v721_v17 = vcombine.low %v677_v61, %v709_v59  ;;  %v722_v22 = vcombine.high %v677_v61, %v709_v59  ;;  %v723_v23 = vcombine.low %v684_v62, %v716_v60  ;;  %v724_v24 = vcombine.high %v684_v62, %v716_v60 }
  0xf5   : > { %v727_v29 = vpack.i.b16 %v717_v7, %v16840_v33  ;;  %v729_v30 = vshrl.u32 %v717_v7, 16  ;;  %v733_v31 = vpack.i.b16 %v718_v10, %v16842_v34  ;;  %v735_v32 = vshrl.u32 %v718_v10, 16 }
  0xf6   : > { %v739_v36 = vpack.i.b16 %v719_v11, %v16844_v35  ;;  %v741_v41 = vshrl.u32 %v719_v11, 16  ;;  %v745_v42 = vpack.i.b16 %v720_v16, %v16846_v37  ;;  %v747_v43 = vshrl.u32 %v720_v16, 16 }
  0xf7   : > { %v730_v44 = vpack.i.b16 %v729_v30, %v728_v0  ;;  %v736_v45 = vpack.i.b16 %v735_v32, %v734_v2  ;;  %v751_v46 = vpack.i.b16 %v721_v17, %v16848_v38  ;;  %v753_v49 = vshrl.u32 %v721_v17, 16  ;;  %v16067_v17 = vld [vmem:[#allocation6 + $0x34] ss:$8 sps:$4 sm:$0xff]  }
  0xf8   : > { %v742_v53 = vpack.i.b16 %v741_v41, %v740_v18  ;;  %v748_v33 = vpack.i.b16 %v747_v43, %v746_v14  ;;  %v757_v51 = vpack.i.b16 %v722_v22, %v16850_v39  ;;  %v759_v34 = vshrl.u32 %v722_v22, 16  ;;  %v16063_v14 = vld [vmem:[#allocation6 + $0x50] ss:$8 sps:$4 sm:$0xff]  }
  0xf9   : > { %v754_v35 = vpack.i.b16 %v753_v49, %v752_v15  ;;  %v763_v55 = vpack.i.b16 %v723_v23, %v16852_v40  ;;  %v765_v37 = vshrl.u32 %v723_v23, 16  ;;  %v769_v5 = vpack.i.b16 %v724_v24, %v16857_v48  ;;  %4444 = vmatpush1.bf16.msra.mxu0 %v16063_v14  ;;  %v16070_v49 = vld [vmem:[#allocation6 + $0x24] ss:$8 sps:$4 sm:$0xff]   ;;  %v16073_v14 = vld [vmem:[#allocation6 + $0x14] ss:$8 sps:$4 sm:$0xff]  }
  0xfa   : > { %v760_v0 = vpack.i.b16 %v759_v34, %v758_v20  ;;  %v771_v2 = vshrl.u32 %v724_v24, 16  ;;  %v16887_v8 = vcombine.low %v727_v29, %v727_v29  ;;  %v16889_v38 = vcombine.high %v727_v29, %v727_v29  ;;  %4445 = vmatprep.subr.bf16.mxu0 %v16064_v6 }
  0xfb   : > { %v766_v56 = vpack.i.b16 %v765_v37, %v764_v63  ;;  %v16891_v12 = vcombine.low %v730_v44, %v730_v44  ;;  %v16893_v39 = vcombine.high %v730_v44, %v730_v44  ;;  %v16895_v18 = vcombine.low %v733_v31, %v733_v31 }
  0xfc   : > { %v772_v40 = vpack.i.b16 %v771_v2, %v770_v3  ;;  %v16897_v1 = vcombine.high %v733_v31, %v733_v31  ;;  %v16899_v48 = vcombine.low %v736_v45, %v736_v45  ;;  %v16901_v4 = vcombine.high %v736_v45, %v736_v45  ;;  %v16066_v3 = vld [vmem:[#allocation6 + $0x40] ss:$8 sps:$4 sm:$0xff]  }
  0xfd   : > { %v16903_v9 = vcombine.low %v739_v36, %v739_v36  ;;  %v16905_v13 = vcombine.high %v739_v36, %v739_v36  ;;  %v16907_v19 = vcombine.low %v742_v53, %v742_v53  ;;  %v16909_v15 = vcombine.high %v742_v53, %v742_v53  ;;  %4446 = vmatpush1.bf16.msra.mxu0 %v16066_v3 }
  0xfe   : > { %v16911_v20 = vcombine.low %v745_v42, %v745_v42  ;;  %v16913_v57 = vcombine.high %v745_v42, %v745_v42  ;;  %v16915_v58 = vcombine.low %v748_v33, %v748_v33  ;;  %v16917_v59 = vcombine.high %v748_v33, %v748_v33  ;;  %v16069_v42 = vld [vmem:[#allocation6 + $0x30] ss:$8 sps:$4 sm:$0xff]   ;;  %4447 = vmatprep.subr.bf16.mxu0 %v16067_v17 }
  0xff   : > { %v16919_v60 = vcombine.low %v751_v46, %v751_v46  ;;  %v16921_v61 = vcombine.high %v751_v46, %v751_v46  ;;  %v16923_v62 = vcombine.low %v754_v35, %v754_v35  ;;  %v16925_v63 = vcombine.high %v754_v35, %v754_v35 }
 0x100   : > { %v16927_v7 = vcombine.low %v757_v51, %v757_v51  ;;  %v16929_v10 = vcombine.high %v757_v51, %v757_v51  ;;  %v16931_v11 = vcombine.low %v760_v0, %v760_v0  ;;  %v16933_v16 = vcombine.high %v760_v0, %v760_v0 }
 0x101   : > { %v16935_v22 = vcombine.low %v763_v55, %v763_v55  ;;  %v16937_v23 = vcombine.high %v763_v55, %v763_v55  ;;  %v16939_v24 = vcombine.low %v766_v56, %v766_v56  ;;  %v16941_v25 = vcombine.high %v766_v56, %v766_v56  ;;  %4448 = vmatpush1.bf16.msra.mxu0 %v16069_v42 }
 0x102   : > { %v16943_v26 = vcombine.low %v769_v5, %v769_v5  ;;  %v16945_v28 = vcombine.high %v769_v5, %v769_v5  ;;  %v16947_v29 = vcombine.low %v772_v40, %v772_v40  ;;  %v16949_v30 = vcombine.high %v772_v40, %v772_v40  ;;  %4449 = vmatprep.subr.bf16.mxu0 %v16070_v49 }
 0x103   : > { %v840_v31 = vshrl.u32 %v16887_v8, 16  ;;  %v843_v32 = vshll.u32 %v16887_v8, 16  ;;  %v848_v36 = vshrl.u32 %v16889_v38, 16  ;;  %v851_v41 = vshll.u32 %v16889_v38, 16  ;;  %v16072_v38 = vld [vmem:[#allocation6 + $0x20] ss:$8 sps:$4 sm:$0xff]  }
 0x104   : > { %v857_v43 = vshrl.u32 %v16891_v12, 16  ;;  %v860_v44 = vshll.u32 %v16891_v12, 16  ;;  %v865_v45 = vshrl.u32 %v16893_v39, 16  ;;  %v868_v46 = vshll.u32 %v16893_v39, 16 }
 0x105   : > { %v842_v52 = vrot.slane %v840_v31, 7  ;;  %v16959_v53 = vrot.slane %v848_v36, 7  ;;  %v874_v33 = vshrl.u32 %v16895_v18, 16  ;;  %v877_v51 = vshll.u32 %v16895_v18, 16  ;;  %4450 = vmatpush1.bf16.msra.mxu0 %v16072_v38  ;;  %v1214_v18 = vld [vmem:[#allocation2 + $0x68] sm:$0x1] }
 0x106   : > { %v859_v54 = vrot.slane %v857_v43, 7  ;;  %v16969_v35 = vrot.slane %v865_v45, 7  ;;  %v882_v55 = vshrl.u32 %v16897_v1, 16  ;;  %v885_v37 = vshll.u32 %v16897_v1, 16  ;;  %v16075_v45 = vld [vmem:[#allocation6 + $0x10] ss:$8 sps:$4 sm:$0xff]   ;;  %4451 = vmatprep.subr.bf16.mxu0 %v16073_v14 }
 0x107   : > { %v16973_v5 = vor.u32 %v843_v32, %v842_v52  ;;  %v846_v0 = vrot.slane %v842_v52, 4  ;;  %v853_v2 = vor.u32 %v851_v41, %v16959_v53  ;;  %v855_v8 = vrot.slane %v16959_v53, 4 }
 0x108   : > { %v16977_v56 = vor.u32 %v860_v44, %v859_v54  ;;  %v863_v12 = vrot.slane %v859_v54, 4  ;;  %v870_v39 = vor.u32 %v868_v46, %v16969_v35  ;;  %v876_v1 = vrot.slane %v874_v33, 7  ;;  %v1196_v44 = vld [vmem:[#allocation2 + $0x48] sm:$0xf] }
 0x109   : > { %v854_v40 = vsel %vm16965_vm7, %v846_v0, %v853_v2  ;;  %v16983_v6 = vrot.slane %v882_v55, 7  ;;  %v891_v3 = vshrl.u32 %v16899_v48, 16  ;;  %v894_v31 = vshll.u32 %v16899_v48, 16  ;;  %4452 = vmatpush1.bf16.msra.mxu0 %v16075_v45  ;;  %v1193_v2 = vld [vmem:[#allocation2 + $0x44] sm:$0x1] }
 0x10a   : > { %v871_v17 = vsel %vm16965_vm7, %v863_v12, %v870_v39  ;;  %v899_v32 = vshrl.u32 %v16901_v4, 16  ;;  %v902_v36 = vshll.u32 %v16901_v4, 16  ;;  %1164 = vst.msk [vmem:[#allocation2 + $0x10] sm:$0xf] %vm286_vm6, %v854_v40  ;;  %v16992_v41 = vor.u32 %v877_v51, %v876_v1 }
 0x10b   : > { %v880_v42 = vrot.slane %v876_v1, 4  ;;  %v887_v43 = vor.u32 %v885_v37, %v16983_v6  ;;  %1171 = vst.msk [vmem:[#allocation2 + $0x1c] sm:$0xf] %vm286_vm6, %v871_v17  ;;  %v893_v46 = vrot.slane %v891_v3, 7  ;;  %v908_v48 = vshrl.u32 %v16903_v9, 16 }
 0x10c   : > { %v16997_v49 = vrot.slane %v899_v32, 7  ;;  %v911_v4 = vshll.u32 %v16903_v9, 16  ;;  %v916_v33 = vshrl.u32 %v16905_v13, 16  ;;  %v919_v51 = vshll.u32 %v16905_v13, 16 }
 0x10d   : > { %v888_v52 = vsel %vm16965_vm7, %v880_v42, %v887_v43  ;;  %v925_v54 = vshrl.u32 %v16907_v19, 16  ;;  %v17006_v55 = vor.u32 %v894_v31, %v893_v46  ;;  %v897_v37 = vrot.slane %v893_v46, 4 }
 0x10e   : > { %v904_v0 = vor.u32 %v902_v36, %v16997_v49  ;;  %1178 = vst.msk [vmem:[#allocation2 + $0x28] sm:$0xf] %vm286_vm6, %v888_v52  ;;  %v910_v9 = vrot.slane %v908_v48, 7  ;;  %v17011_v38 = vrot.slane %v916_v33, 7  ;;  %v928_v39 = vshll.u32 %v16907_v19, 16 }
 0x10f   : > { %v927_v12 = vrot.slane %v925_v54, 7  ;;  %v933_v14 = vshrl.u32 %v16909_v15, 16  ;;  %v936_v40 = vshll.u32 %v16909_v15, 16  ;;  %v942_v1 = vshrl.u32 %v16911_v20, 16  ;;  %v1186_v52 = vld [vmem:[#allocation2 + $0x38] sm:$0x1] }
 0x110   : > { %v905_v13 = vsel %vm16965_vm7, %v897_v37, %v904_v0  ;;  %v17019_v3 = vor.u32 %v911_v4, %v910_v9  ;;  %v914_v17 = vrot.slane %v910_v9, 4  ;;  %v921_v31 = vor.u32 %v919_v51, %v17011_v38 }
 0x111   : > { %1185 = vst.msk [vmem:[#allocation2 + $0x34] sm:$0xf] %vm286_vm6, %v905_v13  ;;  %v17024_v19 = vor.u32 %v928_v39, %v927_v12  ;;  %v931_v36 = vrot.slane %v927_v12, 4  ;;  %v17026_v42 = vrot.slane %v933_v14, 7  ;;  %v944_v43 = vrot.slane %v942_v1, 7 }
 0x112   : > { %v922_v15 = vsel %vm16965_vm7, %v914_v17, %v921_v31  ;;  %v945_v45 = vshll.u32 %v16911_v20, 16  ;;  %v950_v46 = vshrl.u32 %v16913_v57, 16  ;;  %v953_v48 = vshll.u32 %v16913_v57, 16  ;;  %v1182_v14 = vld [vmem:[#allocation2 + $0x30] sm:$0xf] }
 0x113   : > { %v938_v4 = vor.u32 %v936_v40, %v17026_v42  ;;  %v948_v33 = vrot.slane %v944_v43, 4  ;;  %v959_v51 = vshrl.u32 %v16915_v58, 16  ;;  %1192 = vst.msk [vmem:[#allocation2 + $0x40] sm:$0xf] %vm286_vm6, %v922_v15  ;;  %v962_v0 = vshll.u32 %v16915_v58, 16 }
 0x114   : > { %v17037_v54 = vor.u32 %v945_v45, %v944_v43  ;;  %v17039_v37 = vrot.slane %v950_v46, 7  ;;  %v967_v20 = vshrl.u32 %v16917_v59, 16  ;;  %v970_v12 = vshll.u32 %v16917_v59, 16  ;;  %v1179_v15 = vld [vmem:[#allocation2 + $0x2c] sm:$0x1] }
 0x115   : > { %v939_v57 = vsel %vm16965_vm7, %v931_v36, %v938_v4  ;;  %v961_v9 = vrot.slane %v959_v51, 7  ;;  %v976_v39 = vshrl.u32 %v16919_v60, 16  ;;  %v979_v1 = vshll.u32 %v16919_v60, 16 }
 0x116   : > { %v955_v13 = vor.u32 %v953_v48, %v17039_v37  ;;  %v17049_v40 = vrot.slane %v967_v20, 7  ;;  %1199 = vst.msk [vmem:[#allocation2 + $0x4c] sm:$0xf] %vm286_vm6, %v939_v57  ;;  %v984_v36 = vshrl.u32 %v16921_v61, 16  ;;  %v987_v45 = vshll.u32 %v16921_v61, 16 }
 0x117   : > { %v17053_v58 = vor.u32 %v962_v0, %v961_v9  ;;  %v965_v17 = vrot.slane %v961_v9, 4  ;;  %v978_v31 = vrot.slane %v976_v39, 7  ;;  %v993_v4 = vshrl.u32 %v16923_v62, 16 }
 0x118   : > { %v956_v59 = vsel %vm16965_vm7, %v948_v33, %v955_v13  ;;  %v972_v43 = vor.u32 %v970_v12, %v17049_v40  ;;  %v17063_v48 = vrot.slane %v984_v36, 7  ;;  %v996_v33 = vshll.u32 %v16923_v62, 16 }
 0x119   : > { %v17061_v46 = vor.u32 %v979_v1, %v978_v31  ;;  %v982_v60 = vrot.slane %v978_v31, 4  ;;  %1206 = vst.msk [vmem:[#allocation2 + $0x58] sm:$0xf] %vm286_vm6, %v956_v59  ;;  %v1001_v0 = vshrl.u32 %v16925_v63, 16  ;;  %v1004_v20 = vshll.u32 %v16925_v63, 16 }
 0x11a   : > { %v973_v51 = vsel %vm16965_vm7, %v965_v17, %v972_v43  ;;  %v989_v61 = vor.u32 %v987_v45, %v17063_v48  ;;  %v995_v9 = vrot.slane %v993_v4, 7  ;;  %v1010_v12 = vshrl.u32 %v16927_v7, 16 }
 0x11b   : > { %1213 = vst.msk [vmem:[#allocation2 + $0x64] sm:$0xf] %vm286_vm6, %v973_v51  ;;  %v17076_v39 = vrot.slane %v1001_v0, 7  ;;  %v1013_v13 = vshll.u32 %v16927_v7, 16  ;;  %v1018_v1 = vshrl.u32 %v16929_v10, 16  ;;  %v1021_v62 = vshll.u32 %v16929_v10, 16 }
 0x11c   : > { %v990_v63 = vsel %vm16965_vm7, %v982_v60, %v989_v61  ;;  %v17083_v17 = vor.u32 %v996_v33, %v995_v9  ;;  %v999_v31 = vrot.slane %v995_v9, 4  ;;  %v1012_v36 = vrot.slane %v1010_v12, 7 }
 0x11d   : > { %v1006_v59 = vor.u32 %v1004_v20, %v17076_v39  ;;  %v17087_v45 = vrot.slane %v1018_v1, 7  ;;  %v1027_v4 = vshrl.u32 %v16931_v11, 16  ;;  %1220 = vst.msk [vmem:[#allocation2 + $0x70] sm:$0xf] %vm286_vm6, %v990_v63  ;;  %v1030_v51 = vshll.u32 %v16931_v11, 16 }
 0x11e   : > { %v17091_v7 = vor.u32 %v1013_v13, %v1012_v36  ;;  %v1016_v10 = vrot.slane %v1012_v36, 4  ;;  %v1035_v60 = vshrl.u32 %v16933_v16, 16  ;;  %v1038_v12 = vshll.u32 %v16933_v16, 16  ;;  %v1175_v20 = vld [vmem:[#allocation2 + $0x24] sm:$0xf] }
 0x11f   : > { %v1007_v33 = vsel %vm16965_vm7, %v999_v31, %v1006_v59  ;;  %v1023_v0 = vor.u32 %v1021_v62, %v17087_v45  ;;  %v1029_v61 = vrot.slane %v1027_v4, 7  ;;  %v1044_v13 = vshrl.u32 %v16935_v22, 16 }
 0x120   : > { %v17099_v9 = vrot.slane %v1035_v60, 7  ;;  %v1047_v1 = vshll.u32 %v16935_v22, 16  ;;  %1227 = vst.msk [vmem:[#allocation2 + $0x7c] sm:$0xf] %vm286_vm6, %v1007_v33  ;;  %v1052_v62 = vshrl.u32 %v16937_v23, 16  ;;  %v1055_v16 = vshll.u32 %v16937_v23, 16 }
 0x121   : > { %v1024_v11 = vsel %vm16965_vm7, %v1016_v10, %v1023_v0  ;;  %v17107_v63 = vor.u32 %v1030_v51, %v1029_v61  ;;  %v1033_v31 = vrot.slane %v1029_v61, 4  ;;  %v1046_v4 = vrot.slane %v1044_v13, 7  ;;  %v1168_v13 = vld [vmem:[#allocation2 + $0x18] sm:$0xf] }
 0x122   : > { %v1040_v36 = vor.u32 %v1038_v12, %v17099_v9  ;;  %1234 = vst.msk [vmem:[#allocation2 + $0x88] sm:$0xf] %vm286_vm6, %v1024_v11  ;;  %v17114_v22 = vrot.slane %v1052_v62, 7  ;;  %v1061_v60 = vshrl.u32 %v16939_v24, 16  ;;  %v1064_v10 = vshll.u32 %v16939_v24, 16 }
 0x123   : > { %v1069_v51 = vshrl.u32 %v16941_v25, 16  ;;  %v17121_v0 = vor.u32 %v1047_v1, %v1046_v4  ;;  %v1050_v61 = vrot.slane %v1046_v4, 4  ;;  %v1072_v12 = vshll.u32 %v16941_v25, 16  ;;  %v1165_v4 = vld [vmem:[#allocation2 + $0x14] sm:$0x1] }
 0x124   : > { %v1041_v33 = vsel %vm16965_vm7, %v1033_v31, %v1040_v36  ;;  %v1057_v23 = vor.u32 %v1055_v16, %v17114_v22  ;;  %v1063_v11 = vrot.slane %v1061_v60, 7  ;;  %v1078_v24 = vshrl.u32 %v16943_v26, 16  ;;  %v1161_v36 = vld [vmem:[#allocation2 + $0xc] sm:$0xf] }
 0x125   : > { %v17126_v62 = vrot.slane %v1069_v51, 7  ;;  %1241 = vst.msk [vmem:[#allocation2 + $0x94] sm:$0xf] %vm286_vm6, %v1041_v33  ;;  %v1081_v59 = vshll.u32 %v16943_v26, 16  ;;  %v1086_v31 = vshrl.u32 %v16945_v28, 16  ;;  %v1089_v1 = vshll.u32 %v16945_v28, 16 }
 0x126   : > { %v1058_v25 = vsel %vm16965_vm7, %v1050_v61, %v1057_v23  ;;  %v17135_v16 = vor.u32 %v1064_v10, %v1063_v11  ;;  %v1067_v60 = vrot.slane %v1063_v11, 4  ;;  %v1172_v33 = vld [vmem:[#allocation2 + $0x20] sm:$0x1]  ;;  %v1080_v43 = vrot.slane %v1078_v24, 7  ;;  %v1189_v28 = vld [vmem:[#allocation2 + $0x3c] sm:$0xf] }
 0x127   : > { %v1074_v51 = vor.u32 %v1072_v12, %v17126_v62  ;;  %v17145_v57 = vrot.slane %v1086_v31, 7  ;;  %v1095_v10 = vshrl.u32 %v16947_v29, 16  ;;  %1248 = vst.msk [vmem:[#allocation2 + $0xa0] sm:$0xf] %vm286_vm6, %v1058_v25  ;;  %v1098_v12 = vshll.u32 %v16947_v29, 16 }
 0x128   : > { %v1103_v23 = vshrl.u32 %v16949_v30, 16  ;;  %v1106_v11 = vshll.u32 %v16949_v30, 16  ;;  %v17154_v24 = vor.u32 %v1081_v59, %v1080_v43  ;;  %v1084_v31 = vrot.slane %v1080_v43, 4  ;;  %v1203_v59 = vld [vmem:[#allocation2 + $0x54] sm:$0xf] }
 0x129   : > { %v1075_v61 = vsel %vm16965_vm7, %v1067_v60, %v1074_v51  ;;  %v1091_v32 = vor.u32 %v1089_v1, %v17145_v57  ;;  %v1200_v60 = vld [vmem:[#allocation2 + $0x50] sm:$0x1]  ;;  %v1097_v29 = vrot.slane %v1095_v10, 7  ;;  %v1162_v30 = vsel %vm17140_vm8, %v16973_v5, %v1161_v36  ;;  %v1207_v1 = vld [vmem:[#allocation2 + $0x5c] sm:$0x1] }
 0x12a   : > { %1255 = vst.msk [vmem:[#allocation2 + $0xac] sm:$0xf] %vm286_vm6, %v1075_v61  ;;  %v17159_v51 = vrot.slane %v1103_v23, 7  ;;  %v1166_v43 = vsel %vm16723_vm2, %v855_v8, %v1165_v4  ;;  %v1210_v25 = vld [vmem:[#allocation2 + $0x60] sm:$0xf]  ;;  %v1169_v10 = vsel %vm17140_vm8, %v16977_v56, %v1168_v13  ;;  %v24142_v5 = vrot.slane %v16969_v35, 4 }
 0x12b   : > { %v1092_v21 = vsel %vm16965_vm7, %v1084_v31, %v1091_v32  ;;  %1163 = vst [vmem:[#allocation2 + $0xc] sm:$0xf] %v1162_v30  ;;  %1167 = vst [vmem:[#allocation2 + $0x14] sm:$0x1] %v1166_v43  ;;  %v1176_v8 = vsel %vm17140_vm8, %v16992_v41, %v1175_v20  ;;  %v1217_v36 = vld [vmem:[#allocation2 + $0x6c] sm:$0xf]  ;;  %v17180_v32 = vor.u32 %v1098_v12, %v1097_v29 }
 0x12c   : > { %v1173_v53 = vsel %vm16723_vm2, %v24142_v5, %v1172_v33  ;;  %v1221_v4 = vld [vmem:[#allocation2 + $0x74] sm:$0x1]  ;;  %v1224_v61 = vld [vmem:[#allocation2 + $0x78] sm:$0xf]  ;;  %v1228_v23 = vld [vmem:[#allocation2 + $0x80] sm:$0x1]  ;;  %v1108_v30 = vor.u32 %v1106_v11, %v17159_v51  ;;  %v1183_v12 = vsel %vm17140_vm8, %v17006_v55, %v1182_v14 }
 0x12d   : > { %v1101_v31 = vrot.slane %v1097_v29, 4  ;;  %v1110_v56 = vrot.slane %v17159_v51, 4  ;;  %1170 = vst [vmem:[#allocation2 + $0x18] sm:$0xf] %v1169_v10  ;;  %1174 = vst [vmem:[#allocation2 + $0x20] sm:$0x1] %v1173_v53  ;;  %v1190_v10 = vsel %vm17140_vm8, %v17019_v3, %v1189_v28  ;;  %v1197_v3 = vsel %vm17140_vm8, %v17024_v19, %v1196_v44 }
 0x12e   : > { %1177 = vst [vmem:[#allocation2 + $0x24] sm:$0xf] %v1176_v8  ;;  %v1231_v35 = vld [vmem:[#allocation2 + $0x84] sm:$0xf]  ;;  %v1235_v13 = vld [vmem:[#allocation2 + $0x8c] sm:$0x1]  ;;  %v1211_v44 = vsel %vm17140_vm8, %v17053_v58, %v1210_v25 }
 0x12f   : > { %v1238_v33 = vld [vmem:[#allocation2 + $0x90] sm:$0xf]  ;;  %v1242_v43 = vld [vmem:[#allocation2 + $0x98] sm:$0x1]  ;;  %1262 = vst.msk [vmem:[#allocation2 + $0xb8] sm:$0xf] %vm286_vm6, %v1092_v21 }
 0x130   : > { %v24143_v41 = vrot.slane %v16983_v6, 4  ;;  %v24144_v11 = vrot.slane %v16997_v49, 4  ;;  %v1245_v5 = vld [vmem:[#allocation2 + $0x9c] sm:$0xf]  ;;  %v1249_v21 = vld [vmem:[#allocation2 + $0xa4] sm:$0x1] }
 0x131   : > { %v1252_v53 = vld [vmem:[#allocation2 + $0xa8] sm:$0xf]  ;;  %v1256_v6 = vld [vmem:[#allocation2 + $0xb0] sm:$0x1]  ;;  %1184 = vst [vmem:[#allocation2 + $0x30] sm:$0xf] %v1183_v12 }
 0x132   : > { %v1180_v20 = vsel %vm16723_vm2, %v24143_v41, %v1179_v15  ;;  %v1187_v29 = vsel %vm16723_vm2, %v24144_v11, %v1186_v52  ;;  %v1109_v15 = vsel %vm16965_vm7, %v1101_v31, %v1108_v30  ;;  %1191 = vst [vmem:[#allocation2 + $0x3c] sm:$0xf] %v1190_v10  ;;  %v24145_v49 = vrot.slane %v17011_v38, 4  ;;  %v1259_v28 = vld [vmem:[#allocation2 + $0xb4] sm:$0xf] }
 0x133   : > { %1181 = vst [vmem:[#allocation2 + $0x2c] sm:$0x1] %v1180_v20  ;;  %1188 = vst [vmem:[#allocation2 + $0x38] sm:$0x1] %v1187_v29  ;;  %v24146_v52 = vrot.slane %v17026_v42, 4  ;;  %v1204_v38 = vsel %vm17140_vm8, %v17037_v54, %v1203_v59  ;;  %v24147_v8 = vrot.slane %v17039_v37, 4  ;;  %v1218_v54 = vsel %vm17140_vm8, %v17061_v46, %v1217_v36 }
 0x134   : > { %v1194_v55 = vsel %vm16723_vm2, %v24145_v49, %v1193_v2  ;;  %1198 = vst [vmem:[#allocation2 + $0x48] sm:$0xf] %v1197_v3  ;;  %v24148_v19 = vrot.slane %v17049_v40, 4  ;;  %v1266_v31 = vld [vmem:[#allocation2 + $0xc0] sm:$0xf]  ;;  %v24149_v37 = vrot.slane %v17063_v48, 4  ;;  %v1232_v46 = vsel %vm17140_vm8, %v17091_v7, %v1231_v35 }
 0x135   : > { %v1201_v14 = vsel %vm16723_vm2, %v24146_v52, %v1200_v60  ;;  %1195 = vst [vmem:[#allocation2 + $0x44] sm:$0x1] %v1194_v55  ;;  %v1208_v2 = vsel %vm16723_vm2, %v24147_v8, %v1207_v1  ;;  %v1263_v60 = vld [vmem:[#allocation2 + $0xbc] sm:$0x1]  ;;  %1269 = vst.msk [vmem:[#allocation2 + $0xc4] sm:$0xf] %vm286_vm6, %v1109_v15 }
 0x136   : > { %1202 = vst [vmem:[#allocation2 + $0x50] sm:$0x1] %v1201_v14  ;;  %v1215_v42 = vsel %vm16723_vm2, %v24148_v19, %v1214_v18  ;;  %v1270_v30 = vld [vmem:[#allocation2 + $0xc8] sm:$0x1]  ;;  %1205 = vst [vmem:[#allocation2 + $0x54] sm:$0xf] %v1204_v38  ;;  %v1222_v40 = vsel %vm16723_vm2, %v24149_v37, %v1221_v4  ;;  %v1225_v18 = vsel %vm17140_vm8, %v17083_v17, %v1224_v61 }
 0x137   : > { %1209 = vst [vmem:[#allocation2 + $0x5c] sm:$0x1] %v1208_v2  ;;  %1212 = vst [vmem:[#allocation2 + $0x60] sm:$0xf] %v1211_v44  ;;  %v24150_v58 = vrot.slane %v17076_v39, 4  ;;  %v24151_v48 = vrot.slane %v17087_v45, 4  ;;  %v1239_v39 = vsel %vm17140_vm8, %v17107_v63, %v1238_v33  ;;  %v1246_v45 = vsel %vm17140_vm8, %v17121_v0, %v1245_v5 }
 0x138   : > { %1216 = vst [vmem:[#allocation2 + $0x68] sm:$0x1] %v1215_v42  ;;  %v16078_v59 = vld [vmem:[#allocation6 + $0x4] ss:$8 sps:$4 sm:$0xff]   ;;  %v16080_v1 = vld [vmem:[#allocation6] ss:$8 sps:$4 sm:$0xff]  }
 0x139   : > { %v1229_v25 = vsel %vm16723_vm2, %v24150_v58, %v1228_v23  ;;  %1219 = vst [vmem:[#allocation2 + $0x6c] sm:$0xf] %v1218_v54  ;;  %1223 = vst [vmem:[#allocation2 + $0x74] sm:$0x1] %v1222_v40  ;;  %v1236_v17 = vsel %vm16723_vm2, %v24151_v48, %v1235_v13  ;;  %v24152_v36 = vrot.slane %v17099_v9, 4  ;;  %v24153_v7 = vrot.slane %v17114_v22, 4  ;;  %4453 = vmatprep.subr.bf16.mxu0 %v16078_v59 }
 0x13a   : > { %1226 = vst [vmem:[#allocation2 + $0x78] sm:$0xf] %v1225_v18  ;;  %1230 = vst [vmem:[#allocation2 + $0x80] sm:$0x1] %v1229_v25  ;;  %v1253_v9 = vsel %vm17140_vm8, %v17135_v16, %v1252_v53  ;;  %v24154_v63 = vrot.slane %v17126_v62, 4  ;;  %v16023_v35 = vld [vmem:[#allocation2 + $0xc] sm:$0xff]   ;;  %v1260_v22 = vsel %vm17140_vm8, %v17154_v24, %v1259_v28  ;;  %v1267_v62 = vsel %vm17140_vm8, %v17180_v32, %v1266_v31 }
 0x13b   : > { %v1243_v4 = vsel %vm16723_vm2, %v24152_v36, %v1242_v43  ;;  %1233 = vst [vmem:[#allocation2 + $0x84] sm:$0xf] %v1232_v46  ;;  %1237 = vst [vmem:[#allocation2 + $0x8c] sm:$0x1] %v1236_v17  ;;  %v1250_v61 = vsel %vm16723_vm2, %v24153_v7, %v1249_v21  ;;  %v24155_v0 = vrot.slane %v17145_v57, 4  ;;  %v1271_v13 = vsel %vm16723_vm2, %v1110_v56, %v1270_v30  ;;  %v16024_v33 = vld [vmem:[#allocation2 + $0x18] sm:$0xff]  }
 0x13c   : > { %1240 = vst [vmem:[#allocation2 + $0x90] sm:$0xf] %v1239_v39  ;;  %1244 = vst [vmem:[#allocation2 + $0x98] sm:$0x1] %v1243_v4  ;;  %v1257_v23 = vsel %vm16723_vm2, %v24154_v63, %v1256_v6  ;;  %4454 = vmatpush1.bf16.msra.mxu0 %v16080_v1  ;;  %1698 = vrot.lane.b32.xlu0 %v16023_v35, %s16459_s24  ;;  %v16462_v57 = vmov 0   ;;  %v16026_v51 = vld [vmem:[#allocation2 + $0x24] sm:$0xff]  }
 0x13d   : > { %1247 = vst [vmem:[#allocation2 + $0x9c] sm:$0xf] %v1246_v45  ;;  %1251 = vst [vmem:[#allocation2 + $0xa4] sm:$0x1] %v1250_v61  ;;  %v1264_v16 = vsel %vm16723_vm2, %v24155_v0, %v1263_v60  ;;  %1702 = vrot.lane.b32.xlu1 %v16024_v33, %s16459_s24  ;;  %v16028_v56 = vld [vmem:[#allocation2 + $0x30] sm:$0xff]   ;;  %v16030_v41 = vld [vmem:[#allocation2 + $0x3c] sm:$0xff]  }
 0x13e   : > { %1254 = vst [vmem:[#allocation2 + $0xa8] sm:$0xf] %v1253_v9  ;;  %1258 = vst [vmem:[#allocation2 + $0xb0] sm:$0x1] %v1257_v23  ;;  %v16032_v12 = vld [vmem:[#allocation2 + $0x48] sm:$0xff]   ;;  %v16034_v29 = vld [vmem:[#allocation2 + $0x54] sm:$0xff]  }
 0x13f   : > { %1261 = vst [vmem:[#allocation2 + $0xb4] sm:$0xf] %v1260_v22  ;;  %1265 = vst [vmem:[#allocation2 + $0xbc] sm:$0x1] %v1264_v16  ;;  %v16084_v21 = vld [vmem:[#allocation6 + $0xb4] ss:$8 sps:$4 sm:$0xff]  }
 0x140   : > { %1268 = vst [vmem:[#allocation2 + $0xc0] sm:$0xf] %v1267_v62  ;;  %1272 = vst [vmem:[#allocation2 + $0xc8] sm:$0x1] %v1271_v13  ;;  %v16086_v53 = vld [vmem:[#allocation6 + $0xb0] ss:$8 sps:$4 sm:$0xff]   ;;  %4463 = vmatprep.subr.bf16.mxu0 %v16084_v21 }
 0x141   : > { %287 = vst.msk [vmem:[#allocation2] sm:$0xf] %vm286_vm6, %v16462_v57  ;;  %288 = vst.msk [vmem:[#allocation2 + $0x4] sm:$0xf] %vm286_vm6, %v16462_v57  ;;  %1706 = vrot.lane.b32.xlu1 %v16026_v51, %s16459_s24  ;;  %v16037_v6 = vld [vmem:[#allocation2 + $0x60] sm:$0xff]   ;;  %4464 = vmatpush2.bf16.msra.mxu0 %v16086_v53  ;;  %v16039_v52 = vld [vmem:[#allocation2 + $0x6c] sm:$0xff]  }
 0x142   : > { %290 = vst.msk [vmem:[#allocation2 + $0x8] sm:$0x1] %vm289_vm0, %v16462_v57  ;;  %294 = vst.msk [vmem:[#allocation2 + $0xd4] sm:$0x1] %vm289_vm0, %v16462_v57  ;;  %v16090_v49 = vld [vmem:[#allocation6 + $0xa4] ss:$8 sps:$4 sm:$0xff]  }
 0x143   : > { %292 = vst.msk [vmem:[#allocation2 + $0xcc] sm:$0xf] %vm286_vm6, %v16462_v57  ;;  %293 = vst.msk [vmem:[#allocation2 + $0xd0] sm:$0xf] %vm286_vm6, %v16462_v57  ;;  %v16092_v55 = vld [vmem:[#allocation6 + $0xa0] ss:$8 sps:$4 sm:$0xff]   ;;  %4465 = vmatprep.subr.bf16.mxu0 %v16090_v49 }
 0x144   : > { %v16025_v24 = vld [vmem:[#allocation2 + $0x14] ss:$0 sps:$4 sm:$0x11]   ;;  %v16027_v32 = vld [vmem:[#allocation2 + $0x20] ss:$0 sps:$4 sm:$0x11]   ;;  %vm17974_vm0 = vmor %vm5504_vm14, %vm5505_vm15 }
 0x145   : > { %1700 = vrot.lane.b32.xlu0 %v16025_v24, %s16459_s24  ;;  %1710 = vrot.lane.b32.xlu1 %v16028_v56, %s16459_s24  ;;  %v16029_v43 = vld [vmem:[#allocation2 + $0x2c] ss:$0 sps:$4 sm:$0x11]   ;;  %v16031_v20 = vld [vmem:[#allocation2 + $0x38] ss:$0 sps:$4 sm:$0x11]  }
 0x146   : > { %v16033_v11 = vld [vmem:[#allocation2 + $0x44] ss:$0 sps:$4 sm:$0x11]   ;;  %v16035_v10 = vld [vmem:[#allocation2 + $0x50] ss:$0 sps:$4 sm:$0x11]   ;;  %4466 = vmatpush2.bf16.msra.mxu0 %v16092_v55 }
 0x147   : > { %v16036_v5 = vld [vmem:[#allocation2 + $0x5c] ss:$0 sps:$4 sm:$0x11]   ;;  %v16038_v15 = vld [vmem:[#allocation2 + $0x68] ss:$0 sps:$4 sm:$0x11]  }
 0x148   : > { %v16096_v3 = vld [vmem:[#allocation6 + $0x94] ss:$8 sps:$4 sm:$0xff]   ;;  %v16040_v14 = vld [vmem:[#allocation2 + $0x78] sm:$0xff]   ;;  %v16098_v28 = vld [vmem:[#allocation6 + $0x90] ss:$8 sps:$4 sm:$0xff]  }
 0x149   : > { %1704 = vrot.lane.b32.xlu0 %v16027_v32, %s16459_s24  ;;  %1714 = vrot.lane.b32.xlu1 %v16030_v41, %s16459_s24  ;;  %v16102_v38 = vld [vmem:[#allocation6 + $0x84] ss:$8 sps:$4 sm:$0xff]   ;;  %v16041_v8 = vld [vmem:[#allocation2 + $0x74] ss:$0 sps:$4 sm:$0x11]   ;;  %v16048_v54 = vld [vmem:[#allocation2 + $0xa8] sm:$0xff]  }
 0x14a   : > { %4467 = vmatprep.subr.bf16.mxu0 %v16096_v3  ;;  %v16042_v2 = vld [vmem:[#allocation2 + $0x84] sm:$0xff]   ;;  %v16104_v44 = vld [vmem:[#allocation6 + $0x80] ss:$8 sps:$4 sm:$0xff]   ;;  %v16044_v42 = vld [vmem:[#allocation2 + $0x90] sm:$0xff]   ;;  %v16463_v1 = vmov 1966171168  }
 0x14b   : > { %4468 = vmatpush2.bf16.msra.mxu0 %v16098_v28  ;;  %v16043_v19 = vld [vmem:[#allocation2 + $0x80] ss:$0 sps:$4 sm:$0x11]   ;;  %v16045_v60 = vld [vmem:[#allocation2 + $0x8c] ss:$0 sps:$4 sm:$0x11]   ;;  %v2022_v46 = vunpack.c.l.s4 %v16463_v1 }
 0x14c   : > { %4469 = vmatprep.subr.bf16.mxu0 %v16102_v38  ;;  %v16046_v31 = vld [vmem:[#allocation2 + $0x9c] sm:$0xff]   ;;  %v16047_v30 = vld [vmem:[#allocation2 + $0x98] ss:$0 sps:$4 sm:$0x11]   ;;  %v16082_v7 = vld [vmem:[#allocation2 + $0xc] sm:$0xff]  }
 0x14d   : > { %1708 = vrot.lane.b32.xlu0 %v16029_v43, %s16459_s24  ;;  %1718 = vrot.lane.b32.xlu1 %v16032_v12, %s16459_s24  ;;  %v16049_v37 = vld [vmem:[#allocation2 + $0xa4] ss:$0 sps:$4 sm:$0x11]   ;;  %v16050_v40 = vld [vmem:[#allocation2 + $0xb4] sm:$0xff]   ;;  %v2023_v36 = vunpack.c.0.s8 %v2022_v46  ;;  %v1395_v45 = vld [vmem:[#allocation2 + $0x1c] sm:$0xf] }
 0x14e   : > { %v16051_v18 = vld [vmem:[#allocation2 + $0xb0] ss:$0 sps:$4 sm:$0x11]   ;;  %v16052_v58 = vld [vmem:[#allocation2 + $0xbc] ss:$0 sps:$4 sm:$0x11]  }
 0x14f   : > { %4470 = vmatpush2.bf16.msra.mxu0 %v16104_v44  ;;  %v16053_v25 = vld [vmem:[#allocation2 + $0xc0] sm:$0xff]   ;;  %v16054_v59 = vld [vmem:[#allocation2 + $0xc8] ss:$0 sps:$4 sm:$0x11]   ;;  %v1394_v4 = vld [vmem:[#allocation2 + $0x18] sm:$0xf]  ;;  %v17324_v22 = vsub.s32 %v2023_v36, %v16799_v47 }
 0x150   : > { %v16077_v48 = vld [vmem:[#allocation2] sm:$0xff]   ;;  %v15492_v63 = vcombine.low %v1394_v4, %v1395_v45  ;;  %v1398_v35 = vld [vmem:[#allocation2 + $0x28] sm:$0xf]  ;;  %v16088_v21 = vld [vmem:[#allocation2 + $0x18] sm:$0xff]  }
 0x151   : > { %1712 = vrot.lane.b32.xlu0 %v16031_v20, %s16459_s24  ;;  %1722 = vrot.lane.b32.xlu1 %v16034_v29, %s16459_s24  ;;  %v1397_v23 = vld [vmem:[#allocation2 + $0x24] sm:$0xf]  ;;  %24156 = vst [vmem:[#allocation19_spill] sm:$0xff] %v17324_v22  ;;  %v16083_v16 = vld [vmem:[#allocation2 + $0x8] ss:$0 sps:$4 sm:$0x11]  }
 0x152   : > { %v15494_v57 = vcombine.low %v1397_v23, %v1398_v35  ;;  %v1396_v41 = vld [vmem:[#allocation2 + $0x20] sm:$0x1] }
 0x155   : > { %1716 = vrot.lane.b32.xlu0 %v16033_v11, %s16459_s24  ;;  %1724 = vrot.lane.b32.xlu1 %v16036_v5, %s16459_s24 }
 0x159   : > { %1720 = vrot.lane.b32.xlu0 %v16035_v10, %s16459_s24  ;;  %1728 = vrot.lane.b32.xlu1 %v16038_v15, %s16459_s24 }
 0x15d   : > { %1726 = vrot.lane.b32.xlu0 %v16037_v6, %s16459_s24  ;;  %1734 = vrot.lane.b32.xlu1 %v16040_v14, %s16459_s24  ;;  %v1401_v14 = vld [vmem:[#allocation2 + $0x34] sm:$0xf] }
 0x161   : > { %1730 = vrot.lane.b32.xlu0 %v16039_v52, %s16459_s24  ;;  %1738 = vrot.lane.b32.xlu1 %v16042_v2, %s16459_s24  ;;  %v1400_v52 = vld [vmem:[#allocation2 + $0x30] sm:$0xf] }
 0x165   : > { %1732 = vrot.lane.b32.xlu0 %v16041_v8, %s16459_s24  ;;  %1742 = vrot.lane.b32.xlu1 %v16044_v42, %s16459_s24  ;;  %v16089_v42 = vld [vmem:[#allocation2 + $0x14] ss:$0 sps:$4 sm:$0x11]  }
 0x169   : > { %1736 = vrot.lane.b32.xlu0 %v16043_v19, %s16459_s24  ;;  %1746 = vrot.lane.b32.xlu1 %v16046_v31, %s16459_s24 }
 0x16d   : > { %1740 = vrot.lane.b32.xlu0 %v16045_v60, %s16459_s24  ;;  %1750 = vrot.lane.b32.xlu1 %v16048_v54, %s16459_s24 }
 0x171   : > { %1744 = vrot.lane.b32.xlu0 %v16047_v30, %s16459_s24  ;;  %1754 = vrot.lane.b32.xlu1 %v16050_v40, %s16459_s24  ;;  %v15496_v30 = vcombine.low %v1400_v52, %v1401_v14 }
 0x175   : > { %1748 = vrot.lane.b32.xlu0 %v16049_v37, %s16459_s24  ;;  %1756 = vrot.lane.b32.xlu1 %v16052_v58, %s16459_s24 }
 0x179   : > { %1752 = vrot.lane.b32.xlu0 %v16051_v18, %s16459_s24  ;;  %1760 = vrot.lane.b32.xlu1 %v16054_v59, %s16459_s24 }
 0x17d   : > { %1758 = vrot.lane.b32.xlu0 %v16053_v25, %s16459_s24 }
 0x1ae   : > { %v1699_v17 = vpop.permute.xlu0 %1698 }
 0x1af   : > { %v1703_v39 = vpop.permute.xlu1 %1702  ;;  %v1893_v61 = vsel %vm1890_vm9, %v16077_v48, %v1699_v17 }
 0x1b0   : > { %v1899_v9 = vsel %vm1890_vm9, %v16082_v7, %v1703_v39  ;;  %v15524_v0 = vcombine.low %v1893_v61, %v1394_v4  ;;  %v2020_v62 = vcombine.high %v1893_v61, %v15492_v63  ;;  %v1399_v39 = vld [vmem:[#allocation2 + $0x2c] sm:$0x1]  ;;  %v16093_v61 = vld [vmem:[#allocation2 + $0x24] sm:$0xff]  }
 0x1b1   : > { %v15526_v13 = vcombine.low %v1899_v9, %v1397_v23  ;;  %v2085_v51 = vcombine.high %v1899_v9, %v15494_v57 }
 0x1b2   : > { %v2027_v24 = vrot.slane %v15524_v0, %v17324_v22  ;;  %v2034_v56 = vrot.slane %v2020_v62, %v17324_v22 }
 0x1b3   : > { %v2092_v43 = vrot.slane %v15526_v13, %v17324_v22  ;;  %v2099_v11 = vrot.slane %v2085_v51, %v17324_v22  ;;  %v1707_v29 = vpop.permute.xlu1 %1706 }
 0x1b4   : > { %v2035_v12 = vcombine.high %v2027_v24, %v2027_v24  ;;  %v2036_v10 = vcombine.high %v2034_v56, %v2034_v56  ;;  %v1905_v15 = vsel %vm1890_vm9, %v16088_v21, %v1707_v29  ;;  %v2043_v2 = vrot.slane %v2027_v24, %v17324_v22 }
 0x1b5   : > { %v2100_v5 = vcombine.high %v2092_v43, %v2092_v43  ;;  %v2108_v53 = vrot.slane %v2092_v43, %v17324_v22  ;;  %v2101_v55 = vcombine.high %v2099_v11, %v2099_v11  ;;  %v2115_v3 = vrot.slane %v2099_v11, %v17324_v22 }
 0x1b6   : > { %v2057_v49 = vrot.slane %v2035_v12, %v17324_v22  ;;  %v2064_v28 = vrot.slane %v2036_v10, %v17324_v22  ;;  %v15528_v19 = vcombine.low %v1905_v15, %v1400_v52  ;;  %v2050_v60 = vrot.slane %v2034_v56, %v17324_v22  ;;  %v1403_v12 = vld [vmem:[#allocation2 + $0x3c] sm:$0xf] }
 0x1b7   : > { %v1701_v33 = vpop.permute.xlu0 %1700  ;;  %v2122_v38 = vrot.slane %v2100_v5, %v17324_v22  ;;  %v2130_v44 = vcombine.high %v2108_v53, %v2108_v53  ;;  %v2129_v37 = vrot.slane %v2101_v55, %v17324_v22  ;;  %v2131_v40 = vcombine.high %v2115_v3, %v2115_v3  ;;  %v1711_v45 = vpop.permute.xlu1 %1710 }
 0x1b8   : > { %v1896_v32 = vsel %vm1890_vm9, %v16083_v16, %v1701_v33  ;;  %v3059_v54 = vcombine.low %v2043_v2, %v2057_v49  ;;  %v15556_v58 = vcombine.high %v2043_v2, %v2057_v49  ;;  %v3061_v25 = vcombine.low %v2050_v60, %v2064_v28 }
 0x1b9   : > { %v15525_v20 = vcombine.low %v1896_v32, %v1396_v41  ;;  %v2132_v59 = vcombine.high %v2122_v38, %v2122_v38  ;;  %v2150_v1 = vcombine.high %v1905_v15, %v15496_v30  ;;  %v15557_v46 = vcombine.high %v2050_v60, %v2064_v28  ;;  %v16095_v60 = vld [vmem:[#allocation2 + $0x20] ss:$0 sps:$4 sm:$0x11]  }
 0x1ba   : > { %v3126_v48 = vcombine.low %v2122_v38, %v2130_v44  ;;  %v2157_v17 = vrot.slane %v15528_v19, %v17324_v22  ;;  %v3128_v7 = vcombine.low %v2129_v37, %v2131_v40  ;;  %v3069_v9 = vrot.slane %v3059_v54, %v17324_v22  ;;  %v1404_v54 = vld [vmem:[#allocation2 + $0x40] sm:$0xf] }
 0x1bb   : > { %v2076_v6 = vrot.slane %v15525_v20, %v17324_v22  ;;  %v1705_v8 = vpop.permute.xlu0 %1704  ;;  %v3127_v63 = vcombine.low %v2132_v59, %v2115_v3  ;;  %v2164_v23 = vrot.slane %v2150_v1, %v17324_v22  ;;  %v3076_v35 = vrot.slane %v15556_v58, %v17324_v22 }
 0x1bc   : > { %v1902_v18 = vsel %vm1890_vm9, %v16089_v42, %v1705_v8  ;;  %v3083_v0 = vrot.slane %v3061_v25, %v17324_v22  ;;  %v3142_v16 = vrot.slane %v3126_v48, %v17324_v22  ;;  %v2165_v62 = vcombine.high %v2157_v17, %v2157_v17 }
 0x1bd   : > { %v2083_v31 = vrot.slane %v2076_v6, %v17324_v22  ;;  %v15527_v4 = vcombine.low %v1902_v18, %v1399_v39  ;;  %v1911_v13 = vsel %vm1890_vm9, %v16093_v61, %v1711_v45  ;;  %v3090_v33 = vrot.slane %v15557_v46, %v17324_v22 }
 0x1be   : > { %v3092_v51 = vcombine.high %v3069_v9, %v3076_v35  ;;  %v3091_v32 = vcombine.low %v3069_v9, %v3076_v35  ;;  %v3149_v41 = vrot.slane %v3127_v63, %v17324_v22  ;;  %v2166_v20 = vcombine.high %v2164_v23, %v2164_v23 }
 0x1bf   : > { %v3125_v36 = vcombine.low %v2083_v31, %v2108_v53  ;;  %v2141_v24 = vrot.slane %v15527_v4, %v17324_v22  ;;  %v3094_v56 = vcombine.high %v3083_v0, %v3090_v33  ;;  %v3093_v43 = vcombine.low %v3083_v0, %v3090_v33  ;;  %v1709_v44 = vpop.permute.xlu0 %1708 }
 0x1c0   : > { %v3108_v11 = vrot.slane %v3092_v51, %v17324_v22  ;;  %v3101_v29 = vrot.slane %v3091_v32, %v17324_v22  ;;  %v15530_v10 = vcombine.low %v1911_v13, %v1403_v12  ;;  %v3156_v53 = vrot.slane %v3128_v7, %v17324_v22 }
 0x1c1   : > { %v3135_v57 = vrot.slane %v3125_v36, %v17324_v22  ;;  %v3122_v5 = vrot.slane %v3094_v56, %v17324_v22  ;;  %v3115_v21 = vrot.slane %v3093_v43, %v17324_v22  ;;  %v2187_v6 = vrot.slane %v2165_v62, %v17324_v22  ;;  %v16099_v56 = vld [vmem:[#allocation2 + $0x30] sm:$0xff]  }
 0x1c2   : > { %v2148_v15 = vrot.slane %v2141_v24, %v17324_v22  ;;  %v2173_v52 = vrot.slane %v2157_v17, %v17324_v22  ;;  %v17363_v14 = vrot.slane %v2166_v20, %v17324_v22  ;;  %v2133_v28 = vcombine.high %v2129_v37, %v2129_v37  ;;  %v1402_v17 = vld [vmem:[#allocation2 + $0x38] sm:$0x1] }
 0x1c3   : > { %v3158_v49 = vcombine.high %v3135_v57, %v3142_v16  ;;  %v3124_v55 = vcombine.low %v3108_v11, %v3122_v5  ;;  %v3123_v3 = vcombine.low %v3101_v29, %v3115_v21  ;;  %v3160_v38 = vcombine.high %v3149_v41, %v3156_v53  ;;  %v16101_v29 = vld [vmem:[#allocation2 + $0x2c] ss:$0 sps:$4 sm:$0x11]   ;;  %v1406_v21 = vld [vmem:[#allocation2 + $0x48] sm:$0xf] }
 0x1c4   : > { %v17366_v8 = vrot.slane %v2164_v23, %v17324_v22  ;;  %v2222_v2 = vrot.slane %v15530_v10, %v17324_v22  ;;  %v3192_v19 = vcombine.low %v2173_v52, %v2187_v6  ;;  %v3191_v42 = vcombine.low %v2133_v28, %v2148_v15 }
 0x1c5   : > { %15596 = vmatprep.mubr.msk.bf16.mxu0 %vm1890_vm9, %v3124_v55  ;;  %v3174_v31 = vrot.slane %v3158_v49, %v17324_v22  ;;  %v3188_v30 = vrot.slane %v3160_v38, %v17324_v22  ;;  %v15558_v40 = vcombine.high %v2173_v52, %v2187_v6  ;;  %v1908_v18 = vsel %vm1890_vm9, %v16095_v60, %v1709_v44  ;;  %v1405_v52 = vld [vmem:[#allocation2 + $0x44] sm:$0x1] }
 0x1c6   : > { %4472 = vmatmul.mubr.bf16.vlgmr.msra.gmra.mxu0 %v3123_v3  ;;  %v3194_v37 = vcombine.low %v17366_v8, %v17363_v14  ;;  %v3157_v25 = vcombine.low %v3135_v57, %v3142_v16  ;;  %v3208_v59 = vrot.slane %v3192_v19, %v17324_v22  ;;  %v3201_v1 = vrot.slane %v3191_v42, %v17324_v22 }
 0x1c7   : > { %v3190_v58 = vcombine.low %v3174_v31, %v3188_v30  ;;  %v15498_v46 = vcombine.low %v1403_v12, %v1404_v54  ;;  %v2230_v48 = vcombine.high %v2222_v2, %v2222_v2  ;;  %v15529_v39 = vcombine.low %v1908_v18, %v1402_v17  ;;  %v16105_v31 = vld [vmem:[#allocation2 + $0x3c] sm:$0xff]  }
 0x1c8   : > { %v3159_v36 = vcombine.low %v3149_v41, %v3156_v53  ;;  %v3215_v4 = vrot.slane %v15558_v40, %v17324_v22  ;;  %v3222_v45 = vrot.slane %v3194_v37, %v17324_v22  ;;  %v3167_v61 = vrot.slane %v3157_v25, %v17324_v22  ;;  %v1713_v41 = vpop.permute.xlu0 %1712  ;;  %v1407_v40 = vld [vmem:[#allocation2 + $0x4c] sm:$0xf] }
 0x1c9   : > { %15597 = vmatprep.mubr.msk.bf16.mxu0 %vm1890_vm9, %v3190_v58  ;;  %v2215_v7 = vcombine.high %v1911_v13, %v15498_v46  ;;  %v2252_v63 = vrot.slane %v2230_v48, %v17324_v22  ;;  %v3224_v23 = vcombine.high %v3201_v1, %v3208_v59  ;;  %v2206_v35 = vrot.slane %v15529_v39, %v17324_v22  ;;  %v1715_v13 = vpop.permute.xlu1 %1714  ;;  %v1410_v48 = vld [vmem:[#allocation2 + $0x58] sm:$0xf] }
 0x1ca   : > { %v3181_v9 = vrot.slane %v3159_v36, %v17324_v22  ;;  %v3226_v62 = vcombine.high %v3215_v4, %v3222_v45  ;;  %v2238_v33 = vrot.slane %v2222_v2, %v17324_v22  ;;  %v1917_v11 = vsel %vm1890_vm9, %v16099_v56, %v1715_v13 }
 0x1cb   : > { %v2229_v16 = vrot.slane %v2215_v7, %v17324_v22  ;;  %v3240_v57 = vrot.slane %v3224_v23, %v17324_v22  ;;  %v2262_v24 = vcombine.high %v2252_v63, %v2252_v63  ;;  %v2213_v32 = vrot.slane %v2206_v35, %v17324_v22 }
 0x1cc   : > { %v3189_v0 = vcombine.low %v3167_v61, %v3181_v9  ;;  %v3254_v51 = vrot.slane %v3226_v62, %v17324_v22  ;;  %v2260_v12 = vcombine.high %v2238_v33, %v2238_v33  ;;  %v1914_v53 = vsel %vm1890_vm9, %v16101_v29, %v1713_v41 }
 0x1cd   : > { %v2245_v43 = vrot.slane %v2229_v16, %v17324_v22  ;;  %v3258_v5 = vcombine.low %v2213_v32, %v2238_v33  ;;  %v3223_v6 = vcombine.low %v3201_v1, %v3208_v59  ;;  %v3225_v15 = vcombine.low %v3215_v4, %v3222_v45  ;;  %v1719_v44 = vpop.permute.xlu1 %1718  ;;  %v1409_v1 = vld [vmem:[#allocation2 + $0x54] sm:$0xf]  ;;  %v1717_v45 = vpop.permute.xlu0 %1716 }
 0x1ce   : > { %4482 = vmatmul.mubr.bf16.gmra.mxu0 %v3189_v0  ;;  %v3256_v20 = vcombine.low %v3240_v57, %v3254_v51  ;;  %v15532_v49 = vcombine.low %v1917_v11, %v1406_v21  ;;  %v15559_v55 = vcombine.high %v17366_v8, %v17363_v14  ;;  %v3259_v3 = vcombine.low %v2252_v63, %v2260_v12  ;;  %v16107_v57 = vld [vmem:[#allocation2 + $0x38] ss:$0 sps:$4 sm:$0x11]  }
 0x1cf   : > { %v3260_v10 = vcombine.low %v2262_v24, %v2245_v43  ;;  %v15531_v28 = vcombine.low %v1914_v53, %v1405_v52  ;;  %v17399_v2 = vrot.slane %v3258_v5, %v17324_v22  ;;  %v3233_v19 = vrot.slane %v3223_v6, %v17324_v22  ;;  %v1408_v5 = vld [vmem:[#allocation2 + $0x50] sm:$0x1]  ;;  %v16108_v53 = vld [vmem:[#allocation2 + $0x48] sm:$0xff]  }
 0x1d0   : > { %15598 = vmatprep.mubr.msk.bf16.mxu0 %vm1890_vm9, %v3256_v20  ;;  %v3247_v42 = vrot.slane %v3225_v15, %v17324_v22  ;;  %v2287_v60 = vrot.slane %v15532_v49, %v17324_v22  ;;  %v17405_v30 = vrot.slane %v15559_v55, %v17324_v22  ;;  %v2231_v14 = vcombine.high %v2229_v16, %v2229_v16  ;;  %v1412_v55 = vld [vmem:[#allocation2 + $0x60] sm:$0xf]  ;;  %v17435_v52 = vld [vmem:[#allocation2 + $0x70] sm:$0xf] }
 0x1d1   : > { %v17396_v38 = vrot.slane %v3260_v10, %v17324_v22  ;;  %v3281_v8 = vrot.slane %v3259_v3, %v17324_v22  ;;  %v1923_v54 = vsel %vm1890_vm9, %v16105_v31, %v1719_v44  ;;  %v2271_v37 = vrot.slane %v15531_v28, %v17324_v22  ;;  %v1723_v12 = vpop.permute.xlu1 %1722  ;;  %v17433_v3 = vld [vmem:[#allocation2 + $0x6c] sm:$0xf]  ;;  %v17448_v31 = vld [vmem:[#allocation2 + $0x78] sm:$0xf] }
 0x1d2   : > { %v3255_v18 = vcombine.low %v3233_v19, %v3247_v42  ;;  %v3290_v58 = vcombine.high %v17405_v30, %v17399_v2  ;;  %v2295_v59 = vcombine.high %v2287_v60, %v2287_v60  ;;  %v2259_v46 = vrot.slane %v2231_v14, %v17324_v22  ;;  %v17442_v19 = vld [vmem:[#allocation2 + $0x7c] sm:$0xf]  ;;  %v17452_v14 = vld [vmem:[#allocation2 + $0x88] sm:$0xf] }
 0x1d3   : > { %v3292_v25 = vcombine.high %v3281_v8, %v17396_v38  ;;  %v15534_v17 = vcombine.low %v1923_v54, %v1409_v1  ;;  %v15500_v4 = vcombine.low %v1406_v21, %v1407_v40  ;;  %v2261_v7 = vcombine.high %v2245_v43, %v2245_v43  ;;  %v1721_v43 = vpop.permute.xlu0 %1720  ;;  %v1413_v21 = vld [vmem:[#allocation2 + $0x64] sm:$0xf] }
 0x1d4   : > { %v3306_v39 = vrot.slane %v3290_v58, %v17324_v22  ;;  %v2278_v61 = vrot.slane %v2271_v37, %v17324_v22  ;;  %v2317_v23 = vrot.slane %v2295_v59, %v17324_v22  ;;  %v15502_v35 = vcombine.low %v1409_v1, %v1410_v48 }
 0x1d5   : > { %v3320_v36 = vrot.slane %v3292_v25, %v17324_v22  ;;  %v2280_v63 = vcombine.high %v1917_v11, %v15500_v4  ;;  %v2263_v0 = vcombine.high %v2259_v46, %v2259_v46  ;;  %v2352_v16 = vrot.slane %v15534_v17, %v17324_v22  ;;  %v16110_v4 = vld [vmem:[#allocation2 + $0x44] ss:$0 sps:$4 sm:$0x11]  }
 0x1d6   : > { %4492 = vmatmul.mubr.bf16.gmra.mxu0 %v3255_v18  ;;  %v2303_v62 = vrot.slane %v2287_v60, %v17324_v22  ;;  %v2345_v33 = vcombine.high %v1923_v54, %v15502_v35  ;;  %v3323_v24 = vcombine.low %v2259_v46, %v2261_v7  ;;  %v1920_v56 = vsel %vm1890_vm9, %v16107_v57, %v1717_v45  ;;  %v16112_v46 = vld [vmem:[#allocation2 + $0x54] sm:$0xff]  }
 0x1d7   : > { %v3322_v9 = vcombine.low %v3306_v39, %v3320_v36  ;;  %v3324_v13 = vcombine.low %v2263_v0, %v2278_v61  ;;  %v2294_v51 = vrot.slane %v2280_v63, %v17324_v22  ;;  %v2360_v20 = vcombine.high %v2352_v16, %v2352_v16  ;;  %v1727_v25 = vpop.permute.xlu0 %1726  ;;  %v17468_v63 = vld [vmem:[#allocation2 + $0x90] sm:$0xf] }
 0x1d8   : > { %v3325_v32 = vcombine.low %v2303_v62, %v2317_v23  ;;  %v15560_v41 = vcombine.high %v2303_v62, %v2317_v23  ;;  %v3289_v11 = vcombine.low %v17405_v30, %v17399_v2  ;;  %v3291_v29 = vcombine.low %v3281_v8, %v17396_v38  ;;  %v17450_v30 = vld [vmem:[#allocation2 + $0x84] sm:$0xf]  ;;  %v17470_v23 = vld [vmem:[#allocation2 + $0x94] sm:$0xf] }
 0x1d9   : > { %15599 = vmatprep.mubr.msk.bf16.mxu0 %vm1890_vm9, %v3322_v9  ;;  %v2359_v10 = vrot.slane %v2345_v33, %v17324_v22  ;;  %v17428_v6 = vrot.slane %v3323_v24, %v17324_v22  ;;  %v17431_v15 = vrot.slane %v3324_v13, %v17324_v22  ;;  %v15533_v49 = vcombine.low %v1920_v56, %v1408_v5  ;;  %v1725_v24 = vpop.permute.xlu1 %1724  ;;  %v17480_v13 = vld [vmem:[#allocation2 + $0xa0] sm:$0xf]  ;;  %v16111_v5 = vld [vmem:[#allocation2 + $0x50] ss:$0 sps:$4 sm:$0x11]  }
 0x1da   : > { %v2296_v28 = vcombine.high %v2294_v51, %v2294_v51  ;;  %v17438_v38 = vrot.slane %v3325_v32, %v17324_v22  ;;  %v2368_v2 = vrot.slane %v2352_v16, %v17324_v22  ;;  %v1929_v44 = vsel %vm1890_vm9, %v16108_v53, %v1723_v12  ;;  %v17484_v12 = vld [vmem:[#allocation2 + $0x9c] sm:$0xf]  ;;  %v17492_v53 = vld [vmem:[#allocation2 + $0xa8] sm:$0xf] }
 0x1db   : > { %v17445_v42 = vrot.slane %v15560_v41, %v17324_v22  ;;  %v2382_v60 = vrot.slane %v2360_v20, %v17324_v22  ;;  %v3299_v8 = vrot.slane %v3289_v11, %v17324_v22  ;;  %v3313_v54 = vrot.slane %v3291_v29, %v17324_v22  ;;  %v1411_v20 = vld [vmem:[#allocation2 + $0x5c] sm:$0x1]  ;;  %v17486_v11 = vld [vmem:[#allocation2 + $0xac] sm:$0xf] }
 0x1dc   : > { %v2361_v40 = vcombine.high %v2359_v10, %v2359_v10  ;;  %v2375_v37 = vrot.slane %v2359_v10, %v17324_v22  ;;  %v15504_v18 = vcombine.low %v1412_v55, %v1413_v21  ;;  %v15506_v58 = vcombine.low %v17433_v3, %v17435_v52 }
 0x1dd   : > { %v2336_v59 = vrot.slane %v15533_v49, %v17324_v22  ;;  %v15536_v1 = vcombine.low %v1929_v44, %v1412_v55  ;;  %v3321_v48 = vcombine.low %v3299_v8, %v3313_v54  ;;  %v3356_v17 = vcombine.high %v17428_v6, %v17431_v15  ;;  %v17496_v8 = vld [vmem:[#allocation2 + $0xb8] sm:$0xf] }
 0x1de   : > { %v2324_v39 = vrot.slane %v2296_v28, %v17324_v22  ;;  %v2390_v36 = vcombine.high %v2368_v2, %v2368_v2  ;;  %v15508_v45 = vcombine.low %v17448_v31, %v17442_v19  ;;  %v15510_v7 = vcombine.low %v17450_v30, %v17452_v14 }
 0x1df   : > { %v2392_v61 = vcombine.high %v2382_v60, %v2382_v60  ;;  %v1935_v9 = vsel %vm1890_vm9, %v16112_v46, %v1727_v25  ;;  %4502 = vmatmul.mubr.bf16.gmra.mxu0 %v3321_v48  ;;  %v3358_v35 = vcombine.high %v17438_v38, %v17445_v42  ;;  %v3372_v0 = vrot.slane %v3356_v17, %v17324_v22  ;;  %v1414_v48 = vld [vmem:[#allocation2 + $0x68] sm:$0x1]  ;;  %v1729_v17 = vpop.permute.xlu1 %1728 }
 0x1e0   : > { %v2310_v16 = vrot.slane %v2294_v51, %v17324_v22  ;;  %v17477_v62 = vrot.slane %v2361_v40, %v17324_v22  ;;  %v2410_v33 = vcombine.high %v1929_v44, %v15504_v18  ;;  %v1926_v57 = vsel %vm1890_vm9, %v16110_v4, %v1721_v43  ;;  %v17494_v44 = vld [vmem:[#allocation2 + $0xb4] sm:$0xf] }
 0x1e1   : > { %v2391_v32 = vcombine.high %v2375_v37, %v2375_v37  ;;  %v2343_v56 = vrot.slane %v2336_v59, %v17324_v22  ;;  %v2417_v41 = vrot.slane %v15536_v1, %v17324_v22  ;;  %v3386_v51 = vrot.slane %v3358_v35, %v17324_v22 }
 0x1e2   : > { %v3389_v29 = vcombine.low %v2310_v16, %v2324_v39  ;;  %v15561_v10 = vcombine.high %v2310_v16, %v2324_v39  ;;  %v15538_v43 = vcombine.low %v1935_v9, %v17433_v3  ;;  %v15512_v21 = vcombine.low %v17468_v63, %v17470_v23  ;;  %v16115_v16 = vld [vmem:[#allocation2 + $0x60] sm:$0xff]  }
 0x1e3   : > { %v3392_v49 = vcombine.low %v2382_v60, %v2390_v36  ;;  %v3455_v55 = vcombine.low %v2392_v61, %v2375_v37  ;;  %v15535_v52 = vcombine.low %v1926_v57, %v1411_v20  ;;  %v3388_v28 = vcombine.low %v3372_v0, %v3386_v51  ;;  %v16114_v51 = vld [vmem:[#allocation2 + $0x5c] ss:$0 sps:$4 sm:$0x11]  }
 0x1e4   : > { %v2424_v54 = vrot.slane %v2410_v33, %v17324_v22  ;;  %v1932_v40 = vsel %vm1890_vm9, %v16111_v5, %v1725_v24  ;;  %v2475_v18 = vcombine.high %v1935_v9, %v15506_v58  ;;  %v15514_v3 = vcombine.low %v17484_v12, %v17480_v13  ;;  %v1731_v9 = vpop.permute.xlu0 %1730 }
 0x1e5   : > { %v3456_v25 = vcombine.low %v17477_v62, %v2391_v32  ;;  %v3391_v59 = vcombine.low %v2343_v56, %v2368_v2  ;;  %v2425_v1 = vcombine.high %v2417_v41, %v2417_v41  ;;  %v15516_v60 = vcombine.low %v17492_v53, %v17486_v11  ;;  %15600 = vmatprep.mubr.msk.bf16.mxu0 %vm1890_vm9, %v3388_v28 }
 0x1e6   : > { %v17507_v37 = vrot.slane %v3389_v29, %v17324_v22  ;;  %v17510_v46 = vrot.slane %v15561_v10, %v17324_v22  ;;  %v2482_v58 = vrot.slane %v15538_v43, %v17324_v22  ;;  %v15518_v39 = vcombine.low %v17494_v44, %v17496_v8 }
 0x1e7   : > { %v17516_v2 = vrot.slane %v3392_v49, %v17324_v22  ;;  %v17519_v36 = vrot.slane %v3455_v55, %v17324_v22  ;;  %v2401_v4 = vrot.slane %v15535_v52, %v17324_v22  ;;  %v15537_v61 = vcombine.low %v1932_v40, %v1414_v48  ;;  %v1735_v52 = vpop.permute.xlu1 %1734 }
 0x1e8   : > { %v2426_v35 = vcombine.high %v2424_v54, %v2424_v54  ;;  %v2489_v0 = vrot.slane %v2475_v18, %v17324_v22  ;;  %v3355_v33 = vcombine.low %v17428_v6, %v17431_v15  ;;  %v3357_v57 = vcombine.low %v17438_v38, %v17445_v42 }
 0x1e9   : > { %v17528_v24 = vrot.slane %v3456_v25, %v17324_v22  ;;  %v17531_v32 = vrot.slane %v3391_v59, %v17324_v22  ;;  %v2447_v56 = vrot.slane %v2425_v1, %v17324_v22  ;;  %v2393_v20 = vcombine.high %v17477_v62, %v17477_v62  ;;  %v1417_v25 = vld [vmem:[#allocation2 + $0x74] sm:$0x1]  ;;  %v16117_v59 = vld [vmem:[#allocation2 + $0x6c] sm:$0xff]  }
 0x1ea   : > { %v2490_v29 = vcombine.high %v2482_v58, %v2482_v58  ;;  %v1941_v10 = vsel %vm1890_vm9, %v16115_v16, %v1731_v9  ;;  %v3365_v6 = vrot.slane %v3355_v33, %v17324_v22  ;;  %v3379_v15 = vrot.slane %v3357_v57, %v17324_v22 }
 0x1eb   : > { %v2433_v38 = vrot.slane %v2417_v41, %v17324_v22  ;;  %v2440_v42 = vrot.slane %v2424_v54, %v17324_v22  ;;  %v2408_v5 = vrot.slane %v2401_v4, %v17324_v22  ;;  %v1938_v43 = vsel %vm1890_vm9, %v16114_v51, %v1729_v17 }
 0x1ec   : > { %v2454_v49 = vrot.slane %v2426_v35, %v17324_v22  ;;  %v2466_v62 = vrot.slane %v15537_v61, %v17324_v22  ;;  %v2491_v55 = vcombine.high %v2489_v0, %v2489_v0  ;;  %v3387_v28 = vcombine.low %v3365_v6, %v3379_v15 }
 0x1ed   : > { %v2498_v40 = vrot.slane %v2482_v58, %v17324_v22  ;;  %v2505_v18 = vrot.slane %v2489_v0, %v17324_v22  ;;  %v15540_v41 = vcombine.low %v1941_v10, %v17448_v31  ;;  %v3422_v54 = vcombine.high %v17507_v37, %v17510_v46 }
 0x1ee   : > { %v3458_v1 = vcombine.low %v2433_v38, %v2447_v56  ;;  %v2512_v48 = vrot.slane %v2490_v29, %v17324_v22  ;;  %v15539_v17 = vcombine.low %v1938_v43, %v1417_v25  ;;  %4512 = vmatmul.mubr.bf16.gmra.mxu0 %v3387_v28  ;;  %v3424_v4 = vcombine.high %v17531_v32, %v17516_v2 }
 0x1ef   : > { %v15562_v61 = vcombine.high %v2433_v38, %v2447_v56  ;;  %v3457_v9 = vcombine.low %v2393_v20, %v2408_v5  ;;  %v2540_v58 = vcombine.high %v1941_v10, %v15508_v45  ;;  %v1947_v35 = vsel %vm1890_vm9, %v16117_v59, %v1735_v52 }
 0x1f0   : > { %v2473_v0 = vrot.slane %v2466_v62, %v17324_v22  ;;  %v2519_v16 = vrot.slane %v2491_v55, %v17324_v22  ;;  %v3438_v33 = vrot.slane %v3422_v54, %v17324_v22  ;;  %v3452_v57 = vrot.slane %v3424_v4, %v17324_v22 }
 0x1f1   : > { %v3522_v51 = vcombine.low %v2440_v42, %v2454_v49  ;;  %v2520_v29 = vcombine.high %v2498_v40, %v2498_v40  ;;  %v2521_v6 = vcombine.high %v2505_v18, %v2505_v18  ;;  %v2547_v56 = vrot.slane %v15540_v41, %v17324_v22 }
 0x1f2   : > { %v2522_v20 = vcombine.high %v2512_v48, %v2512_v48  ;;  %v2531_v15 = vrot.slane %v15539_v17, %v17324_v22  ;;  %v15542_v19 = vcombine.low %v1947_v35, %v17450_v30  ;;  %v3454_v31 = vcombine.low %v3438_v33, %v3452_v57 }
 0x1f3   : > { %v17565_v45 = vrot.slane %v3458_v1, %v17324_v22  ;;  %v15563_v10 = vcombine.high %v2440_v42, %v2454_v49  ;;  %v2554_v38 = vrot.slane %v2540_v58, %v17324_v22  ;;  %v2605_v5 = vcombine.high %v1947_v35, %v15510_v7  ;;  %v1739_v58 = vpop.permute.xlu1 %1738 }
 0x1f4   : > { %v3524_v43 = vcombine.low %v2473_v0, %v2498_v40  ;;  %v2523_v62 = vcombine.high %v2519_v16, %v2519_v16  ;;  %15601 = vmatprep.mubr.msk.bf16.mxu0 %vm1890_vm9, %v3454_v31  ;;  %v3421_v55 = vcombine.low %v17507_v37, %v17510_v46  ;;  %v3423_v52 = vcombine.low %v17531_v32, %v17516_v2  ;;  %v1733_v40 = vpop.permute.xlu0 %1732  ;;  %v16119_v32 = vld [vmem:[#allocation2 + $0x68] ss:$0 sps:$4 sm:$0x11]  }
 0x1f5   : > { %v17577_v28 = vrot.slane %v15562_v61, %v17324_v22  ;;  %v3587_v42 = vcombine.low %v2512_v48, %v2520_v29  ;;  %v3589_v49 = vcombine.low %v2519_v16, %v2521_v6  ;;  %v2555_v25 = vcombine.high %v2547_v56, %v2547_v56 }
 0x1f6   : > { %v3479_v41 = vrot.slane %v3457_v9, %v17324_v22  ;;  %v3588_v30 = vcombine.low %v2522_v20, %v2505_v18  ;;  %v2538_v14 = vrot.slane %v2531_v15, %v17324_v22  ;;  %v2612_v7 = vrot.slane %v15542_v19, %v17324_v22  ;;  %v1420_v20 = vld [vmem:[#allocation2 + $0x80] sm:$0x1]  ;;  %v16120_v15 = vld [vmem:[#allocation2 + $0x78] sm:$0xff]  }
 0x1f7   : > { %v17583_v59 = vrot.slane %v3522_v51, %v17324_v22  ;;  %v17586_v37 = vrot.slane %v15563_v10, %v17324_v22  ;;  %v2556_v46 = vcombine.high %v2554_v38, %v2554_v38  ;;  %v2619_v2 = vrot.slane %v2605_v5, %v17324_v22 }
 0x1f8   : > { %v17590_v54 = vrot.slane %v3524_v43, %v17324_v22  ;;  %v3590_v1 = vcombine.low %v2523_v62, %v2538_v14  ;;  %v3431_v18 = vrot.slane %v3421_v55, %v17324_v22  ;;  %v3445_v48 = vrot.slane %v3423_v52, %v17324_v22 }
 0x1f9   : > { %v17595_v17 = vrot.slane %v3587_v42, %v17324_v22  ;;  %v17598_v4 = vrot.slane %v3589_v49, %v17324_v22  ;;  %v17601_v61 = vrot.slane %v2555_v25, %v17324_v22  ;;  %v1944_v9 = vsel %vm1890_vm9, %v16119_v32, %v1733_v40  ;;  %v1743_v40 = vpop.permute.xlu1 %1742 }
 0x1fa   : > { %v17605_v35 = vrot.slane %v3588_v30, %v17324_v22  ;;  %v2620_v0 = vcombine.high %v2612_v7, %v2612_v7  ;;  %v3453_v16 = vcombine.low %v3431_v18, %v3445_v48  ;;  %v3488_v33 = vcombine.high %v17519_v36, %v17528_v24  ;;  %v16123_v18 = vld [vmem:[#allocation2 + $0x84] sm:$0xff]  }
 0x1fb   : > { %v2563_v57 = vrot.slane %v2547_v56, %v17324_v22  ;;  %v2570_v51 = vrot.slane %v2554_v38, %v17324_v22  ;;  %v2584_v29 = vrot.slane %v2556_v46, %v17324_v22  ;;  %v2621_v6 = vcombine.high %v2619_v2, %v2619_v2 }
 0x1fc   : > { %v17613_v19 = vrot.slane %v3590_v1, %v17324_v22  ;;  %v17616_v31 = vrot.slane %v2612_v7, %v17324_v22  ;;  %v15541_v10 = vcombine.low %v1944_v9, %v1420_v20  ;;  %4522 = vmatmul.mubr.bf16.gmra.mxu0 %v3453_v16  ;;  %v3490_v5 = vcombine.high %v3479_v41, %v17565_v45  ;;  %v1737_v7 = vpop.permute.xlu0 %1736  ;;  %v16122_v1 = vld [vmem:[#allocation2 + $0x74] ss:$0 sps:$4 sm:$0x11]  }
 0x1fd   : > { %v3653_v43 = vcombine.low %v2563_v57, %v17601_v61  ;;  %v15564_v56 = vcombine.high %v2563_v57, %v17601_v61  ;;  %v2635_v38 = vrot.slane %v2619_v2, %v17324_v22  ;;  %v1953_v62 = vsel %vm1890_vm9, %v16120_v15, %v1739_v58 }
 0x1fe   : > { %v2642_v55 = vrot.slane %v2620_v0, %v17324_v22  ;;  %v3504_v52 = vrot.slane %v3488_v33, %v17324_v22  ;;  %v3518_v42 = vrot.slane %v3490_v5, %v17324_v22  ;;  %v3487_v49 = vcombine.low %v17519_v36, %v17528_v24  ;;  %v1423_v5 = vld [vmem:[#allocation2 + $0x8c] sm:$0x1] }
 0x1ff   : > { %v3655_v25 = vcombine.low %v2570_v51, %v2584_v29  ;;  %v15565_v30 = vcombine.high %v2570_v51, %v2584_v29  ;;  %v17629_v14 = vrot.slane %v2621_v6, %v17324_v22  ;;  %v3489_v46 = vcombine.low %v3479_v41, %v17565_v45 }
 0x200   : > { %v2650_v2 = vcombine.high %v17616_v31, %v17616_v31  ;;  %v15544_v32 = vcombine.low %v1953_v62, %v17468_v63  ;;  %v3520_v48 = vcombine.low %v3504_v52, %v3518_v42  ;;  %v3554_v36 = vcombine.high %v17577_v28, %v17583_v59 }
 0x201   : > { %v2651_v24 = vcombine.high %v2635_v38, %v2635_v38  ;;  %v3497_v61 = vrot.slane %v3487_v49, %v17324_v22  ;;  %v3511_v9 = vrot.slane %v3489_v46, %v17324_v22  ;;  %v3556_v58 = vcombine.high %v17586_v37, %v17590_v54  ;;  %v16125_v46 = vld [vmem:[#allocation2 + $0x80] ss:$0 sps:$4 sm:$0x11]  }
 0x202   : > { %v2652_v45 = vcombine.high %v2642_v55, %v2642_v55  ;;  %v2670_v41 = vcombine.high %v1953_v62, %v15512_v21  ;;  %v1950_v0 = vsel %vm1890_vm9, %v16122_v1, %v1737_v7  ;;  %v1959_v16 = vsel %vm1890_vm9, %v16123_v18, %v1743_v40  ;;  %15602 = vmatprep.mubr.msk.bf16.mxu0 %vm1890_vm9, %v3520_v48  ;;  %v1741_v40 = vpop.permute.xlu0 %1740 }
 0x203   : > { %v3519_v33 = vcombine.low %v3497_v61, %v3511_v9  ;;  %v3570_v57 = vrot.slane %v3554_v36, %v17324_v22  ;;  %v3584_v51 = vrot.slane %v3556_v58, %v17324_v22  ;;  %v3555_v29 = vcombine.low %v17586_v37, %v17590_v54 }
 0x204   : > { %v3720_v6 = vcombine.low %v2642_v55, %v2650_v2  ;;  %v2677_v20 = vrot.slane %v15544_v32, %v17324_v22  ;;  %v3620_v63 = vcombine.high %v17595_v17, %v17605_v35  ;;  %v3622_v23 = vcombine.high %v17598_v4, %v17613_v19 }
 0x205   : > { %v3722_v21 = vcombine.low %v17629_v14, %v2651_v24  ;;  %v2596_v15 = vrot.slane %v15541_v10, %v17324_v22  ;;  %4532 = vmatmul.mubr.bf16.gmra.mxu0 %v3519_v33  ;;  %v3586_v62 = vcombine.low %v3570_v57, %v3584_v51  ;;  %v3553_v52 = vcombine.low %v17577_v28, %v17583_v59 }
 0x206   : > { %v17661_v37 = vrot.slane %v3653_v43, %v17324_v22  ;;  %v2684_v54 = vrot.slane %v2670_v41, %v17324_v22  ;;  %v15543_v55 = vcombine.low %v1950_v0, %v1423_v5  ;;  %v15546_v42 = vcombine.low %v1959_v16, %v17484_v12  ;;  %v1426_v41 = vld [vmem:[#allocation2 + $0x98] sm:$0x1] }
 0x207   : > { %v17666_v49 = vrot.slane %v15564_v56, %v17324_v22  ;;  %v17669_v7 = vrot.slane %v3655_v25, %v17324_v22  ;;  %v17672_v10 = vrot.slane %v15565_v30, %v17324_v22  ;;  %15603 = vmatprep.mubr.msk.bf16.mxu0 %vm1890_vm9, %v3586_v62  ;;  %v3577_v28 = vrot.slane %v3555_v29, %v17324_v22  ;;  %v16126_v29 = vld [vmem:[#allocation2 + $0x90] sm:$0xff]  }
 0x208   : > { %v3721_v59 = vcombine.low %v2652_v45, %v2635_v38  ;;  %v2685_v43 = vcombine.high %v2677_v20, %v2677_v20  ;;  %v3636_v2 = vrot.slane %v3620_v63, %v17324_v22  ;;  %v3650_v32 = vrot.slane %v3622_v23, %v17324_v22 }
 0x209   : > { %v17679_v56 = vrot.slane %v3720_v6, %v17324_v22  ;;  %v17682_v25 = vrot.slane %v3722_v21, %v17324_v22  ;;  %v2603_v30 = vrot.slane %v2596_v15, %v17324_v22  ;;  %v3563_v1 = vrot.slane %v3553_v52, %v17324_v22 }
 0x20a   : > { %v2686_v18 = vcombine.high %v2684_v54, %v2684_v54  ;;  %v2661_v48 = vrot.slane %v15543_v55, %v17324_v22  ;;  %v2742_v38 = vrot.slane %v15546_v42, %v17324_v22  ;;  %v1956_v36 = vsel %vm1890_vm9, %v16125_v46, %v1741_v40  ;;  %v16128_v46 = vld [vmem:[#allocation2 + $0x8c] ss:$0 sps:$4 sm:$0x11]  }
 0x20b   : > { %v2735_v24 = vcombine.high %v1959_v16, %v15514_v3  ;;  %v3585_v61 = vcombine.low %v3563_v1, %v3577_v28  ;;  %v3619_v9 = vcombine.low %v17595_v17, %v17605_v35  ;;  %v3621_v58 = vcombine.low %v17598_v4, %v17613_v19  ;;  %v1747_v4 = vpop.permute.xlu1 %1746 }
 0x20c   : > { %v2707_v45 = vrot.slane %v2685_v43, %v17324_v22  ;;  %v3652_v0 = vcombine.low %v3636_v2, %v3650_v32  ;;  %v3686_v33 = vcombine.high %v17661_v37, %v17666_v49  ;;  %v3688_v57 = vcombine.high %v17669_v7, %v17672_v10 }
 0x20d   : > { %v17702_v13 = vrot.slane %v3721_v59, %v17324_v22  ;;  %v3719_v12 = vcombine.low %v2603_v30, %v17616_v31  ;;  %v2653_v3 = vcombine.high %v17629_v14, %v17629_v14  ;;  %v15545_v17 = vcombine.low %v1956_v36, %v1426_v41  ;;  %4542 = vmatmul.mubr.bf16.gmra.mxu0 %v3585_v61  ;;  %v1745_v59 = vpop.permute.xlu0 %1744 }
 0x20e   : > { %v2693_v35 = vrot.slane %v2677_v20, %v17324_v22  ;;  %v17709_v19 = vrot.slane %v2686_v18, %v17324_v22  ;;  %v2668_v16 = vrot.slane %v2661_v48, %v17324_v22  ;;  %v2750_v51 = vcombine.high %v2742_v38, %v2742_v38  ;;  %15604 = vmatprep.mubr.msk.bf16.mxu0 %vm1890_vm9, %v3652_v0 }
 0x20f   : > { %v17714_v6 = vrot.slane %v2684_v54, %v17324_v22  ;;  %v2749_v31 = vrot.slane %v2735_v24, %v17324_v22  ;;  %v3629_v14 = vrot.slane %v3619_v9, %v17324_v22  ;;  %v3643_v63 = vrot.slane %v3621_v58, %v17324_v22  ;;  %v1751_v2 = vpop.permute.xlu1 %1750 }
 0x210   : > { %v3786_v23 = vcombine.low %v2693_v35, %v2707_v45  ;;  %v1965_v20 = vsel %vm1890_vm9, %v16126_v29, %v1747_v4  ;;  %v3702_v21 = vrot.slane %v3686_v33, %v17324_v22  ;;  %v3716_v15 = vrot.slane %v3688_v57, %v17324_v22  ;;  %v1429_v33 = vld [vmem:[#allocation2 + $0xa4] sm:$0x1] }
 0x211   : > { %v17723_v5 = vrot.slane %v3719_v12, %v17324_v22  ;;  %v15566_v62 = vcombine.high %v2693_v35, %v2707_v45  ;;  %v2758_v52 = vrot.slane %v2742_v38, %v17324_v22  ;;  %v2726_v54 = vrot.slane %v15545_v17, %v17324_v22  ;;  %v16129_v38 = vld [vmem:[#allocation2 + $0x9c] sm:$0xff]  }
 0x212   : > { %v3788_v55 = vcombine.low %v17714_v6, %v17709_v19  ;;  %v15567_v42 = vcombine.high %v17714_v6, %v17709_v19  ;;  %v3785_v40 = vcombine.low %v2653_v3, %v2668_v16  ;;  %v2772_v28 = vrot.slane %v2750_v51, %v17324_v22  ;;  %v1749_v3 = vpop.permute.xlu0 %1748  ;;  %v16131_v51 = vld [vmem:[#allocation2 + $0x98] ss:$0 sps:$4 sm:$0x11]  }
 0x213   : > { %v15548_v43 = vcombine.low %v1965_v20, %v17492_v53  ;;  %v3651_v32 = vcombine.low %v3629_v14, %v3643_v63  ;;  %v3685_v30 = vcombine.low %v17661_v37, %v17666_v49  ;;  %v3687_v1 = vcombine.low %v17669_v7, %v17672_v10  ;;  %v17770_v14 = vld [vmem:[#allocation2 + $0xc0] sm:$0xf]  ;;  %v17772_v63 = vld [vmem:[#allocation2 + $0xc4] sm:$0xf] }
 0x214   : > { %v17738_v18 = vrot.slane %v3786_v23, %v17324_v22  ;;  %v2751_v48 = vcombine.high %v2749_v31, %v2749_v31  ;;  %v3718_v36 = vcombine.low %v3702_v21, %v3716_v15  ;;  %v3754_v24 = vcombine.high %v17702_v13, %v17682_v25 }
 0x215   : > { %v2765_v61 = vrot.slane %v2749_v31, %v17324_v22  ;;  %v2780_v9 = vcombine.high %v2758_v52, %v2758_v52  ;;  %v2733_v58 = vrot.slane %v2726_v54, %v17324_v22  ;;  %v1962_v45 = vsel %vm1890_vm9, %v16128_v46, %v1745_v59  ;;  %4552 = vmatmul.mubr.bf16.gmra.mxu0 %v3651_v32  ;;  %v1432_v46 = vld [vmem:[#allocation2 + $0xb0] sm:$0x1] }
 0x216   : > { %v2782_v37 = vcombine.high %v2772_v28, %v2772_v28  ;;  %v2800_v49 = vcombine.high %v1965_v20, %v15516_v60  ;;  %v1971_v7 = vsel %vm1890_vm9, %v16129_v38, %v1751_v2  ;;  %15605 = vmatprep.mubr.msk.bf16.mxu0 %vm1890_vm9, %v3718_v36  ;;  %v3752_v10 = vcombine.high %v17723_v5, %v17679_v56  ;;  %v16132_v2 = vld [vmem:[#allocation2 + $0xa8] sm:$0xff]  }
 0x217   : > { %v17753_v41 = vrot.slane %v15566_v62, %v17324_v22  ;;  %v2807_v0 = vrot.slane %v15548_v43, %v17324_v22  ;;  %v3695_v57 = vrot.slane %v3685_v30, %v17324_v22  ;;  %v3709_v12 = vrot.slane %v3687_v1, %v17324_v22 }
 0x218   : > { %v17759_v11 = vrot.slane %v3788_v55, %v17324_v22  ;;  %v17762_v53 = vrot.slane %v3785_v40, %v17324_v22  ;;  %v15547_v60 = vcombine.low %v1962_v45, %v1429_v33  ;;  %v3782_v17 = vrot.slane %v3754_v24, %v17324_v22  ;;  %v1755_v55 = vpop.permute.xlu1 %1754 }
 0x219   : > { %v2779_v4 = vrot.slane %v2751_v48, %v17324_v22  ;;  %v2781_v35 = vcombine.high %v2765_v61, %v2765_v61  ;;  %v3853_v19 = vcombine.low %v2772_v28, %v2780_v9  ;;  %v15550_v16 = vcombine.low %v1971_v7, %v17494_v44 }
 0x21a   : > { %v3854_v29 = vcombine.low %v2782_v37, %v2765_v61  ;;  %v3852_v6 = vcombine.low %v2733_v58, %v2758_v52  ;;  %v17768_v31 = vrot.slane %v2800_v49, %v17324_v22  ;;  %v3768_v23 = vrot.slane %v3752_v10, %v17324_v22 }
 0x21b   : > { %v2815_v20 = vcombine.high %v2807_v0, %v2807_v0  ;;  %v1968_v21 = vsel %vm1890_vm9, %v16131_v51, %v1749_v3  ;;  %v3717_v15 = vcombine.low %v3695_v57, %v3709_v12  ;;  %v3753_v62 = vcombine.low %v17702_v13, %v17682_v25 }
 0x21c   : > { %v2791_v54 = vrot.slane %v15547_v60, %v17324_v22  ;;  %v3784_v52 = vcombine.low %v3768_v23, %v3782_v17  ;;  %v3818_v40 = vcombine.high %v17762_v53, %v17738_v18  ;;  %v3820_v28 = vcombine.high %v17753_v41, %v17759_v11  ;;  %v1753_v60 = vpop.permute.xlu0 %1752  ;;  %v16134_v17 = vld [vmem:[#allocation2 + $0xa4] ss:$0 sps:$4 sm:$0x11]  }
 0x21d   : > { %v17784_v59 = vrot.slane %v15567_v42, %v17324_v22  ;;  %v2872_v43 = vrot.slane %v15550_v16, %v17324_v22  ;;  %v15520_v25 = vcombine.low %v17770_v14, %v17772_v63  ;;  %4562 = vmatmul.mubr.bf16.gmra.mxu0 %v3717_v15  ;;  %v3751_v13 = vcombine.low %v17723_v5, %v17679_v56  ;;  %v1435_v15 = vld [vmem:[#allocation2 + $0xbc] sm:$0x1] }
 0x21e   : > { %v17792_v32 = vrot.slane %v3853_v19, %v17324_v22  ;;  %v3917_v30 = vcombine.low %v2779_v4, %v2781_v35  ;;  %v17795_v1 = vrot.slane %v3852_v6, %v17324_v22  ;;  %v15549_v42 = vcombine.low %v1968_v21, %v1432_v46  ;;  %15606 = vmatprep.mubr.msk.bf16.mxu0 %vm1890_vm9, %v3784_v52  ;;  %v1440_v6 = vld [vmem:[#allocation2 + $0xd0] sm:$0xf] }
 0x21f   : > { %v17799_v48 = vrot.slane %v3854_v29, %v17324_v22  ;;  %v2837_v38 = vrot.slane %v2815_v20, %v17324_v22  ;;  %v17803_v36 = vsel %vm1890_vm9, %v16132_v2, %v1755_v55  ;;  %v3775_v56 = vrot.slane %v3753_v62, %v17324_v22 }
 0x220   : > { %v2816_v5 = vcombine.high %v17768_v31, %v17768_v31  ;;  %v2798_v24 = vrot.slane %v2791_v54, %v17324_v22  ;;  %v3834_v61 = vrot.slane %v3818_v40, %v17324_v22  ;;  %v3848_v9 = vrot.slane %v3820_v28, %v17324_v22  ;;  %v1759_v28 = vpop.permute.xlu0 %1758 }
 0x221   : > { %v2823_v58 = vrot.slane %v2807_v0, %v17324_v22  ;;  %v2865_v45 = vcombine.high %v1971_v7, %v15518_v39  ;;  %v2880_v37 = vcombine.high %v2872_v43, %v2872_v43  ;;  %v3761_v49 = vrot.slane %v3751_v13, %v17324_v22  ;;  %v16136_v13 = vld [vmem:[#allocation2 + $0xb4] sm:$0xff]  }
 0x222   : > { %v2783_v10 = vcombine.high %v2779_v4, %v2779_v4  ;;  %v2888_v33 = vrot.slane %v2872_v43, %v17324_v22  ;;  %v2856_v57 = vrot.slane %v15549_v42, %v17324_v22  ;;  %v15552_v12 = vcombine.low %v17803_v36, %v17770_v14 }
 0x223   : > { %v3919_v3 = vcombine.low %v2823_v58, %v2837_v38  ;;  %v3783_v35 = vcombine.low %v3761_v49, %v3775_v56  ;;  %v3817_v0 = vcombine.low %v17762_v53, %v17738_v18  ;;  %v3819_v44 = vcombine.low %v17753_v41, %v17759_v11  ;;  %v1439_v11 = vld [vmem:[#allocation2 + $0xcc] sm:$0xf] }
 0x224   : > { %v15568_v8 = vcombine.high %v2823_v58, %v2837_v38  ;;  %v3918_v39 = vcombine.low %v2783_v10, %v2798_v24  ;;  %v3850_v7 = vcombine.low %v3834_v61, %v3848_v9  ;;  %v3886_v4 = vcombine.high %v17792_v32, %v17799_v48 }
 0x225   : > { %v2844_v19 = vrot.slane %v2816_v5, %v17324_v22  ;;  %v2879_v16 = vrot.slane %v2865_v45, %v17324_v22  ;;  %v17829_v51 = vrot.slane %v2880_v37, %v17324_v22  ;;  %v1974_v29 = vsel %vm1890_vm9, %v16134_v17, %v1753_v60  ;;  %4572 = vmatmul.mubr.bf16.gmra.mxu0 %v3783_v35  ;;  %v1757_v37 = vpop.permute.xlu1 %1756 }
 0x226   : > { %v2910_v18 = vcombine.high %v2888_v33, %v2888_v33  ;;  %v2863_v53 = vrot.slane %v2856_v57, %v17324_v22  ;;  %v2937_v41 = vrot.slane %v15552_v12, %v17324_v22  ;;  %15607 = vmatprep.mubr.msk.bf16.mxu0 %vm1890_vm9, %v3850_v7  ;;  %v3884_v23 = vcombine.high %v17784_v59, %v17795_v1 }
 0x227   : > { %v2830_v20 = vrot.slane %v17768_v31, %v17324_v22  ;;  %v17840_v21 = vrot.slane %v3919_v3, %v17324_v22  ;;  %v3827_v62 = vrot.slane %v3817_v0, %v17324_v22  ;;  %v3841_v54 = vrot.slane %v3819_v44, %v17324_v22 }
 0x228   : > { %v17845_v55 = vrot.slane %v15568_v8, %v17324_v22  ;;  %v17848_v52 = vrot.slane %v3918_v39, %v17324_v22  ;;  %v15551_v40 = vcombine.low %v1974_v29, %v1435_v15  ;;  %v3914_v43 = vrot.slane %v3886_v4, %v17324_v22 }
 0x229   : > { %v17852_v31 = vrot.slane %v3917_v30, %v17324_v22  ;;  %v3983_v46 = vcombine.low %v2830_v20, %v2844_v19  ;;  %v2881_v2 = vcombine.high %v2879_v16, %v2879_v16  ;;  %v15522_v42 = vcombine.low %v1439_v11, %v1440_v6 }
 0x22a   : > { %v3986_v38 = vcombine.low %v17829_v51, %v2910_v18  ;;  %v3985_v56 = vcombine.low %v2863_v53, %v2888_v33  ;;  %v2945_v5 = vcombine.high %v2937_v41, %v2937_v41  ;;  %v3900_v24 = vrot.slane %v3884_v23, %v17324_v22 }
 0x22b   : > { %v15569_v61 = vcombine.high %v2830_v20, %v2844_v19  ;;  %v1983_v9 = vsel %vm1890_vm9, %v16136_v13, %v1759_v28  ;;  %v3849_v58 = vcombine.low %v3827_v62, %v3841_v54  ;;  %v3885_v45 = vcombine.low %v17792_v32, %v17799_v48  ;;  %v16135_v48 = vld [vmem:[#allocation2 + $0xb0] ss:$0 sps:$4 sm:$0x11]   ;;  %v1438_v19 = vld [vmem:[#allocation2 + $0xc8] sm:$0x1]  ;;  %v1761_v54 = vpop.permute.xlu1 %1760 }
 0x22c   : > { %v2921_v30 = vrot.slane %v15551_v40, %v17324_v22  ;;  %v3916_v49 = vcombine.low %v3900_v24, %v3914_v43  ;;  %v3950_v10 = vcombine.high %v17852_v31, %v17848_v52  ;;  %v3952_v33 = vcombine.high %v17840_v21, %v17845_v55 }
 0x22d   : > { %v17865_v57 = vrot.slane %v3983_v46, %v17324_v22  ;;  %v2895_v12 = vrot.slane %v2879_v16, %v17324_v22  ;;  %v2930_v32 = vcombine.high %v17803_v36, %v15520_v25  ;;  %4582 = vmatmul.mubr.bf16.gmra.mxu0 %v3849_v58  ;;  %v3883_v60 = vcombine.low %v17784_v59, %v17795_v1  ;;  %v16138_v46 = vld [vmem:[#allocation2 + $0xbc] ss:$0 sps:$4 sm:$0x11]  }
 0x22e   : > { %v2909_v3 = vrot.slane %v2881_v2, %v17324_v22  ;;  %v17876_v17 = vrot.slane %v3986_v38, %v17324_v22  ;;  %v17879_v35 = vrot.slane %v3985_v56, %v17324_v22  ;;  %v17882_v0 = vrot.slane %v2945_v5, %v17324_v22  ;;  %15608 = vmatprep.mubr.msk.bf16.mxu0 %vm1890_vm9, %v3916_v49 }
 0x22f   : > { %v17886_v14 = vrot.slane %v2937_v41, %v17324_v22  ;;  %v1980_v63 = vsel %vm1890_vm9, %v16135_v48, %v1757_v37  ;;  %v15554_v25 = vcombine.low %v1983_v9, %v1439_v11  ;;  %v3907_v59 = vrot.slane %v3885_v45, %v17324_v22 }
 0x230   : > { %v2928_v1 = vrot.slane %v2921_v30, %v17324_v22  ;;  %v2995_v36 = vcombine.high %v1983_v9, %v15522_v42  ;;  %v3966_v44 = vrot.slane %v3950_v10, %v17324_v22  ;;  %v3980_v8 = vrot.slane %v3952_v33, %v17324_v22 }
 0x231   : > { %v17894_v39 = vrot.slane %v15569_v61, %v17324_v22  ;;  %v2911_v7 = vcombine.high %v2895_v12, %v2895_v12  ;;  %v2944_v4 = vrot.slane %v2930_v32, %v17324_v22  ;;  %v3893_v16 = vrot.slane %v3883_v60, %v17324_v22 }
 0x232   : > { %v2912_v29 = vcombine.high %v17829_v51, %v17829_v51  ;;  %v4052_v18 = vcombine.low %v17886_v14, %v17882_v0  ;;  %v2913_v53 = vcombine.high %v2909_v3, %v2909_v3  ;;  %v15553_v41 = vcombine.low %v1980_v63, %v1438_v19 }
 0x233   : > { %v3002_v11 = vrot.slane %v15554_v25, %v17324_v22  ;;  %v3915_v6 = vcombine.low %v3893_v16, %v3907_v59  ;;  %v3949_v23 = vcombine.low %v17852_v31, %v17848_v52  ;;  %v3951_v20 = vcombine.low %v17840_v21, %v17845_v55  ;;  %v1441_v31 = vld [vmem:[#allocation2 + $0xd4] sm:$0x1] }
 0x234   : > { %v4051_v15 = vcombine.low %v2913_v53, %v2928_v1  ;;  %v3009_v62 = vrot.slane %v2995_v36, %v17324_v22  ;;  %v3982_v40 = vcombine.low %v3966_v44, %v3980_v8  ;;  %v4018_v51 = vcombine.high %v17879_v35, %v17876_v17 }
 0x235   : > { %v4050_v28 = vcombine.low %v2909_v3, %v2911_v7  ;;  %v2946_v43 = vcombine.high %v2944_v4, %v2944_v4  ;;  %4592 = vmatmul.mubr.bf16.gmra.mxu0 %v3915_v6  ;;  %v4049_v2 = vcombine.low %v2912_v29, %v2895_v12  ;;  %v4080_v13 = vrot.slane %v4052_v18, %v17324_v22 }
 0x236   : > { %v2986_v52 = vrot.slane %v15553_v41, %v17324_v22  ;;  %15609 = vmatprep.mubr.msk.bf16.mxu0 %vm1890_vm9, %v3982_v40  ;;  %v4016_v21 = vcombine.high %v17865_v57, %v17894_v39  ;;  %v3010_v55 = vcombine.high %v3002_v11, %v3002_v11  ;;  %v1986_v42 = vsel %vm1890_vm9, %v16138_v46, %v1761_v54 }
 0x237   : > { %v3959_v38 = vrot.slane %v3949_v23, %v17324_v22  ;;  %v3973_v56 = vrot.slane %v3951_v20, %v17324_v22  ;;  %v4073_v5 = vrot.slane %v4051_v15, %v17324_v22  ;;  %v3011_v24 = vcombine.high %v3009_v62, %v3009_v62 }
 0x238   : > { %v3018_v61 = vrot.slane %v3002_v11, %v17324_v22  ;;  %v4046_v9 = vrot.slane %v4018_v51, %v17324_v22  ;;  %v4066_v58 = vrot.slane %v4050_v28, %v17324_v22  ;;  %v2974_v45 = vrot.slane %v2946_v43, %v17324_v22 }
 0x239   : > { %v4059_v30 = vrot.slane %v4049_v2, %v17324_v22  ;;  %v2993_v37 = vrot.slane %v2986_v52, %v17324_v22  ;;  %v15555_v49 = vcombine.low %v1986_v42, %v1441_v31  ;;  %v4032_v10 = vrot.slane %v4016_v21, %v17324_v22 }
 0x23a   : > { %v2960_v33 = vrot.slane %v2944_v4, %v17324_v22  ;;  %v3032_v12 = vrot.slane %v3010_v55, %v17324_v22  ;;  %v3981_v32 = vcombine.low %v3959_v38, %v3973_v56  ;;  %v4017_v48 = vcombine.low %v17879_v35, %v17876_v17 }
 0x23b   : > { %v3039_v60 = vrot.slane %v3011_v24, %v17324_v22  ;;  %v4118_v3 = vcombine.low %v2993_v37, %v3018_v61  ;;  %v4048_v63 = vcombine.low %v4032_v10, %v4046_v9  ;;  %v4084_v25 = vcombine.high %v4073_v5, %v4080_v13 }
 0x23c   : > { %v15570_v59 = vcombine.high %v17886_v14, %v17882_v0  ;;  %v4116_v1 = vcombine.low %v2960_v33, %v2974_v45  ;;  %v15571_v36 = vcombine.high %v2960_v33, %v2974_v45  ;;  %v4015_v44 = vcombine.low %v17865_v57, %v17894_v39 }
 0x23d   : > { %4602 = vmatmul.mubr.bf16.gmra.mxu0 %v3981_v32  ;;  %v3025_v8 = vrot.slane %v3009_v62, %v17324_v22  ;;  %v3051_v7 = vrot.slane %v15555_v49, %v17324_v22  ;;  %v4082_v17 = vcombine.high %v4059_v30, %v4066_v58  ;;  %v4039_v35 = vrot.slane %v4017_v48, %v17324_v22 }
 0x23e   : > { %15610 = vmatprep.mubr.msk.bf16.mxu0 %vm1890_vm9, %v4048_v63  ;;  %v3042_v4 = vcombine.high %v3032_v12, %v3032_v12  ;;  %v4146_v19 = vrot.slane %v4118_v3, %v17324_v22  ;;  %v3043_v16 = vcombine.high %v3039_v60, %v3039_v60  ;;  %v4112_v0 = vrot.slane %v4084_v25, %v17324_v22 }
 0x23f   : > { %v4125_v14 = vrot.slane %v15570_v59, %v17324_v22  ;;  %v4132_v29 = vrot.slane %v4116_v1, %v17324_v22  ;;  %v4139_v57 = vrot.slane %v15571_v36, %v17324_v22  ;;  %v4025_v39 = vrot.slane %v4015_v44, %v17324_v22 }
 0x240   : > { %v3040_v18 = vcombine.high %v3018_v61, %v3018_v61  ;;  %v3041_v53 = vcombine.high %v3025_v8, %v3025_v8  ;;  %v3058_v41 = vrot.slane %v3051_v7, %v17324_v22  ;;  %v4098_v11 = vrot.slane %v4082_v17, %v17324_v22 }
 0x241   : > { %v4047_v6 = vcombine.low %v4025_v39, %v4039_v35  ;;  %v4083_v23 = vcombine.low %v4073_v5, %v4080_v13  ;;  %v4182_v20 = vcombine.low %v3042_v4, %v3025_v8  ;;  %v4150_v54 = vcombine.high %v4139_v57, %v4146_v19 }
 0x242   : > { %v4184_v15 = vcombine.low %v3043_v16, %v3058_v41  ;;  %v4114_v62 = vcombine.low %v4098_v11, %v4112_v0  ;;  %v4081_v40 = vcombine.low %v4059_v30, %v4066_v58  ;;  %v4181_v51 = vcombine.low %v3032_v12, %v3040_v18 }
 0x243   : > { %v4183_v28 = vcombine.low %v3039_v60, %v3041_v53  ;;  %v4148_v43 = vcombine.high %v4125_v14, %v4132_v29  ;;  %v4105_v46 = vrot.slane %v4083_v23, %v17324_v22  ;;  %v4198_v2 = vrot.slane %v4182_v20, %v17324_v22 }
 0x244   : > { %v4212_v52 = vrot.slane %v4184_v15, %v17324_v22  ;;  %v4178_v21 = vrot.slane %v4150_v54, %v17324_v22  ;;  %v4091_v13 = vrot.slane %v4081_v40, %v17324_v22  ;;  %v4191_v55 = vrot.slane %v4181_v51, %v17324_v22 }
 0x245   : > { %4612 = vmatmul.mubr.bf16.gmra.mxu0 %v4047_v6  ;;  %v4205_v31 = vrot.slane %v4183_v28, %v17324_v22  ;;  %v4164_v42 = vrot.slane %v4148_v43, %v17324_v22  ;;  %v4149_v56 = vcombine.low %v4139_v57, %v4146_v19  ;;  %v4147_v9 = vcombine.low %v4125_v14, %v4132_v29 }
 0x246   : > { %15611 = vmatprep.mubr.msk.bf16.mxu0 %vm1890_vm9, %v4114_v62  ;;  %v4113_v38 = vcombine.low %v4091_v13, %v4105_v46  ;;  %v4214_v24 = vcombine.high %v4191_v55, %v4198_v2  ;;  %v4213_v10 = vcombine.low %v4191_v55, %v4198_v2 }
 0x247   : > { %v4180_v5 = vcombine.low %v4164_v42, %v4178_v21  ;;  %v4216_v61 = vcombine.high %v4205_v31, %v4212_v52  ;;  %v4171_v58 = vrot.slane %v4149_v56, %v17324_v22  ;;  %v4157_v37 = vrot.slane %v4147_v9, %v17324_v22 }
 0x248   : > { %v4230_v45 = vrot.slane %v4214_v24, %v17324_v22  ;;  %v4215_v33 = vcombine.low %v4205_v31, %v4212_v52  ;;  %v4223_v32 = vrot.slane %v4213_v10, %v17324_v22 }
 0x249   : > { %v4244_v30 = vrot.slane %v4216_v61, %v17324_v22  ;;  %v4179_v49 = vcombine.low %v4157_v37, %v4171_v58 }
 0x24a   : > { %v4237_v48 = vrot.slane %v4215_v33, %v17324_v22 }
 0x24b   : > { %v4246_v12 = vcombine.low %v4230_v45, %v4244_v30 }
 0x24c   : > { %v4245_v60 = vcombine.low %v4223_v32, %v4237_v48 }
 0x24d   : > { %4622 = vmatmul.mubr.bf16.gmra.mxu0 %v4113_v38 }
 0x24e   : > { %15612 = vmatprep.mubr.msk.bf16.mxu0 %vm1890_vm9, %v4180_v5 }
 0x255   : > { %4632 = vmatmul.mubr.bf16.gmra.mxu0 %v4179_v49 }
 0x256   : > { %15613 = vmatprep.mubr.msk.bf16.mxu0 %vm1890_vm9, %v4246_v12 }
 0x25d   : > { %4642 = vmatmul.mubr.bf16.gmra.mxu0 %v4245_v60 }
 0x286   : > { %v4473_v3 = vpop.f32.mrf.mxu0 }
 0x288   : > { %v4475_v63 = vpop.f32.mrf.mxu0 }
 0x289   : > { %v4724_v25 = vcombine.low %v4473_v3, %v4475_v63  ;;  %v4725_v59 = vcombine.high %v4473_v3, %v4475_v63 }
 0x28a   : > { %v4477_v1 = vpop.f32.mrf.mxu0 }
 0x28b   : > { %v17965_v36 = vrot.slane %v4724_v25, %v16806_v50  ;;  %v17968_v44 = vrot.slane %v4725_v59, %v16806_v50 }
 0x28c   : > { %v4479_v8 = vpop.f32.mrf.mxu0 }
 0x28d   : > { %v17972_v7 = vcombine.high %v17965_v36, %v17965_v36  ;;  %v4742_v17 = vcombine.low %v4477_v1, %v4479_v8  ;;  %v4743_v35 = vcombine.high %v4477_v1, %v4479_v8  ;;  %v5512_v19 = vrot.slane %v17968_v44, 7 }
 0x28e   : > { %v17981_v16 = vcombine.high %v17968_v44, %v17968_v44  ;;  %v15614_v29 = vrot.slane %v17965_v36, 9  ;;  %v4483_v53 = vpop.f32.mrf.mxu0 }
 0x28f   : > { %v17984_v0 = vrot.slane %v4742_v17, %v16806_v50  ;;  %v17987_v14 = vrot.slane %v4743_v35, %v16806_v50  ;;  %v5509_v57 = vrot.slane %v17972_v7, 7  ;;  %v5514_v39 = vrot.slane %v5512_v19, 2 }
 0x290   : > { %v5515_v18 = vrot.slane %v17981_v16, 7  ;;  %v4485_v20 = vpop.f32.mrf.mxu0 }
 0x291   : > { %v5510_v41 = vsel %vm17974_vm0, %v15614_v29, %v5509_v57  ;;  %v5511_v11 = vrot.slane %v5509_v57, 2  ;;  %v5518_v6 = vrot.slane %v17984_v0, 7  ;;  %v17997_v23 = vcombine.high %v17984_v0, %v17984_v0 }
 0x292   : > { %5907 = vrot.lane.b32.xlu0 %v5510_v41, %s16459_s24  ;;  %v5517_v62 = vrot.slane %v5515_v18, 2  ;;  %v18005_v40 = vcombine.high %v17987_v14, %v17987_v14  ;;  %v4760_v51 = vcombine.low %v4483_v53, %v4485_v20  ;;  %v4761_v28 = vcombine.high %v4483_v53, %v4485_v20  ;;  %v4487_v46 = vpop.f32.mrf.mxu0 }
 0x293   : > { %v5513_v15 = vsel %vm17974_vm0, %v5511_v11, %v5512_v19  ;;  %v5521_v54 = vrot.slane %v17997_v23, 7  ;;  %v5524_v43 = vrot.slane %v17987_v14, 7  ;;  %v5516_v2 = vsel %vm17974_vm0, %v5514_v39, %v5515_v18 }
 0x294   : > { %5909 = vrot.lane.b32.xlu1 %v5513_v15, %s16459_s24  ;;  %v5520_v52 = vrot.slane %v5518_v6, 2  ;;  %v18012_v21 = vrot.slane %v4760_v51, %v16806_v50  ;;  %v18015_v13 = vrot.slane %v4761_v28, %v16806_v50  ;;  %v4489_v55 = vpop.f32.mrf.mxu0  ;;  %v5519_v31 = vsel %vm17974_vm0, %v5517_v62, %v5518_v6 }
 0x295   : > { %v5523_v42 = vrot.slane %v5521_v54, 2  ;;  %v5527_v38 = vrot.slane %v18005_v40, 7  ;;  %v4778_v56 = vcombine.low %v4487_v46, %v4489_v55  ;;  %v5526_v5 = vrot.slane %v5524_v43, 2 }
 0x296   : > { %5911 = vrot.lane.b32.xlu0 %v5516_v2, %s16459_s24  ;;  %v4779_v24 = vcombine.high %v4487_v46, %v4489_v55  ;;  %v5522_v61 = vsel %vm17974_vm0, %v5520_v52, %v5521_v54  ;;  %v18026_v9 = vcombine.high %v18012_v21, %v18012_v21  ;;  %v18030_v58 = vcombine.high %v18015_v13, %v18015_v13  ;;  %v4493_v59 = vpop.f32.mrf.mxu0 }
 0x297   : > { %v18033_v45 = vrot.slane %v4778_v56, %v16806_v50  ;;  %v5525_v30 = vsel %vm17974_vm0, %v5523_v42, %v5524_v43  ;;  %v5529_v37 = vrot.slane %v5527_v38, 2  ;;  %v5530_v49 = vrot.slane %v18012_v21, 7 }
 0x298   : > { %5913 = vrot.lane.b32.xlu1 %v5519_v31, %s16459_s24  ;;  %v5534_v10 = vrot.slane %v18015_v13, 7  ;;  %v5528_v33 = vsel %vm17974_vm0, %v5526_v5, %v5527_v38  ;;  %v18044_v12 = vrot.slane %v4779_v24, %v16806_v50  ;;  %v15615_v32 = vrot.slane %v18026_v9, 9  ;;  %v4495_v29 = vpop.f32.mrf.mxu0 }
 0x299   : > { %v5537_v48 = vrot.slane %v18030_v58, 7  ;;  %v18050_v60 = vcombine.high %v18033_v45, %v18033_v45  ;;  %v5531_v3 = vsel %vm17974_vm0, %v5529_v37, %v5530_v49  ;;  %v5540_v25 = vrot.slane %v18033_v45, 7 }
 0x29a   : > { %5915 = vrot.lane.b32.xlu0 %v5522_v61, %s16459_s24  ;;  %v5536_v63 = vrot.slane %v5534_v10, 2  ;;  %v5535_v1 = vsel %vm17974_vm0, %v15615_v32, %v5534_v10  ;;  %v18062_v35 = vcombine.high %v18044_v12, %v18044_v12  ;;  %v5546_v19 = vrot.slane %v18044_v12, 7  ;;  %v4497_v41 = vpop.f32.mrf.mxu0 }
 0x29b   : > { %v5539_v8 = vrot.slane %v5537_v48, 2  ;;  %v5543_v17 = vrot.slane %v18050_v60, 7  ;;  %v5542_v39 = vrot.slane %v5540_v25, 2  ;;  %v4796_v18 = vcombine.low %v4493_v59, %v4495_v29 }
 0x29c   : > { %5917 = vrot.lane.b32.xlu1 %v5525_v30, %s16459_s24  ;;  %v5538_v57 = vsel %vm17974_vm0, %v5536_v63, %v5537_v48  ;;  %v4797_v53 = vcombine.high %v4493_v59, %v4495_v29  ;;  %v5549_v20 = vrot.slane %v18062_v35, 7  ;;  %v5548_v54 = vrot.slane %v5546_v19, 2  ;;  %v4499_v51 = vpop.f32.mrf.mxu0 }
 0x29d   : > { %v5541_v11 = vsel %vm17974_vm0, %v5539_v8, %v5540_v25  ;;  %v5545_v6 = vrot.slane %v5543_v17, 2  ;;  %v18073_v15 = vrot.slane %v4796_v18, %v16806_v50  ;;  %v5544_v28 = vsel %vm17974_vm0, %v5542_v39, %v5543_v17 }
 0x29e   : > { %5919 = vrot.lane.b32.xlu0 %v5528_v33, %s16459_s24  ;;  %v18076_v62 = vrot.slane %v4797_v53, %v16806_v50  ;;  %v4814_v46 = vcombine.low %v4497_v41, %v4499_v51  ;;  %v4815_v2 = vcombine.high %v4497_v41, %v4499_v51  ;;  %v5551_v31 = vrot.slane %v5549_v20, 2 }
 0x29f   : > { %v5552_v52 = vrot.slane %v18073_v15, 7  ;;  %v5547_v55 = vsel %vm17974_vm0, %v5545_v6, %v5546_v19  ;;  %v18091_v42 = vcombine.high %v18073_v15, %v18073_v15  ;;  %v5550_v56 = vsel %vm17974_vm0, %v5548_v54, %v5549_v20  ;;  %v4503_v25 = vpop.f32.mrf.mxu0 }
 0x2a0   : > { %5921 = vrot.lane.b32.xlu1 %v5531_v3, %s16459_s24  ;;  %v18083_v43 = vcombine.high %v18076_v62, %v18076_v62  ;;  %v18094_v38 = vrot.slane %v4814_v46, %v16806_v50  ;;  %v18100_v5 = vrot.slane %v4815_v2, %v16806_v50  ;;  %v15616_v33 = vrot.slane %v18076_v62, 9 }
 0x2a1   : > { %v5554_v24 = vrot.slane %v5552_v52, 2  ;;  %v5555_v61 = vrot.slane %v18091_v42, 7  ;;  %v5553_v49 = vsel %vm17974_vm0, %v5551_v31, %v5552_v52  ;;  %v4505_v17 = vpop.f32.mrf.mxu0 }
 0x2a2   : > { %5923 = vrot.lane.b32.xlu0 %v5535_v1, %s16459_s24  ;;  %24159 = vst [vmem:[#allocation20_spill] sm:$0xff] %v18094_v38  ;;  %24160 = vst [vmem:[#allocation21_spill] sm:$0xff] %v18100_v5  ;;  %v5559_v30 = vrot.slane %v18083_v43, 7  ;;  %v18107_v37 = vcombine.high %v18094_v38, %v18094_v38  ;;  %v5562_v10 = vrot.slane %v18094_v38, 7  ;;  %v18119_v63 = vcombine.high %v18100_v5, %v18100_v5 }
 0x2a3   : > { %v5556_v32 = vsel %vm17974_vm0, %v5554_v24, %v5555_v61  ;;  %v5568_v8 = vrot.slane %v18100_v5, 7  ;;  %v4832_v39 = vcombine.low %v4503_v25, %v4505_v17  ;;  %v4833_v18 = vcombine.high %v4503_v25, %v4505_v17  ;;  %v4507_v53 = vpop.f32.mrf.mxu0 }
 0x2a4   : > { %5925 = vrot.lane.b32.xlu1 %v5538_v57, %s16459_s24  ;;  %24161 = vst [vmem:[#allocation22_spill] sm:$0xff] %v18107_v37  ;;  %v5561_v48 = vrot.slane %v5559_v30, 2  ;;  %v5565_v3 = vrot.slane %v18107_v37, 7  ;;  %24162 = vst [vmem:[#allocation23_spill] sm:$0xff] %v18119_v63  ;;  %v5560_v59 = vsel %vm17974_vm0, %v15616_v33, %v5559_v30  ;;  %v5564_v1 = vrot.slane %v5562_v10, 2 }
 0x2a5   : > { %v5571_v57 = vrot.slane %v18119_v63, 7  ;;  %v18133_v6 = vrot.slane %v4832_v39, %v16806_v50  ;;  %v18137_v20 = vrot.slane %v4833_v18, %v16806_v50  ;;  %v4509_v54 = vpop.f32.mrf.mxu0 }
 0x2a6   : > { %5927 = vrot.lane.b32.xlu0 %v5541_v11, %s16459_s24  ;;  %v5563_v19 = vsel %vm17974_vm0, %v5561_v48, %v5562_v10  ;;  %v5567_v29 = vrot.slane %v5565_v3, 2  ;;  %v5566_v41 = vsel %vm17974_vm0, %v5564_v1, %v5565_v3  ;;  %v5570_v11 = vrot.slane %v5568_v8, 2 }
 0x2a7   : > { %24163 = vst [vmem:[#allocation24_spill] sm:$0xff] %v18133_v6  ;;  %24164 = vst [vmem:[#allocation25_spill] sm:$0xff] %v18137_v20  ;;  %v4850_v46 = vcombine.low %v4507_v53, %v4509_v54  ;;  %v4851_v2 = vcombine.high %v4507_v53, %v4509_v54  ;;  %v5574_v52 = vrot.slane %v18133_v6, 7  ;;  %v18161_v10 = vcombine.high %v18137_v20, %v18137_v20 }
 0x2a8   : > { %5929 = vrot.lane.b32.xlu1 %v5544_v28, %s16459_s24  ;;  %v5569_v51 = vsel %vm17974_vm0, %v5567_v29, %v5568_v8  ;;  %v5573_v28 = vrot.slane %v5571_v57, 2  ;;  %v5572_v31 = vsel %vm17974_vm0, %v5570_v11, %v5571_v57  ;;  %v5580_v25 = vrot.slane %v18137_v20, 7 }
 0x2a9   : > { %v18153_v24 = vrot.slane %v4851_v2, %v16806_v50  ;;  %v5576_v61 = vrot.slane %v5574_v52, 2  ;;  %24168 = vst [vmem:[#allocation29_spill] sm:$0xff] %v18161_v10 }
 0x2aa   : > { %5931 = vrot.lane.b32.xlu0 %v5547_v55, %s16459_s24  ;;  %v18145_v55 = vcombine.high %v18133_v6, %v18133_v6  ;;  %v5575_v30 = vsel %vm17974_vm0, %v5573_v28, %v5574_v52 }
 0x2ab   : > { %24167 = vst [vmem:[#allocation28_spill] sm:$0xff] %v18153_v24  ;;  %v5590_v8 = vrot.slane %v18153_v24, 7 }
 0x2ac   : > { %5933 = vrot.lane.b32.xlu1 %v5550_v56, %s16459_s24  ;;  %24165 = vst [vmem:[#allocation26_spill] sm:$0xff] %v18145_v55  ;;  %v18150_v56 = vrot.slane %v4850_v46, %v16806_v50  ;;  %v15630_v46 = vld [vmem:[%s23588_s2] ss:$0 sm:$0xff] }
 0x2ae   : > { %5935 = vrot.lane.b32.xlu0 %v5553_v49, %s16459_s24  ;;  %24166 = vst [vmem:[#allocation27_spill] sm:$0xff] %v18150_v56  ;;  %v5577_v49 = vrot.slane %v18145_v55, 7  ;;  %v5584_v33 = vrot.slane %v18150_v56, 7  ;;  %v4513_v39 = vpop.f32.mrf.mxu0 }
 0x2b0   : > { %5937 = vrot.lane.b32.xlu1 %v5556_v32, %s16459_s24  ;;  %v18167_v32 = vcombine.high %v18150_v56, %v18150_v56  ;;  %v5578_v48 = vsel %vm17974_vm0, %v5576_v61, %v5577_v49  ;;  %v5579_v3 = vrot.slane %v5577_v49, 2  ;;  %v5586_v29 = vrot.slane %v5584_v33, 2  ;;  %v4515_v52 = vpop.f32.mrf.mxu0 }
 0x2b1   : > { %v6809_v61 = vcombine.high %v15630_v46, %v15630_v46 }
 0x2b2   : > { %5939 = vrot.lane.b32.xlu0 %v5560_v59, %s16459_s24  ;;  %24169 = vst [vmem:[#allocation30_spill] sm:$0xff] %v18167_v32  ;;  %v18174_v59 = vcombine.high %v18153_v24, %v18153_v24  ;;  %v5587_v1 = vrot.slane %v18167_v32, 7  ;;  %v5581_v17 = vsel %vm17974_vm0, %v5579_v3, %v5580_v25 }
 0x2b4   : > { %5941 = vrot.lane.b32.xlu1 %v5563_v19, %s16459_s24  ;;  %24170 = vst [vmem:[#allocation31_spill] sm:$0xff] %v18174_v59  ;;  %v15617_v19 = vrot.slane %v18161_v10, 9  ;;  %v5593_v28 = vrot.slane %v18174_v59, 7  ;;  %v5588_v3 = vsel %vm17974_vm0, %v5586_v29, %v5587_v1 }
 0x2b6   : > { %5943 = vrot.lane.b32.xlu0 %v5566_v41, %s16459_s24  ;;  %v5585_v54 = vsel %vm17974_vm0, %v15617_v19, %v5584_v33  ;;  %v4869_v33 = vcombine.high %v4513_v39, %v4515_v52  ;;  %v18203_v19 = vrot.slane %v15630_v46, %v16806_v50  ;;  %v5595_v29 = vrot.slane %v5593_v28, 2 }
 0x2b8   : > { %5945 = vrot.lane.b32.xlu1 %v5569_v51, %s16459_s24  ;;  %v5589_v51 = vrot.slane %v5587_v1, 2 }
 0x2ba   : > { %5947 = vrot.lane.b32.xlu0 %v5572_v31, %s16459_s24  ;;  %v5592_v31 = vrot.slane %v5590_v8, 2  ;;  %v5591_v1 = vsel %vm17974_vm0, %v5589_v51, %v5590_v8 }
 0x2bc   : > { %5949 = vrot.lane.b32.xlu1 %v5575_v30, %s16459_s24  ;;  %v5594_v46 = vsel %vm17974_vm0, %v5592_v31, %v5593_v28  ;;  %v18237_v31 = vcombine.high %v18203_v19, %v18203_v19 }
 0x2be   : > { %5951 = vrot.lane.b32.xlu0 %v5578_v48, %s16459_s24  ;;  %v4868_v48 = vcombine.low %v4513_v39, %v4515_v52  ;;  %v18212_v39 = vrot.slane %v4869_v33, %v16806_v50 }
 0x2c0   : > { %5953 = vrot.lane.b32.xlu1 %v5581_v17, %s16459_s24  ;;  %v4517_v17 = vpop.f32.mrf.mxu0  ;;  %v18209_v49 = vrot.slane %v4868_v48, %v16806_v50  ;;  %24172 = vst [vmem:[#allocation33_spill] sm:$0xff] %v18212_v39  ;;  %v5602_v51 = vrot.slane %v18212_v39, 7  ;;  %v18233_v28 = vcombine.high %v18212_v39, %v18212_v39 }
 0x2c2   : > { %5955 = vrot.lane.b32.xlu0 %v5585_v54, %s16459_s24  ;;  %24171 = vst [vmem:[#allocation32_spill] sm:$0xff] %v18209_v49  ;;  %v4519_v52 = vpop.f32.mrf.mxu0  ;;  %v5596_v54 = vrot.slane %v18209_v49, 7  ;;  %v18227_v8 = vcombine.high %v18209_v49, %v18209_v49  ;;  %24174 = vst [vmem:[#allocation35_spill] sm:$0xff] %v18233_v28  ;;  %v5604_v25 = vrot.slane %v5602_v51, 2  ;;  %v5605_v41 = vrot.slane %v18233_v28, 7 }
 0x2c3   : > { %v4886_v2 = vcombine.low %v4517_v17, %v4519_v52  ;;  %v4887_v33 = vcombine.high %v4517_v17, %v4519_v52 }
 0x2c4   : > { %5957 = vrot.lane.b32.xlu1 %v5588_v3, %s16459_s24  ;;  %v18220_v3 = vrot.slane %v6809_v61, %v16806_v50  ;;  %24173 = vst [vmem:[#allocation34_spill] sm:$0xff] %v18227_v8  ;;  %v5597_v52 = vsel %vm17974_vm0, %v5595_v29, %v5596_v54  ;;  %v5599_v48 = vrot.slane %v18227_v8, 7  ;;  %v4523_v47 = vpop.f32.mrf.mxu0 }
 0x2c5   : > { %v18241_v17 = vrot.slane %v4886_v2, %v16806_v50 }
 0x2c6   : > { %5959 = vrot.lane.b32.xlu0 %v5591_v1, %s16459_s24  ;;  %v18244_v1 = vrot.slane %v4887_v33, %v16806_v50  ;;  %v18252_v30 = vcombine.high %v18220_v3, %v18220_v3  ;;  %v5601_v11 = vrot.slane %v5599_v48, 2  ;;  %v4525_v10 = vpop.f32.mrf.mxu0 }
 0x2c7   : > { %24175 = vst [vmem:[#allocation36_spill] sm:$0xff] %v18241_v17  ;;  %v18258_v33 = vcombine.high %v18241_v17, %v18241_v17  ;;  %v4904_v55 = vcombine.low %v4523_v47, %v4525_v10  ;;  %v4905_v22 = vcombine.high %v4523_v47, %v4525_v10 }
 0x2c8   : > { %5961 = vrot.lane.b32.xlu1 %v5594_v46, %s16459_s24  ;;  %24176 = vst [vmem:[#allocation37_spill] sm:$0xff] %v18244_v1  ;;  %v5598_v46 = vrot.slane %v5596_v54, 2  ;;  %v18262_v54 = vcombine.high %v18244_v1, %v18244_v1  ;;  %v5612_v61 = vrot.slane %v18244_v1, 7  ;;  %v5603_v29 = vsel %vm17974_vm0, %v5601_v11, %v5602_v51  ;;  %v4527_v56 = vpop.f32.mrf.mxu0 }
 0x2c9   : > { %24177 = vst [vmem:[#allocation38_spill] sm:$0xff] %v18258_v33  ;;  %v5609_v2 = vrot.slane %v18258_v33, 7  ;;  %v5606_v11 = vsel %vm17974_vm0, %v5604_v25, %v5605_v41  ;;  %v15618_v51 = vrot.slane %v18241_v17, 9  ;;  %v18296_v17 = vrot.slane %v4904_v55, %v16806_v50 }
 0x2ca   : > { %5963 = vrot.lane.b32.xlu0 %v5597_v52, %s16459_s24  ;;  %24178 = vst [vmem:[#allocation39_spill] sm:$0xff] %v18262_v54  ;;  %v5600_v52 = vsel %vm17974_vm0, %v5598_v46, %v5599_v48  ;;  %v5614_v46 = vrot.slane %v5612_v61, 2  ;;  %v18299_v47 = vrot.slane %v4905_v22, %v16806_v50  ;;  %v4529_v53 = vpop.f32.mrf.mxu0 }
 0x2cb   : > { %v5611_v48 = vrot.slane %v5609_v2, 2  ;;  %v5610_v18 = vsel %vm17974_vm0, %v15618_v51, %v5609_v2  ;;  %24179 = vst [vmem:[#allocation40_spill] sm:$0xff] %v18296_v17  ;;  %v4922_v41 = vcombine.low %v4527_v56, %v4529_v53  ;;  %v4923_v57 = vcombine.high %v4527_v56, %v4529_v53 }
 0x2cc   : > { %5965 = vrot.lane.b32.xlu1 %v5600_v52, %s16459_s24  ;;  %v5615_v52 = vrot.slane %v18262_v54, 7  ;;  %24180 = vst [vmem:[#allocation41_spill] sm:$0xff] %v18299_v47  ;;  %v5618_v22 = vrot.slane %v18296_v17, 7 }
 0x2cd   : > { %v5613_v2 = vsel %vm17974_vm0, %v5611_v48, %v5612_v61  ;;  %v18318_v61 = vcombine.high %v18299_v47, %v18299_v47  ;;  %v18323_v56 = vrot.slane %v4922_v41, %v16806_v50  ;;  %v18326_v53 = vrot.slane %v4923_v57, %v16806_v50 }
 0x2ce   : > { %5967 = vrot.lane.b32.xlu0 %v5603_v29, %s16459_s24  ;;  %v5617_v10 = vrot.slane %v5615_v52, 2  ;;  %v5616_v51 = vsel %vm17974_vm0, %v5614_v46, %v5615_v52  ;;  %v4533_v52 = vpop.f32.mrf.mxu0  ;;  %v5620_v55 = vrot.slane %v5618_v22, 2 }
 0x2cf   : > { %24182 = vst [vmem:[#allocation43_spill] sm:$0xff] %v18318_v61  ;;  %24183 = vst [vmem:[#allocation44_spill] sm:$0xff] %v18323_v56  ;;  %v5627_v48 = vrot.slane %v18318_v61, 7  ;;  %v5630_v57 = vrot.slane %v18323_v56, 7  ;;  %v18338_v41 = vcombine.high %v18323_v56, %v18323_v56 }
 0x2d0   : > { %5969 = vrot.lane.b32.xlu1 %v5606_v11, %s16459_s24  ;;  %v5624_v11 = vrot.slane %v18299_v47, 7  ;;  %24184 = vst [vmem:[#allocation45_spill] sm:$0xff] %v18326_v53  ;;  %v4535_v47 = vpop.f32.mrf.mxu0 }
 0x2d1   : > { %24185 = vst [vmem:[#allocation46_spill] sm:$0xff] %v18338_v41  ;;  %v5629_v1 = vrot.slane %v5627_v48, 2  ;;  %v15619_v33 = vrot.slane %v18338_v41, 9 }
 0x2d2   : > { %5971 = vrot.lane.b32.xlu0 %v5610_v18, %s16459_s24  ;;  %v18313_v18 = vcombine.high %v18296_v17, %v18296_v17  ;;  %v5626_v29 = vrot.slane %v5624_v11, 2  ;;  %v4941_v17 = vcombine.high %v4533_v52, %v4535_v47  ;;  %v4537_v54 = vpop.f32.mrf.mxu0 }
 0x2d4   : > { %5973 = vrot.lane.b32.xlu1 %v5613_v2, %s16459_s24  ;;  %24181 = vst [vmem:[#allocation42_spill] sm:$0xff] %v18313_v18  ;;  %v5619_v2 = vsel %vm17974_vm0, %v5617_v10, %v5618_v22  ;;  %v5621_v25 = vrot.slane %v18313_v18, 7  ;;  %v18343_v10 = vcombine.high %v18326_v53, %v18326_v53  ;;  %v4940_v22 = vcombine.low %v4533_v52, %v4535_v47 }
 0x2d5   : > { %v18355_v8 = vrot.slane %v4941_v17, %v16806_v50 }
 0x2d6   : > { %5975 = vrot.lane.b32.xlu0 %v5616_v51, %s16459_s24  ;;  %v5634_v51 = vrot.slane %v18326_v53, 7  ;;  %24186 = vst [vmem:[#allocation47_spill] sm:$0xff] %v18343_v10  ;;  %v5622_v46 = vsel %vm17974_vm0, %v5620_v55, %v5621_v25  ;;  %v5623_v18 = vrot.slane %v5621_v25, 2  ;;  %v18352_v39 = vrot.slane %v4940_v22, %v16806_v50  ;;  %v4539_v55 = vpop.f32.mrf.mxu0 }
 0x2d7   : > { %24188 = vst [vmem:[#allocation49_spill] sm:$0xff] %v18355_v8  ;;  %v5637_v25 = vrot.slane %v18343_v10, 7  ;;  %v4958_v17 = vcombine.low %v4537_v54, %v4539_v55  ;;  %v4959_v22 = vcombine.high %v4537_v54, %v4539_v55 }
 0x2d8   : > { %5977 = vrot.lane.b32.xlu1 %v5619_v2, %s16459_s24  ;;  %v5628_v2 = vsel %vm17974_vm0, %v5626_v29, %v5627_v48  ;;  %v5636_v28 = vrot.slane %v5634_v51, 2  ;;  %24187 = vst [vmem:[#allocation48_spill] sm:$0xff] %v18352_v39  ;;  %v5625_v47 = vsel %vm17974_vm0, %v5623_v18, %v5624_v11  ;;  %v5631_v29 = vsel %vm17974_vm0, %v5629_v1, %v5630_v57  ;;  %v4543_v41 = vpop.f32.mrf.mxu0 }
 0x2d9   : > { %v5635_v48 = vsel %vm17974_vm0, %v15619_v33, %v5634_v51  ;;  %v5639_v18 = vrot.slane %v5637_v25, 2  ;;  %v18373_v1 = vcombine.high %v18352_v39, %v18352_v39  ;;  %v5646_v33 = vrot.slane %v18355_v8, 7 }
 0x2da   : > { %5979 = vrot.lane.b32.xlu0 %v5622_v46, %s16459_s24  ;;  %v5638_v11 = vsel %vm17974_vm0, %v5636_v28, %v5637_v25  ;;  %v18378_v57 = vcombine.high %v18355_v8, %v18355_v8  ;;  %v18381_v54 = vrot.slane %v4958_v17, %v16806_v50  ;;  %v18384_v28 = vrot.slane %v4959_v22, %v16806_v50  ;;  %v4545_v25 = vpop.f32.mrf.mxu0 }
 0x2db   : > { %24189 = vst [vmem:[#allocation50_spill] sm:$0xff] %v18373_v1  ;;  %v5643_v46 = vrot.slane %v18373_v1, 7  ;;  %v5648_v8 = vrot.slane %v5646_v33, 2  ;;  %v4976_v22 = vcombine.low %v4543_v41, %v4545_v25 }
 0x2dc   : > { %5981 = vrot.lane.b32.xlu1 %v5625_v47, %s16459_s24  ;;  %v5640_v47 = vrot.slane %v18352_v39, 7  ;;  %24190 = vst [vmem:[#allocation51_spill] sm:$0xff] %v18378_v57  ;;  %24191 = vst [vmem:[#allocation52_spill] sm:$0xff] %v18381_v54  ;;  %v18394_v17 = vcombine.high %v18384_v28, %v18384_v28  ;;  %v4977_v39 = vcombine.high %v4543_v41, %v4545_v25  ;;  %v5649_v51 = vrot.slane %v18378_v57, 7  ;;  %v4547_v53 = vpop.f32.mrf.mxu0 }
 0x2dd   : > { %24192 = vst [vmem:[#allocation53_spill] sm:$0xff] %v18384_v28  ;;  %v18406_v1 = vrot.slane %v4976_v22, %v16806_v50  ;;  %v15620_v10 = vrot.slane %v18384_v28, 9 }
 0x2de   : > { %5983 = vrot.lane.b32.xlu0 %v5628_v2, %s16459_s24  ;;  %v5641_v55 = vsel %vm17974_vm0, %v5639_v18, %v5640_v47  ;;  %v5642_v52 = vrot.slane %v5640_v47, 2  ;;  %24193 = vst [vmem:[#allocation54_spill] sm:$0xff] %v18394_v17  ;;  %v5645_v2 = vrot.slane %v5643_v46, 2  ;;  %v5652_v18 = vrot.slane %v18381_v54, 7  ;;  %v4549_v57 = vpop.f32.mrf.mxu0 }
 0x2df   : > { %v18403_v47 = vcombine.high %v18381_v54, %v18381_v54  ;;  %24195 = vst [vmem:[#allocation56_spill] sm:$0xff] %v18406_v1  ;;  %v18409_v41 = vrot.slane %v4977_v39, %v16806_v50  ;;  %v5650_v25 = vsel %vm17974_vm0, %v5648_v8, %v5649_v51  ;;  %v4994_v22 = vcombine.low %v4547_v53, %v4549_v57 }
 0x2e0   : > { %5985 = vrot.lane.b32.xlu1 %v5631_v29, %s16459_s24  ;;  %v5644_v29 = vsel %vm17974_vm0, %v5642_v52, %v5643_v46  ;;  %v5647_v46 = vsel %vm17974_vm0, %v5645_v2, %v5646_v33  ;;  %v5654_v52 = vrot.slane %v5652_v18, 2  ;;  %v4995_v56 = vcombine.high %v4547_v53, %v4549_v57  ;;  %v4553_v8 = vpop.f32.mrf.mxu0 }
 0x2e1   : > { %24194 = vst [vmem:[#allocation55_spill] sm:$0xff] %v18403_v47  ;;  %24196 = vst [vmem:[#allocation57_spill] sm:$0xff] %v18409_v41  ;;  %v5655_v54 = vrot.slane %v18403_v47, 7  ;;  %v5659_v61 = vrot.slane %v18394_v17, 7  ;;  %v5662_v33 = vrot.slane %v18406_v1, 7  ;;  %v5668_v2 = vrot.slane %v18409_v41, 7 }
 0x2e2   : > { %5987 = vrot.lane.b32.xlu0 %v5635_v48, %s16459_s24  ;;  %v5651_v48 = vrot.slane %v5649_v51, 2  ;;  %v18427_v51 = vcombine.high %v18406_v1, %v18406_v1  ;;  %v18431_v53 = vrot.slane %v4994_v22, %v16806_v50  ;;  %v18434_v57 = vrot.slane %v4995_v56, %v16806_v50 }
 0x2e3   : > { %v18442_v1 = vcombine.high %v18409_v41, %v18409_v41  ;;  %v5670_v28 = vrot.slane %v5668_v2, 2 }
 0x2e4   : > { %5989 = vrot.lane.b32.xlu1 %v5638_v11, %s16459_s24  ;;  %v5653_v39 = vsel %vm17974_vm0, %v5651_v48, %v5652_v18  ;;  %v5656_v11 = vsel %vm17974_vm0, %v5654_v52, %v5655_v54  ;;  %24197 = vst [vmem:[#allocation58_spill] sm:$0xff] %v18427_v51  ;;  %24198 = vst [vmem:[#allocation59_spill] sm:$0xff] %v18431_v53  ;;  %v5661_v18 = vrot.slane %v5659_v61, 2  ;;  %v4555_v48 = vpop.f32.mrf.mxu0  ;;  %v5664_v54 = vrot.slane %v5662_v33, 2 }
 0x2e5   : > { %24199 = vst [vmem:[#allocation60_spill] sm:$0xff] %v18434_v57  ;;  %v5665_v52 = vrot.slane %v18427_v51, 7  ;;  %24200 = vst [vmem:[#allocation61_spill] sm:$0xff] %v18442_v1  ;;  %v5012_v22 = vcombine.low %v4553_v8, %v4555_v48  ;;  %v5013_v17 = vcombine.high %v4553_v8, %v4555_v48  ;;  %v5674_v47 = vrot.slane %v18431_v53, 7 }
 0x2e6   : > { %5991 = vrot.lane.b32.xlu0 %v5641_v55, %s16459_s24  ;;  %v5660_v55 = vsel %vm17974_vm0, %v15620_v10, %v5659_v61  ;;  %v5663_v56 = vsel %vm17974_vm0, %v5661_v18, %v5662_v33  ;;  %v4557_v10 = vpop.f32.mrf.mxu0  ;;  %v5671_v51 = vrot.slane %v18442_v1, 7  ;;  %v18453_v41 = vcombine.high %v18431_v53, %v18431_v53 }
 0x2e7   : > { %v5666_v61 = vsel %vm17974_vm0, %v5664_v54, %v5665_v52  ;;  %v18456_v8 = vrot.slane %v5012_v22, %v16806_v50  ;;  %v18459_v33 = vrot.slane %v5013_v17, %v16806_v50  ;;  %v5676_v18 = vrot.slane %v5674_v47, 2 }
 0x2e8   : > { %5993 = vrot.lane.b32.xlu1 %v5644_v29, %s16459_s24  ;;  %v5667_v29 = vrot.slane %v5665_v52, 2  ;;  %24201 = vst [vmem:[#allocation62_spill] sm:$0xff] %v18453_v41  ;;  %v5680_v48 = vrot.slane %v18434_v57, 7  ;;  %v18467_v52 = vsel %vm17974_vm0, %v5670_v28, %v5671_v51  ;;  %v5673_v53 = vrot.slane %v5671_v51, 2 }
 0x2e9   : > { %24202 = vst [vmem:[#allocation63_spill] sm:$0xff] %v18456_v8  ;;  %24203 = vst [vmem:[#allocation64_spill] sm:$0xff] %v18459_v33  ;;  %v5677_v22 = vrot.slane %v18453_v41, 7  ;;  %v18472_v17 = vcombine.high %v18459_v33, %v18459_v33  ;;  %v18476_v59 = vcombine.high %v18434_v57, %v18434_v57 }
 0x2ea   : > { %5995 = vrot.lane.b32.xlu0 %v5647_v46, %s16459_s24  ;;  %v4559_v46 = vpop.f32.mrf.mxu0  ;;  %v5669_v54 = vsel %vm17974_vm0, %v5667_v29, %v5668_v2  ;;  %v18481_v28 = vsel %vm17974_vm0, %v5673_v53, %v5674_v47  ;;  %v5684_v29 = vrot.slane %v18456_v8, 7 }
 0x2eb   : > { %24204 = vst [vmem:[#allocation65_spill] sm:$0xff] %v18472_v17  ;;  %v5030_v1 = vcombine.low %v4557_v10, %v4559_v46  ;;  %v5031_v49 = vcombine.high %v4557_v10, %v4559_v46  ;;  %24205 = vst [vmem:[#allocation66_spill] sm:$0xff] %v18476_v59  ;;  %v18485_v51 = vsel %vm17974_vm0, %v5676_v18, %v5677_v22  ;;  %v5679_v2 = vrot.slane %v5677_v22, 2 }
 0x2ec   : > { %5997 = vrot.lane.b32.xlu1 %v5650_v25, %s16459_s24  ;;  %v4563_v25 = vpop.f32.mrf.mxu0  ;;  %v15621_v57 = vrot.slane %v18476_v59, 9  ;;  %v5686_v18 = vrot.slane %v5684_v29, 2  ;;  %v5693_v22 = vrot.slane %v18472_v17, 7 }
 0x2ed   : > { %v18489_v10 = vrot.slane %v5030_v1, %v16806_v50  ;;  %v18492_v46 = vrot.slane %v5031_v49, %v16806_v50  ;;  %v18502_v53 = vsel %vm17974_vm0, %v5679_v2, %v5680_v48  ;;  %v5690_v1 = vrot.slane %v18459_v33, 7 }
 0x2ee   : > { %5999 = vrot.lane.b32.xlu0 %v5653_v39, %s16459_s24  ;;  %v18497_v39 = vcombine.high %v18456_v8, %v18456_v8  ;;  %v4565_v47 = vpop.f32.mrf.mxu0  ;;  %v18512_v8 = vsel %vm17974_vm0, %v15621_v57, %v5684_v29  ;;  %v5695_v24 = vrot.slane %v5693_v22, 2 }
 0x2ef   : > { %24206 = vst [vmem:[#allocation67_spill] sm:$0xff] %v18489_v10  ;;  %24207 = vst [vmem:[#allocation68_spill] sm:$0xff] %v18492_v46  ;;  %v18508_v49 = vcombine.high %v18489_v10, %v18489_v10  ;;  %v5048_v59 = vcombine.low %v4563_v25, %v4565_v47  ;;  %v5049_v41 = vcombine.high %v4563_v25, %v4565_v47  ;;  %v5692_v2 = vrot.slane %v5690_v1, 2 }
 0x2f0   : > { %24208 = vst [vmem:[#allocation69_spill] sm:$0xff] %v18497_v39  ;;  %6001 = vrot.lane.b32.xlu1 %v5656_v11, %s16459_s24  ;;  %v4567_v11 = vpop.f32.mrf.mxu0  ;;  %v5687_v48 = vrot.slane %v18497_v39, 7  ;;  %v5696_v33 = vrot.slane %v18489_v10, 7  ;;  %v5702_v57 = vrot.slane %v18492_v46, 7 }
 0x2f1   : > { %24209 = vst [vmem:[#allocation70_spill] sm:$0xff] %v18508_v49  ;;  %v18518_v17 = vrot.slane %v5048_v59, %v16806_v50  ;;  %v18521_v32 = vrot.slane %v5049_v41, %v16806_v50  ;;  %v5699_v25 = vrot.slane %v18508_v49, 7  ;;  %v18532_v10 = vsel %vm17974_vm0, %v5692_v2, %v5693_v22 }
 0x2f2   : > { %6003 = vrot.lane.b32.xlu0 %v5660_v55, %s16459_s24  ;;  %v4569_v29 = vpop.f32.mrf.mxu0  ;;  %v18528_v55 = vsel %vm17974_vm0, %v5686_v18, %v5687_v48  ;;  %v5689_v47 = vrot.slane %v5687_v48, 2  ;;  %v18536_v59 = vsel %vm17974_vm0, %v5695_v24, %v5696_v33  ;;  %v5698_v48 = vrot.slane %v5696_v33, 2 }
 0x2f3   : > { %24210 = vst [vmem:[#allocation71_spill] sm:$0xff] %v18518_v17  ;;  %24211 = vst [vmem:[#allocation72_spill] sm:$0xff] %v18521_v32  ;;  %v18540_v41 = vcombine.high %v18518_v17, %v18518_v17  ;;  %v5066_v49 = vcombine.low %v4567_v11, %v4569_v29  ;;  %v5067_v18 = vcombine.high %v4567_v11, %v4569_v29  ;;  %v5701_v24 = vrot.slane %v5699_v25, 2 }
 0x2f4   : > { %6005 = vrot.lane.b32.xlu1 %v5663_v56, %s16459_s24  ;;  %v18544_v56 = vcombine.high %v18521_v32, %v18521_v32  ;;  %v4573_v39 = vpop.f32.mrf.mxu0  ;;  %v18549_v22 = vsel %vm17974_vm0, %v5689_v47, %v5690_v1  ;;  %v18553_v2 = vcombine.high %v18492_v46, %v18492_v46  ;;  %v5704_v11 = vrot.slane %v5702_v57, 2 }
 0x2f5   : > { %24212 = vst [vmem:[#allocation73_spill] sm:$0xff] %v18540_v41  ;;  %v18556_v20 = vrot.slane %v5066_v49, %v16806_v50  ;;  %v18559_v6 = vrot.slane %v5067_v18, %v16806_v50  ;;  %v15622_v29 = vrot.slane %v18518_v17, 9  ;;  %v18565_v33 = vsel %vm17974_vm0, %v5698_v48, %v5699_v25 }
 0x2f6   : > { %24213 = vst [vmem:[#allocation74_spill] sm:$0xff] %v18544_v56  ;;  %6007 = vrot.lane.b32.xlu0 %v5666_v61, %s16459_s24  ;;  %24214 = vst [vmem:[#allocation75_spill] sm:$0xff] %v18553_v2  ;;  %v4575_v61 = vpop.f32.mrf.mxu0  ;;  %v18569_v1 = vsel %vm17974_vm0, %v5701_v24, %v5702_v57  ;;  %v5705_v49 = vrot.slane %v18553_v2, 7  ;;  %v5709_v47 = vrot.slane %v18540_v41, 7  ;;  %v5712_v41 = vrot.slane %v18521_v32, 7 }
 0x2f7   : > { %24215 = vst [vmem:[#allocation76_spill] sm:$0xff] %v18556_v20  ;;  %24216 = vst [vmem:[#allocation77_spill] sm:$0xff] %v18559_v6  ;;  %v18575_v18 = vcombine.high %v18556_v20, %v18556_v20  ;;  %v18579_v17 = vcombine.high %v18559_v6, %v18559_v6  ;;  %v5085_v46 = vcombine.high %v4573_v39, %v4575_v61 }
 0x2f8   : > { %6009 = vrot.lane.b32.xlu1 %v5669_v54, %s16459_s24  ;;  %v5084_v54 = vcombine.low %v4573_v39, %v4575_v61  ;;  %v4577_v25 = vpop.f32.mrf.mxu0  ;;  %v18585_v57 = vsel %vm17974_vm0, %v5704_v11, %v5705_v49  ;;  %v18589_v48 = vsel %vm17974_vm0, %v15622_v29, %v5709_v47  ;;  %v5711_v24 = vrot.slane %v5709_v47, 2 }
 0x2f9   : > { %24217 = vst [vmem:[#allocation78_spill] sm:$0xff] %v18575_v18  ;;  %24218 = vst [vmem:[#allocation79_spill] sm:$0xff] %v18579_v17  ;;  %v18596_v39 = vrot.slane %v5085_v46, %v16806_v50  ;;  %v5715_v61 = vrot.slane %v18544_v56, 7  ;;  %v5714_v29 = vrot.slane %v5712_v41, 2  ;;  %v5721_v49 = vrot.slane %v18575_v18, 7 }
 0x2fa   : > { %6011 = vrot.lane.b32.xlu0 %v18467_v52, %s16459_s24  ;;  %v18593_v2 = vrot.slane %v5084_v54, %v16806_v50  ;;  %v5718_v52 = vrot.slane %v18556_v20, 7  ;;  %v4579_v63 = vpop.f32.mrf.mxu0  ;;  %v18604_v11 = vsel %vm17974_vm0, %v5711_v24, %v5712_v41  ;;  %v5724_v47 = vrot.slane %v18559_v6, 7 }
 0x2fb   : > { %24220 = vst [vmem:[#allocation81_spill] sm:$0xff] %v18596_v39  ;;  %v18614_v54 = vcombine.high %v18596_v39, %v18596_v39  ;;  %v5102_v20 = vcombine.low %v4577_v25, %v4579_v63  ;;  %v5103_v56 = vcombine.high %v4577_v25, %v4579_v63  ;;  %v18620_v41 = vsel %vm17974_vm0, %v5714_v29, %v5715_v61 }
 0x2fc   : > { %24219 = vst [vmem:[#allocation80_spill] sm:$0xff] %v18593_v2  ;;  %6013 = vrot.lane.b32.xlu1 %v18481_v28, %s16459_s24  ;;  %v18610_v46 = vcombine.high %v18593_v2, %v18593_v2  ;;  %v4583_v28 = vpop.f32.mrf.mxu0  ;;  %v5717_v24 = vrot.slane %v5715_v61, 2  ;;  %v5720_v6 = vrot.slane %v5718_v52, 2  ;;  %v5723_v18 = vrot.slane %v5721_v49, 2 }
 0x2fd   : > { %24222 = vst [vmem:[#allocation83_spill] sm:$0xff] %v18614_v54  ;;  %v18623_v32 = vrot.slane %v5102_v20, %v16806_v50  ;;  %v18626_v5 = vrot.slane %v5103_v56, %v16806_v50  ;;  %v5726_v37 = vrot.slane %v5724_v47, 2  ;;  %v5727_v63 = vrot.slane %v18579_v17, 7 }
 0x2fe   : > { %24221 = vst [vmem:[#allocation82_spill] sm:$0xff] %v18610_v46  ;;  %6015 = vrot.lane.b32.xlu0 %v18485_v51, %s16459_s24  ;;  %v4585_v25 = vpop.f32.mrf.mxu0  ;;  %v18633_v51 = vsel %vm17974_vm0, %v5717_v24, %v5718_v52  ;;  %v18637_v61 = vsel %vm17974_vm0, %v5720_v6, %v5721_v49  ;;  %v18641_v20 = vsel %vm17974_vm0, %v5723_v18, %v5724_v47  ;;  %v5730_v56 = vrot.slane %v18593_v2, 7 }
 0x2ff   : > { %24223 = vst [vmem:[#allocation84_spill] sm:$0xff] %v18623_v32  ;;  %24224 = vst [vmem:[#allocation85_spill] sm:$0xff] %v18626_v5  ;;  %v18646_v29 = vcombine.high %v18623_v32, %v18623_v32  ;;  %v5120_v52 = vcombine.low %v4583_v28, %v4585_v25  ;;  %v5121_v24 = vcombine.high %v4583_v28, %v4585_v25  ;;  %v5729_v18 = vrot.slane %v5727_v63, 2 }
 0x300   : > { %6017 = vrot.lane.b32.xlu1 %v18502_v53, %s16459_s24  ;;  %v18650_v53 = vcombine.high %v18626_v5, %v18626_v5  ;;  %v4587_v17 = vpop.f32.mrf.mxu0  ;;  %v18656_v6 = vsel %vm17974_vm0, %v5726_v37, %v5727_v63  ;;  %v15623_v49 = vrot.slane %v18610_v46, 9  ;;  %v5734_v47 = vrot.slane %v18596_v39, 7 }
 0x301   : > { %24225 = vst [vmem:[#allocation86_spill] sm:$0xff] %v18646_v29  ;;  %v18661_v2 = vrot.slane %v5120_v52, %v16806_v50  ;;  %v5737_v25 = vrot.slane %v18614_v54, 7  ;;  %v18673_v63 = vsel %vm17974_vm0, %v5729_v18, %v5730_v56 }
 0x302   : > { %24226 = vst [vmem:[#allocation87_spill] sm:$0xff] %v18650_v53  ;;  %6019 = vrot.lane.b32.xlu0 %v18512_v8, %s16459_s24  ;;  %v18664_v53 = vrot.slane %v5121_v24, %v16806_v50  ;;  %v5740_v8 = vrot.slane %v18623_v32, 7  ;;  %v4589_v38 = vpop.f32.mrf.mxu0  ;;  %v18677_v52 = vsel %vm17974_vm0, %v15623_v49, %v5734_v47  ;;  %v5736_v24 = vrot.slane %v5734_v47, 2 }
 0x303   : > { %24227 = vst [vmem:[#allocation88_spill] sm:$0xff] %v18661_v2  ;;  %v5138_v32 = vcombine.low %v4587_v17, %v4589_v38  ;;  %v5139_v46 = vcombine.high %v4587_v17, %v4589_v38 }
 0x304   : > { %24228 = vst [vmem:[#allocation89_spill] sm:$0xff] %v18664_v53  ;;  %v5908_v28 = vpop.permute.xlu0 %5907  ;;  %6021 = vrot.lane.b32.xlu1 %v18528_v55, %s16459_s24  ;;  %v18681_v54 = vcombine.high %v18664_v53, %v18664_v53  ;;  %v24230_v55 = vrot.slane %v17972_v7, 2  ;;  %v18690_v18 = vsel %vm17974_vm0, %v5736_v24, %v5737_v25  ;;  %v5742_v49 = vrot.slane %v5740_v8, 2 }
 0x305   : > { %v6291_v37 = vadd.f32 %v5908_v28, %v17965_v36  ;;  %v5739_v36 = vrot.slane %v5737_v25, 2  ;;  %v4593_v28 = vpop.f32.mrf.mxu0  ;;  %v18693_v47 = vrot.slane %v5138_v32, %v16806_v50  ;;  %v18696_v38 = vrot.slane %v5139_v46, %v16806_v50 }
 0x306   : > { %24229 = vst [vmem:[#allocation90_spill] sm:$0xff] %v18681_v54  ;;  %v5910_v39 = vpop.permute.xlu1 %5909  ;;  %6023 = vrot.lane.b32.xlu0 %v18549_v22, %s16459_s24  ;;  %v24233_v25 = vrot.slane %v17968_v44, 2  ;;  %v5746_v32 = vrot.slane %v18626_v5, 7 }
 0x307   : > { %v6675_v2 = vadd.f32 %v24230_v55, %v6291_v37  ;;  %v6292_v56 = vadd.f32 %v5910_v39, %v17972_v7  ;;  %24231 = vst [vmem:[#allocation91_spill] sm:$0xff] %v18693_v47  ;;  %24232 = vst [vmem:[#allocation92_spill] sm:$0xff] %v18696_v38  ;;  %v18700_v37 = vsel %vm17974_vm0, %v5739_v36, %v5740_v8  ;;  %v5743_v7 = vrot.slane %v18646_v29, 7  ;;  %v4595_v39 = vpop.f32.mrf.mxu0 }
 0x308   : > { %v5912_v17 = vpop.permute.xlu0 %5911  ;;  %6025 = vrot.lane.b32.xlu1 %v18532_v10, %s16459_s24  ;;  %v18712_v46 = vcombine.high %v18693_v47, %v18693_v47  ;;  %v18716_v8 = vcombine.high %v18696_v38, %v18696_v38  ;;  %v5156_v36 = vcombine.low %v4593_v28, %v4595_v39 }
 0x309   : > { %v6830_v22 = vadd.f32 %v18203_v19, %v6675_v2  ;;  %v6676_v24 = vadd.f32 %v24233_v25, %v6292_v56  ;;  %v6293_v55 = vadd.f32 %v5912_v17, %v17968_v44  ;;  %v5157_v2 = vcombine.high %v4593_v28, %v4595_v39  ;;  %v4597_v54 = vpop.f32.mrf.mxu0 }
 0x30a   : > { %24234 = vst [vmem:[#allocation93_spill] sm:$0xff] %v18712_v46  ;;  %24235 = vst [vmem:[#allocation94_spill] sm:$0xff] %v18716_v8  ;;  %v5914_v29 = vpop.permute.xlu1 %5913  ;;  %v24236_v17 = vrot.slane %v17981_v16, 2  ;;  %6027 = vrot.lane.b32.xlu0 %v18536_v59, %s16459_s24  ;;  %v18725_v5 = vrot.slane %v5156_v36, %v16806_v50  ;;  %v18732_v39 = vsel %vm17974_vm0, %v5742_v49, %v5743_v7 }
 0x30b   : > { %v6958_v56 = vmax.f32 %v6830_v22, 0.0  ;;  %v6831_v44 = vadd.f32 %v18237_v31, %v6676_v24  ;;  %v6294_v25 = vadd.f32 %v5914_v29, %v17981_v16  ;;  %v18728_v8 = vrot.slane %v5157_v2, %v16806_v50  ;;  %v4599_v24 = vpop.f32.mrf.mxu0 }
 0x30c   : > { %v6677_v10 = vadd.f32 %v24236_v17, %v6293_v55  ;;  %v5916_v28 = vpop.permute.xlu0 %5915  ;;  %v5745_v22 = vrot.slane %v5743_v7, 2  ;;  %v24237_v16 = vrot.slane %v17984_v0, 2  ;;  %6029 = vrot.lane.b32.xlu1 %v18565_v33, %s16459_s24  ;;  %v18742_v36 = vcombine.high %v18725_v5, %v18725_v5 }
 0x30d   : > { %v6959_v38 = vmax.f32 %v6831_v44, 0.0  ;;  %v6295_v59 = vadd.f32 %v5916_v28, %v17984_v0  ;;  %v18746_v49 = vcombine.high %v18728_v8, %v18728_v8  ;;  %v5174_v7 = vcombine.low %v4597_v54, %v4599_v24  ;;  %v4603_v17 = vpop.f32.mrf.mxu0 }
 0x30e   : > { %v6832_v55 = vadd.f32 %v18220_v3, %v6677_v10  ;;  %v6678_v29 = vadd.f32 %v24237_v16, %v6294_v25  ;;  %v5175_v2 = vcombine.high %v4597_v54, %v4599_v24  ;;  %v5918_v44 = vpop.permute.xlu1 %5917  ;;  %v24239_v0 = vrot.slane %v17997_v23, 2  ;;  %6031 = vrot.lane.b32.xlu0 %v18569_v1, %s16459_s24 }
 0x30f   : > { %24238 = vst [vmem:[#allocation95_spill] sm:$0xff] %v18746_v49  ;;  %v7214_v10 = vcombine.low %v6958_v56, %v6959_v38  ;;  %v18754_v33 = vrot.slane %v5174_v7, %v16806_v50  ;;  %v6296_v54 = vadd.f32 %v5918_v44, %v17997_v23  ;;  %v18762_v38 = vsel %vm17974_vm0, %v5745_v22, %v5746_v32  ;;  %v4605_v56 = vpop.f32.mrf.mxu0 }
 0x310   : > { %v6960_v46 = vmax.f32 %v6832_v55, 0.0  ;;  %v6833_v25 = vadd.f32 %v18252_v30, %v6678_v29  ;;  %v6679_v28 = vadd.f32 %v24239_v0, %v6295_v59  ;;  %v18757_v16 = vrot.slane %v5175_v2, %v16806_v50  ;;  %v5920_v24 = vpop.permute.xlu0 %5919  ;;  %6033 = vrot.lane.b32.xlu1 %v18585_v57, %s16459_s24 }
 0x311   : > { %24240 = vst [vmem:[#allocation96_spill] sm:$0xff] %v18754_v33  ;;  %v7222_v55 = vrot.slane %v7214_v10, %v16806_v50  ;;  %v6297_v1 = vadd.f32 %v5920_v24, %v17987_v14  ;;  %v18771_v7 = vcombine.high %v18754_v33, %v18754_v33  ;;  %v5192_v22 = vcombine.low %v4603_v17, %v4605_v56  ;;  %v4607_v10 = vpop.f32.mrf.mxu0 }
 0x312   : > { %24241 = vst [vmem:[#allocation97_spill] sm:$0xff] %v18757_v16  ;;  %v6961_v29 = vmax.f32 %v6833_v25, 0.0  ;;  %v6834_v59 = vadd.f32 %v18203_v19, %v6679_v28  ;;  %v18775_v23 = vcombine.high %v18757_v16, %v18757_v16  ;;  %v5193_v2 = vcombine.high %v4603_v17, %v4605_v56  ;;  %v5922_v44 = vpop.permute.xlu1 %5921  ;;  %6035 = vrot.lane.b32.xlu0 %v18589_v48, %s16459_s24 }
 0x313   : > { %24242 = vst [vmem:[#allocation98_spill] sm:$0xff] %v18771_v7  ;;  %v24244_v28 = vrot.slane %v17987_v14, 2  ;;  %v24245_v49 = vrot.slane %v18005_v40, 2  ;;  %v18784_v7 = vrot.slane %v5192_v22, %v16806_v50  ;;  %v6298_v17 = vadd.f32 %v5922_v44, %v18005_v40 }
 0x314   : > { %24243 = vst [vmem:[#allocation99_spill] sm:$0xff] %v18775_v23  ;;  %v7215_v25 = vcombine.low %v6960_v46, %v6961_v29  ;;  %v6962_v0 = vmax.f32 %v6834_v59, 0.0  ;;  %v18787_v23 = vrot.slane %v5193_v2, %v16806_v50  ;;  %v5924_v56 = vpop.permute.xlu0 %5923  ;;  %v18790_v46 = vrot.slane %v5746_v32, 2  ;;  %v4609_v29 = vpop.f32.mrf.mxu0  ;;  %6037 = vrot.lane.b32.xlu1 %v18604_v11, %s16459_s24 }
 0x315   : > { %v6680_v24 = vadd.f32 %v24244_v28, %v6296_v54  ;;  %v6681_v57 = vadd.f32 %v24245_v49, %v6297_v1  ;;  %24246 = vst [vmem:[#allocation100_spill] sm:$0xff] %v18784_v7  ;;  %v6299_v48 = vadd.f32 %v5924_v56, %v18026_v9  ;;  %v18800_v59 = vcombine.high %v18784_v7, %v18784_v7 }
 0x316   : > { %24247 = vst [vmem:[#allocation101_spill] sm:$0xff] %v18787_v23  ;;  %v7229_v14 = vrot.slane %v7215_v25, %v16806_v50  ;;  %v5210_v40 = vcombine.low %v4607_v10, %v4609_v29  ;;  %v5211_v1 = vcombine.high %v4607_v10, %v4609_v29  ;;  %v24249_v32 = vrot.slane %v18012_v21, 2  ;;  %v5926_v2 = vpop.permute.xlu1 %5925  ;;  %v4613_v44 = vpop.f32.mrf.mxu0  ;;  %6039 = vrot.lane.b32.xlu0 %v18620_v41, %s16459_s24 }
 0x317   : > { %v6835_v54 = vadd.f32 %v18237_v31, %v6680_v24  ;;  %v6836_v49 = vadd.f32 %v18220_v3, %v6681_v57  ;;  %24248 = vst [vmem:[#allocation102_spill] sm:$0xff] %v18800_v59  ;;  %v24250_v57 = vrot.slane %v18015_v13, 2  ;;  %v6300_v10 = vadd.f32 %v5926_v2, %v18015_v13 }
 0x318   : > { %v6682_v22 = vadd.f32 %v24249_v32, %v6298_v17  ;;  %v7230_v25 = vcombine.low %v7222_v55, %v7229_v14  ;;  %v18809_v11 = vrot.slane %v5210_v40, %v16806_v50  ;;  %v18812_v56 = vrot.slane %v5211_v1, %v16806_v50  ;;  %v5928_v17 = vpop.permute.xlu0 %5927  ;;  %v4615_v55 = vpop.f32.mrf.mxu0  ;;  %6041 = vrot.lane.b32.xlu1 %v18633_v51, %s16459_s24 }
 0x319   : > { %v6963_v28 = vmax.f32 %v6835_v54, 0.0  ;;  %v6964_v24 = vmax.f32 %v6836_v49, 0.0  ;;  %v6683_v9 = vadd.f32 %v24250_v57, %v6299_v48  ;;  %v6301_v49 = vadd.f32 %v5928_v17, %v18030_v58 }
 0x31a   : > { %24251 = vst [vmem:[#allocation103_spill] sm:$0xff] %v18809_v11  ;;  %v6837_v21 = vadd.f32 %v18252_v30, %v6682_v22  ;;  %v15903_v29 = vpack.c.bf16 %v7230_v25, %v7230_v25  ;;  %v18822_v41 = vcombine.high %v18809_v11, %v18809_v11  ;;  %v18826_v48 = vcombine.high %v18812_v56, %v18812_v56  ;;  %v5930_v1 = vpop.permute.xlu1 %5929  ;;  %v4617_v32 = vpop.f32.mrf.mxu0 }
 0x31b   : > { %v7231_v14 = vcombine.low %v6962_v0, %v6963_v28  ;;  %v6838_v54 = vadd.f32 %v18203_v19, %v6683_v9  ;;  %v5228_v13 = vcombine.low %v4613_v44, %v4615_v55  ;;  %v5229_v40 = vcombine.high %v4613_v44, %v4615_v55  ;;  %6043 = vrot.lane.b32.xlu0 %v18637_v61, %s16459_s24 }
 0x31c   : > { %24252 = vst [vmem:[#allocation104_spill] sm:$0xff] %v18826_v48  ;;  %v7887_v0 = vshrl.u32 %v15903_v29, 16  ;;  %v7890_v22 = vshll.u32 %v15903_v29, 16  ;;  %v6965_v25 = vmax.f32 %v6837_v21, 0.0  ;;  %v24255_v9 = vrot.slane %v18030_v58, 2  ;;  %v5932_v17 = vpop.permute.xlu0 %5931  ;;  %v4619_v55 = vpop.f32.mrf.mxu0  ;;  %6045 = vrot.lane.b32.xlu1 %v18641_v20, %s16459_s24 }
 0x31d   : > { %v7239_v2 = vrot.slane %v7231_v14, %v16806_v50  ;;  %v18832_v51 = vrot.slane %v5228_v13, %v16806_v50  ;;  %v18835_v28 = vrot.slane %v5229_v40, %v16806_v50  ;;  %v6966_v57 = vmax.f32 %v6838_v54, 0.0 }
 0x31e   : > { %v6684_v44 = vadd.f32 %v24255_v9, %v6300_v10  ;;  %v18839_v48 = vrot.slane %v7887_v0, 7  ;;  %v7232_v29 = vcombine.low %v6964_v24, %v6965_v25  ;;  %v24256_v21 = vrot.slane %v18033_v45, 2  ;;  %v5934_v40 = vpop.permute.xlu1 %5933  ;;  %v4623_v24 = vpop.f32.mrf.mxu0 }
 0x31f   : > { %24253 = vst [vmem:[#allocation105_spill] sm:$0xff] %v18832_v51  ;;  %24254 = vst [vmem:[#allocation106_spill] sm:$0xff] %v18835_v28  ;;  %v6302_v61 = vadd.f32 %v5930_v1, %v18033_v45  ;;  %v18848_v13 = vcombine.high %v18832_v51, %v18832_v51  ;;  %v18852_v58 = vcombine.high %v18835_v28, %v18835_v28  ;;  %6047 = vrot.lane.b32.xlu0 %v18656_v6, %s16459_s24 }
 0x320   : > { %v6685_v14 = vadd.f32 %v24256_v21, %v6301_v49  ;;  %v5246_v10 = vcombine.low %v4617_v32, %v4619_v55  ;;  %v5247_v54 = vcombine.high %v4617_v32, %v4619_v55  ;;  %v7892_v0 = vor.u32 %v7890_v22, %v18839_v48  ;;  %v8206_v32 = vld [vmem:[#allocation2 + $0xc] sm:$0xf]  ;;  %v5936_v21 = vpop.permute.xlu0 %5935  ;;  %v4625_v49 = vpop.f32.mrf.mxu0  ;;  %6049 = vrot.lane.b32.xlu1 %v18673_v63, %s16459_s24 }
 0x321   : > { %24257 = vst [vmem:[#allocation107_spill] sm:$0xff] %v18848_v13  ;;  %24258 = vst [vmem:[#allocation108_spill] sm:$0xff] %v18852_v58  ;;  %v7246_v45 = vrot.slane %v7232_v29, %v16806_v50  ;;  %v6839_v20 = vadd.f32 %v18237_v31, %v6684_v44  ;;  %v24260_v22 = vrot.slane %v18050_v60, 2  ;;  %v6303_v6 = vadd.f32 %v5932_v17, %v18050_v60 }
 0x322   : > { %v18861_v1 = vrot.slane %v5246_v10, %v16806_v50  ;;  %v18864_v25 = vrot.slane %v5247_v54, %v16806_v50  ;;  %v6840_v9 = vadd.f32 %v18220_v3, %v6685_v14  ;;  %v8207_v44 = vsel %vm17140_vm8, %v7892_v0, %v8206_v32  ;;  %v4627_v0 = vpop.f32.mrf.mxu0 }
 0x323   : > { %v6686_v55 = vadd.f32 %v24260_v22, %v6302_v61  ;;  %v7247_v29 = vcombine.low %v7239_v2, %v7246_v45  ;;  %v6967_v58 = vmax.f32 %v6839_v20, 0.0  ;;  %v5264_v61 = vcombine.low %v4623_v24, %v4625_v49  ;;  %8208 = vst [vmem:[#allocation2 + $0xc] sm:$0xf] %v8207_v44  ;;  %v5938_v22 = vpop.permute.xlu1 %5937  ;;  %6051 = vrot.lane.b32.xlu0 %v18677_v52, %s16459_s24 }
 0x324   : > { %24259 = vst [vmem:[#allocation109_spill] sm:$0xff] %v18861_v1  ;;  %v18876_v10 = vcombine.high %v18861_v1, %v18861_v1  ;;  %v18880_v14 = vcombine.high %v18864_v25, %v18864_v25  ;;  %v5265_v54 = vcombine.high %v4623_v24, %v4625_v49  ;;  %v6968_v20 = vmax.f32 %v6840_v9, 0.0  ;;  %v5940_v44 = vpop.permute.xlu0 %5939  ;;  %6053 = vrot.lane.b32.xlu1 %v18690_v18, %s16459_s24 }
 0x325   : > { %v15904_v2 = vpack.c.bf16 %v7247_v29, %v7247_v29  ;;  %v7248_v45 = vcombine.low %v6966_v57, %v6967_v58  ;;  %v6841_v60 = vadd.f32 %v18252_v30, %v6686_v55  ;;  %v18886_v63 = vrot.slane %v5264_v61, %v16806_v50  ;;  %v4629_v29 = vpop.f32.mrf.mxu0 }
 0x326   : > { %24261 = vst [vmem:[#allocation110_spill] sm:$0xff] %v18876_v10  ;;  %v18889_v17 = vrot.slane %v5265_v54, %v16806_v50  ;;  %v24264_v32 = vrot.slane %v18044_v12, 2  ;;  %v6304_v49 = vadd.f32 %v5934_v40, %v18044_v12  ;;  %v5283_v12 = vcombine.high %v4627_v0, %v4629_v29 }
 0x327   : > { %24262 = vst [vmem:[#allocation111_spill] sm:$0xff] %v18886_v63  ;;  %v7895_v57 = vshrl.u32 %v15904_v2, 16  ;;  %v7898_v58 = vshll.u32 %v15904_v2, 16  ;;  %v7256_v9 = vrot.slane %v7248_v45, %v16806_v50  ;;  %v6969_v55 = vmax.f32 %v6841_v60, 0.0  ;;  %v5942_v40 = vpop.permute.xlu1 %5941  ;;  %v4633_v54 = vpop.f32.mrf.mxu0  ;;  %6055 = vrot.lane.b32.xlu0 %v18700_v37, %s16459_s24 }
 0x328   : > { %24263 = vst [vmem:[#allocation112_spill] sm:$0xff] %v18889_v17  ;;  %v6687_v24 = vadd.f32 %v24264_v32, %v6303_v6  ;;  %v18899_v52 = vcombine.high %v18886_v63, %v18886_v63  ;;  %v18903_v61 = vcombine.high %v18889_v17, %v18889_v17  ;;  %v5282_v6 = vcombine.low %v4627_v0, %v4629_v29 }
 0x329   : > { %v7897_v32 = vrot.slane %v7895_v57, 7  ;;  %v7249_v2 = vcombine.low %v6968_v20, %v6969_v55  ;;  %v24267_v60 = vrot.slane %v18062_v35, 2  ;;  %v18914_v17 = vrot.slane %v5283_v12, %v16806_v50  ;;  %v5944_v57 = vpop.permute.xlu0 %5943  ;;  %v4635_v20 = vpop.f32.mrf.mxu0  ;;  %6057 = vrot.lane.b32.xlu1 %v18732_v39, %s16459_s24 }
 0x32a   : > { %24265 = vst [vmem:[#allocation113_spill] sm:$0xff] %v18899_v52  ;;  %24266 = vst [vmem:[#allocation114_spill] sm:$0xff] %v18903_v61  ;;  %v6842_v45 = vadd.f32 %v18203_v19, %v6687_v24  ;;  %v18911_v18 = vrot.slane %v5282_v6, %v16806_v50  ;;  %v6305_v0 = vadd.f32 %v5936_v21, %v18062_v35 }
 0x32b   : > { %v6688_v10 = vadd.f32 %v24267_v60, %v6304_v49  ;;  %24269 = vst [vmem:[#allocation116_spill] sm:$0xff] %v18914_v17  ;;  %v6306_v29 = vadd.f32 %v5938_v22, %v18073_v15  ;;  %v7900_v55 = vor.u32 %v7898_v58, %v7897_v32  ;;  %v7902_v24 = vrot.slane %v7897_v32, 4  ;;  %v8210_v60 = vld [vmem:[#allocation2 + $0x14] sm:$0x1]  ;;  %v5946_v21 = vpop.permute.xlu1 %5945  ;;  %v4637_v22 = vpop.f32.mrf.mxu0  ;;  %6059 = vrot.lane.b32.xlu0 %v18762_v38, %s16459_s24 }
 0x32c   : > { %24268 = vst [vmem:[#allocation115_spill] sm:$0xff] %v18911_v18  ;;  %v7263_v61 = vrot.slane %v7249_v2, %v16806_v50  ;;  %v6970_v49 = vmax.f32 %v6842_v45, 0.0  ;;  %v18923_v37 = vcombine.high %v18914_v17, %v18914_v17  ;;  %v5300_v6 = vcombine.low %v4633_v54, %v4635_v20 }
 0x32d   : > { %v5301_v12 = vcombine.high %v4633_v54, %v4635_v20  ;;  %v6843_v35 = vadd.f32 %v18237_v31, %v6688_v10  ;;  %v24271_v58 = vrot.slane %v18839_v48, 4  ;;  %v8211_v2 = vsel %vm16723_vm2, %v7902_v24, %v8210_v60 }
 0x32e   : > { %24270 = vst [vmem:[#allocation117_spill] sm:$0xff] %v18923_v37  ;;  %v7264_v39 = vcombine.low %v7256_v9, %v7263_v61  ;;  %v24272_v45 = vrot.slane %v18073_v15, 2  ;;  %v18937_v54 = vrot.slane %v5300_v6, %v16806_v50  ;;  %8212 = vst [vmem:[#allocation2 + $0x14] sm:$0x1] %v8211_v2  ;;  %v24275_v20 = vrot.slane %v18091_v42, 2  ;;  %v5948_v9 = vpop.permute.xlu0 %5947  ;;  %v4639_v61 = vpop.f32.mrf.mxu0 }
 0x32f   : > { %v7901_v32 = vsel %vm16965_vm7, %v24271_v58, %v7900_v55  ;;  %v18940_v10 = vrot.slane %v5301_v12, %v16806_v50  ;;  %v6971_v48 = vmax.f32 %v6843_v35, 0.0  ;;  %v6307_v38 = vadd.f32 %v5940_v44, %v18076_v62 }
 0x330   : > { %v6689_v17 = vadd.f32 %v24272_v45, %v6305_v0  ;;  %24273 = vst [vmem:[#allocation118_spill] sm:$0xff] %v18937_v54  ;;  %8209 = vst.msk [vmem:[#allocation2 + $0x10] sm:$0xf] %vm286_vm6, %v7901_v32  ;;  %v6690_v55 = vadd.f32 %v24275_v20, %v6306_v29  ;;  %v15905_v15 = vpack.c.bf16 %v7264_v39, %v7264_v39  ;;  %v5950_v29 = vpop.permute.xlu1 %5949  ;;  %v4643_v35 = vpop.f32.mrf.mxu0  ;;  %v24280_v39 = vrot.slane %v18083_v43, 2 }
 0x331   : > { %24274 = vst [vmem:[#allocation119_spill] sm:$0xff] %v18940_v10  ;;  %v6308_v24 = vadd.f32 %v5942_v40, %v18083_v43  ;;  %v18950_v6 = vcombine.high %v18937_v54, %v18937_v54  ;;  %v18954_v12 = vcombine.high %v18940_v10, %v18940_v10  ;;  %v5318_v60 = vcombine.low %v4637_v22, %v4639_v61  ;;  %v24307_v54 = vld [vmem:[#allocation90_spill] sm:$0xff] }
 0x332   : > { %v6844_v0 = vadd.f32 %v18220_v3, %v6689_v17  ;;  %v5319_v42 = vcombine.high %v4637_v22, %v4639_v61  ;;  %v7904_v58 = vshrl.u32 %v15905_v15, 16  ;;  %v7907_v32 = vshll.u32 %v15905_v15, 16  ;;  %v5952_v20 = vpop.permute.xlu0 %5951  ;;  %v24281_v15 = vld [vmem:[#allocation20_spill] sm:$0xff] }
 0x333   : > { %24276 = vst [vmem:[#allocation120_spill] sm:$0xff] %v18950_v6  ;;  %24277 = vst [vmem:[#allocation121_spill] sm:$0xff] %v18954_v12  ;;  %v7265_v2 = vcombine.low %v6970_v49, %v6971_v48  ;;  %v18957_v62 = vrot.slane %v5318_v60, %v16806_v50  ;;  %v6845_v40 = vadd.f32 %v18252_v30, %v6690_v55  ;;  %v4645_v12 = vpop.f32.mrf.mxu0  ;;  %v24282_v49 = vrot.slane %v24281_v15, 2 }
 0x334   : > { %v6972_v17 = vmax.f32 %v6844_v0, 0.0  ;;  %v18960_v44 = vrot.slane %v5319_v42, %v16806_v50  ;;  %v6691_v45 = vadd.f32 %v24280_v39, %v6307_v38  ;;  %v18965_v22 = vrot.slane %v7904_v58, 7  ;;  %v18979_v42 = vpop.permute.xlu1 %5953 }
 0x335   : > { %24278 = vst [vmem:[#allocation122_spill] sm:$0xff] %v18957_v62  ;;  %v7273_v61 = vrot.slane %v7265_v2, %v16806_v50  ;;  %v6692_v48 = vadd.f32 %v24282_v49, %v6308_v24  ;;  %v6309_v0 = vadd.f32 %v5944_v57, %v24281_v15  ;;  %v18973_v60 = vcombine.high %v18957_v62, %v18957_v62  ;;  %v4647_v58 = vpop.f32.mrf.mxu0 }
 0x336   : > { %24279 = vst [vmem:[#allocation123_spill] sm:$0xff] %v18960_v44  ;;  %v18977_v55 = vcombine.high %v18960_v44, %v18960_v44  ;;  %v5336_v43 = vcombine.low %v4643_v35, %v4645_v12  ;;  %v5337_v38 = vcombine.high %v4643_v35, %v4645_v12  ;;  %v7909_v2 = vor.u32 %v7907_v32, %v18965_v22  ;;  %v8213_v44 = vld [vmem:[#allocation2 + $0x18] sm:$0xf]  ;;  %v24287_v12 = vld [vmem:[#allocation22_spill] sm:$0xff]  ;;  %v18993_v62 = vpop.permute.xlu0 %5955 }
 0x337   : > { %24283 = vst [vmem:[#allocation20_spill] sm:$0xff] %v18973_v60  ;;  %v6973_v24 = vmax.f32 %v6845_v40, 0.0  ;;  %v6846_v57 = vadd.f32 %v18203_v19, %v6691_v45  ;;  %v24288_v35 = vrot.slane %v24287_v12, 2  ;;  %v4649_v32 = vpop.f32.mrf.mxu0 }
 0x338   : > { %24284 = vst [vmem:[#allocation124_spill] sm:$0xff] %v18977_v55  ;;  %v18985_v15 = vrot.slane %v5336_v43, %v16806_v50  ;;  %v18988_v49 = vrot.slane %v5337_v38, %v16806_v50  ;;  %v6847_v55 = vadd.f32 %v18237_v31, %v6692_v48  ;;  %v8214_v40 = vsel %vm17140_vm8, %v7909_v2, %v8213_v44  ;;  %v24291_v2 = vld [vmem:[#allocation21_spill] sm:$0xff] }
 0x339   : > { %v6693_v60 = vadd.f32 %v24288_v35, %v6309_v0  ;;  %v7266_v39 = vcombine.low %v6972_v17, %v6973_v24  ;;  %v6974_v45 = vmax.f32 %v6846_v57, 0.0  ;;  %v6310_v43 = vadd.f32 %v5946_v21, %v24287_v12  ;;  %8215 = vst [vmem:[#allocation2 + $0x18] sm:$0xf] %v8214_v40  ;;  %v19006_v35 = vpop.permute.xlu1 %5957 }
 0x33a   : > { %24285 = vst [vmem:[#allocation125_spill] sm:$0xff] %v18985_v15  ;;  %24286 = vst [vmem:[#allocation126_spill] sm:$0xff] %v18988_v49  ;;  %v19000_v38 = vcombine.high %v18985_v15, %v18985_v15  ;;  %v19004_v48 = vcombine.high %v18988_v49, %v18988_v49  ;;  %v5354_v10 = vcombine.low %v4647_v58, %v4649_v32  ;;  %v6975_v44 = vmax.f32 %v6847_v55, 0.0  ;;  %v19020_v40 = vpop.permute.xlu0 %5959 }
 0x33b   : > { %v5355_v0 = vcombine.high %v4647_v58, %v4649_v32  ;;  %v7280_v6 = vrot.slane %v7266_v39, %v16806_v50  ;;  %v6848_v17 = vadd.f32 %v18220_v3, %v6693_v60  ;;  %v24292_v21 = vrot.slane %v24291_v2, 2  ;;  %v24295_v58 = vld [vmem:[#allocation87_spill] sm:$0xff] }
 0x33c   : > { %24289 = vst [vmem:[#allocation22_spill] sm:$0xff] %v19000_v38  ;;  %24290 = vst [vmem:[#allocation127_spill] sm:$0xff] %v19004_v48  ;;  %v19013_v57 = vrot.slane %v5354_v10, %v16806_v50  ;;  %v6311_v48 = vadd.f32 %v5948_v9, %v24291_v2  ;;  %v5749_v32 = vrot.slane %v24295_v58, 7  ;;  %v7282_v39 = vcombine.low %v6974_v45, %v6975_v44  ;;  %v24297_v10 = vld [vmem:[#allocation23_spill] sm:$0xff] }
 0x33d   : > { %v6694_v24 = vadd.f32 %v24292_v21, %v6310_v43  ;;  %v19016_v12 = vrot.slane %v5355_v0, %v16806_v50  ;;  %v7281_v49 = vcombine.low %v7273_v61, %v7280_v6  ;;  %v6976_v55 = vmax.f32 %v6848_v17, 0.0  ;;  %v19033_v2 = vpop.permute.xlu1 %5961 }
 0x33e   : > { %24293 = vst [vmem:[#allocation21_spill] sm:$0xff] %v19013_v57  ;;  %v19025_v43 = vcombine.high %v19013_v57, %v19013_v57  ;;  %v24298_v21 = vrot.slane %v24297_v10, 2  ;;  %v5750_v9 = vsel %vm17974_vm0, %v18790_v46, %v5749_v32  ;;  %v6312_v0 = vadd.f32 %v5950_v29, %v24297_v10 }
 0x33f   : > { %24294 = vst [vmem:[#allocation128_spill] sm:$0xff] %v19016_v12  ;;  %v6849_v60 = vadd.f32 %v18252_v30, %v6694_v24  ;;  %v15906_v6 = vpack.c.bf16 %v7281_v49, %v7281_v49  ;;  %v7290_v61 = vrot.slane %v7282_v39, %v16806_v50  ;;  %6061 = vrot.lane.b32.xlu1 %v5750_v9, %s16459_s24  ;;  %v5751_v44 = vrot.slane %v5749_v32, 2  ;;  %v24299_v24 = vld [vmem:[#allocation24_spill] sm:$0xff] }
 0x340   : > { %24296 = vst [vmem:[#allocation129_spill] sm:$0xff] %v19025_v43  ;;  %v6695_v38 = vadd.f32 %v24298_v21, %v6311_v48  ;;  %v24300_v12 = vrot.slane %v24299_v24, 2  ;;  %v24301_v21 = vld [vmem:[#allocation88_spill] sm:$0xff]  ;;  %v6313_v46 = vadd.f32 %v5952_v20, %v24299_v24  ;;  %v19042_v43 = vpop.permute.xlu0 %5963 }
 0x341   : > { %v6977_v45 = vmax.f32 %v6849_v60, 0.0  ;;  %v5752_v58 = vrot.slane %v24301_v21, 7  ;;  %v7912_v29 = vshrl.u32 %v15906_v6, 16  ;;  %v7915_v10 = vshll.u32 %v15906_v6, 16 }
 0x342   : > { %v6850_v17 = vadd.f32 %v18203_v19, %v6695_v38  ;;  %v6696_v48 = vadd.f32 %v24300_v12, %v6312_v0  ;;  %v19046_v39 = vcombine.high %v24301_v21, %v24301_v21  ;;  %v24303_v12 = vld [vmem:[#allocation26_spill] sm:$0xff] }
 0x343   : > { %v7283_v49 = vcombine.low %v6976_v55, %v6977_v45  ;;  %v5753_v38 = vsel %vm17974_vm0, %v5751_v44, %v5752_v58  ;;  %v24304_v9 = vrot.slane %v24303_v12, 2  ;;  %v7914_v57 = vrot.slane %v7912_v29, 7  ;;  %v19056_v45 = vpop.permute.xlu1 %5965 }
 0x344   : > { %24302 = vst [vmem:[#allocation23_spill] sm:$0xff] %v19046_v39  ;;  %v6978_v60 = vmax.f32 %v6850_v17, 0.0  ;;  %v6851_v32 = vadd.f32 %v18237_v31, %v6696_v48  ;;  %6063 = vrot.lane.b32.xlu0 %v5753_v38, %s16459_s24  ;;  %v5754_v6 = vrot.slane %v5752_v58, 2  ;;  %v5755_v55 = vrot.slane %v19046_v39, 7  ;;  %v19064_v38 = vpop.permute.xlu0 %5967  ;;  %v8217_v58 = vld [vmem:[#allocation2 + $0x20] sm:$0x1] }
 0x345   : > { %v6697_v0 = vadd.f32 %v24304_v9, %v6313_v46  ;;  %v7297_v20 = vrot.slane %v7283_v49, %v16806_v50  ;;  %v6314_v48 = vadd.f32 %v18979_v42, %v24303_v12  ;;  %v15624_v44 = vrot.slane %v18664_v53, 9 }
 0x346   : > { %v6979_v24 = vmax.f32 %v6851_v32, 0.0  ;;  %v7917_v21 = vor.u32 %v7915_v10, %v7914_v57  ;;  %v7919_v46 = vrot.slane %v7914_v57, 4  ;;  %v5756_v49 = vsel %vm17974_vm0, %v5754_v6, %v5755_v55  ;;  %v24305_v32 = vld [vmem:[#allocation25_spill] sm:$0xff] }
 0x347   : > { %v6852_v17 = vadd.f32 %v18220_v3, %v6697_v0  ;;  %v7298_v29 = vcombine.low %v7290_v61, %v7297_v20  ;;  %6065 = vrot.lane.b32.xlu1 %v5756_v49, %s16459_s24  ;;  %v24306_v0 = vrot.slane %v24305_v32, 2  ;;  %v5759_v42 = vrot.slane %v24307_v54, 7  ;;  %v24309_v20 = vld [vmem:[#allocation29_spill] sm:$0xff]  ;;  %v19078_v6 = vpop.permute.xlu1 %5969 }
 0x348   : > { %v7299_v9 = vcombine.low %v6978_v60, %v6979_v24  ;;  %v24308_v12 = vrot.slane %v18965_v22, 4  ;;  %v8218_v61 = vsel %vm16723_vm2, %v7919_v46, %v8217_v58  ;;  %v6315_v60 = vadd.f32 %v18993_v62, %v24309_v20  ;;  %v24310_v46 = vld [vmem:[#allocation27_spill] sm:$0xff]  ;;  %v19089_v58 = vpop.permute.xlu0 %5971 }
 0x349   : > { %v6980_v39 = vmax.f32 %v6852_v17, 0.0  ;;  %v6698_v15 = vadd.f32 %v24306_v0, %v6314_v48  ;;  %v15907_v10 = vpack.c.bf16 %v7298_v29, %v7298_v29  ;;  %8219 = vst [vmem:[#allocation2 + $0x20] sm:$0x1] %v8218_v61  ;;  %v5760_v22 = vsel %vm17974_vm0, %v15624_v44, %v5759_v42 }
 0x34a   : > { %v7918_v57 = vsel %vm16965_vm7, %v24308_v12, %v7917_v21  ;;  %v7307_v55 = vrot.slane %v7299_v9, %v16806_v50  ;;  %v5761_v21 = vrot.slane %v5759_v42, 2  ;;  %6067 = vrot.lane.b32.xlu0 %v5760_v22, %s16459_s24  ;;  %v24311_v29 = vrot.slane %v24310_v46, 2  ;;  %v24313_v12 = vld [vmem:[#allocation30_spill] sm:$0xff]  ;;  %v24315_v22 = vld [vmem:[#allocation28_spill] sm:$0xff] }
 0x34b   : > { %8216 = vst.msk [vmem:[#allocation2 + $0x1c] sm:$0xf] %vm286_vm6, %v7918_v57  ;;  %v6853_v24 = vadd.f32 %v18252_v30, %v6698_v15  ;;  %v7921_v17 = vshrl.u32 %v15907_v10, 16  ;;  %v7924_v48 = vshll.u32 %v15907_v10, 16  ;;  %v5762_v49 = vrot.slane %v18693_v47, 7  ;;  %v24312_v15 = vld [vmem:[#allocation93_spill] sm:$0xff]  ;;  %v19101_v20 = vpop.permute.xlu1 %5973 }
 0x34c   : > { %v6699_v62 = vadd.f32 %v24311_v29, %v6315_v60  ;;  %v6316_v9 = vadd.f32 %v19006_v35, %v24310_v46  ;;  %v5765_v0 = vrot.slane %v24312_v15, 7  ;;  %v6317_v44 = vadd.f32 %v19020_v40, %v24313_v12 }
 0x34d   : > { %v6981_v32 = vmax.f32 %v6853_v24, 0.0  ;;  %v19096_v42 = vrot.slane %v7921_v17, 7  ;;  %v5763_v61 = vsel %vm17974_vm0, %v5761_v21, %v5762_v49  ;;  %v5764_v10 = vrot.slane %v5762_v49, 2  ;;  %v19112_v49 = vpop.permute.xlu0 %5975 }
 0x34e   : > { %v6854_v57 = vadd.f32 %v18203_v19, %v6699_v62  ;;  %6069 = vrot.lane.b32.xlu1 %v5763_v61, %s16459_s24  ;;  %v24314_v35 = vrot.slane %v24313_v12, 2  ;;  %v24316_v46 = vrot.slane %v24315_v22, 2  ;;  %v5767_v40 = vrot.slane %v5765_v0, 2 }
 0x34f   : > { %v7300_v60 = vcombine.low %v6980_v39, %v6981_v32  ;;  %v7926_v17 = vor.u32 %v7924_v48, %v19096_v42  ;;  %v5766_v21 = vsel %vm17974_vm0, %v5764_v10, %v5765_v0  ;;  %v8220_v39 = vld [vmem:[#allocation2 + $0x24] sm:$0xf]  ;;  %v24318_v0 = vld [vmem:[#allocation94_spill] sm:$0xff] }
 0x350   : > { %v6700_v24 = vadd.f32 %v24314_v35, %v6316_v9  ;;  %v6701_v29 = vadd.f32 %v24316_v46, %v6317_v44  ;;  %v6982_v15 = vmax.f32 %v6854_v57, 0.0  ;;  %6071 = vrot.lane.b32.xlu0 %v5766_v21, %s16459_s24  ;;  %v24317_v44 = vld [vmem:[#allocation92_spill] sm:$0xff]  ;;  %v6318_v57 = vadd.f32 %v19033_v2, %v24315_v22  ;;  %v24319_v35 = vld [vmem:[#allocation31_spill] sm:$0xff] }
 0x351   : > { %v7314_v32 = vrot.slane %v7300_v60, %v16806_v50  ;;  %v5768_v61 = vrot.slane %v24317_v44, 7  ;;  %v8221_v48 = vsel %vm17140_vm8, %v7926_v17, %v8220_v39  ;;  %v5771_v10 = vrot.slane %v24318_v0, 7  ;;  %v19126_v60 = vpop.permute.xlu1 %5977  ;;  %v24321_v22 = vld [vmem:[#allocation32_spill] sm:$0xff] }
 0x352   : > { %v6855_v12 = vadd.f32 %v18237_v31, %v6700_v24  ;;  %v6856_v9 = vadd.f32 %v18220_v3, %v6701_v29  ;;  %v6319_v46 = vadd.f32 %v19042_v43, %v24319_v35  ;;  %8222 = vst [vmem:[#allocation2 + $0x24] sm:$0xf] %v8221_v48  ;;  %v24320_v17 = vrot.slane %v24319_v35, 2  ;;  %v19135_v43 = vpop.permute.xlu0 %5979 }
 0x353   : > { %v7315_v24 = vcombine.low %v7307_v55, %v7314_v32  ;;  %v5769_v29 = vsel %vm17974_vm0, %v5767_v40, %v5768_v61  ;;  %v5770_v2 = vrot.slane %v5768_v61, 2  ;;  %v24322_v0 = vrot.slane %v24321_v22, 2 }
 0x354   : > { %v6983_v21 = vmax.f32 %v6855_v12, 0.0  ;;  %v6984_v62 = vmax.f32 %v6856_v9, 0.0  ;;  %6073 = vrot.lane.b32.xlu1 %v5769_v29, %s16459_s24  ;;  %v6702_v39 = vadd.f32 %v24320_v17, %v6318_v57  ;;  %v5773_v47 = vrot.slane %v5771_v10, 2 }
 0x355   : > { %v6703_v44 = vadd.f32 %v24322_v0, %v6319_v46  ;;  %v15908_v53 = vpack.c.bf16 %v7315_v24, %v7315_v24  ;;  %v5774_v55 = vrot.slane %v18725_v5, 7  ;;  %v6320_v32 = vadd.f32 %v19056_v45, %v24321_v22  ;;  %v19145_v57 = vpop.permute.xlu1 %5981 }
 0x356   : > { %v7316_v48 = vcombine.low %v6982_v15, %v6983_v21  ;;  %v6857_v40 = vadd.f32 %v18252_v30, %v6702_v39  ;;  %v5772_v12 = vsel %vm17974_vm0, %v5770_v2, %v5771_v10  ;;  %v5777_v61 = vrot.slane %v18742_v36, 7  ;;  %v24323_v10 = vld [vmem:[#allocation34_spill] sm:$0xff]  ;;  %v19154_v17 = vpop.permute.xlu0 %5983 }
 0x357   : > { %v6858_v9 = vadd.f32 %v18203_v19, %v6703_v44  ;;  %v7929_v0 = vshrl.u32 %v15908_v53, 16  ;;  %v7932_v35 = vshll.u32 %v15908_v53, 16  ;;  %6075 = vrot.lane.b32.xlu0 %v5772_v12, %s16459_s24  ;;  %v5775_v45 = vsel %vm17974_vm0, %v5773_v47, %v5774_v55  ;;  %v24325_v12 = vld [vmem:[#allocation33_spill] sm:$0xff] }
 0x358   : > { %v7324_v15 = vrot.slane %v7316_v48, %v16806_v50  ;;  %v6985_v46 = vmax.f32 %v6857_v40, 0.0  ;;  %6077 = vrot.lane.b32.xlu1 %v5775_v45, %s16459_s24  ;;  %v24324_v21 = vrot.slane %v24323_v10, 2  ;;  %v5776_v29 = vrot.slane %v5774_v55, 2 }
 0x359   : > { %v6986_v24 = vmax.f32 %v6858_v9, 0.0  ;;  %v7931_v39 = vrot.slane %v7929_v0, 7  ;;  %v6321_v53 = vadd.f32 %v19064_v38, %v24323_v10  ;;  %v5779_v2 = vrot.slane %v5777_v61, 2 }
 0x35a   : > { %v6704_v44 = vadd.f32 %v24324_v21, %v6320_v32  ;;  %v5780_v22 = vrot.slane %v18728_v8, 7  ;;  %v7317_v48 = vcombine.low %v6984_v62, %v6985_v46  ;;  %v5778_v40 = vsel %vm17974_vm0, %v5776_v29, %v5777_v61  ;;  %v19164_v32 = vpop.permute.xlu1 %5985  ;;  %v8224_v46 = vld [vmem:[#allocation2 + $0x2c] sm:$0x1]  ;;  %v24327_v61 = vld [vmem:[#allocation35_spill] sm:$0xff]  ;;  %v19176_v29 = vpop.permute.xlu0 %5987 }
 0x35b   : > { %v6322_v9 = vadd.f32 %v19078_v6, %v24325_v12  ;;  %v7934_v55 = vor.u32 %v7932_v35, %v7931_v39  ;;  %v7936_v45 = vrot.slane %v7931_v39, 4  ;;  %6079 = vrot.lane.b32.xlu0 %v5778_v40, %s16459_s24  ;;  %v24326_v38 = vrot.slane %v24325_v12, 2 }
 0x35c   : > { %v6859_v47 = vadd.f32 %v18237_v31, %v6704_v44  ;;  %v5781_v62 = vsel %vm17974_vm0, %v5779_v2, %v5780_v22  ;;  %v7331_v10 = vrot.slane %v7317_v48, %v16806_v50  ;;  %v24328_v6 = vrot.slane %v24327_v61, 2  ;;  %v24330_v48 = vld [vmem:[#allocation98_spill] sm:$0xff]  ;;  %v24331_v61 = vld [vmem:[#allocation36_spill] sm:$0xff] }
 0x35d   : > { %v6705_v0 = vadd.f32 %v24326_v38, %v6321_v53  ;;  %6081 = vrot.lane.b32.xlu1 %v5781_v62, %s16459_s24  ;;  %v5784_v35 = vrot.slane %v18754_v33, 7  ;;  %v24329_v39 = vrot.slane %v19096_v42, 4  ;;  %v8225_v2 = vsel %vm16723_vm2, %v7936_v45, %v8224_v46  ;;  %v24333_v46 = vld [vmem:[#allocation38_spill] sm:$0xff] }
 0x35e   : > { %v6987_v21 = vmax.f32 %v6859_v47, 0.0  ;;  %v6706_v44 = vadd.f32 %v24328_v6, %v6322_v9  ;;  %v5787_v47 = vrot.slane %v24330_v48, 7  ;;  %8226 = vst [vmem:[#allocation2 + $0x2c] sm:$0x1] %v8225_v2  ;;  %v7332_v40 = vcombine.low %v7324_v15, %v7331_v10  ;;  %v19188_v62 = vpop.permute.xlu1 %5989  ;;  %v24332_v6 = vld [vmem:[#allocation95_spill] sm:$0xff] }
 0x35f   : > { %v7935_v53 = vsel %vm16965_vm7, %v24329_v39, %v7934_v55  ;;  %v6860_v22 = vadd.f32 %v18220_v3, %v6705_v0  ;;  %v5786_v38 = vrot.slane %v5784_v35, 2  ;;  %v6323_v55 = vadd.f32 %v19089_v58, %v24331_v61 }
 0x360   : > { %8223 = vst.msk [vmem:[#allocation2 + $0x28] sm:$0xf] %vm286_vm6, %v7935_v53  ;;  %v7333_v12 = vcombine.low %v6986_v24, %v6987_v21  ;;  %v6861_v9 = vadd.f32 %v18252_v30, %v6706_v44  ;;  %v15625_v45 = vrot.slane %v24332_v6, 9  ;;  %v6324_v0 = vadd.f32 %v19101_v20, %v24333_v46  ;;  %v19198_v24 = vpop.permute.xlu0 %5991  ;;  %v24335_v44 = vld [vmem:[#allocation37_spill] sm:$0xff] }
 0x361   : > { %v6988_v42 = vmax.f32 %v6860_v22, 0.0  ;;  %v15909_v39 = vpack.c.bf16 %v7332_v40, %v7332_v40  ;;  %v5788_v15 = vsel %vm17974_vm0, %v5786_v38, %v5787_v47  ;;  %v24334_v10 = vrot.slane %v24333_v46, 2  ;;  %v24337_v38 = vld [vmem:[#allocation99_spill] sm:$0xff] }
 0x362   : > { %v7341_v53 = vrot.slane %v7333_v12, %v16806_v50  ;;  %v6989_v2 = vmax.f32 %v6861_v9, 0.0  ;;  %6085 = vrot.lane.b32.xlu0 %v5788_v15, %s16459_s24  ;;  %v5785_v58 = vsel %vm17974_vm0, %v15625_v45, %v5784_v35  ;;  %v24336_v22 = vrot.slane %v24335_v44, 2  ;;  %v19210_v33 = vpop.permute.xlu1 %5993 }
 0x363   : > { %v6707_v21 = vadd.f32 %v24334_v10, %v6323_v55  ;;  %v5790_v40 = vrot.slane %v18757_v16, 7  ;;  %v7938_v12 = vshrl.u32 %v15909_v39, 16  ;;  %v7941_v9 = vshll.u32 %v15909_v39, 16  ;;  %6083 = vrot.lane.b32.xlu1 %v5785_v58, %s16459_s24 }
 0x364   : > { %v6708_v20 = vadd.f32 %v24336_v22, %v6324_v0  ;;  %v7334_v61 = vcombine.low %v6988_v42, %v6989_v2  ;;  %v5793_v6 = vrot.slane %v24337_v38, 7  ;;  %v6325_v35 = vadd.f32 %v19112_v49, %v24335_v44  ;;  %v24338_v42 = vld [vmem:[#allocation39_spill] sm:$0xff]  ;;  %v19221_v10 = vpop.permute.xlu0 %5995  ;;  %v8227_v38 = vld [vmem:[#allocation2 + $0x30] sm:$0xf] }
 0x365   : > { %v6862_v46 = vadd.f32 %v18203_v19, %v6707_v21  ;;  %v5792_v15 = vrot.slane %v5790_v40, 2  ;;  %v19216_v45 = vrot.slane %v7938_v12, 7  ;;  %v5789_v39 = vrot.slane %v5787_v47, 2 }
 0x366   : > { %v6863_v55 = vadd.f32 %v18237_v31, %v6708_v20  ;;  %v7348_v0 = vrot.slane %v7334_v61, %v16806_v50  ;;  %v6326_v2 = vadd.f32 %v19126_v60, %v24338_v42  ;;  %v24339_v20 = vrot.slane %v24338_v42, 2  ;;  %v19232_v47 = vpop.permute.xlu1 %5997 }
 0x367   : > { %v6990_v58 = vmax.f32 %v6862_v46, 0.0  ;;  %v5794_v21 = vsel %vm17974_vm0, %v5792_v15, %v5793_v6  ;;  %v7943_v49 = vor.u32 %v7941_v9, %v19216_v45  ;;  %v7944_v44 = vrot.slane %v19216_v45, 4 }
 0x368   : > { %v6991_v22 = vmax.f32 %v6863_v55, 0.0  ;;  %v6709_v16 = vadd.f32 %v24339_v20, %v6325_v35  ;;  %v7349_v12 = vcombine.low %v7341_v53, %v7348_v0  ;;  %6089 = vrot.lane.b32.xlu0 %v5794_v21, %s16459_s24  ;;  %v5791_v60 = vsel %vm17974_vm0, %v5789_v39, %v5790_v40  ;;  %v24340_v55 = vld [vmem:[#allocation40_spill] sm:$0xff]  ;;  %v19244_v39 = vpop.permute.xlu0 %5999  ;;  %v24342_v20 = vld [vmem:[#allocation42_spill] sm:$0xff] }
 0x369   : > { %6087 = vrot.lane.b32.xlu1 %v5791_v60, %s16459_s24  ;;  %v24341_v15 = vrot.slane %v24340_v55, 2  ;;  %v5796_v9 = vrot.slane %v18784_v7, 7  ;;  %v8228_v53 = vsel %vm17140_vm8, %v7943_v49, %v8227_v38  ;;  %v5799_v0 = vrot.slane %v18800_v59, 7 }
 0x36a   : > { %v7350_v61 = vcombine.low %v6990_v58, %v6991_v22  ;;  %v6864_v46 = vadd.f32 %v18220_v3, %v6709_v16  ;;  %v15910_v45 = vpack.c.bf16 %v7349_v12, %v7349_v12  ;;  %v6327_v40 = vadd.f32 %v19135_v43, %v24340_v55  ;;  %8229 = vst [vmem:[#allocation2 + $0x30] sm:$0xf] %v8228_v53  ;;  %v19250_v12 = vpop.permute.xlu1 %6001 }
 0x36b   : > { %v6710_v35 = vadd.f32 %v24341_v15, %v6326_v2  ;;  %v5798_v2 = vrot.slane %v5796_v9, 2  ;;  %v24343_v60 = vrot.slane %v24342_v20, 2  ;;  %v5795_v49 = vrot.slane %v5793_v6, 2 }
 0x36c   : > { %v7358_v16 = vrot.slane %v7350_v61, %v16806_v50  ;;  %v6992_v42 = vmax.f32 %v6864_v46, 0.0  ;;  %v7946_v22 = vshrl.u32 %v15910_v45, 16  ;;  %v7949_v21 = vshll.u32 %v15910_v45, 16  ;;  %v19265_v45 = vpop.permute.xlu0 %6003 }
 0x36d   : > { %v6865_v58 = vadd.f32 %v18252_v30, %v6710_v35  ;;  %v6711_v38 = vadd.f32 %v24343_v60, %v6327_v40  ;;  %v5800_v43 = vsel %vm17974_vm0, %v5798_v2, %v5799_v0  ;;  %v6328_v55 = vadd.f32 %v19145_v57, %v24342_v20  ;;  %v24344_v57 = vld [vmem:[#allocation41_spill] sm:$0xff] }
 0x36e   : > { %v19258_v61 = vcombine.high %v18787_v23, %v18787_v23  ;;  %v7948_v46 = vrot.slane %v7946_v22, 7  ;;  %6093 = vrot.lane.b32.xlu0 %v5800_v43, %s16459_s24  ;;  %v5797_v6 = vsel %vm17974_vm0, %v5795_v49, %v5796_v9  ;;  %v5802_v53 = vrot.slane %v18787_v23, 7  ;;  %v19273_v9 = vpop.permute.xlu1 %6005  ;;  %v8231_v49 = vld [vmem:[#allocation2 + $0x38] sm:$0x1] }
 0x36f   : > { %v6993_v15 = vmax.f32 %v6865_v58, 0.0  ;;  %v6866_v35 = vadd.f32 %v18203_v19, %v6711_v38  ;;  %6091 = vrot.lane.b32.xlu1 %v5797_v6, %s16459_s24  ;;  %v24345_v58 = vrot.slane %v24344_v57, 2  ;;  %v6329_v22 = vadd.f32 %v19154_v17, %v24344_v57 }
 0x370   : > { %v5805_v20 = vrot.slane %v19258_v61, 7  ;;  %v7951_v60 = vor.u32 %v7949_v21, %v7948_v46  ;;  %v7953_v38 = vrot.slane %v7948_v46, 4  ;;  %v5804_v7 = vrot.slane %v5802_v53, 2 }
 0x371   : > { %v7351_v40 = vcombine.low %v6992_v42, %v6993_v15  ;;  %v6712_v2 = vadd.f32 %v24345_v58, %v6328_v55  ;;  %v6994_v43 = vmax.f32 %v6866_v35, 0.0  ;;  %v24346_v15 = vld [vmem:[#allocation43_spill] sm:$0xff]  ;;  %v5801_v55 = vrot.slane %v5799_v0, 2  ;;  %v19287_v35 = vpop.permute.xlu0 %6007 }
 0x372   : > { %v24347_v6 = vrot.slane %v24346_v15, 2  ;;  %v7952_v58 = vsel %vm16965_vm7, %v7944_v44, %v7951_v60  ;;  %v8232_v17 = vsel %vm16723_vm2, %v7953_v38, %v8231_v49  ;;  %v5806_v21 = vsel %vm17974_vm0, %v5804_v7, %v5805_v20  ;;  %v24348_v7 = vld [vmem:[#allocation44_spill] sm:$0xff]  ;;  %v24350_v60 = vld [vmem:[#allocation46_spill] sm:$0xff] }
 0x373   : > { %v7365_v23 = vrot.slane %v7351_v40, %v16806_v50  ;;  %v6867_v42 = vadd.f32 %v18237_v31, %v6712_v2  ;;  %v6330_v46 = vadd.f32 %v19164_v32, %v24346_v15  ;;  %8230 = vst.msk [vmem:[#allocation2 + $0x34] sm:$0xf] %vm286_vm6, %v7952_v58  ;;  %8233 = vst [vmem:[#allocation2 + $0x38] sm:$0x1] %v8232_v17  ;;  %6097 = vrot.lane.b32.xlu0 %v5806_v21, %s16459_s24 }
 0x374   : > { %v6713_v59 = vadd.f32 %v24347_v6, %v6329_v22  ;;  %v5803_v0 = vsel %vm17974_vm0, %v5801_v55, %v5802_v53  ;;  %v24349_v2 = vrot.slane %v24348_v7, 2  ;;  %v5809_v32 = vrot.slane %v18822_v41, 7  ;;  %v24351_v6 = vld [vmem:[#allocation45_spill] sm:$0xff]  ;;  %v24353_v7 = vld [vmem:[#allocation47_spill] sm:$0xff] }
 0x375   : > { %v7366_v40 = vcombine.low %v7358_v16, %v7365_v23  ;;  %v6995_v57 = vmax.f32 %v6867_v42, 0.0  ;;  %6095 = vrot.lane.b32.xlu1 %v5803_v0, %s16459_s24  ;;  %v5812_v22 = vrot.slane %v18812_v56, 7  ;;  %v6331_v23 = vadd.f32 %v19176_v29, %v24350_v60  ;;  %v19301_v16 = vpop.permute.xlu1 %6009  ;;  %v19309_v21 = vpop.permute.xlu0 %6011 }
 0x376   : > { %v6868_v44 = vadd.f32 %v18220_v3, %v6713_v59  ;;  %v6714_v20 = vadd.f32 %v24349_v2, %v6330_v46  ;;  %v15626_v42 = vrot.slane %v18809_v11, 9  ;;  %v5811_v15 = vrot.slane %v5809_v32, 2 }
 0x377   : > { %v15911_v38 = vpack.c.bf16 %v7366_v40, %v7366_v40  ;;  %v7367_v49 = vcombine.low %v6994_v43, %v6995_v57  ;;  %v24352_v55 = vrot.slane %v24351_v6, 2  ;;  %v6332_v17 = vadd.f32 %v19188_v62, %v24351_v6 }
 0x378   : > { %v6996_v59 = vmax.f32 %v6868_v44, 0.0  ;;  %v6869_v53 = vadd.f32 %v18252_v30, %v6714_v20  ;;  %v5810_v43 = vsel %vm17974_vm0, %v15626_v42, %v5809_v32  ;;  %v5813_v57 = vsel %vm17974_vm0, %v5811_v15, %v5812_v22 }
 0x379   : > { %v6715_v58 = vadd.f32 %v24352_v55, %v6331_v23  ;;  %v7955_v46 = vshrl.u32 %v15911_v38, 16  ;;  %v7958_v29 = vshll.u32 %v15911_v38, 16  ;;  %v7375_v0 = vrot.slane %v7367_v49, %v16806_v50  ;;  %6099 = vrot.lane.b32.xlu1 %v5810_v43, %s16459_s24  ;;  %v19320_v20 = vpop.permute.xlu1 %6013  ;;  %6101 = vrot.lane.b32.xlu0 %v5813_v57, %s16459_s24  ;;  %v24355_v23 = vld [vmem:[#allocation104_spill] sm:$0xff] }
 0x37a   : > { %v6997_v40 = vmax.f32 %v6869_v53, 0.0  ;;  %v24354_v2 = vrot.slane %v24353_v7, 2  ;;  %v5815_v38 = vrot.slane %v24355_v23, 7  ;;  %v5818_v32 = vrot.slane %v18832_v51, 7  ;;  %v24356_v49 = vld [vmem:[#allocation48_spill] sm:$0xff] }
 0x37b   : > { %v6870_v44 = vadd.f32 %v18203_v19, %v6715_v58  ;;  %v19322_v60 = vrot.slane %v7955_v46, 7  ;;  %v6461_v42 = vrot.slane %v24356_v49, 2  ;;  %v6333_v55 = vadd.f32 %v19198_v24, %v24353_v7  ;;  %v19331_v58 = vpop.permute.xlu0 %6015 }
 0x37c   : > { %v6716_v62 = vadd.f32 %v24354_v2, %v6332_v17  ;;  %v7368_v53 = vcombine.low %v6996_v59, %v6997_v40  ;;  %v8234_v17 = vld [vmem:[#allocation2 + $0x3c] sm:$0xf]  ;;  %v5817_v57 = vrot.slane %v5815_v38, 2  ;;  %v5814_v2 = vrot.slane %v5812_v22, 2  ;;  %v24357_v59 = vld [vmem:[#allocation50_spill] sm:$0xff] }
 0x37d   : > { %v6998_v15 = vmax.f32 %v6870_v44, 0.0  ;;  %v7960_v46 = vor.u32 %v7958_v29, %v19322_v60  ;;  %v6717_v11 = vadd.f32 %v6461_v42, %v6333_v55  ;;  %v6462_v40 = vrot.slane %v24357_v59, 2  ;;  %v19337_v44 = vpop.permute.xlu1 %6017 }
 0x37e   : > { %v6871_v6 = vadd.f32 %v18237_v31, %v6716_v62  ;;  %v7382_v23 = vrot.slane %v7368_v53, %v16806_v50  ;;  %v5819_v7 = vsel %vm17974_vm0, %v5817_v57, %v5818_v32  ;;  %v5816_v29 = vsel %vm17974_vm0, %v5814_v2, %v5815_v38  ;;  %v24358_v38 = vld [vmem:[#allocation49_spill] sm:$0xff] }
 0x37f   : > { %v8235_v24 = vsel %vm17140_vm8, %v7960_v46, %v8234_v17  ;;  %v6334_v22 = vadd.f32 %v19210_v33, %v24356_v49  ;;  %6105 = vrot.lane.b32.xlu0 %v5819_v7, %s16459_s24  ;;  %v6872_v42 = vadd.f32 %v18220_v3, %v6717_v11  ;;  %6103 = vrot.lane.b32.xlu1 %v5816_v29, %s16459_s24  ;;  %v19351_v55 = vpop.permute.xlu0 %6019  ;;  %v5824_v46 = vrot.slane %v18835_v28, 7  ;;  %v24359_v7 = vld [vmem:[#allocation51_spill] sm:$0xff] }
 0x380   : > { %v6999_v51 = vmax.f32 %v6871_v6, 0.0  ;;  %8236 = vst [vmem:[#allocation2 + $0x3c] sm:$0xf] %v8235_v24  ;;  %v7383_v62 = vcombine.low %v7375_v0, %v7382_v23  ;;  %v5821_v6 = vrot.slane %v18848_v13, 7  ;;  %v6463_v57 = vrot.slane %v24358_v38, 2 }
 0x381   : > { %v6718_v17 = vadd.f32 %v6462_v40, %v6334_v22  ;;  %v6335_v33 = vadd.f32 %v19221_v10, %v24357_v59  ;;  %v7000_v23 = vmax.f32 %v6872_v42, 0.0  ;;  %v19358_v11 = vpop.permute.xlu1 %6021  ;;  %v5820_v24 = vrot.slane %v5818_v32, 2  ;;  %v24360_v42 = vld [vmem:[#allocation108_spill] sm:$0xff] }
 0x382   : > { %v7384_v53 = vcombine.low %v6998_v15, %v6999_v51  ;;  %v15912_v0 = vpack.c.bf16 %v7383_v62, %v7383_v62  ;;  %v5823_v49 = vrot.slane %v5821_v6, 2  ;;  %v6464_v40 = vrot.slane %v24359_v7, 2 }
 0x383   : > { %v6873_v15 = vadd.f32 %v18252_v30, %v6718_v17  ;;  %v6719_v2 = vadd.f32 %v6463_v57, %v6335_v33  ;;  %v6336_v10 = vadd.f32 %v19232_v47, %v24358_v38  ;;  %v19366_v59 = vpop.permute.xlu0 %6023  ;;  %v5822_v32 = vsel %vm17974_vm0, %v5820_v24, %v5821_v6 }
 0x384   : > { %v7392_v51 = vrot.slane %v7384_v53, %v16806_v50  ;;  %v7963_v29 = vshrl.u32 %v15912_v0, 16  ;;  %v7966_v22 = vshll.u32 %v15912_v0, 16  ;;  %v5825_v43 = vsel %vm17974_vm0, %v5823_v49, %v5824_v46  ;;  %6107 = vrot.lane.b32.xlu1 %v5822_v32, %s16459_s24  ;;  %v24361_v49 = vld [vmem:[#allocation52_spill] sm:$0xff] }
 0x385   : > { %v7001_v62 = vmax.f32 %v6873_v15, 0.0  ;;  %6109 = vrot.lane.b32.xlu0 %v5825_v43, %s16459_s24  ;;  %v6874_v53 = vadd.f32 %v18203_v19, %v6719_v2  ;;  %v5827_v17 = vrot.slane %v24360_v42, 7  ;;  %v6720_v33 = vadd.f32 %v6464_v40, %v6336_v10  ;;  %v19376_v38 = vpop.permute.xlu1 %6025  ;;  %v8238_v40 = vld [vmem:[#allocation2 + $0x44] sm:$0x1] }
 0x386   : > { %v7965_v57 = vrot.slane %v7963_v29, 7  ;;  %v5830_v0 = vrot.slane %v18861_v1, 7  ;;  %v6465_v47 = vrot.slane %v24361_v49, 2  ;;  %v6337_v2 = vadd.f32 %v19244_v39, %v24359_v7 }
 0x387   : > { %v7385_v15 = vcombine.low %v7000_v23, %v7001_v62  ;;  %v7002_v13 = vmax.f32 %v6874_v53, 0.0  ;;  %v5829_v43 = vrot.slane %v5827_v17, 2  ;;  %v6875_v24 = vadd.f32 %v18237_v31, %v6720_v33  ;;  %v19381_v42 = vpop.permute.xlu0 %6027  ;;  %v24362_v23 = vld [vmem:[#allocation55_spill] sm:$0xff] }
 0x388   : > { %v7968_v28 = vor.u32 %v7966_v22, %v7965_v57  ;;  %v7970_v6 = vrot.slane %v7965_v57, 4  ;;  %v5826_v29 = vrot.slane %v5824_v46, 2  ;;  %v6721_v1 = vadd.f32 %v6465_v47, %v6337_v2  ;;  %v24365_v2 = vld [vmem:[#allocation53_spill] sm:$0xff] }
 0x389   : > { %v7399_v10 = vrot.slane %v7385_v15, %v16806_v50  ;;  %v5831_v32 = vsel %vm17974_vm0, %v5829_v43, %v5830_v0  ;;  %v6466_v62 = vrot.slane %v24362_v23, 2  ;;  %v24363_v53 = vrot.slane %v19322_v60, 4  ;;  %v19396_v57 = vpop.permute.xlu1 %6029  ;;  %v24364_v43 = vld [vmem:[#allocation54_spill] sm:$0xff]  ;;  %v24367_v23 = vld [vmem:[#allocation56_spill] sm:$0xff] }
 0x38a   : > { %v8239_v7 = vsel %vm16723_vm2, %v7970_v6, %v8238_v40  ;;  %v7003_v46 = vmax.f32 %v6875_v24, 0.0  ;;  %6113 = vrot.lane.b32.xlu0 %v5831_v32, %s16459_s24  ;;  %v5828_v22 = vsel %vm17974_vm0, %v5826_v29, %v5827_v17  ;;  %v6876_v60 = vadd.f32 %v18220_v3, %v6721_v1 }
 0x38b   : > { %v7969_v39 = vsel %vm16965_vm7, %v24363_v53, %v7968_v28  ;;  %8240 = vst [vmem:[#allocation2 + $0x44] sm:$0x1] %v8239_v7  ;;  %v7400_v33 = vcombine.low %v7392_v51, %v7399_v10  ;;  %6111 = vrot.lane.b32.xlu1 %v5828_v22, %s16459_s24  ;;  %v6338_v28 = vadd.f32 %v19250_v12, %v24361_v49  ;;  %v5834_v0 = vrot.slane %v18864_v25, 7  ;;  %v19408_v24 = vpop.permute.xlu0 %6031  ;;  %v24366_v12 = vld [vmem:[#allocation110_spill] sm:$0xff] }
 0x38c   : > { %8237 = vst.msk [vmem:[#allocation2 + $0x40] sm:$0xf] %vm286_vm6, %v7969_v39  ;;  %v7401_v47 = vcombine.low %v7002_v13, %v7003_v46  ;;  %v5837_v15 = vrot.slane %v18880_v14, 7  ;;  %v6467_v17 = vrot.slane %v24364_v43, 2  ;;  %v6339_v6 = vadd.f32 %v19265_v45, %v24365_v2  ;;  %v24368_v2 = vld [vmem:[#allocation58_spill] sm:$0xff] }
 0x38d   : > { %v15913_v51 = vpack.c.bf16 %v7400_v33, %v7400_v33  ;;  %v7004_v29 = vmax.f32 %v6876_v60, 0.0  ;;  %v6722_v1 = vadd.f32 %v6466_v62, %v6338_v28  ;;  %v5836_v40 = vrot.slane %v5834_v0, 2  ;;  %v19416_v46 = vpop.permute.xlu1 %6033 }
 0x38e   : > { %v7409_v10 = vrot.slane %v7401_v47, %v16806_v50  ;;  %v6723_v32 = vadd.f32 %v6467_v17, %v6339_v6  ;;  %v15627_v49 = vrot.slane %v24366_v12, 9  ;;  %v6468_v13 = vrot.slane %v24367_v23, 2 }
 0x38f   : > { %v7972_v53 = vshrl.u32 %v15913_v51, 16  ;;  %v7975_v39 = vshll.u32 %v15913_v51, 16  ;;  %v6877_v7 = vadd.f32 %v18252_v30, %v6722_v1  ;;  %v5838_v45 = vsel %vm17974_vm0, %v5836_v40, %v5837_v15 }
 0x390   : > { %6117 = vrot.lane.b32.xlu0 %v5838_v45, %s16459_s24  ;;  %v6878_v62 = vadd.f32 %v18203_v19, %v6723_v32  ;;  %v5835_v22 = vsel %vm17974_vm0, %v15627_v49, %v5834_v0  ;;  %v6340_v33 = vadd.f32 %v19273_v9, %v24364_v43  ;;  %v5840_v60 = vrot.slane %v18886_v63, 7  ;;  %v19432_v32 = vpop.permute.xlu0 %6035 }
 0x391   : > { %v19425_v28 = vrot.slane %v7972_v53, 7  ;;  %v7005_v47 = vmax.f32 %v6877_v7, 0.0  ;;  %6115 = vrot.lane.b32.xlu1 %v5835_v22, %s16459_s24  ;;  %v5843_v17 = vrot.slane %v18899_v52, 7  ;;  %v6469_v6 = vrot.slane %v24368_v2, 2  ;;  %v8241_v7 = vld [vmem:[#allocation2 + $0x48] sm:$0xf] }
 0x392   : > { %v7006_v51 = vmax.f32 %v6878_v62, 0.0  ;;  %v6724_v1 = vadd.f32 %v6468_v13, %v6340_v33  ;;  %v5842_v40 = vrot.slane %v5840_v60, 2  ;;  %v6341_v0 = vadd.f32 %v19287_v35, %v24367_v23  ;;  %v24369_v13 = vld [vmem:[#allocation57_spill] sm:$0xff] }
 0x393   : > { %v7977_v9 = vor.u32 %v7975_v39, %v19425_v28  ;;  %v7402_v49 = vcombine.low %v7004_v29, %v7005_v47  ;;  %v5839_v53 = vrot.slane %v5837_v15, 2  ;;  %v6470_v33 = vrot.slane %v24369_v13, 2  ;;  %v19448_v39 = vpop.permute.xlu1 %6037 }
 0x394   : > { %v6879_v45 = vadd.f32 %v18237_v31, %v6724_v1  ;;  %v5844_v22 = vsel %vm17974_vm0, %v5842_v40, %v5843_v17  ;;  %v6725_v62 = vadd.f32 %v6469_v6, %v6341_v0  ;;  %v6342_v15 = vadd.f32 %v19301_v16, %v24368_v2  ;;  %v24370_v1 = vld [vmem:[#allocation112_spill] sm:$0xff]  ;;  %v24371_v0 = vld [vmem:[#allocation114_spill] sm:$0xff] }
 0x395   : > { %v8242_v35 = vsel %vm17140_vm8, %v7977_v9, %v8241_v7  ;;  %v7416_v23 = vrot.slane %v7402_v49, %v16806_v50  ;;  %6121 = vrot.lane.b32.xlu0 %v5844_v22, %s16459_s24  ;;  %v5841_v29 = vsel %vm17974_vm0, %v5839_v53, %v5840_v60  ;;  %v5846_v40 = vrot.slane %v24370_v1, 7  ;;  %v24372_v22 = vld [vmem:[#allocation61_spill] sm:$0xff]  ;;  %v24373_v1 = vld [vmem:[#allocation59_spill] sm:$0xff] }
 0x396   : > { %8243 = vst [vmem:[#allocation2 + $0x48] sm:$0xf] %v8242_v35  ;;  %v7007_v47 = vmax.f32 %v6879_v45, 0.0  ;;  %v6880_v6 = vadd.f32 %v18220_v3, %v6725_v62  ;;  %6119 = vrot.lane.b32.xlu1 %v5841_v29, %s16459_s24  ;;  %v5849_v9 = vrot.slane %v24371_v0, 7  ;;  %v6726_v7 = vadd.f32 %v6470_v33, %v6342_v15  ;;  %v19457_v45 = vpop.permute.xlu0 %6039 }
 0x397   : > { %v7417_v49 = vcombine.low %v7409_v10, %v7416_v23  ;;  %v6471_v43 = vrot.slane %v24372_v22, 2  ;;  %v6343_v60 = vadd.f32 %v19309_v21, %v24369_v13  ;;  %v5848_v53 = vrot.slane %v5846_v40, 2  ;;  %v19471_v15 = vpop.permute.xlu1 %6041 }
 0x398   : > { %v7418_v16 = vcombine.low %v7006_v51, %v7007_v47  ;;  %v7008_v2 = vmax.f32 %v6880_v6, 0.0  ;;  %v5845_v35 = vrot.slane %v5843_v17, 2  ;;  %v6881_v29 = vadd.f32 %v18252_v30, %v6726_v7  ;;  %v16159_v47 = vld [vmem:[#allocation8 + $0x74] ss:$8 sps:$4 sm:$0xff]  }
 0x399   : > { %v15914_v62 = vpack.c.bf16 %v7417_v49, %v7417_v49  ;;  %v6727_v63 = vadd.f32 %v6471_v43, %v6343_v60  ;;  %v6472_v52 = vrot.slane %v24373_v1, 2  ;;  %v5850_v33 = vsel %vm17974_vm0, %v5848_v53, %v5849_v9  ;;  %11482 = vmatprep.subr.bf16.mxu1 %v16159_v47 }
 0x39a   : > { %v7426_v10 = vrot.slane %v7418_v16, %v16806_v50  ;;  %v5847_v21 = vsel %vm17974_vm0, %v5845_v35, %v5846_v40  ;;  %v6344_v51 = vadd.f32 %v19320_v20, %v24372_v22  ;;  %v7009_v23 = vmax.f32 %v6881_v29, 0.0  ;;  %6125 = vrot.lane.b32.xlu0 %v5850_v33, %s16459_s24  ;;  %v24374_v20 = vld [vmem:[#allocation62_spill] sm:$0xff]  ;;  %v19483_v33 = vpop.permute.xlu0 %6043 }
 0x39b   : > { %v7980_v17 = vshrl.u32 %v15914_v62, 16  ;;  %v7983_v13 = vshll.u32 %v15914_v62, 16  ;;  %v6882_v43 = vadd.f32 %v18203_v19, %v6727_v63  ;;  %6123 = vrot.lane.b32.xlu1 %v5847_v21, %s16459_s24  ;;  %v19475_v49 = vcombine.high %v18911_v18, %v18911_v18  ;;  %v16161_v22 = vld [vmem:[#allocation8 + $0x70] ss:$8 sps:$4 sm:$0xff]  }
 0x39c   : > { %v6728_v6 = vadd.f32 %v6472_v52, %v6344_v51  ;;  %v5852_v40 = vrot.slane %v18911_v18, 7  ;;  %v6473_v7 = vrot.slane %v24374_v20, 2  ;;  %v7419_v16 = vcombine.low %v7008_v2, %v7009_v23  ;;  %11483 = vmatpush1.bf16.msra.mxu1 %v16161_v22  ;;  %v8245_v2 = vld [vmem:[#allocation2 + $0x50] sm:$0x1] }
 0x39d   : > { %v7982_v60 = vrot.slane %v7980_v17, 7  ;;  %v7010_v53 = vmax.f32 %v6882_v43, 0.0  ;;  %v6345_v63 = vadd.f32 %v19331_v58, %v24373_v1  ;;  %v5855_v52 = vrot.slane %v19475_v49, 7  ;;  %v24375_v43 = vld [vmem:[#allocation60_spill] sm:$0xff] }
 0x39e   : > { %v6883_v35 = vadd.f32 %v18237_v31, %v6728_v6  ;;  %v5854_v62 = vrot.slane %v5852_v40, 2  ;;  %v5851_v29 = vrot.slane %v5849_v9, 2  ;;  %v7433_v18 = vrot.slane %v7419_v16, %v16806_v50 }
 0x39f   : > { %v7985_v21 = vor.u32 %v7983_v13, %v7982_v60  ;;  %v7987_v51 = vrot.slane %v7982_v60, 4  ;;  %v6729_v17 = vadd.f32 %v6473_v7, %v6345_v63  ;;  %v6474_v47 = vrot.slane %v24375_v43, 2  ;;  %v19499_v60 = vpop.permute.xlu1 %6045  ;;  %v24377_v63 = vld [vmem:[#allocation118_spill] sm:$0xff] }
 0x3a0   : > { %v7011_v23 = vmax.f32 %v6883_v35, 0.0  ;;  %v5856_v58 = vsel %vm17974_vm0, %v5854_v62, %v5855_v52  ;;  %v5853_v1 = vsel %vm17974_vm0, %v5851_v29, %v5852_v40  ;;  %v24376_v9 = vrot.slane %v19425_v28, 4  ;;  %v24378_v62 = vld [vmem:[#allocation63_spill] sm:$0xff]  ;;  %v24379_v29 = vld [vmem:[#allocation66_spill] sm:$0xff] }
 0x3a1   : > { %v8246_v13 = vsel %vm16723_vm2, %v7987_v51, %v8245_v2  ;;  %v7434_v22 = vcombine.low %v7426_v10, %v7433_v18  ;;  %6129 = vrot.lane.b32.xlu0 %v5856_v58, %s16459_s24  ;;  %v6884_v7 = vadd.f32 %v18220_v3, %v6729_v17  ;;  %6127 = vrot.lane.b32.xlu1 %v5853_v1, %s16459_s24  ;;  %v5859_v16 = vrot.slane %v18923_v37, 7  ;;  %v24380_v2 = vld [vmem:[#allocation116_spill] sm:$0xff]  ;;  %v19515_v58 = vpop.permute.xlu0 %6047 }
 0x3a2   : > { %v7986_v6 = vsel %vm16965_vm7, %v24376_v9, %v7985_v21  ;;  %8247 = vst [vmem:[#allocation2 + $0x50] sm:$0x1] %v8246_v13  ;;  %v19502_v40 = vcombine.low %v7010_v53, %v7011_v23  ;;  %v6346_v28 = vadd.f32 %v19337_v44, %v24374_v20  ;;  %v5862_v18 = vrot.slane %v24377_v63, 7  ;;  %v16164_v44 = vld [vmem:[#allocation8 + $0x64] ss:$8 sps:$4 sm:$0xff]  }
 0x3a3   : > { %8244 = vst.msk [vmem:[#allocation2 + $0x4c] sm:$0xf] %vm286_vm6, %v7986_v6  ;;  %v15915_v10 = vpack.c.bf16 %v7434_v22, %v7434_v22  ;;  %v7012_v35 = vmax.f32 %v6884_v7, 0.0  ;;  %v6475_v52 = vrot.slane %v24378_v62, 2  ;;  %v6347_v21 = vadd.f32 %v19351_v55, %v24379_v29  ;;  %v16166_v20 = vld [vmem:[#allocation8 + $0x60] ss:$8 sps:$4 sm:$0xff]   ;;  %11484 = vmatprep.subr.bf16.mxu1 %v16164_v44 }
 0x3a4   : > { %v7443_v53 = vrot.slane %v19502_v40, %v16806_v50  ;;  %v6730_v51 = vadd.f32 %v6474_v47, %v6346_v28  ;;  %v5861_v17 = vrot.slane %v5859_v16, 2  ;;  %v15628_v23 = vrot.slane %v24380_v2, 9  ;;  %v24381_v6 = vld [vmem:[#allocation69_spill] sm:$0xff]  ;;  %11485 = vmatpush1.bf16.msra.mxu1 %v16166_v20 }
 0x3a5   : > { %v7989_v1 = vshrl.u32 %v15915_v10, 16  ;;  %v7992_v43 = vshll.u32 %v15915_v10, 16  ;;  %v6731_v9 = vadd.f32 %v6475_v52, %v6347_v21  ;;  %v6476_v13 = vrot.slane %v24381_v6, 2  ;;  %v16167_v22 = vld [vmem:[#allocation8 + $0x54] ss:$8 sps:$4 sm:$0xff]   ;;  %v24382_v52 = vld [vmem:[#allocation120_spill] sm:$0xff] }
 0x3a6   : > { %v6885_v7 = vadd.f32 %v18252_v30, %v6730_v51  ;;  %v5863_v55 = vsel %vm17974_vm0, %v5861_v17, %v5862_v18  ;;  %v5860_v47 = vsel %vm17974_vm0, %v15628_v23, %v5859_v16  ;;  %v6348_v40 = vadd.f32 %v19358_v11, %v24378_v62  ;;  %v24383_v21 = vld [vmem:[#allocation119_spill] sm:$0xff]  ;;  %v19532_v17 = vpop.permute.xlu1 %6049  ;;  %v24384_v23 = vld [vmem:[#allocation64_spill] sm:$0xff]  ;;  %v16169_v62 = vld [vmem:[#allocation8 + $0x50] ss:$8 sps:$4 sm:$0xff]   ;;  %11486 = vmatprep.subr.bf16.mxu1 %v16167_v22 }
 0x3a7   : > { %v19525_v28 = vrot.slane %v7989_v1, 7  ;;  %6133 = vrot.lane.b32.xlu0 %v5863_v55, %s16459_s24  ;;  %v6886_v10 = vadd.f32 %v18203_v19, %v6731_v9  ;;  %6131 = vrot.lane.b32.xlu1 %v5860_v47, %s16459_s24  ;;  %v5865_v29 = vrot.slane %v24382_v52, 7  ;;  %v5868_v51 = vrot.slane %v24383_v21, 7  ;;  %v8248_v47 = vld [vmem:[#allocation2 + $0x54] sm:$0xf] }
 0x3a8   : > { %v7013_v2 = vmax.f32 %v6885_v7, 0.0  ;;  %v6732_v16 = vadd.f32 %v6476_v13, %v6348_v40  ;;  %v6477_v37 = vrot.slane %v24384_v23, 2  ;;  %v6349_v11 = vadd.f32 %v19366_v59, %v24381_v6  ;;  %v19540_v40 = vpop.permute.xlu0 %6051  ;;  %11487 = vmatpush1.bf16.msra.mxu1 %v16169_v62  ;;  %v16170_v22 = vld [vmem:[#allocation8 + $0x44] ss:$8 sps:$4 sm:$0xff]  }
 0x3a9   : > { %v7994_v44 = vor.u32 %v7992_v43, %v19525_v28  ;;  %v7014_v9 = vmax.f32 %v6886_v10, 0.0  ;;  %v5867_v55 = vrot.slane %v5865_v29, 2  ;;  %v5864_v13 = vrot.slane %v5862_v18, 2  ;;  %v24385_v43 = vld [vmem:[#allocation65_spill] sm:$0xff]  ;;  %11488 = vmatprep.subr.bf16.mxu1 %v16170_v22 }
 0x3aa   : > { %v7436_v52 = vcombine.low %v7012_v35, %v7013_v2  ;;  %v6887_v21 = vadd.f32 %v18237_v31, %v6732_v16  ;;  %v6733_v7 = vadd.f32 %v6477_v37, %v6349_v11  ;;  %v6478_v6 = vrot.slane %v24385_v43, 2  ;;  %v16172_v16 = vld [vmem:[#allocation8 + $0x40] ss:$8 sps:$4 sm:$0xff]  }
 0x3ab   : > { %v8249_v59 = vsel %vm17140_vm8, %v7994_v44, %v8248_v47  ;;  %v5869_v20 = vsel %vm17974_vm0, %v5867_v55, %v5868_v51  ;;  %v6350_v10 = vadd.f32 %v19376_v38, %v24384_v23  ;;  %v5866_v18 = vsel %vm17974_vm0, %v5864_v13, %v5865_v29  ;;  %v24386_v44 = vld [vmem:[#allocation67_spill] sm:$0xff]  ;;  %v16173_v23 = vld [vmem:[#allocation8 + $0x34] ss:$8 sps:$4 sm:$0xff]  }
 0x3ac   : > { %8250 = vst [vmem:[#allocation2 + $0x54] sm:$0xf] %v8249_v59  ;;  %v7450_v35 = vrot.slane %v7436_v52, %v16806_v50  ;;  %v7015_v2 = vmax.f32 %v6887_v21, 0.0  ;;  %6137 = vrot.lane.b32.xlu0 %v5869_v20, %s16459_s24  ;;  %v6888_v37 = vadd.f32 %v18220_v3, %v6733_v7  ;;  %6135 = vrot.lane.b32.xlu1 %v5866_v18, %s16459_s24  ;;  %v6479_v55 = vrot.slane %v24386_v44, 2  ;;  %v19558_v21 = vpop.permute.xlu1 %6053  ;;  %v16139_v20 = vld [vmem:[#allocation2 + $0xc] sm:$0xff]  }
 0x3ad   : > { %v6734_v11 = vadd.f32 %v6478_v6, %v6350_v10  ;;  %v6351_v38 = vadd.f32 %v19381_v42, %v24385_v43  ;;  %v5870_v52 = vrot.slane %v5868_v51, 2  ;;  %v24387_v29 = vld [vmem:[#allocation121_spill] sm:$0xff]  ;;  %v24388_v6 = vld [vmem:[#allocation70_spill] sm:$0xff]  ;;  %v6352_v1 = vadd.f32 %v19396_v57, %v24386_v44  ;;  %v19569_v43 = vpop.permute.xlu0 %6055  ;;  %11489 = vmatpush1.bf16.msra.mxu1 %v16172_v16 }
 0x3ae   : > { %v7451_v47 = vcombine.low %v7443_v53, %v7450_v35  ;;  %v7452_v7 = vcombine.low %v7014_v9, %v7015_v2  ;;  %v7016_v59 = vmax.f32 %v6888_v37, 0.0  ;;  %v5871_v62 = vrot.slane %v24387_v29, 7  ;;  %v16175_v35 = vld [vmem:[#allocation8 + $0x30] ss:$8 sps:$4 sm:$0xff]   ;;  %11490 = vmatprep.subr.bf16.mxu1 %v16173_v23 }
 0x3af   : > { %v6889_v13 = vadd.f32 %v18252_v30, %v6734_v11  ;;  %v6735_v18 = vadd.f32 %v6479_v55, %v6351_v38  ;;  %v6480_v10 = vrot.slane %v24388_v6, 2  ;;  %v24389_v57 = vld [vmem:[#allocation122_spill] sm:$0xff]  ;;  %v24390_v38 = vld [vmem:[#allocation68_spill] sm:$0xff]  ;;  %v24394_v63 = vrot.slane %v19525_v28, 4 }
 0x3b0   : > { %v15916_v42 = vpack.c.bf16 %v7451_v47, %v7451_v47  ;;  %v7460_v51 = vrot.slane %v7452_v7, %v16806_v50  ;;  %8742 = vrot.lane.b32.xlu0 %v16139_v20, %s16459_s24  ;;  %v5872_v53 = vsel %vm17974_vm0, %v5870_v52, %v5871_v62  ;;  %v5873_v9 = vrot.slane %v5871_v62, 2 }
 0x3b1   : > { %v7017_v2 = vmax.f32 %v6889_v13, 0.0  ;;  %v6890_v37 = vadd.f32 %v18203_v19, %v6735_v18  ;;  %6139 = vrot.lane.b32.xlu1 %v5872_v53, %s16459_s24  ;;  %v6736_v22 = vadd.f32 %v6480_v10, %v6352_v1  ;;  %v5874_v11 = vrot.slane %v24389_v57, 7  ;;  %v16140_v13 = vld [vmem:[#allocation2 + $0x18] sm:$0xff]   ;;  %v19580_v18 = vpop.permute.xlu1 %6057  ;;  %11491 = vmatpush1.bf16.msra.mxu1 %v16175_v35  ;;  %v19592_v35 = vpop.permute.xlu0 %6059 }
 0x3b2   : > { %v7997_v44 = vshrl.u32 %v15916_v42, 16  ;;  %v8000_v55 = vshll.u32 %v15916_v42, 16  ;;  %v6481_v47 = vrot.slane %v24390_v38, 2  ;;  %v6353_v52 = vadd.f32 %v19408_v24, %v24388_v6  ;;  %v16178_v1 = vld [vmem:[#allocation8 + $0x24] ss:$8 sps:$4 sm:$0xff]  }
 0x3b3   : > { %v7453_v7 = vcombine.low %v7016_v59, %v7017_v2  ;;  %v7018_v20 = vmax.f32 %v6890_v37, 0.0  ;;  %v6891_v16 = vadd.f32 %v18237_v31, %v6736_v22  ;;  %v5875_v62 = vsel %vm17974_vm0, %v5873_v9, %v5874_v11  ;;  %v24391_v42 = vld [vmem:[#allocation75_spill] sm:$0xff]  ;;  %v24392_v9 = vld [vmem:[#allocation73_spill] sm:$0xff]  ;;  %11492 = vmatprep.subr.bf16.mxu1 %v16178_v1 }
 0x3b4   : > { %v7999_v10 = vrot.slane %v7997_v44, 7  ;;  %6141 = vrot.lane.b32.xlu0 %v5875_v62, %s16459_s24  ;;  %v6737_v23 = vadd.f32 %v6481_v47, %v6353_v52  ;;  %v6482_v53 = vrot.slane %v24391_v42, 2  ;;  %v6354_v24 = vadd.f32 %v19416_v46, %v24390_v38  ;;  %v16180_v59 = vld [vmem:[#allocation8 + $0x20] ss:$8 sps:$4 sm:$0xff]   ;;  %v16181_v62 = vld [vmem:[#allocation8 + $0x14] ss:$8 sps:$4 sm:$0xff]  }
 0x3b5   : > { %v7467_v6 = vrot.slane %v7453_v7, %v16806_v50  ;;  %v7019_v2 = vmax.f32 %v6891_v16, 0.0  ;;  %8746 = vrot.lane.b32.xlu1 %v16140_v13, %s16459_s24  ;;  %v6483_v37 = vrot.slane %v24392_v9, 2  ;;  %v24393_v22 = vld [vmem:[#allocation71_spill] sm:$0xff]  ;;  %v16141_v46 = vld [vmem:[#allocation2 + $0x14] ss:$0 sps:$4 sm:$0x11]   ;;  %11493 = vmatpush1.bf16.msra.mxu1 %v16180_v59  ;;  %v6356_v59 = vadd.f32 %v19448_v39, %v24392_v9 }
 0x3b6   : > { %v6355_v44 = vadd.f32 %v19432_v32, %v24393_v22  ;;  %v8002_v47 = vor.u32 %v8000_v55, %v7999_v10  ;;  %v8004_v52 = vrot.slane %v7999_v10, 4  ;;  %v6892_v42 = vadd.f32 %v18220_v3, %v6737_v23  ;;  %v8252_v38 = vld [vmem:[#allocation2 + $0x5c] sm:$0x1]  ;;  %v16183_v23 = vld [vmem:[#allocation8 + $0x10] ss:$8 sps:$4 sm:$0xff]   ;;  %11494 = vmatprep.subr.bf16.mxu1 %v16181_v62  ;;  %v24399_v9 = vld [vmem:[#allocation124_spill] sm:$0xff] }
 0x3b7   : > { %v6738_v57 = vadd.f32 %v6482_v53, %v6354_v24  ;;  %v7468_v7 = vcombine.low %v7460_v51, %v7467_v6  ;;  %v7469_v16 = vcombine.low %v7018_v20, %v7019_v2  ;;  %v5876_v13 = vrot.slane %v5874_v11, 2  ;;  %v24395_v20 = vld [vmem:[#allocation20_spill] sm:$0xff]  ;;  %v19606_v53 = vpop.permute.xlu1 %6061  ;;  %v24397_v2 = vld [vmem:[#allocation123_spill] sm:$0xff]  ;;  %v24398_v62 = vld [vmem:[#allocation74_spill] sm:$0xff] }
 0x3b8   : > { %v6739_v29 = vadd.f32 %v6483_v37, %v6355_v44  ;;  %v8003_v32 = vsel %vm16965_vm7, %v24394_v63, %v8002_v47  ;;  %v8253_v55 = vsel %vm16723_vm2, %v8004_v52, %v8252_v38  ;;  %v7020_v1 = vmax.f32 %v6892_v42, 0.0  ;;  %8744 = vrot.lane.b32.xlu0 %v16141_v46, %s16459_s24  ;;  %v24396_v6 = vld [vmem:[#allocation72_spill] sm:$0xff] }
 0x3b9   : > { %v6893_v10 = vadd.f32 %v18252_v30, %v6738_v57  ;;  %8251 = vst.msk [vmem:[#allocation2 + $0x58] sm:$0xf] %vm286_vm6, %v8003_v32  ;;  %8254 = vst [vmem:[#allocation2 + $0x5c] sm:$0x1] %v8253_v55  ;;  %v15917_v51 = vpack.c.bf16 %v7468_v7, %v7468_v7  ;;  %v7477_v11 = vrot.slane %v7469_v16, %v16806_v50  ;;  %v5877_v63 = vrot.slane %v24395_v20, 7  ;;  %v19616_v7 = vpop.permute.xlu0 %6063  ;;  %v24400_v55 = vld [vmem:[#allocation125_spill] sm:$0xff] }
 0x3ba   : > { %v6894_v28 = vadd.f32 %v18203_v19, %v6739_v29  ;;  %v6484_v57 = vrot.slane %v24396_v6, 2  ;;  %v5880_v37 = vrot.slane %v24397_v2, 7  ;;  %v6485_v38 = vrot.slane %v24398_v62, 2  ;;  %11495 = vmatpush1.bf16.msra.mxu1 %v16183_v23  ;;  %v16188_v23 = vld [vmem:[#allocation8] ss:$8 sps:$4 sm:$0xff]  }
 0x3bb   : > { %v7021_v24 = vmax.f32 %v6893_v10, 0.0  ;;  %v8006_v22 = vshrl.u32 %v15917_v51, 16  ;;  %v8009_v44 = vshll.u32 %v15917_v51, 16  ;;  %v5878_v52 = vsel %vm17974_vm0, %v5876_v13, %v5877_v63  ;;  %v16186_v13 = vld [vmem:[#allocation8 + $0x4] ss:$8 sps:$4 sm:$0xff]  }
 0x3bc   : > { %v7022_v47 = vmax.f32 %v6894_v28, 0.0  ;;  %6143 = vrot.lane.b32.xlu1 %v5878_v52, %s16459_s24  ;;  %v6740_v42 = vadd.f32 %v6484_v57, %v6356_v59  ;;  %v5879_v46 = vrot.slane %v5877_v63, 2  ;;  %v6357_v39 = vadd.f32 %v19457_v45, %v24396_v6  ;;  %v24401_v63 = vld [vmem:[#allocation76_spill] sm:$0xff]  ;;  %v16189_v57 = vld [vmem:[#allocation8 + $0xb4] ss:$8 sps:$4 sm:$0xff]   ;;  %v19634_v52 = vpop.permute.xlu1 %6065  ;;  %11496 = vmatprep.subr.bf16.mxu1 %v16186_v13 }
 0x3bd   : > { %v7470_v29 = vcombine.low %v7020_v1, %v7021_v24  ;;  %v19618_v16 = vrot.slane %v8006_v22, 7  ;;  %v15629_v32 = vrot.slane %v24399_v9, 9  ;;  %v5884_v10 = vrot.slane %v24400_v55, 7  ;;  %v24403_v45 = vld [vmem:[#allocation78_spill] sm:$0xff] }
 0x3be   : > { %v6895_v51 = vadd.f32 %v18237_v31, %v6740_v42  ;;  %v5881_v28 = vsel %vm17974_vm0, %v5879_v46, %v5880_v37  ;;  %v6486_v24 = vrot.slane %v24401_v63, 2  ;;  %v6741_v6 = vadd.f32 %v6485_v38, %v6357_v39  ;;  %11497 = vmatpush1.bf16.msra.mxu1 %v16188_v23  ;;  %v24402_v39 = vld [vmem:[#allocation22_spill] sm:$0xff] }
 0x3bf   : > { %v7484_v1 = vrot.slane %v7470_v29, %v16806_v50  ;;  %v8011_v59 = vor.u32 %v8009_v44, %v19618_v16  ;;  %6145 = vrot.lane.b32.xlu0 %v5881_v28, %s16459_s24  ;;  %v5885_v22 = vsel %vm17974_vm0, %v15629_v32, %v5884_v10  ;;  %v8255_v29 = vld [vmem:[#allocation2 + $0x60] sm:$0xf]  ;;  %v6358_v46 = vadd.f32 %v19471_v15, %v24398_v62  ;;  %v16191_v13 = vld [vmem:[#allocation8 + $0xb0] ss:$8 sps:$4 sm:$0xff]  }
 0x3c0   : > { %v7023_v37 = vmax.f32 %v6895_v51, 0.0  ;;  %6147 = vrot.lane.b32.xlu1 %v5885_v22, %s16459_s24  ;;  %v5886_v44 = vrot.slane %v5884_v10, 2  ;;  %v6896_v38 = vadd.f32 %v18220_v3, %v6741_v6  ;;  %v23793_v32 = vrot.slane %v24402_v39, 7  ;;  %11506 = vmatprep.subr.bf16.mxu1 %v16189_v57  ;;  %v16142_v62 = vld [vmem:[#allocation2 + $0x24] sm:$0xff]   ;;  %v19646_v10 = vpop.permute.xlu0 %6067 }
 0x3c1   : > { %v7485_v42 = vcombine.low %v7477_v11, %v7484_v1  ;;  %v8256_v28 = vsel %vm17140_vm8, %v8011_v59, %v8255_v29  ;;  %v6487_v9 = vrot.slane %v24403_v45, 2  ;;  %v6742_v51 = vadd.f32 %v6486_v24, %v6358_v46  ;;  %v24404_v6 = vld [vmem:[#allocation77_spill] sm:$0xff] }
 0x3c2   : > { %8257 = vst [vmem:[#allocation2 + $0x60] sm:$0xf] %v8256_v28  ;;  %v7486_v1 = vcombine.low %v7022_v47, %v7023_v37  ;;  %v6359_v15 = vadd.f32 %v19483_v33, %v24401_v63  ;;  %v7024_v23 = vmax.f32 %v6896_v38, 0.0  ;;  %v5888_v59 = vsel %vm17974_vm0, %v5886_v44, %v23793_v32  ;;  %v16143_v63 = vld [vmem:[#allocation2 + $0x20] ss:$0 sps:$4 sm:$0x11]   ;;  %11507 = vmatpush2.bf16.msra.mxu1 %v16191_v13 }
 0x3c3   : > { %v15918_v11 = vpack.c.bf16 %v7485_v42, %v7485_v42  ;;  %v6488_v22 = vrot.slane %v24404_v6, 2  ;;  %v6360_v57 = vadd.f32 %v19499_v60, %v24403_v45  ;;  %v6897_v33 = vadd.f32 %v18252_v30, %v6742_v51  ;;  %6149 = vrot.lane.b32.xlu0 %v5888_v59, %s16459_s24  ;;  %v16197_v42 = vld [vmem:[#allocation8 + $0xa4] ss:$8 sps:$4 sm:$0xff]   ;;  %v16199_v37 = vld [vmem:[#allocation8 + $0xa0] ss:$8 sps:$4 sm:$0xff]   ;;  %v19662_v45 = vpop.permute.xlu1 %6069  ;;  %v16144_v51 = vld [vmem:[#allocation2 + $0x30] sm:$0xff]  }
 0x3c4   : > { %v7494_v24 = vrot.slane %v7486_v1, %v16806_v50  ;;  %8750 = vrot.lane.b32.xlu1 %v16142_v62, %s16459_s24  ;;  %v6743_v46 = vadd.f32 %v6487_v9, %v6359_v15  ;;  %v24405_v28 = vld [vmem:[#allocation79_spill] sm:$0xff]  ;;  %v6361_v60 = vadd.f32 %v19515_v58, %v24404_v6  ;;  %v24406_v32 = vld [vmem:[#allocation80_spill] sm:$0xff]  ;;  %11508 = vmatprep.subr.bf16.mxu1 %v16197_v42  ;;  %v19670_v58 = vpop.permute.xlu0 %6071  ;;  %v8259_v6 = vld [vmem:[#allocation2 + $0x68] sm:$0x1] }
 0x3c5   : > { %v8014_v29 = vshrl.u32 %v15918_v11, 16  ;;  %v8017_v47 = vshll.u32 %v15918_v11, 16  ;;  %v6744_v44 = vadd.f32 %v6488_v22, %v6360_v57  ;;  %v6489_v38 = vrot.slane %v24405_v28, 2  ;;  %v24407_v57 = vld [vmem:[#allocation81_spill] sm:$0xff] }
 0x3c6   : > { %v7025_v1 = vmax.f32 %v6897_v33, 0.0  ;;  %v6490_v59 = vrot.slane %v24406_v32, 2  ;;  %v6362_v62 = vadd.f32 %v19532_v17, %v24405_v28  ;;  %v6898_v9 = vadd.f32 %v18203_v19, %v6743_v46  ;;  %v24408_v28 = vld [vmem:[#allocation82_spill] sm:$0xff]  ;;  %11509 = vmatpush2.bf16.msra.mxu1 %v16199_v37 }
 0x3c7   : > { %v8016_v11 = vrot.slane %v8014_v29, 7  ;;  %v6899_v15 = vadd.f32 %v18237_v31, %v6744_v44  ;;  %v6745_v22 = vadd.f32 %v6489_v38, %v6361_v60  ;;  %v6491_v55 = vrot.slane %v24407_v57, 2  ;;  %8748 = vrot.lane.b32.xlu0 %v16143_v63, %s16459_s24 }
 0x3c8   : > { %v7487_v33 = vcombine.low %v7024_v23, %v7025_v1  ;;  %8754 = vrot.lane.b32.xlu1 %v16144_v51, %s16459_s24  ;;  %v6746_v32 = vadd.f32 %v6490_v59, %v6362_v62  ;;  %v7026_v17 = vmax.f32 %v6898_v9, 0.0  ;;  %v6363_v44 = vadd.f32 %v19540_v40, %v24408_v28  ;;  %v19685_v1 = vpop.permute.xlu1 %6073 }
 0x3c9   : > { %v8019_v13 = vor.u32 %v8017_v47, %v8016_v11  ;;  %v8021_v29 = vrot.slane %v8016_v11, 4  ;;  %v7027_v42 = vmax.f32 %v6899_v15, 0.0  ;;  %v6900_v46 = vadd.f32 %v18220_v3, %v6745_v22  ;;  %v16145_v11 = vld [vmem:[#allocation2 + $0x2c] ss:$0 sps:$4 sm:$0x11]   ;;  %v24411_v15 = vld [vmem:[#allocation126_spill] sm:$0xff] }
 0x3ca   : > { %v24409_v38 = vrot.slane %v19618_v16, 4  ;;  %v7501_v63 = vrot.slane %v7487_v33, %v16806_v50  ;;  %v6901_v60 = vadd.f32 %v18252_v30, %v6746_v32  ;;  %v6747_v51 = vadd.f32 %v6491_v55, %v6363_v44 }
 0x3cb   : > { %v8260_v23 = vsel %vm16723_vm2, %v8021_v29, %v8259_v6  ;;  %v7503_v40 = vcombine.low %v7026_v17, %v7027_v42  ;;  %v7028_v37 = vmax.f32 %v6900_v46, 0.0  ;;  %v24410_v16 = vrot.slane %v24402_v39, 7  ;;  %8752 = vrot.lane.b32.xlu0 %v16145_v11, %s16459_s24  ;;  %v24412_v6 = vld [vmem:[#allocation83_spill] sm:$0xff]  ;;  %v19698_v42 = vpop.permute.xlu0 %6075 }
 0x3cc   : > { %v8020_v47 = vsel %vm16965_vm7, %v24409_v38, %v8019_v13  ;;  %8261 = vst [vmem:[#allocation2 + $0x68] sm:$0x1] %v8260_v23  ;;  %v7502_v62 = vcombine.low %v7494_v24, %v7501_v63  ;;  %v7029_v9 = vmax.f32 %v6901_v60, 0.0  ;;  %v5890_v22 = vrot.slane %v24411_v15, 7  ;;  %v24413_v17 = vld [vmem:[#allocation127_spill] sm:$0xff]  ;;  %v19702_v38 = vpop.permute.xlu1 %6077  ;;  %v24414_v63 = vld [vmem:[#allocation84_spill] sm:$0xff] }
 0x3cd   : > { %8258 = vst.msk [vmem:[#allocation2 + $0x64] sm:$0xf] %vm286_vm6, %v8020_v47  ;;  %v5889_v59 = vrot.slane %v24410_v16, 2  ;;  %v6492_v13 = vrot.slane %v24412_v6, 2  ;;  %v7511_v29 = vrot.slane %v7503_v40, %v16806_v50  ;;  %v6902_v33 = vadd.f32 %v18203_v19, %v6747_v51 }
 0x3ce   : > { %v6364_v32 = vadd.f32 %v19558_v21, %v24407_v57  ;;  %v5893_v55 = vrot.slane %v24413_v17, 7  ;;  %v15919_v46 = vpack.c.bf16 %v7502_v62, %v7502_v62  ;;  %v7504_v24 = vcombine.low %v7028_v37, %v7029_v9  ;;  %v24415_v62 = vld [vmem:[#allocation21_spill] sm:$0xff] }
 0x3cf   : > { %v5891_v28 = vsel %vm17974_vm0, %v5889_v59, %v5890_v22  ;;  %v5892_v44 = vrot.slane %v5890_v22, 2  ;;  %v7030_v47 = vmax.f32 %v6902_v33, 0.0  ;;  %v6493_v60 = vrot.slane %v24414_v63, 2  ;;  %v19714_v22 = vpop.permute.xlu0 %6079 }
 0x3d0   : > { %6151 = vrot.lane.b32.xlu1 %v5891_v28, %s16459_s24  ;;  %v6748_v23 = vadd.f32 %v6492_v13, %v6364_v32  ;;  %v6365_v21 = vadd.f32 %v19569_v43, %v24412_v6  ;;  %v8023_v57 = vshrl.u32 %v15919_v46, 16  ;;  %v8026_v11 = vshll.u32 %v15919_v46, 16  ;;  %v24416_v43 = vld [vmem:[#allocation86_spill] sm:$0xff]  ;;  %v19719_v46 = vpop.permute.xlu1 %6081 }
 0x3d1   : > { %v7518_v40 = vrot.slane %v7504_v24, %v16806_v50  ;;  %v5894_v37 = vsel %vm17974_vm0, %v5892_v44, %v5893_v55  ;;  %v5895_v59 = vrot.slane %v5893_v55, 2  ;;  %v5896_v9 = vrot.slane %v24415_v62, 7 }
 0x3d2   : > { %v6903_v51 = vadd.f32 %v18237_v31, %v6748_v23  ;;  %6153 = vrot.lane.b32.xlu0 %v5894_v37, %s16459_s24  ;;  %v6749_v16 = vadd.f32 %v6493_v60, %v6365_v21  ;;  %v8025_v13 = vrot.slane %v8023_v57, 7  ;;  %v6494_v6 = vrot.slane %v24416_v43, 2  ;;  %v16200_v23 = vld [vmem:[#allocation8 + $0x94] ss:$8 sps:$4 sm:$0xff]  }
 0x3d3   : > { %v7519_v33 = vcombine.low %v7511_v29, %v7518_v40  ;;  %v6366_v32 = vadd.f32 %v19580_v18, %v24414_v63  ;;  %v5897_v44 = vsel %vm17974_vm0, %v5895_v59, %v5896_v9  ;;  %v5898_v55 = vrot.slane %v5896_v9, 2  ;;  %v8262_v60 = vld [vmem:[#allocation2 + $0x6c] sm:$0xf]  ;;  %v16202_v40 = vld [vmem:[#allocation8 + $0x90] ss:$8 sps:$4 sm:$0xff]   ;;  %11510 = vmatprep.subr.bf16.mxu1 %v16200_v23 }
 0x3d4   : > { %v7031_v24 = vmax.f32 %v6903_v51, 0.0  ;;  %v6904_v28 = vadd.f32 %v18220_v3, %v6749_v16  ;;  %v8028_v21 = vor.u32 %v8026_v11, %v8025_v13  ;;  %v8029_v37 = vrot.slane %v8025_v13, 4  ;;  %6155 = vrot.lane.b32.xlu1 %v5897_v44, %s16459_s24  ;;  %v24417_v63 = vld [vmem:[#allocation129_spill] sm:$0xff]  ;;  %v16203_v16 = vld [vmem:[#allocation8 + $0x84] ss:$8 sps:$4 sm:$0xff]   ;;  %11511 = vmatpush2.bf16.msra.mxu1 %v16202_v40  ;;  %v19736_v44 = vpop.permute.xlu0 %6085 }
 0x3d5   : > { %v15920_v57 = vpack.c.bf16 %v7519_v33, %v7519_v33  ;;  %v6750_v29 = vadd.f32 %v6494_v6, %v6366_v32  ;;  %v5899_v17 = vrot.slane %v24417_v63, 7  ;;  %v24418_v51 = vld [vmem:[#allocation85_spill] sm:$0xff]  ;;  %v16146_v13 = vld [vmem:[#allocation2 + $0x3c] sm:$0xff]   ;;  %v6367_v32 = vadd.f32 %v19592_v35, %v24416_v43  ;;  %11512 = vmatprep.subr.bf16.mxu1 %v16203_v16 }
 0x3d6   : > { %v7520_v62 = vcombine.low %v7030_v47, %v7031_v24  ;;  %v7032_v18 = vmax.f32 %v6904_v28, 0.0  ;;  %v6495_v15 = vrot.slane %v24418_v51, 2  ;;  %v8263_v59 = vsel %vm17140_vm8, %v8028_v21, %v8262_v60  ;;  %v16205_v33 = vld [vmem:[#allocation8 + $0x80] ss:$8 sps:$4 sm:$0xff]  }
 0x3d7   : > { %v8031_v9 = vshrl.u32 %v15920_v57, 16  ;;  %v8034_v39 = vshll.u32 %v15920_v57, 16  ;;  %v6905_v11 = vadd.f32 %v18252_v30, %v6750_v29  ;;  %8264 = vst [vmem:[#allocation2 + $0x6c] sm:$0xf] %v8263_v59  ;;  %v5900_v6 = vsel %vm17974_vm0, %v5898_v55, %v5899_v17  ;;  %v24419_v24 = vld [vmem:[#allocation87_spill] sm:$0xff]  ;;  %v24420_v21 = vld [vmem:[#allocation88_spill] sm:$0xff]  ;;  %v19743_v55 = vpop.permute.xlu1 %6083 }
 0x3d8   : > { %v7528_v47 = vrot.slane %v7520_v62, %v16806_v50  ;;  %v6496_v28 = vrot.slane %v24419_v24, 2  ;;  %6157 = vrot.lane.b32.xlu0 %v5900_v6, %s16459_s24  ;;  %8758 = vrot.lane.b32.xlu1 %v16146_v13, %s16459_s24  ;;  %v6368_v62 = vadd.f32 %v19606_v53, %v24418_v51  ;;  %v6497_v57 = vrot.slane %v24420_v21, 2  ;;  %v24421_v40 = vld [vmem:[#allocation128_spill] sm:$0xff]  ;;  %v8266_v59 = vld [vmem:[#allocation2 + $0x74] sm:$0x1] }
 0x3d9   : > { %v8033_v23 = vrot.slane %v8031_v9, 7  ;;  %v7033_v60 = vmax.f32 %v6905_v11, 0.0  ;;  %v6751_v29 = vadd.f32 %v6495_v15, %v6367_v32  ;;  %v6369_v35 = vadd.f32 %v19616_v7, %v24419_v24  ;;  %v16147_v13 = vld [vmem:[#allocation2 + $0x38] ss:$0 sps:$4 sm:$0x11]   ;;  %11513 = vmatpush2.bf16.msra.mxu1 %v16205_v33 }
 0x3da   : > { %v5901_v43 = vrot.slane %v5899_v17, 2  ;;  %v5902_v16 = vrot.slane %v24421_v40, 7  ;;  %v6752_v63 = vadd.f32 %v6496_v28, %v6368_v62  ;;  %v24422_v15 = vld [vmem:[#allocation23_spill] sm:$0xff]  ;;  %v19759_v33 = vpop.permute.xlu0 %6089 }
 0x3db   : > { %v8036_v9 = vor.u32 %v8034_v39, %v8033_v23  ;;  %v8038_v11 = vrot.slane %v8033_v23, 4  ;;  %v7521_v6 = vcombine.low %v7032_v18, %v7033_v60  ;;  %v6906_v53 = vadd.f32 %v18203_v19, %v6751_v29 }
 0x3dc   : > { %v6753_v51 = vadd.f32 %v6497_v57, %v6369_v35  ;;  %v5903_v2 = vsel %vm17974_vm0, %v5901_v43, %v5902_v16  ;;  %v6498_v32 = vrot.slane %v24422_v15, 2  ;;  %v6907_v18 = vadd.f32 %v18237_v31, %v6752_v63  ;;  %8756 = vrot.lane.b32.xlu0 %v16147_v13, %s16459_s24  ;;  %v19770_v63 = vpop.permute.xlu1 %6087  ;;  %v24425_v15 = vld [vmem:[#allocation93_spill] sm:$0xff] }
 0x3dd   : > { %v8037_v7 = vsel %vm16965_vm7, %v8029_v37, %v8036_v9  ;;  %v8267_v17 = vsel %vm16723_vm2, %v8038_v11, %v8266_v59  ;;  %v7535_v39 = vrot.slane %v7521_v6, %v16806_v50  ;;  %v7034_v24 = vmax.f32 %v6906_v53, 0.0  ;;  %6159 = vrot.lane.b32.xlu1 %v5903_v2, %s16459_s24  ;;  %v24423_v9 = vld [vmem:[#allocation89_spill] sm:$0xff]  ;;  %v24424_v6 = vld [vmem:[#allocation91_spill] sm:$0xff] }
 0x3de   : > { %8265 = vst.msk [vmem:[#allocation2 + $0x70] sm:$0xf] %vm286_vm6, %v8037_v7  ;;  %8268 = vst [vmem:[#allocation2 + $0x74] sm:$0x1] %v8267_v17  ;;  %v6908_v28 = vadd.f32 %v18220_v3, %v6753_v51  ;;  %v6370_v37 = vadd.f32 %v19634_v52, %v24420_v21  ;;  %v19768_v23 = vcombine.high %v24421_v40, %v24421_v40  ;;  %v7035_v62 = vmax.f32 %v6907_v18, 0.0  ;;  %v16148_v11 = vld [vmem:[#allocation2 + $0x48] sm:$0xff]  }
 0x3df   : > { %v7536_v60 = vcombine.low %v7528_v47, %v7535_v39  ;;  %v5904_v57 = vrot.slane %v5902_v16, 2  ;;  %v6499_v29 = vrot.slane %v24307_v54, 2  ;;  %v6371_v2 = vadd.f32 %v19646_v10, %v24423_v9  ;;  %v24427_v9 = vld [vmem:[#allocation94_spill] sm:$0xff] }
 0x3e0   : > { %v7036_v35 = vmax.f32 %v6908_v28, 0.0  ;;  %v6754_v43 = vadd.f32 %v6498_v32, %v6370_v37  ;;  %v5905_v59 = vrot.slane %v19768_v23, 7  ;;  %v7537_v21 = vcombine.low %v7034_v24, %v7035_v62  ;;  %v19786_v18 = vpop.permute.xlu0 %6093  ;;  %v16149_v24 = vld [vmem:[#allocation2 + $0x44] ss:$0 sps:$4 sm:$0x11]   ;;  %v16150_v37 = vld [vmem:[#allocation2 + $0x54] sm:$0xff]  }
 0x3e1   : > { %v15921_v52 = vpack.c.bf16 %v7536_v60, %v7536_v60  ;;  %v6500_v13 = vrot.slane %v24424_v6, 2  ;;  %v6372_v53 = vadd.f32 %v19662_v45, %v24307_v54  ;;  %v6755_v51 = vadd.f32 %v6499_v29, %v6371_v2  ;;  %8762 = vrot.lane.b32.xlu1 %v16148_v11, %s16459_s24  ;;  %v24426_v60 = vld [vmem:[#allocation92_spill] sm:$0xff] }
 0x3e2   : > { %v6909_v47 = vadd.f32 %v18252_v30, %v6754_v43  ;;  %v5906_v16 = vsel %vm17974_vm0, %v5904_v57, %v5905_v59  ;;  %v6501_v32 = vrot.slane %v24425_v15, 2  ;;  %v7545_v17 = vrot.slane %v7537_v21, %v16806_v50  ;;  %v19792_v57 = vpop.permute.xlu1 %6091 }
 0x3e3   : > { %v8040_v7 = vshrl.u32 %v15921_v52, 16  ;;  %v8043_v10 = vshll.u32 %v15921_v52, 16  ;;  %6161 = vrot.lane.b32.xlu0 %v5906_v16, %s16459_s24  ;;  %v6756_v39 = vadd.f32 %v6500_v13, %v6372_v53  ;;  %v6910_v45 = vadd.f32 %v18203_v19, %v6755_v51  ;;  %v8269_v16 = vld [vmem:[#allocation2 + $0x78] sm:$0xf] }
 0x3e4   : > { %v7037_v54 = vmax.f32 %v6909_v47, 0.0  ;;  %v6373_v28 = vadd.f32 %v19670_v58, %v24424_v6  ;;  %v6502_v62 = vrot.slane %v24426_v60, 2  ;;  %v6374_v59 = vadd.f32 %v19685_v1, %v24425_v15  ;;  %v16152_v15 = vld [vmem:[#allocation2 + $0x5c] ss:$0 sps:$4 sm:$0x11]  }
 0x3e5   : > { %v19794_v29 = vrot.slane %v8040_v7, 7  ;;  %v6911_v43 = vadd.f32 %v18237_v31, %v6756_v39  ;;  %v6503_v2 = vrot.slane %v24427_v9, 2  ;;  %v7038_v52 = vmax.f32 %v6910_v45, 0.0  ;;  %8766 = vrot.lane.b32.xlu1 %v16150_v37, %s16459_s24  ;;  %v19809_v7 = vpop.permute.xlu0 %6097  ;;  %v8461_v34 = vld [vmem:[#allocation2 + $0x74] sm:$0x1] }
 0x3e6   : > { %v7538_v11 = vcombine.low %v7036_v35, %v7037_v54  ;;  %v6757_v21 = vadd.f32 %v6501_v32, %v6373_v28  ;;  %v6375_v58 = vadd.f32 %v19698_v42, %v24426_v60  ;;  %v6758_v47 = vadd.f32 %v6502_v62, %v6374_v59  ;;  %v16151_v54 = vld [vmem:[#allocation2 + $0x50] ss:$0 sps:$4 sm:$0x11]  }
 0x3e7   : > { %v8045_v6 = vor.u32 %v8043_v10, %v19794_v29  ;;  %v8046_v13 = vrot.slane %v19794_v29, 4  ;;  %v7039_v53 = vmax.f32 %v6911_v43, 0.0  ;;  %8760 = vrot.lane.b32.xlu0 %v16149_v24, %s16459_s24  ;;  %v6504_v32 = vrot.slane %v18725_v5, 2  ;;  %v19816_v24 = vpop.permute.xlu1 %6095 }
 0x3e8   : > { %v7552_v1 = vrot.slane %v7538_v11, %v16806_v50  ;;  %v6912_v35 = vadd.f32 %v18220_v3, %v6757_v21  ;;  %v6759_v51 = vadd.f32 %v6503_v2, %v6375_v58  ;;  %v6913_v39 = vadd.f32 %v18252_v30, %v6758_v47 }
 0x3e9   : > { %v8270_v42 = vsel %vm17140_vm8, %v8045_v6, %v8269_v16  ;;  %v7554_v10 = vcombine.low %v7038_v52, %v7039_v53  ;;  %v6376_v45 = vadd.f32 %v19702_v38, %v24427_v9  ;;  %8768 = vrot.lane.b32.xlu1 %v16152_v15, %s16459_s24  ;;  %v6505_v62 = vrot.slane %v18742_v36, 2  ;;  %v16154_v52 = vld [vmem:[#allocation2 + $0x68] ss:$0 sps:$4 sm:$0x11]   ;;  %v16153_v53 = vld [vmem:[#allocation2 + $0x60] sm:$0xff]  }
 0x3ea   : > { %8271 = vst [vmem:[#allocation2 + $0x78] sm:$0xf] %v8270_v42  ;;  %v7553_v28 = vcombine.low %v7545_v17, %v7552_v1  ;;  %v7040_v37 = vmax.f32 %v6912_v35, 0.0  ;;  %v6914_v60 = vadd.f32 %v18203_v19, %v6759_v51  ;;  %v7041_v59 = vmax.f32 %v6913_v39, 0.0  ;;  %v16155_v42 = vld [vmem:[#allocation2 + $0x6c] sm:$0xff]  }
 0x3eb   : > { %v7562_v43 = vrot.slane %v7554_v10, %v16806_v50  ;;  %8764 = vrot.lane.b32.xlu0 %v16151_v54, %s16459_s24  ;;  %v6760_v2 = vadd.f32 %v6504_v32, %v6376_v45  ;;  %v6377_v38 = vadd.f32 %v19714_v22, %v18725_v5  ;;  %v6506_v17 = vrot.slane %v18728_v8, 2  ;;  %v19830_v1 = vpop.permute.xlu1 %6099  ;;  %v24428_v22 = vld [vmem:[#allocation96_spill] sm:$0xff]  ;;  %v19835_v15 = vpop.permute.xlu0 %6101 }
 0x3ec   : > { %v15922_v9 = vpack.c.bf16 %v7553_v28, %v7553_v28  ;;  %v7042_v11 = vmax.f32 %v6914_v60, 0.0  ;;  %v6378_v21 = vadd.f32 %v19719_v46, %v18742_v36  ;;  %v7555_v58 = vcombine.low %v7040_v37, %v7041_v59  ;;  %v24429_v28 = vld [vmem:[#allocation95_spill] sm:$0xff] }
 0x3ed   : > { %v6915_v6 = vadd.f32 %v18237_v31, %v6760_v2  ;;  %v6761_v47 = vadd.f32 %v6505_v62, %v6377_v38  ;;  %v6508_v16 = vrot.slane %v24330_v48, 2  ;;  %8772 = vrot.lane.b32.xlu1 %v16154_v52, %s16459_s24  ;;  %v6380_v8 = vadd.f32 %v19736_v44, %v24428_v22  ;;  %v24430_v59 = vld [vmem:[#allocation99_spill] sm:$0xff] }
 0x3ee   : > { %v8048_v35 = vshrl.u32 %v15922_v9, 16  ;;  %v8051_v51 = vshll.u32 %v15922_v9, 16  ;;  %v6762_v5 = vadd.f32 %v6506_v17, %v6378_v21  ;;  %v7569_v36 = vrot.slane %v7555_v58, %v16806_v50  ;;  %v8273_v21 = vld [vmem:[#allocation2 + $0x80] sm:$0x1] }
 0x3ef   : > { %v7043_v46 = vmax.f32 %v6915_v6, 0.0  ;;  %8770 = vrot.lane.b32.xlu0 %v16153_v53, %s16459_s24  ;;  %v6916_v32 = vadd.f32 %v18220_v3, %v6761_v47  ;;  %v6507_v10 = vrot.slane %v24428_v22, 2  ;;  %v6764_v45 = vadd.f32 %v6508_v16, %v6380_v8  ;;  %v24431_v47 = vld [vmem:[#allocation97_spill] sm:$0xff] }
 0x3f0   : > { %v8050_v39 = vrot.slane %v8048_v35, 7  ;;  %v6917_v54 = vadd.f32 %v18252_v30, %v6762_v5  ;;  %v6379_v37 = vadd.f32 %v19743_v55, %v24429_v28  ;;  %v7570_v44 = vcombine.low %v7562_v43, %v7569_v36  ;;  %v24433_v28 = vld [vmem:[#allocation100_spill] sm:$0xff] }
 0x3f1   : > { %v7571_v60 = vcombine.low %v7042_v11, %v7043_v46  ;;  %v7044_v62 = vmax.f32 %v6916_v32, 0.0  ;;  %v6510_v2 = vrot.slane %v24430_v59, 2  ;;  %v6919_v17 = vadd.f32 %v18237_v31, %v6764_v45  ;;  %v19850_v43 = vpop.permute.xlu0 %6105  ;;  %v19852_v11 = vpop.permute.xlu1 %6103  ;;  %v16156_v46 = vld [vmem:[#allocation2 + $0x74] ss:$0 sps:$4 sm:$0x11]  }
 0x3f2   : > { %v8053_v38 = vor.u32 %v8051_v51, %v8050_v39  ;;  %v8055_v9 = vrot.slane %v8050_v39, 4  ;;  %v7045_v52 = vmax.f32 %v6917_v54, 0.0  ;;  %v15923_v58 = vpack.c.bf16 %v7570_v44, %v7570_v44 }
 0x3f3   : > { %v7579_v6 = vrot.slane %v7571_v60, %v16806_v50  ;;  %8774 = vrot.lane.b32.xlu0 %v16155_v42, %s16459_s24  ;;  %v6763_v53 = vadd.f32 %v6507_v10, %v6379_v37  ;;  %v6382_v55 = vadd.f32 %v19759_v33, %v24431_v47  ;;  %v7047_v5 = vmax.f32 %v6919_v17, 0.0  ;;  %v24432_v42 = vld [vmem:[#allocation102_spill] sm:$0xff] }
 0x3f4   : > { %v8054_v16 = vsel %vm16965_vm7, %v8046_v13, %v8053_v38  ;;  %v8274_v35 = vsel %vm16723_vm2, %v8055_v9, %v8273_v21  ;;  %v7572_v51 = vcombine.low %v7044_v62, %v7045_v52  ;;  %v8057_v22 = vshrl.u32 %v15923_v58, 16  ;;  %v8276_v21 = vld [vmem:[#allocation2 + $0x84] sm:$0xf] }
 0x3f5   : > { %8272 = vst.msk [vmem:[#allocation2 + $0x7c] sm:$0xf] %vm286_vm6, %v8054_v16  ;;  %8275 = vst [vmem:[#allocation2 + $0x80] sm:$0x1] %v8274_v35  ;;  %v8060_v8 = vshll.u32 %v15923_v58, 16  ;;  %v6918_v33 = vadd.f32 %v18203_v19, %v6763_v53  ;;  %v6766_v36 = vadd.f32 %v6510_v2, %v6382_v55  ;;  %v6509_v29 = vrot.slane %v24431_v47, 2 }
 0x3f6   : > { %v7586_v32 = vrot.slane %v7572_v51, %v16806_v50  ;;  %v6381_v13 = vadd.f32 %v19770_v63, %v24330_v48  ;;  %v6512_v10 = vrot.slane %v24432_v42, 2  ;;  %v8059_v39 = vrot.slane %v8057_v22, 7  ;;  %v19876_v17 = vpop.permute.xlu1 %6107 }
 0x3f7   : > { %v7046_v54 = vmax.f32 %v6918_v33, 0.0  ;;  %v6921_v45 = vadd.f32 %v18252_v30, %v6766_v36  ;;  %8776 = vrot.lane.b32.xlu0 %v16156_v46, %s16459_s24  ;;  %v6384_v37 = vadd.f32 %v19786_v18, %v24433_v28  ;;  %v6511_v62 = vrot.slane %v24433_v28, 2  ;;  %v19874_v38 = vpop.permute.xlu0 %6109 }
 0x3f8   : > { %v7587_v44 = vcombine.low %v7579_v6, %v7586_v32  ;;  %v6765_v60 = vadd.f32 %v6509_v29, %v6381_v13  ;;  %v6383_v2 = vadd.f32 %v19792_v57, %v24430_v59  ;;  %v8062_v48 = vor.u32 %v8060_v8, %v8059_v39  ;;  %v24434_v59 = vld [vmem:[#allocation101_spill] sm:$0xff] }
 0x3f9   : > { %v8063_v63 = vrot.slane %v8059_v39, 4  ;;  %v7588_v9 = vcombine.low %v7046_v54, %v7047_v5  ;;  %v7049_v52 = vmax.f32 %v6921_v45, 0.0  ;;  %v6768_v18 = vadd.f32 %v6512_v10, %v6384_v37 }
 0x3fa   : > { %v15924_v58 = vpack.c.bf16 %v7587_v44, %v7587_v44  ;;  %v6920_v53 = vadd.f32 %v18220_v3, %v6765_v60  ;;  %v6767_v6 = vadd.f32 %v6511_v62, %v6383_v2  ;;  %v8277_v47 = vsel %vm17140_vm8, %v8062_v48, %v8276_v21  ;;  %v8280_v2 = vld [vmem:[#allocation2 + $0x8c] sm:$0x1] }
 0x3fb   : > { %v7596_v55 = vrot.slane %v7588_v9, %v16806_v50  ;;  %v6514_v57 = vrot.slane %v19258_v61, 2  ;;  %v6386_v16 = vadd.f32 %v19809_v7, %v24434_v59  ;;  %8278 = vst [vmem:[#allocation2 + $0x84] sm:$0xf] %v8277_v47  ;;  %v6923_v22 = vadd.f32 %v18237_v31, %v6768_v18  ;;  %v24435_v18 = vld [vmem:[#allocation103_spill] sm:$0xff] }
 0x3fc   : > { %v8065_v35 = vshrl.u32 %v15924_v58, 16  ;;  %v8068_v51 = vshll.u32 %v15924_v58, 16  ;;  %v7048_v5 = vmax.f32 %v6920_v53, 0.0  ;;  %v16157_v8 = vld [vmem:[#allocation2 + $0x78] sm:$0xff]   ;;  %v6922_v33 = vadd.f32 %v18203_v19, %v6767_v6  ;;  %v19890_v61 = vpop.permute.xlu0 %6113 }
 0x3fd   : > { %v6770_v36 = vadd.f32 %v6514_v57, %v6386_v16  ;;  %v6513_v46 = vrot.slane %v24434_v59, 2  ;;  %v6385_v32 = vadd.f32 %v19816_v24, %v24432_v42  ;;  %v16158_v29 = vld [vmem:[#allocation2 + $0x80] ss:$0 sps:$4 sm:$0x11]   ;;  %v7051_v10 = vmax.f32 %v6923_v22, 0.0  ;;  %8778 = vrot.lane.b32.xlu1 %v16157_v8, %s16459_s24  ;;  %v19894_v54 = vpop.permute.xlu1 %6111  ;;  %v24436_v59 = vld [vmem:[#allocation105_spill] sm:$0xff] }
 0x3fe   : > { %v8067_v13 = vrot.slane %v8065_v35, 7  ;;  %v7589_v7 = vcombine.low %v7048_v5, %v7049_v52  ;;  %v6516_v39 = vrot.slane %v18812_v56, 2  ;;  %v7050_v45 = vmax.f32 %v6922_v33, 0.0  ;;  %8780 = vrot.lane.b32.xlu0 %v16158_v29, %s16459_s24  ;;  %v24437_v5 = vld [vmem:[#allocation104_spill] sm:$0xff] }
 0x3ff   : > { %v6925_v28 = vadd.f32 %v18252_v30, %v6770_v36  ;;  %v6769_v37 = vadd.f32 %v6513_v46, %v6385_v32  ;;  %v6388_v44 = vadd.f32 %v19835_v15, %v18822_v41  ;;  %v6515_v62 = vrot.slane %v18822_v41, 2  ;;  %v24438_v46 = vld [vmem:[#allocation106_spill] sm:$0xff] }
 0x400   : > { %v8070_v24 = vor.u32 %v8068_v51, %v8067_v13  ;;  %v8072_v42 = vrot.slane %v8067_v13, 4  ;;  %v7603_v60 = vrot.slane %v7589_v7, %v16806_v50  ;;  %v7605_v48 = vcombine.low %v7050_v45, %v7051_v10 }
 0x401   : > { %v7053_v9 = vmax.f32 %v6925_v28, 0.0  ;;  %v6924_v52 = vadd.f32 %v18220_v3, %v6769_v37  ;;  %v6772_v21 = vadd.f32 %v6516_v39, %v6388_v44  ;;  %v6387_v6 = vadd.f32 %v19830_v1, %v24435_v18  ;;  %v24439_v28 = vld [vmem:[#allocation107_spill] sm:$0xff] }
 0x402   : > { %v8071_v58 = vsel %vm16965_vm7, %v8063_v63, %v8070_v24  ;;  %v8281_v15 = vsel %vm16723_vm2, %v8072_v42, %v8280_v2  ;;  %v7604_v53 = vcombine.low %v7596_v55, %v7603_v60  ;;  %v7613_v41 = vrot.slane %v7605_v48, %v16806_v50  ;;  %v6118_v35 = vpop.permute.xlu0 %6117  ;;  %v8283_v60 = vld [vmem:[#allocation2 + $0x90] sm:$0xf] }
 0x403   : > { %8279 = vst.msk [vmem:[#allocation2 + $0x88] sm:$0xf] %vm286_vm6, %v8071_v58  ;;  %8282 = vst [vmem:[#allocation2 + $0x8c] sm:$0x1] %v8281_v15  ;;  %v7052_v47 = vmax.f32 %v6924_v52, 0.0  ;;  %v6927_v57 = vadd.f32 %v18237_v31, %v6772_v21  ;;  %v6518_v16 = vrot.slane %v24436_v59, 2  ;;  %v6771_v63 = vadd.f32 %v6515_v62, %v6387_v6  ;;  %v6116_v8 = vpop.permute.xlu1 %6115 }
 0x404   : > { %v15925_v51 = vpack.c.bf16 %v7604_v53, %v7604_v53  ;;  %v6390_v22 = vadd.f32 %v19850_v43, %v24437_v5  ;;  %v6517_v55 = vrot.slane %v24437_v5, 2  ;;  %v6389_v36 = vadd.f32 %v19852_v11, %v18812_v56 }
 0x405   : > { %v7606_v1 = vcombine.low %v7052_v47, %v7053_v9  ;;  %v7055_v33 = vmax.f32 %v6927_v57, 0.0  ;;  %v6520_v32 = vrot.slane %v24438_v46, 2  ;;  %v6926_v7 = vadd.f32 %v18203_v19, %v6771_v63  ;;  %v24440_v9 = vld [vmem:[#allocation109_spill] sm:$0xff] }
 0x406   : > { %v8074_v29 = vshrl.u32 %v15925_v51, 16  ;;  %v8077_v13 = vshll.u32 %v15925_v51, 16  ;;  %v6774_v10 = vadd.f32 %v6518_v16, %v6390_v22  ;;  %v6773_v45 = vadd.f32 %v6517_v55, %v6389_v36  ;;  %v24441_v51 = vld [vmem:[#allocation108_spill] sm:$0xff] }
 0x407   : > { %v7620_v39 = vrot.slane %v7606_v1, %v16806_v50  ;;  %v6392_v43 = vadd.f32 %v19874_v38, %v24439_v28  ;;  %v6519_v37 = vrot.slane %v24439_v28, 2  ;;  %v7054_v24 = vmax.f32 %v6926_v7, 0.0  ;;  %v19927_v11 = vpop.permute.xlu0 %6121 }
 0x408   : > { %v8076_v44 = vrot.slane %v8074_v29, 7  ;;  %v6929_v42 = vadd.f32 %v18252_v30, %v6774_v10  ;;  %v6391_v56 = vadd.f32 %v19876_v17, %v24436_v59  ;;  %v6928_v2 = vadd.f32 %v18220_v3, %v6773_v45  ;;  %v19931_v21 = vpop.permute.xlu1 %6119 }
 0x409   : > { %v7621_v62 = vcombine.low %v7613_v41, %v7620_v39  ;;  %v6776_v48 = vadd.f32 %v6520_v32, %v6392_v43  ;;  %v6522_v52 = vrot.slane %v24440_v9, 2  ;;  %v7622_v15 = vcombine.low %v7054_v24, %v7055_v33 }
 0x40a   : > { %v8079_v38 = vor.u32 %v8077_v13, %v8076_v44  ;;  %v8080_v58 = vrot.slane %v8076_v44, 4  ;;  %v7057_v53 = vmax.f32 %v6929_v42, 0.0  ;;  %v16162_v18 = vld [vmem:[#allocation2 + $0x84] sm:$0xff]   ;;  %v7056_v47 = vmax.f32 %v6928_v2, 0.0 }
 0x40b   : > { %v15926_v6 = vpack.c.bf16 %v7621_v62, %v7621_v62  ;;  %v6775_v57 = vadd.f32 %v6519_v37, %v6391_v56  ;;  %v16163_v17 = vld [vmem:[#allocation2 + $0x8c] ss:$0 sps:$4 sm:$0x11]   ;;  %v7630_v41 = vrot.slane %v7622_v15, %v16806_v50  ;;  %v6931_v16 = vadd.f32 %v18237_v31, %v6776_v48  ;;  %8782 = vrot.lane.b32.xlu1 %v16162_v18, %s16459_s24  ;;  %v8287_v56 = vld [vmem:[#allocation2 + $0x98] sm:$0x1] }
 0x40c   : > { %v8284_v59 = vsel %vm17140_vm8, %v8079_v38, %v8283_v60  ;;  %v6394_v63 = vadd.f32 %v19890_v61, %v24441_v51  ;;  %v7623_v55 = vcombine.low %v7056_v47, %v7057_v53  ;;  %v6521_v1 = vrot.slane %v24441_v51, 2  ;;  %8784 = vrot.lane.b32.xlu0 %v16163_v17, %s16459_s24  ;;  %v6126_v13 = vpop.permute.xlu0 %6125  ;;  %v24442_v15 = vld [vmem:[#allocation113_spill] sm:$0xff] }
 0x40d   : > { %8285 = vst [vmem:[#allocation2 + $0x90] sm:$0xf] %v8284_v59  ;;  %v8082_v5 = vshrl.u32 %v15926_v6, 16  ;;  %v8085_v22 = vshll.u32 %v15926_v6, 16  ;;  %v6930_v33 = vadd.f32 %v18203_v19, %v6775_v57  ;;  %v6393_v32 = vadd.f32 %v19894_v54, %v24438_v46  ;;  %v6124_v45 = vpop.permute.xlu1 %6123 }
 0x40e   : > { %v6778_v36 = vadd.f32 %v6522_v52, %v6394_v63  ;;  %v6524_v29 = vrot.slane %v18880_v14, 2  ;;  %v7637_v7 = vrot.slane %v7623_v55, %v16806_v50  ;;  %v6396_v10 = vadd.f32 %v6118_v35, %v18864_v25 }
 0x40f   : > { %v8084_v61 = vrot.slane %v8082_v5, 7  ;;  %v6523_v39 = vrot.slane %v18864_v25, 2  ;;  %v7058_v28 = vmax.f32 %v6930_v33, 0.0  ;;  %v6777_v37 = vadd.f32 %v6521_v1, %v6393_v32  ;;  %v24444_v1 = vld [vmem:[#allocation112_spill] sm:$0xff] }
 0x410   : > { %v6933_v43 = vadd.f32 %v18252_v30, %v6778_v36  ;;  %v6395_v44 = vadd.f32 %v6116_v8, %v24366_v12  ;;  %v7638_v54 = vcombine.low %v7630_v41, %v7637_v7  ;;  %v6780_v46 = vadd.f32 %v6524_v29, %v6396_v10 }
 0x411   : > { %v8087_v24 = vor.u32 %v8085_v22, %v8084_v61  ;;  %v8089_v42 = vrot.slane %v8084_v61, 4  ;;  %v7059_v60 = vmax.f32 %v6931_v16, 0.0  ;;  %v6932_v2 = vadd.f32 %v18220_v3, %v6777_v37 }
 0x412   : > { %v7061_v62 = vmax.f32 %v6933_v43, 0.0  ;;  %v6779_v48 = vadd.f32 %v6523_v39, %v6395_v44  ;;  %v15927_v9 = vpack.c.bf16 %v7638_v54, %v7638_v54  ;;  %v6935_v52 = vadd.f32 %v18237_v31, %v6780_v46 }
 0x413   : > { %v8088_v25 = vsel %vm16965_vm7, %v8080_v58, %v8087_v24  ;;  %v8288_v35 = vsel %vm16723_vm2, %v8089_v42, %v8287_v56  ;;  %v7639_v12 = vcombine.low %v7058_v28, %v7059_v60  ;;  %v7060_v8 = vmax.f32 %v6932_v2, 0.0  ;;  %v6130_v18 = vpop.permute.xlu0 %6129  ;;  %v24443_v58 = vld [vmem:[#allocation111_spill] sm:$0xff]  ;;  %v6128_v59 = vpop.permute.xlu1 %6127 }
 0x414   : > { %8286 = vst.msk [vmem:[#allocation2 + $0x94] sm:$0xf] %vm286_vm6, %v8088_v25  ;;  %8289 = vst [vmem:[#allocation2 + $0x98] sm:$0x1] %v8288_v35  ;;  %v6934_v38 = vadd.f32 %v18203_v19, %v6779_v48  ;;  %v6526_v53 = vrot.slane %v24442_v15, 2  ;;  %v8091_v6 = vshrl.u32 %v15927_v9, 16  ;;  %v6398_v17 = vadd.f32 %v19927_v11, %v24443_v58 }
 0x415   : > { %v8094_v47 = vshll.u32 %v15927_v9, 16  ;;  %v7063_v57 = vmax.f32 %v6935_v52, 0.0  ;;  %v7640_v41 = vcombine.low %v7060_v8, %v7061_v62  ;;  %v6525_v51 = vrot.slane %v24443_v58, 2  ;;  %v24445_v48 = vld [vmem:[#allocation115_spill] sm:$0xff]  ;;  %v24447_v58 = vld [vmem:[#allocation117_spill] sm:$0xff] }
 0x416   : > { %v7062_v16 = vmax.f32 %v6934_v38, 0.0  ;;  %v6397_v63 = vadd.f32 %v19931_v21, %v18880_v14  ;;  %v19965_v5 = vrot.slane %v8091_v6, 7  ;;  %v6782_v22 = vadd.f32 %v6526_v53, %v6398_v17  ;;  %v8290_v21 = vld [vmem:[#allocation2 + $0x9c] sm:$0xf]  ;;  %v24446_v53 = vld [vmem:[#allocation118_spill] sm:$0xff] }
 0x417   : > { %v6528_v55 = vrot.slane %v24371_v0, 2  ;;  %v6400_v33 = vadd.f32 %v6126_v13, %v24444_v1  ;;  %v7647_v36 = vrot.slane %v7639_v12, %v16806_v50  ;;  %v7654_v32 = vrot.slane %v7640_v41, %v16806_v50 }
 0x418   : > { %v7656_v11 = vcombine.low %v7062_v16, %v7063_v57  ;;  %v6781_v29 = vadd.f32 %v6525_v51, %v6397_v63  ;;  %v8096_v61 = vor.u32 %v8094_v47, %v19965_v5  ;;  %v6937_v7 = vadd.f32 %v18252_v30, %v6782_v22 }
 0x419   : > { %v6784_v10 = vadd.f32 %v6528_v55, %v6400_v33  ;;  %v6527_v14 = vrot.slane %v24444_v1, 2  ;;  %v8097_v39 = vrot.slane %v19965_v5, 4  ;;  %v7655_v28 = vcombine.low %v7647_v36, %v7654_v32  ;;  %v6134_v37 = vpop.permute.xlu0 %6133  ;;  %v6132_v44 = vpop.permute.xlu1 %6131  ;;  %v8294_v33 = vld [vmem:[#allocation2 + $0xa4] sm:$0x1] }
 0x41a   : > { %v6936_v43 = vadd.f32 %v18220_v3, %v6781_v29  ;;  %v6399_v13 = vadd.f32 %v6124_v45, %v24442_v15  ;;  %v8291_v24 = vsel %vm17140_vm8, %v8096_v61, %v8290_v21  ;;  %v7664_v42 = vrot.slane %v7656_v11, %v16806_v50 }
 0x41b   : > { %v7065_v54 = vmax.f32 %v6937_v7, 0.0  ;;  %v6939_v46 = vadd.f32 %v18237_v31, %v6784_v10  ;;  %v16176_v56 = vld [vmem:[#allocation2 + $0x90] sm:$0xff]   ;;  %8292 = vst [vmem:[#allocation2 + $0x9c] sm:$0xf] %v8291_v24  ;;  %v15928_v60 = vpack.c.bf16 %v7655_v28, %v7655_v28  ;;  %v6402_v25 = vadd.f32 %v6130_v18, %v24445_v48 }
 0x41c   : > { %v7064_v62 = vmax.f32 %v6936_v43, 0.0  ;;  %v6783_v2 = vadd.f32 %v6527_v14, %v6399_v13  ;;  %v16177_v35 = vld [vmem:[#allocation2 + $0x98] ss:$0 sps:$4 sm:$0x11]   ;;  %v6530_v45 = vrot.slane %v19475_v49, 2  ;;  %v6529_v52 = vrot.slane %v24445_v48, 2  ;;  %8786 = vrot.lane.b32.xlu1 %v16176_v56, %s16459_s24 }
 0x41d   : > { %v7067_v9 = vmax.f32 %v6939_v46, 0.0  ;;  %v6401_v12 = vadd.f32 %v6128_v59, %v24371_v0  ;;  %v8099_v8 = vshrl.u32 %v15928_v60, 16  ;;  %v6532_v6 = vrot.slane %v24446_v53, 2  ;;  %8788 = vrot.lane.b32.xlu0 %v16177_v35, %s16459_s24  ;;  %v24448_v59 = vld [vmem:[#allocation116_spill] sm:$0xff]  ;;  %v24449_v13 = vld [vmem:[#allocation119_spill] sm:$0xff] }
 0x41e   : > { %v7657_v38 = vcombine.low %v7064_v62, %v7065_v54  ;;  %v6938_v15 = vadd.f32 %v18203_v19, %v6783_v2  ;;  %v8102_v47 = vshll.u32 %v15928_v60, 16  ;;  %v6786_v18 = vadd.f32 %v6530_v45, %v6402_v25  ;;  %v6138_v49 = vpop.permute.xlu0 %6137  ;;  %v6136_v63 = vpop.permute.xlu1 %6135  ;;  %v24450_v46 = vld [vmem:[#allocation120_spill] sm:$0xff]  ;;  %v8439_v60 = vld [vmem:[#allocation2 + $0x1c] sm:$0xf] }
 0x41f   : > { %v6785_v57 = vadd.f32 %v6529_v52, %v6401_v12  ;;  %v6404_v17 = vadd.f32 %v6134_v37, %v24447_v58  ;;  %v8101_v41 = vrot.slane %v8099_v8, 7  ;;  %v6403_v51 = vadd.f32 %v6132_v44, %v24448_v59  ;;  %v16184_v44 = vld [vmem:[#allocation2] sm:$0xff]   ;;  %v8438_v12 = vld [vmem:[#allocation2 + $0x18] sm:$0xf] }
 0x420   : > { %v7671_v16 = vrot.slane %v7657_v38, %v16806_v50  ;;  %v7066_v0 = vmax.f32 %v6938_v15, 0.0  ;;  %v6941_v5 = vadd.f32 %v18252_v30, %v6786_v18  ;;  %v6531_v1 = vrot.slane %v24447_v58, 2 }
 0x421   : > { %v6940_v22 = vadd.f32 %v18220_v3, %v6785_v57  ;;  %v6788_v55 = vadd.f32 %v6532_v6, %v6404_v17  ;;  %v8104_v36 = vor.u32 %v8102_v47, %v8101_v41  ;;  %v8106_v32 = vrot.slane %v8101_v41, 4 }
 0x422   : > { %v7672_v11 = vcombine.low %v7664_v42, %v7671_v16  ;;  %v7673_v29 = vcombine.low %v7066_v0, %v7067_v9  ;;  %v7069_v61 = vmax.f32 %v6941_v5, 0.0  ;;  %v6787_v10 = vadd.f32 %v6531_v1, %v6403_v51  ;;  %v8743_v14 = vpop.permute.xlu0 %8742  ;;  %v8297_v16 = vld [vmem:[#allocation2 + $0xa8] sm:$0xf]  ;;  %v24451_v51 = vld [vmem:[#allocation19_spill] sm:$0xff] }
 0x423   : > { %v7068_v7 = vmax.f32 %v6940_v22, 0.0  ;;  %v8105_v21 = vsel %vm16965_vm7, %v8097_v39, %v8104_v36  ;;  %v8295_v28 = vsel %vm16723_vm2, %v8106_v32, %v8294_v33  ;;  %v6534_v37 = vrot.slane %v24449_v13, 2  ;;  %v6140_v62 = vpop.permute.xlu1 %6139 }
 0x424   : > { %v15929_v43 = vpack.c.bf16 %v7672_v11, %v7672_v11  ;;  %8293 = vst.msk [vmem:[#allocation2 + $0xa0] sm:$0xf] %vm286_vm6, %v8105_v21  ;;  %8296 = vst [vmem:[#allocation2 + $0xa4] sm:$0x1] %v8295_v28  ;;  %v6943_v42 = vadd.f32 %v18237_v31, %v6788_v55  ;;  %v6942_v54 = vadd.f32 %v18203_v19, %v6787_v10  ;;  %v6533_v48 = vrot.slane %v24450_v46, 2 }
 0x425   : > { %v7674_v24 = vcombine.low %v7068_v7, %v7069_v61  ;;  %v6406_v56 = vadd.f32 %v6138_v49, %v24450_v46  ;;  %v7681_v2 = vrot.slane %v7673_v29, %v16806_v50  ;;  %v6405_v25 = vadd.f32 %v6136_v63, %v24446_v53  ;;  %v24452_v7 = vld [vmem:[#allocation121_spill] sm:$0xff] }
 0x426   : > { %v8108_v39 = vshrl.u32 %v15929_v43, 16  ;;  %v8111_v35 = vshll.u32 %v15929_v43, 16  ;;  %v7070_v45 = vmax.f32 %v6942_v54, 0.0  ;;  %v15727_v15 = vcombine.low %v8438_v12, %v8439_v60  ;;  %v6142_v58 = vpop.permute.xlu0 %6141  ;;  %v8442_v21 = vld [vmem:[#allocation2 + $0x28] sm:$0xf] }
 0x427   : > { %v7688_v9 = vrot.slane %v7674_v24, %v16806_v50  ;;  %v6790_v52 = vadd.f32 %v6534_v37, %v6406_v56  ;;  %v6789_v38 = vadd.f32 %v6533_v48, %v6405_v25  ;;  %v8936_v6 = vsel %vm1890_vm9, %v16184_v44, %v8743_v14  ;;  %v8747_v5 = vpop.permute.xlu1 %8746  ;;  %v16194_v24 = vld [vmem:[#allocation2 + $0x8] ss:$0 sps:$4 sm:$0x11]   ;;  %v8441_v25 = vld [vmem:[#allocation2 + $0x24] sm:$0xf] }
 0x428   : > { %v8110_v8 = vrot.slane %v8108_v39, 7  ;;  %v15759_v57 = vcombine.low %v8936_v6, %v8438_v12  ;;  %v7071_v49 = vmax.f32 %v6943_v42, 0.0  ;;  %v9063_v41 = vcombine.high %v8936_v6, %v15727_v15 }
 0x429   : > { %v7689_v47 = vcombine.low %v7681_v2, %v7688_v9  ;;  %v6945_v18 = vadd.f32 %v18252_v30, %v6790_v52  ;;  %v6944_v53 = vadd.f32 %v18220_v3, %v6789_v38  ;;  %v6535_v10 = vrot.slane %v24452_v7, 2  ;;  %v24453_v2 = vld [vmem:[#allocation122_spill] sm:$0xff] }
 0x42a   : > { %v8113_v17 = vor.u32 %v8111_v35, %v8110_v8  ;;  %v9070_v63 = vrot.slane %v15759_v57, %v24451_v51  ;;  %v7690_v55 = vcombine.low %v7070_v45, %v7071_v49  ;;  %v9077_v33 = vrot.slane %v9063_v41, %v24451_v51  ;;  %v8745_v42 = vpop.permute.xlu0 %8744  ;;  %v16192_v35 = vld [vmem:[#allocation2 + $0xc] sm:$0xff]   ;;  %v8440_v49 = vld [vmem:[#allocation2 + $0x20] sm:$0x1] }
 0x42b   : > { %v15930_v0 = vpack.c.bf16 %v7689_v47, %v7689_v47  ;;  %v7073_v59 = vmax.f32 %v6945_v18, 0.0  ;;  %v7072_v1 = vmax.f32 %v6944_v53, 0.0  ;;  %v16195_v36 = vld [vmem:[#allocation2 + $0x9c] sm:$0xff]   ;;  %v16196_v11 = vld [vmem:[#allocation2 + $0xa4] ss:$0 sps:$4 sm:$0x11]   ;;  %v6407_v14 = vadd.f32 %v6140_v62, %v24449_v13 }
 0x42c   : > { %v8298_v22 = vsel %vm17140_vm8, %v8113_v17, %v8297_v16  ;;  %v9078_v61 = vcombine.high %v9070_v63, %v9070_v63  ;;  %8790 = vrot.lane.b32.xlu1 %v16195_v36, %s16459_s24  ;;  %v8114_v28 = vrot.slane %v8110_v8, 4  ;;  %v6408_v44 = vadd.f32 %v6142_v58, %v24452_v7  ;;  %8792 = vrot.lane.b32.xlu0 %v16196_v11, %s16459_s24  ;;  %v8301_v45 = vld [vmem:[#allocation2 + $0xb0] sm:$0x1] }
 0x42d   : > { %8299 = vst [vmem:[#allocation2 + $0xa8] sm:$0xf] %v8298_v22  ;;  %v8116_v32 = vshrl.u32 %v15930_v0, 16  ;;  %v7691_v29 = vcombine.low %v7072_v1, %v7073_v59  ;;  %v8119_v37 = vshll.u32 %v15930_v0, 16  ;;  %v7698_v54 = vrot.slane %v7690_v55, %v16806_v50 }
 0x42e   : > { %v9079_v56 = vcombine.high %v9077_v33, %v9077_v33  ;;  %v20023_v60 = vrot.slane %v9070_v63, %v24451_v51  ;;  %v20026_v39 = vrot.slane %v9077_v33, %v24451_v51  ;;  %v6536_v48 = vrot.slane %v24453_v2, 2  ;;  %v6144_v9 = vpop.permute.xlu1 %6143 }
 0x42f   : > { %v8118_v43 = vrot.slane %v8116_v32, 7  ;;  %v7705_v46 = vrot.slane %v7691_v29, %v16806_v50  ;;  %v20030_v12 = vrot.slane %v9078_v61, %v24451_v51  ;;  %v6791_v8 = vadd.f32 %v6535_v10, %v6407_v14 }
 0x430   : > { %v15729_v38 = vcombine.low %v8441_v25, %v8442_v21  ;;  %v6792_v47 = vadd.f32 %v6536_v48, %v6408_v44  ;;  %v8942_v18 = vsel %vm1890_vm9, %v16192_v35, %v8747_v5  ;;  %v8939_v53 = vsel %vm1890_vm9, %v16194_v24, %v8745_v42  ;;  %v8304_v44 = vld [vmem:[#allocation2 + $0xb4] sm:$0xf] }
 0x431   : > { %v8121_v13 = vor.u32 %v8119_v37, %v8118_v43  ;;  %v8123_v62 = vrot.slane %v8118_v43, 4  ;;  %v7706_v52 = vcombine.low %v7698_v54, %v7705_v46  ;;  %v15761_v58 = vcombine.low %v8942_v18, %v8441_v25  ;;  %v6146_v63 = vpop.permute.xlu0 %6145 }
 0x432   : > { %v9128_v17 = vcombine.high %v8942_v18, %v15729_v38  ;;  %v6947_v41 = vadd.f32 %v18237_v31, %v6792_v47  ;;  %v15760_v16 = vcombine.low %v8939_v53, %v8440_v49  ;;  %v6537_v0 = vrot.slane %v24395_v20, 2  ;;  %v6148_v29 = vpop.permute.xlu1 %6147  ;;  %v24456_v49 = vld [vmem:[#allocation124_spill] sm:$0xff] }
 0x433   : > { %v8122_v15 = vsel %vm16965_vm7, %v8114_v28, %v8121_v13  ;;  %v8302_v6 = vsel %vm16723_vm2, %v8123_v62, %v8301_v45  ;;  %v15931_v57 = vpack.c.bf16 %v7706_v52, %v7706_v52  ;;  %v6409_v59 = vadd.f32 %v6144_v9, %v24453_v2  ;;  %v24454_v2 = vld [vmem:[#allocation123_spill] sm:$0xff] }
 0x434   : > { %8300 = vst.msk [vmem:[#allocation2 + $0xac] sm:$0xf] %vm286_vm6, %v8122_v15  ;;  %8303 = vst [vmem:[#allocation2 + $0xb0] sm:$0x1] %v8302_v6  ;;  %v6946_v5 = vadd.f32 %v18203_v19, %v6791_v8  ;;  %v9135_v55 = vrot.slane %v15761_v58, %v24451_v51  ;;  %v9142_v1 = vrot.slane %v9128_v17, %v24451_v51  ;;  %v7075_v7 = vmax.f32 %v6947_v41, 0.0  ;;  %v24455_v58 = vld [vmem:[#allocation125_spill] sm:$0xff] }
 0x435   : > { %v8125_v22 = vshrl.u32 %v15931_v57, 16  ;;  %v8128_v33 = vshll.u32 %v15931_v57, 16  ;;  %v20046_v36 = vrot.slane %v9079_v56, %v24451_v51  ;;  %v9119_v32 = vrot.slane %v15760_v16, %v24451_v51  ;;  %v6150_v25 = vpop.permute.xlu0 %6149  ;;  %v16206_v41 = vld [vmem:[#allocation2 + $0x18] sm:$0xff]  }
 0x436   : > { %v6793_v11 = vadd.f32 %v6537_v0, %v6409_v59  ;;  %v9143_v10 = vcombine.high %v9135_v55, %v9135_v55  ;;  %v9151_v14 = vrot.slane %v9135_v55, %v24451_v51  ;;  %v10102_v21 = vcombine.low %v20023_v60, %v20030_v12  ;;  %v8751_v47 = vpop.permute.xlu1 %8750  ;;  %v24457_v0 = vld [vmem:[#allocation22_spill] sm:$0xff] }
 0x437   : > { %v20049_v61 = vrot.slane %v8125_v22, 7  ;;  %v9144_v28 = vcombine.high %v9142_v1, %v9142_v1  ;;  %v9158_v43 = vrot.slane %v9142_v1, %v24451_v51  ;;  %v9126_v37 = vrot.slane %v9119_v32, %v24451_v51 }
 0x438   : > { %v15791_v42 = vcombine.high %v20023_v60, %v20030_v12  ;;  %v7074_v54 = vmax.f32 %v6946_v5, 0.0  ;;  %v9165_v46 = vrot.slane %v9143_v10, %v24451_v51  ;;  %v10104_v56 = vcombine.low %v20026_v39, %v20046_v36  ;;  %v8445_v12 = vld [vmem:[#allocation2 + $0x34] sm:$0xf] }
 0x439   : > { %v8130_v24 = vor.u32 %v8128_v33, %v20049_v61  ;;  %v15792_v13 = vcombine.high %v20026_v39, %v20046_v36  ;;  %v6948_v62 = vadd.f32 %v18220_v3, %v6793_v11  ;;  %v6538_v48 = vrot.slane %v24454_v2, 2 }
 0x43a   : > { %v7707_v45 = vcombine.low %v7074_v54, %v7075_v7  ;;  %v9173_v60 = vcombine.high %v9151_v14, %v9151_v14  ;;  %v6410_v52 = vadd.f32 %v6146_v63, %v24395_v20  ;;  %v8131_v38 = vrot.slane %v20049_v61, 4  ;;  %v8444_v20 = vld [vmem:[#allocation2 + $0x30] sm:$0xf]  ;;  %v8749_v7 = vpop.permute.xlu0 %8748 }
 0x43b   : > { %v16212_v35 = vld [vmem:[#allocation2 + $0xa8] sm:$0xff]   ;;  %v8305_v9 = vsel %vm17140_vm8, %v8130_v24, %v8304_v44  ;;  %v16213_v8 = vld [vmem:[#allocation2 + $0xb0] ss:$0 sps:$4 sm:$0x11]   ;;  %v20071_v39 = vrot.slane %v9144_v28, %v24451_v51  ;;  %v9174_v15 = vcombine.high %v9158_v43, %v9158_v43  ;;  %v10168_v6 = vcombine.low %v9126_v37, %v9151_v14 }
 0x43c   : > { %8306 = vst [vmem:[#allocation2 + $0xb4] sm:$0xf] %v8305_v9  ;;  %8794 = vrot.lane.b32.xlu1 %v16212_v35, %s16459_s24  ;;  %v9175_v18 = vcombine.high %v9165_v46, %v9165_v46  ;;  %v6794_v57 = vadd.f32 %v6538_v48, %v6410_v52  ;;  %v6539_v17 = vrot.slane %v24455_v58, 2  ;;  %v6411_v53 = vadd.f32 %v6148_v29, %v24456_v49  ;;  %v16208_v9 = vld [vmem:[#allocation2 + $0x14] ss:$0 sps:$4 sm:$0x11]  }
 0x43d   : > { %8796 = vrot.lane.b32.xlu0 %v16213_v8, %s16459_s24  ;;  %v7076_v16 = vmax.f32 %v6948_v62, 0.0  ;;  %v6540_v59 = vrot.slane %v24457_v0, 2  ;;  %v6412_v63 = vadd.f32 %v6150_v25, %v24455_v58  ;;  %v15731_v22 = vcombine.low %v8444_v20, %v8445_v12 }
 0x43e   : > { %v10169_v5 = vcombine.low %v9165_v46, %v9173_v60  ;;  %v6949_v55 = vadd.f32 %v18252_v30, %v6794_v57  ;;  %v6795_v1 = vadd.f32 %v6539_v17, %v6411_v53  ;;  %v8948_v33 = vsel %vm1890_vm9, %v16206_v41, %v8751_v47  ;;  %v8755_v47 = vpop.permute.xlu1 %8754 }
 0x43f   : > { %v6796_v36 = vadd.f32 %v6540_v59, %v6412_v63  ;;  %v15763_v32 = vcombine.low %v8948_v33, %v8444_v20  ;;  %v9193_v11 = vcombine.high %v8948_v33, %v15731_v22  ;;  %v10112_v29 = vrot.slane %v10102_v21, %v24451_v51 }
 0x440   : > { %v10171_v10 = vcombine.low %v20071_v39, %v9174_v15  ;;  %v7077_v14 = vmax.f32 %v6949_v55, 0.0  ;;  %v10119_v28 = vrot.slane %v15791_v42, %v24451_v51  ;;  %v10126_v37 = vrot.slane %v10104_v56, %v24451_v51  ;;  %v8448_v55 = vld [vmem:[#allocation2 + $0x40] sm:$0xf] }
 0x441   : > { %v6951_v44 = vadd.f32 %v18237_v31, %v6796_v36  ;;  %v9200_v24 = vrot.slane %v15763_v32, %v24451_v51  ;;  %v9207_v54 = vrot.slane %v9193_v11, %v24451_v51  ;;  %v10133_v46 = vrot.slane %v15792_v13, %v24451_v51  ;;  %v16209_v11 = vld [vmem:[#allocation2 + $0x24] sm:$0xff]  }
 0x442   : > { %v7715_v62 = vrot.slane %v7707_v45, %v16806_v50  ;;  %v20091_v21 = vrot.slane %v10168_v6, %v24451_v51  ;;  %v7708_v2 = vcombine.low %v7076_v16, %v7077_v14  ;;  %v10135_v48 = vcombine.high %v10112_v29, %v10119_v28 }
 0x443   : > { %v10170_v25 = vcombine.low %v9175_v18, %v9158_v43  ;;  %v6950_v42 = vadd.f32 %v18203_v19, %v6795_v1  ;;  %v9208_v35 = vcombine.high %v9200_v24, %v9200_v24  ;;  %v9209_v56 = vcombine.high %v9207_v54, %v9207_v54  ;;  %v8443_v43 = vld [vmem:[#allocation2 + $0x2c] sm:$0x1]  ;;  %v8753_v18 = vpop.permute.xlu0 %8752 }
 0x444   : > { %v20095_v60 = vrot.slane %v10169_v5, %v24451_v51  ;;  %v7722_v52 = vrot.slane %v7708_v2, %v16806_v50  ;;  %v10137_v12 = vcombine.high %v10126_v37, %v10133_v46  ;;  %v10151_v13 = vrot.slane %v10135_v48, %v24451_v51 }
 0x445   : > { %v20100_v45 = vrot.slane %v10171_v10, %v24451_v51  ;;  %v7079_v8 = vmax.f32 %v6951_v44, 0.0  ;;  %v20103_v15 = vrot.slane %v9208_v35, %v24451_v51  ;;  %v8945_v6 = vsel %vm1890_vm9, %v16208_v9, %v8749_v7 }
 0x446   : > { %v7723_v57 = vcombine.low %v7715_v62, %v7722_v52  ;;  %v20107_v58 = vrot.slane %v9209_v56, %v24451_v51  ;;  %v10165_v17 = vrot.slane %v10137_v12, %v24451_v51  ;;  %v15762_v49 = vcombine.low %v8945_v6, %v8443_v43  ;;  %v24458_v43 = vld [vmem:[#allocation126_spill] sm:$0xff] }
 0x447   : > { %v20111_v53 = vrot.slane %v10170_v25, %v24451_v51  ;;  %v7078_v20 = vmax.f32 %v6950_v42, 0.0  ;;  %v9216_v41 = vrot.slane %v9200_v24, %v24451_v51  ;;  %v10134_v16 = vcombine.low %v10112_v29, %v10119_v28  ;;  %v8447_v28 = vld [vmem:[#allocation2 + $0x3c] sm:$0xf]  ;;  %v8446_v42 = vld [vmem:[#allocation2 + $0x38] sm:$0x1] }
 0x448   : > { %v15932_v59 = vpack.c.bf16 %v7723_v57, %v7723_v57  ;;  %v9223_v63 = vrot.slane %v9207_v54, %v24451_v51  ;;  %v10167_v22 = vcombine.low %v10151_v13, %v10165_v17  ;;  %v9176_v5 = vcombine.high %v20071_v39, %v20071_v39  ;;  %v16211_v39 = vld [vmem:[#allocation2 + $0x20] ss:$0 sps:$4 sm:$0x11]  }
 0x449   : > { %v20117_v1 = vcombine.low %v7078_v20, %v7079_v8  ;;  %v10235_v33 = vcombine.low %v9216_v41, %v20103_v15  ;;  %v9184_v36 = vrot.slane %v15762_v49, %v24451_v51  ;;  %v10136_v32 = vcombine.low %v10126_v37, %v10133_v46  ;;  %v6152_v37 = vpop.permute.xlu1 %6151  ;;  %v6154_v46 = vpop.permute.xlu0 %6153 }
 0x44a   : > { %v8133_v7 = vshrl.u32 %v15932_v59, 16  ;;  %v15793_v10 = vcombine.high %v9216_v41, %v20103_v15  ;;  %v10237_v29 = vcombine.low %v9223_v63, %v20107_v58  ;;  %v15794_v14 = vcombine.high %v9223_v63, %v20107_v58  ;;  %15831 = vmatprep.mubr.msk.bf16.mxu1 %vm1890_vm9, %v10167_v22 }
 0x44b   : > { %v10144_v44 = vrot.slane %v10134_v16, %v24451_v51  ;;  %v10158_v24 = vrot.slane %v10136_v32, %v24451_v51  ;;  %v15733_v54 = vcombine.low %v8447_v28, %v8448_v55  ;;  %v8954_v62 = vsel %vm1890_vm9, %v16209_v11, %v8755_v47  ;;  %v8308_v47 = vld [vmem:[#allocation2 + $0xbc] sm:$0x1] }
 0x44c   : > { %v8135_v2 = vrot.slane %v8133_v7, 7  ;;  %v8136_v48 = vshll.u32 %v15932_v59, 16  ;;  %v15765_v25 = vcombine.low %v8954_v62, %v8447_v28  ;;  %v8951_v35 = vsel %vm1890_vm9, %v16211_v39, %v8753_v18 }
 0x44d   : > { %v9191_v56 = vrot.slane %v9184_v36, %v24451_v51  ;;  %v10166_v9 = vcombine.low %v10144_v44, %v10158_v24  ;;  %v9258_v52 = vcombine.high %v8954_v62, %v15733_v54  ;;  %v15764_v12 = vcombine.low %v8951_v35, %v8446_v42  ;;  %v6156_v55 = vpop.permute.xlu1 %6155  ;;  %v6158_v61 = vpop.permute.xlu0 %6157  ;;  %v8451_v35 = vld [vmem:[#allocation2 + $0x4c] sm:$0xf] }
 0x44e   : > { %v8138_v13 = vor.u32 %v8136_v48, %v8135_v2  ;;  %v8140_v8 = vrot.slane %v8135_v2, 4  ;;  %v9265_v15 = vrot.slane %v15765_v25, %v24451_v51  ;;  %v6541_v6 = vrot.slane %v24458_v43, 2 }
 0x44f   : > { %11515 = vmatmul.mubr.bf16.vlgmr.msra.gmra.mxu1 %v10166_v9  ;;  %v9272_v57 = vrot.slane %v9258_v52, %v24451_v51  ;;  %v9249_v58 = vrot.slane %v15764_v12, %v24451_v51  ;;  %v6413_v17 = vadd.f32 %v6152_v37, %v24457_v0  ;;  %v10201_v18 = vcombine.high %v20091_v21, %v20095_v60 }
 0x450   : > { %v8139_v49 = vsel %vm16965_vm7, %v8131_v38, %v8138_v13  ;;  %v8309_v20 = vsel %vm16723_vm2, %v8140_v8, %v8308_v47  ;;  %v9273_v41 = vcombine.high %v9265_v15, %v9265_v15  ;;  %v9281_v16 = vrot.slane %v9265_v15, %v24451_v51  ;;  %v16214_v13 = vld [vmem:[#allocation2 + $0x30] sm:$0xff]   ;;  %v16216_v8 = vld [vmem:[#allocation2 + $0x2c] ss:$0 sps:$4 sm:$0x11]  }
 0x451   : > { %8307 = vst.msk [vmem:[#allocation2 + $0xb8] sm:$0xf] %vm286_vm6, %v8139_v49  ;;  %8310 = vst [vmem:[#allocation2 + $0xbc] sm:$0x1] %v8309_v20  ;;  %v7732_v0 = vrot.slane %v20117_v1, %v16806_v50  ;;  %v10234_v59 = vcombine.low %v9176_v5, %v9191_v56  ;;  %v9274_v63 = vcombine.high %v9272_v57, %v9272_v57  ;;  %v8757_v15 = vpop.permute.xlu0 %8756  ;;  %v8450_v49 = vld [vmem:[#allocation2 + $0x48] sm:$0xf] }
 0x452   : > { %v6797_v22 = vadd.f32 %v6541_v6, %v6413_v17  ;;  %v20148_v36 = vrot.slane %v10235_v33, %v24451_v51  ;;  %v20151_v38 = vrot.slane %v9272_v57, %v24451_v51  ;;  %v9256_v32 = vrot.slane %v9249_v58, %v24451_v51 }
 0x453   : > { %v10203_v11 = vcombine.high %v20111_v53, %v20100_v45  ;;  %v20157_v7 = vrot.slane %v15793_v10, %v24451_v51  ;;  %v20160_v5 = vrot.slane %v10237_v29, %v24451_v51  ;;  %v20163_v28 = vrot.slane %v9273_v41, %v24451_v51  ;;  %v24459_v29 = vld [vmem:[#allocation127_spill] sm:$0xff] }
 0x454   : > { %v6952_v33 = vadd.f32 %v18220_v3, %v6797_v22  ;;  %v20167_v39 = vrot.slane %v15794_v14, %v24451_v51  ;;  %v9303_v44 = vcombine.high %v9281_v16, %v9281_v16  ;;  %v10217_v24 = vrot.slane %v10201_v18, %v24451_v51 }
 0x455   : > { %v10231_v54 = vrot.slane %v10203_v11, %v24451_v51  ;;  %v20172_v62 = vrot.slane %v10234_v59, %v24451_v51  ;;  %v20175_v10 = vrot.slane %v9274_v63, %v24451_v51  ;;  %v6542_v37 = vrot.slane %v24459_v29, 2  ;;  %v8449_v59 = vld [vmem:[#allocation2 + $0x44] sm:$0x1] }
 0x456   : > { %v6414_v2 = vadd.f32 %v6154_v46, %v24458_v43  ;;  %v9304_v48 = vcombine.high %v20151_v38, %v20151_v38  ;;  %v20181_v14 = vcombine.low %v9256_v32, %v9281_v16  ;;  %v10200_v42 = vcombine.low %v20091_v21, %v20095_v60  ;;  %v8759_v46 = vpop.permute.xlu1 %8758  ;;  %v24460_v21 = vld [vmem:[#allocation21_spill] sm:$0xff] }
 0x457   : > { %v10233_v25 = vcombine.low %v10217_v24, %v10231_v54  ;;  %v9305_v56 = vcombine.high %v20163_v28, %v20163_v28  ;;  %v7080_v9 = vmax.f32 %v6952_v33, 0.0  ;;  %v10202_v12 = vcombine.low %v20111_v53, %v20100_v45  ;;  %v24461_v45 = vld [vmem:[#allocation129_spill] sm:$0xff] }
 0x458   : > { %v6798_v52 = vadd.f32 %v6542_v37, %v6414_v2  ;;  %v10302_v43 = vcombine.low %v20163_v28, %v9303_v44  ;;  %v10210_v6 = vrot.slane %v10200_v42, %v24451_v51  ;;  %v6543_v60 = vrot.slane %v24460_v21, 2  ;;  %v16220_v57 = vld [vmem:[#allocation2 + $0xb4] sm:$0xff]   ;;  %v16224_v24 = vld [vmem:[#allocation2 + $0xbc] ss:$0 sps:$4 sm:$0x11]  }
 0x459   : > { %15832 = vmatprep.mubr.msk.bf16.mxu1 %vm1890_vm9, %v10233_v25  ;;  %v6415_v47 = vadd.f32 %v6156_v55, %v24459_v29  ;;  %v10224_v17 = vrot.slane %v10202_v12, %v24451_v51  ;;  %v6544_v53 = vrot.slane %v24461_v45, 2  ;;  %v6416_v18 = vadd.f32 %v6158_v61, %v24460_v21  ;;  %8798 = vrot.lane.b32.xlu1 %v16220_v57, %s16459_s24 }
 0x45a   : > { %v6953_v58 = vadd.f32 %v18252_v30, %v6798_v52  ;;  %v15735_v41 = vcombine.low %v8450_v49, %v8451_v35  ;;  %v8960_v16 = vsel %vm1890_vm9, %v16214_v13, %v8759_v46  ;;  %v8957_v63 = vsel %vm1890_vm9, %v16216_v8, %v8757_v15  ;;  %v6160_v52 = vpop.permute.xlu1 %6159 }
 0x45b   : > { %v6799_v20 = vadd.f32 %v6543_v60, %v6415_v47  ;;  %v10232_v55 = vcombine.low %v10210_v6, %v10224_v17  ;;  %v6800_v32 = vadd.f32 %v6544_v53, %v6416_v18  ;;  %v15767_v11 = vcombine.low %v8960_v16, %v8450_v49  ;;  %v6162_v17 = vpop.permute.xlu0 %6161 }
 0x45c   : > { %v7081_v22 = vmax.f32 %v6953_v58, 0.0  ;;  %v9323_v33 = vcombine.high %v8960_v16, %v15735_v41  ;;  %v15766_v44 = vcombine.low %v8957_v63, %v8449_v59  ;;  %v10267_v61 = vcombine.high %v20172_v62, %v20148_v36  ;;  %v8454_v63 = vld [vmem:[#allocation2 + $0x58] sm:$0xf] }
 0x45d   : > { %v6954_v28 = vadd.f32 %v18203_v19, %v6799_v20  ;;  %11525 = vmatmul.mubr.bf16.gmra.mxu1 %v10232_v55  ;;  %v6955_v29 = vadd.f32 %v18237_v31, %v6800_v32  ;;  %v9330_v37 = vrot.slane %v15767_v11, %v24451_v51  ;;  %v10269_v2 = vcombine.high %v20157_v7, %v20160_v5 }
 0x45e   : > { %v7725_v54 = vcombine.low %v7080_v9, %v7081_v22  ;;  %v20209_v25 = vcombine.low %v20175_v10, %v9304_v48  ;;  %v9337_v19 = vrot.slane %v9323_v33, %v24451_v51  ;;  %v9314_v42 = vrot.slane %v15766_v44, %v24451_v51  ;;  %8800 = vrot.lane.b32.xlu1 %v16224_v24, %s16459_s24 }
 0x45f   : > { %v10283_v35 = vrot.slane %v10267_v61, %v24451_v51  ;;  %v7082_v31 = vmax.f32 %v6954_v28, 0.0  ;;  %v7083_v12 = vmax.f32 %v6955_v29, 0.0  ;;  %v9338_v13 = vcombine.high %v9330_v37, %v9330_v37  ;;  %v16217_v28 = vld [vmem:[#allocation2 + $0x3c] sm:$0xff]  }
 0x460   : > { %v7739_v9 = vrot.slane %v7725_v54, %v16806_v50  ;;  %v10303_v46 = vcombine.low %v9305_v56, %v20151_v38  ;;  %v9339_v8 = vcombine.high %v9337_v19, %v9337_v19  ;;  %v9321_v48 = vrot.slane %v9314_v42, %v24451_v51  ;;  %v8453_v54 = vld [vmem:[#allocation2 + $0x54] sm:$0xf] }
 0x461   : > { %v10297_v15 = vrot.slane %v10269_v2, %v24451_v51  ;;  %v20222_v21 = vcombine.low %v7082_v31, %v7083_v12  ;;  %v20225_v60 = vrot.slane %v9338_v13, %v24451_v51  ;;  %v9306_v47 = vcombine.high %v20175_v10, %v20175_v10  ;;  %v8457_v31 = vld [vmem:[#allocation2 + $0x64] sm:$0xf] }
 0x462   : > { %v7740_v6 = vcombine.low %v7732_v0, %v7739_v9  ;;  %v20230_v57 = vrot.slane %v9339_v8, %v24451_v51  ;;  %v6545_v56 = vrot.slane %v24421_v40, 2  ;;  %v6417_v58 = vadd.f32 %v6160_v52, %v24461_v45  ;;  %v8763_v45 = vpop.permute.xlu1 %8762 }
 0x463   : > { %v10299_v38 = vcombine.low %v10283_v35, %v10297_v15  ;;  %v20235_v1 = vrot.slane %v10302_v43, %v24451_v51  ;;  %v20239_v0 = vrot.slane %v20181_v14, %v24451_v51  ;;  %v20242_v18 = vrot.slane %v9330_v37, %v24451_v51  ;;  %v16221_v15 = vld [vmem:[#allocation2 + $0x48] sm:$0xff]  }
 0x464   : > { %v15933_v53 = vpack.c.bf16 %v7740_v6, %v7740_v6  ;;  %v20245_v10 = vrot.slane %v10303_v46, %v24451_v51  ;;  %v20248_v49 = vrot.slane %v9337_v19, %v24451_v51  ;;  %v20250_v20 = vcombine.low %v9306_v47, %v9321_v48 }
 0x465   : > { %15833 = vmatprep.mubr.msk.bf16.mxu1 %vm1890_vm9, %v10299_v38  ;;  %v6801_v43 = vadd.f32 %v6545_v56, %v6417_v58  ;;  %v7749_v14 = vrot.slane %v20222_v21, %v16806_v50  ;;  %v10368_v16 = vcombine.low %v20242_v18, %v20225_v60  ;;  %v15795_v59 = vcombine.high %v20242_v18, %v20225_v60  ;;  %v8452_v58 = vld [vmem:[#allocation2 + $0x50] sm:$0x1] }
 0x466   : > { %v8142_v41 = vshrl.u32 %v15933_v53, 16  ;;  %v8145_v22 = vshll.u32 %v15933_v53, 16  ;;  %v10432_v55 = vcombine.low %v20248_v49, %v20230_v57  ;;  %v10266_v11 = vcombine.low %v20172_v62, %v20148_v36  ;;  %v8761_v36 = vpop.permute.xlu0 %8760  ;;  %v8767_v12 = vpop.permute.xlu1 %8766 }
 0x467   : > { %v6956_v32 = vadd.f32 %v18220_v3, %v6801_v43  ;;  %v10268_v44 = vcombine.low %v20157_v7, %v20160_v5  ;;  %v6546_v61 = vrot.slane %v19768_v23, 2  ;;  %v6418_v24 = vadd.f32 %v6162_v17, %v24421_v40  ;;  %v16219_v5 = vld [vmem:[#allocation2 + $0x38] ss:$0 sps:$4 sm:$0x11]   ;;  %v8311_v23 = vld [vmem:[#allocation2 + $0xc0] sm:$0xf] }
 0x468   : > { %v20264_v33 = vrot.slane %v8142_v41, 7  ;;  %v15796_v29 = vcombine.high %v20248_v49, %v20230_v57  ;;  %v10276_v37 = vrot.slane %v10266_v11, %v24451_v51  ;;  %v15737_v3 = vcombine.low %v8453_v54, %v8454_v63  ;;  %v8456_v17 = vld [vmem:[#allocation2 + $0x60] sm:$0xf] }
 0x469   : > { %v8966_v2 = vsel %vm1890_vm9, %v16217_v28, %v8763_v45  ;;  %v7084_v19 = vmax.f32 %v6956_v32, 0.0  ;;  %v10290_v42 = vrot.slane %v10268_v44, %v24451_v51  ;;  %v6802_v7 = vadd.f32 %v6546_v61, %v6418_v24 }
 0x46a   : > { %v8147_v62 = vor.u32 %v8145_v22, %v20264_v33  ;;  %v15769_v35 = vcombine.low %v8966_v2, %v8453_v54  ;;  %v9388_v40 = vcombine.high %v8966_v2, %v15737_v3  ;;  %v10333_v52 = vcombine.high %v20167_v39, %v20239_v0 }
 0x46b   : > { %v10335_v9 = vcombine.high %v20235_v1, %v20245_v10  ;;  %v10298_v46 = vcombine.low %v10276_v37, %v10290_v42  ;;  %v6957_v8 = vadd.f32 %v18252_v30, %v6802_v7  ;;  %v8963_v48 = vsel %vm1890_vm9, %v16219_v5, %v8761_v36 }
 0x46c   : > { %v8312_v13 = vsel %vm17140_vm8, %v8147_v62, %v8311_v23  ;;  %v9395_v6 = vrot.slane %v15769_v35, %v24451_v51  ;;  %v9402_v47 = vrot.slane %v9388_v40, %v24451_v51  ;;  %v10349_v38 = vrot.slane %v10333_v52, %v24451_v51  ;;  %v8765_v52 = vpop.permute.xlu0 %8764 }
 0x46d   : > { %8313 = vst [vmem:[#allocation2 + $0xc0] sm:$0xf] %v8312_v13  ;;  %v10363_v56 = vrot.slane %v10335_v9, %v24451_v51  ;;  %11535 = vmatmul.mubr.bf16.gmra.mxu1 %v10298_v46  ;;  %v7085_v26 = vmax.f32 %v6957_v8, 0.0  ;;  %v15768_v53 = vcombine.low %v8963_v48, %v8452_v58  ;;  %v15739_v43 = vcombine.low %v8456_v17, %v8457_v31  ;;  %v8769_v9 = vpop.permute.xlu1 %8768  ;;  %v8455_v48 = vld [vmem:[#allocation2 + $0x5c] sm:$0x1] }
 0x46e   : > { %v8972_v30 = vsel %vm1890_vm9, %v16221_v15, %v8767_v12  ;;  %v9403_v45 = vcombine.high %v9395_v6, %v9395_v6  ;;  %v9404_v41 = vcombine.high %v9402_v47, %v9402_v47  ;;  %v9411_v63 = vrot.slane %v9395_v6, %v24451_v51 }
 0x46f   : > { %v9418_v22 = vrot.slane %v9402_v47, %v24451_v51  ;;  %v7742_v32 = vcombine.low %v7084_v19, %v7085_v26  ;;  %v10365_v11 = vcombine.low %v10349_v38, %v10363_v56  ;;  %v9379_v28 = vrot.slane %v15768_v53, %v24451_v51  ;;  %v8460_v56 = vld [vmem:[#allocation2 + $0x70] sm:$0xf] }
 0x470   : > { %v15771_v44 = vcombine.low %v8972_v30, %v8456_v17  ;;  %v9425_v61 = vrot.slane %v9403_v45, %v24451_v51  ;;  %v20294_v24 = vrot.slane %v9404_v41, %v24451_v51  ;;  %v9433_v54 = vcombine.high %v9411_v63, %v9411_v63  ;;  %v8771_v58 = vpop.permute.xlu0 %8770 }
 0x471   : > { %v9434_v37 = vcombine.high %v9418_v22, %v9418_v22  ;;  %v7756_v3 = vrot.slane %v7742_v32, %v16806_v50  ;;  %15834 = vmatprep.mubr.msk.bf16.mxu1 %vm1890_vm9, %v10365_v11  ;;  %v9386_v2 = vrot.slane %v9379_v28, %v24451_v51  ;;  %v9453_v36 = vcombine.high %v8972_v30, %v15739_v43  ;;  %v16226_v30 = vld [vmem:[#allocation2 + $0x54] sm:$0xff]   ;;  %v8773_v45 = vpop.permute.xlu1 %8772  ;;  %v8459_v11 = vld [vmem:[#allocation2 + $0x6c] sm:$0xf]  ;;  %v16228_v28 = vld [vmem:[#allocation2 + $0x5c] ss:$0 sps:$4 sm:$0x11]  }
 0x472   : > { %v9460_v62 = vrot.slane %v15771_v44, %v24451_v51  ;;  %v20302_v19 = vrot.slane %v20209_v25, %v24451_v51  ;;  %v20306_v42 = vrot.slane %v20250_v20, %v24451_v51  ;;  %v9435_v7 = vcombine.high %v9425_v61, %v9425_v61  ;;  %v8315_v44 = vld [vmem:[#allocation2 + $0xc8] sm:$0x1] }
 0x473   : > { %v7757_v5 = vcombine.low %v7749_v14, %v7756_v3  ;;  %v10435_v23 = vcombine.low %v9425_v61, %v9433_v54  ;;  %v10499_v35 = vcombine.low %v20294_v24, %v9434_v37  ;;  %v9467_v40 = vrot.slane %v9453_v36, %v24451_v51 }
 0x474   : > { %v20317_v25 = vrot.slane %v10368_v16, %v24451_v51  ;;  %v20323_v20 = vrot.slane %v15795_v59, %v24451_v51  ;;  %v9468_v21 = vcombine.high %v9460_v62, %v9460_v62  ;;  %v10332_v14 = vcombine.low %v20167_v39, %v20239_v0  ;;  %v16223_v0 = vld [vmem:[#allocation2 + $0x44] ss:$0 sps:$4 sm:$0x11]  }
 0x475   : > { %v20331_v31 = vrot.slane %v10432_v55, %v24451_v51  ;;  %v20337_v16 = vrot.slane %v15796_v29, %v24451_v51  ;;  %v15934_v60 = vpack.c.bf16 %v7757_v5, %v7757_v5  ;;  %v10434_v18 = vcombine.low %v9386_v2, %v9411_v63 }
 0x476   : > { %v8148_v59 = vrot.slane %v20264_v33, 4  ;;  %v10498_v12 = vcombine.low %v9435_v7, %v9418_v22  ;;  %v9469_v13 = vcombine.high %v9467_v40, %v9467_v40  ;;  %v10334_v39 = vcombine.low %v20235_v1, %v20245_v10  ;;  %v16225_v1 = vld [vmem:[#allocation2 + $0x50] ss:$0 sps:$4 sm:$0x11]  }
 0x477   : > { %v8150_v46 = vshrl.u32 %v15934_v60, 16  ;;  %v20343_v55 = vrot.slane %v10435_v23, %v24451_v51  ;;  %v20346_v8 = vrot.slane %v10499_v35, %v24451_v51  ;;  %v9476_v57 = vrot.slane %v9460_v62, %v24451_v51  ;;  %v8458_v62 = vld [vmem:[#allocation2 + $0x68] sm:$0x1] }
 0x478   : > { %v9490_v49 = vrot.slane %v9468_v21, %v24451_v51  ;;  %v10342_v29 = vrot.slane %v10332_v14, %v24451_v51  ;;  %v10356_v33 = vrot.slane %v10334_v39, %v24451_v51  ;;  %v8969_v15 = vsel %vm1890_vm9, %v16223_v0, %v8765_v52 }
 0x479   : > { %v8152_v10 = vrot.slane %v8150_v46, 7  ;;  %v8153_v6 = vshll.u32 %v15934_v60, 16  ;;  %v20354_v47 = vrot.slane %v10434_v18, %v24451_v51  ;;  %v15770_v38 = vcombine.low %v8969_v15, %v8455_v48  ;;  %v8775_v48 = vpop.permute.xlu0 %8774 }
 0x47a   : > { %v20357_v17 = vrot.slane %v10498_v12, %v24451_v51  ;;  %v9483_v26 = vrot.slane %v9467_v40, %v24451_v51  ;;  %v9497_v53 = vrot.slane %v9469_v13, %v24451_v51  ;;  %v10364_v43 = vcombine.low %v10342_v29, %v10356_v33  ;;  %v8463_v33 = vld [vmem:[#allocation2 + $0x7c] sm:$0xf] }
 0x47b   : > { %v8155_v41 = vor.u32 %v8153_v6, %v8152_v10  ;;  %v8157_v63 = vrot.slane %v8152_v10, 4  ;;  %v9436_v22 = vcombine.high %v20294_v24, %v20294_v24  ;;  %v8975_v32 = vsel %vm1890_vm9, %v16225_v1, %v8769_v9 }
 0x47c   : > { %v10501_v61 = vcombine.low %v9476_v57, %v9490_v49  ;;  %11545 = vmatmul.mubr.bf16.gmra.mxu1 %v10364_v43  ;;  %v9444_v54 = vrot.slane %v15770_v38, %v24451_v51  ;;  %v15741_v37 = vcombine.low %v8459_v11, %v8460_v56  ;;  %v8978_v3 = vsel %vm1890_vm9, %v16226_v30, %v8771_v58  ;;  %v8462_v58 = vld [vmem:[#allocation2 + $0x78] sm:$0xf] }
 0x47d   : > { %v8156_v2 = vsel %vm16965_vm7, %v8148_v59, %v8155_v41  ;;  %v8316_v36 = vsel %vm16723_vm2, %v8157_v63, %v8315_v44  ;;  %v15773_v24 = vcombine.low %v8978_v3, %v8459_v11  ;;  %v8981_v7 = vsel %vm1890_vm9, %v16228_v28, %v8773_v45 }
 0x47e   : > { %8314 = vst.msk [vmem:[#allocation2 + $0xc4] sm:$0xf] %vm286_vm6, %v8156_v2  ;;  %8317 = vst [vmem:[#allocation2 + $0xc8] sm:$0x1] %v8316_v36  ;;  %v15797_v5 = vcombine.high %v9476_v57, %v9490_v49  ;;  %v10565_v23 = vcombine.low %v9483_v26, %v9497_v53  ;;  %v15772_v35 = vcombine.low %v8975_v32, %v8458_v62  ;;  %v8777_v36 = vpop.permute.xlu0 %8776 }
 0x47f   : > { %v9518_v40 = vcombine.high %v8978_v3, %v15741_v37  ;;  %v9451_v52 = vrot.slane %v9444_v54, %v24451_v51  ;;  %v9525_v21 = vrot.slane %v15773_v24, %v24451_v51  ;;  %v10399_v27 = vcombine.high %v20302_v19, %v20306_v42 }
 0x480   : > { %v10401_v14 = vcombine.high %v20317_v25, %v20323_v20  ;;  %v15798_v9 = vcombine.high %v9483_v26, %v9497_v53  ;;  %v15774_v18 = vcombine.low %v8981_v7, %v8461_v34  ;;  %v10398_v59 = vcombine.low %v20302_v19, %v20306_v42  ;;  %v16229_v26 = vld [vmem:[#allocation2 + $0x60] sm:$0xff]  }
 0x481   : > { %v9532_v60 = vrot.slane %v9518_v40, %v24451_v51  ;;  %v9533_v12 = vcombine.high %v9525_v21, %v9525_v21  ;;  %v9541_v13 = vrot.slane %v9525_v21, %v24451_v51  ;;  %v10415_v39 = vrot.slane %v10399_v27, %v24451_v51 }
 0x482   : > { %v10429_v0 = vrot.slane %v10401_v14, %v24451_v51  ;;  %v20385_v46 = vrot.slane %v10501_v61, %v24451_v51  ;;  %v20388_v57 = vrot.slane %v15797_v5, %v24451_v51  ;;  %v10500_v15 = vcombine.low %v9436_v22, %v9451_v52 }
 0x483   : > { %v9534_v49 = vcombine.high %v9532_v60, %v9532_v60  ;;  %v9548_v29 = vrot.slane %v9532_v60, %v24451_v51  ;;  %v9509_v19 = vrot.slane %v15772_v35, %v24451_v51  ;;  %v9555_v42 = vrot.slane %v9533_v12, %v24451_v51 }
 0x484   : > { %v10431_v1 = vcombine.low %v10415_v39, %v10429_v0  ;;  %v9574_v6 = vrot.slane %v15774_v18, %v24451_v51  ;;  %v10400_v38 = vcombine.low %v20317_v25, %v20323_v20  ;;  %v10408_v56 = vrot.slane %v10398_v59, %v24451_v51 }
 0x485   : > { %v9562_v10 = vrot.slane %v9534_v49, %v24451_v51  ;;  %v20399_v53 = vrot.slane %v10565_v23, %v24451_v51  ;;  %v20402_v43 = vrot.slane %v15798_v9, %v24451_v51  ;;  %v9563_v30 = vcombine.high %v9541_v13, %v9541_v13  ;;  %v16234_v41 = vld [vmem:[#allocation2 + $0xc8] ss:$0 sps:$4 sm:$0x11]   ;;  %v16235_v63 = vld [vmem:[#allocation2 + $0xc0] sm:$0xff]  }
 0x486   : > { %15835 = vmatprep.mubr.msk.bf16.mxu1 %vm1890_vm9, %v10431_v1  ;;  %v15743_v45 = vcombine.low %v8462_v58, %v8463_v33  ;;  %v9564_v22 = vcombine.high %v9548_v29, %v9548_v29  ;;  %v9565_v32 = vcombine.high %v9555_v42, %v9555_v42  ;;  %v10422_v25 = vrot.slane %v10400_v38, %v24451_v51  ;;  %v16231_v23 = vld [vmem:[#allocation2 + $0x68] ss:$0 sps:$4 sm:$0x11]  }
 0x487   : > { %v8984_v20 = vsel %vm1890_vm9, %v16229_v26, %v8775_v48  ;;  %v9516_v11 = vrot.slane %v9509_v19, %v24451_v51  ;;  %v9566_v28 = vcombine.high %v9562_v10, %v9562_v10  ;;  %8804 = vrot.lane.b32.xlu1 %v16234_v41, %s16459_s24  ;;  %v20410_v54 = vrot.slane %v10500_v15, %v24451_v51  ;;  %v8466_v38 = vld [vmem:[#allocation2 + $0x88] sm:$0xf]  ;;  %v16232_v41 = vld [vmem:[#allocation2 + $0x6c] sm:$0xff]  }
 0x488   : > { %v15775_v44 = vcombine.low %v8984_v20, %v8462_v58  ;;  %v9583_v61 = vcombine.high %v8984_v20, %v15743_v45  ;;  %v9581_v37 = vrot.slane %v9574_v6, %v24451_v51  ;;  %v10430_v3 = vcombine.low %v10408_v56, %v10422_v25  ;;  %8802 = vrot.lane.b32.xlu0 %v16235_v63, %s16459_s24  ;;  %v8779_v56 = vpop.permute.xlu1 %8778  ;;  %v8465_v20 = vld [vmem:[#allocation2 + $0x84] sm:$0xf] }
 0x489   : > { %v10465_v2 = vcombine.high %v20331_v31, %v20337_v16  ;;  %v10567_v62 = vcombine.low %v9516_v11, %v9541_v13  ;;  %v10467_v5 = vcombine.high %v20354_v47, %v20343_v55  ;;  %v10630_v35 = vcombine.low %v9555_v42, %v9563_v30 }
 0x48a   : > { %v9590_v24 = vrot.slane %v15775_v44, %v24451_v51  ;;  %v9597_v7 = vrot.slane %v9583_v61, %v24451_v51  ;;  %v10631_v40 = vcombine.low %v9565_v32, %v9548_v29  ;;  %v10632_v52 = vcombine.low %v9562_v10, %v9564_v22  ;;  %11555 = vmatmul.mubr.bf16.gmra.mxu1 %v10430_v3 }
 0x48b   : > { %v10464_v21 = vcombine.low %v20331_v31, %v20337_v16  ;;  %v10633_v34 = vcombine.low %v9566_v28, %v9581_v37  ;;  %v8987_v9 = vsel %vm1890_vm9, %v16231_v23, %v8777_v36  ;;  %v10481_v18 = vrot.slane %v10465_v2, %v24451_v51  ;;  %v8464_v31 = vld [vmem:[#allocation2 + $0x80] sm:$0x1]  ;;  %v8781_v37 = vpop.permute.xlu0 %8780 }
 0x48c   : > { %v9598_v27 = vcombine.high %v9590_v24, %v9590_v24  ;;  %v9599_v14 = vcombine.high %v9597_v7, %v9597_v7  ;;  %v9606_v60 = vrot.slane %v9590_v24, %v24451_v51  ;;  %v10495_v59 = vrot.slane %v10467_v5, %v24451_v51 }
 0x48d   : > { %v10466_v12 = vcombine.low %v20354_v47, %v20343_v55  ;;  %v10531_v16 = vcombine.high %v20357_v17, %v20346_v8  ;;  %v10533_v0 = vcombine.high %v20410_v54, %v20385_v46  ;;  %v15776_v29 = vcombine.low %v8987_v9, %v8464_v31 }
 0x48e   : > { %v9620_v13 = vrot.slane %v9598_v27, %v24451_v51  ;;  %v20430_v39 = vrot.slane %v9599_v14, %v24451_v51  ;;  %v10497_v49 = vcombine.low %v10481_v18, %v10495_v59  ;;  %v10474_v33 = vrot.slane %v10464_v21, %v24451_v51 }
 0x48f   : > { %v10488_v48 = vrot.slane %v10466_v12, %v24451_v51  ;;  %v10595_v55 = vrot.slane %v10567_v62, %v24451_v51  ;;  %v20440_v47 = vrot.slane %v10630_v35, %v24451_v51  ;;  %v20443_v15 = vrot.slane %v10632_v52, %v24451_v51 }
 0x490   : > { %v9613_v19 = vrot.slane %v9597_v7, %v24451_v51  ;;  %v10696_v42 = vcombine.low %v9606_v60, %v9620_v13  ;;  %15836 = vmatprep.mubr.msk.bf16.mxu1 %vm1890_vm9, %v10497_v49  ;;  %v10547_v10 = vrot.slane %v10531_v16, %v24451_v51  ;;  %v10561_v6 = vrot.slane %v10533_v0, %v24451_v51 }
 0x491   : > { %v10496_v1 = vcombine.low %v10474_v33, %v10488_v48  ;;  %v20450_v58 = vrot.slane %v10631_v40, %v24451_v51  ;;  %v20453_v26 = vrot.slane %v10633_v34, %v24451_v51  ;;  %v15799_v30 = vcombine.high %v9606_v60, %v9620_v13  ;;  %v8467_v60 = vld [vmem:[#allocation2 + $0x8c] sm:$0x1] }
 0x492   : > { %v10698_v45 = vcombine.low %v9613_v19, %v20430_v39  ;;  %v20457_v63 = vrot.slane %v15776_v29, %v24451_v51  ;;  %v10563_v22 = vcombine.low %v10547_v10, %v10561_v6  ;;  %v10530_v32 = vcombine.low %v20357_v17, %v20346_v8 }
 0x493   : > { %11565 = vmatmul.mubr.bf16.gmra.mxu1 %v10496_v1  ;;  %v10532_v25 = vcombine.low %v20410_v54, %v20385_v46  ;;  %v10597_v11 = vcombine.high %v20388_v57, %v20399_v53  ;;  %v10599_v28 = vcombine.high %v20402_v43, %v10595_v55  ;;  %v15745_v44 = vcombine.low %v8465_v20, %v8466_v38  ;;  %v16236_v46 = vld [vmem:[#allocation2 + $0x74] ss:$0 sps:$4 sm:$0x11]   ;;  %v8783_v38 = vpop.permute.xlu1 %8782 }
 0x494   : > { %v8990_v61 = vsel %vm1890_vm9, %v16232_v41, %v8779_v56  ;;  %v15800_v3 = vcombine.high %v9613_v19, %v20430_v39  ;;  %v20469_v2 = vrot.slane %v10696_v42, %v24451_v51  ;;  %15837 = vmatprep.mubr.msk.bf16.mxu1 %vm1890_vm9, %v10563_v22  ;;  %v20474_v54 = vrot.slane %v15799_v30, %v24451_v51  ;;  %v8469_v42 = vld [vmem:[#allocation2 + $0x94] sm:$0xf]  ;;  %v8785_v22 = vpop.permute.xlu0 %8784 }
 0x495   : > { %v10554_v8 = vrot.slane %v10532_v25, %v24451_v51  ;;  %v15777_v17 = vcombine.low %v8990_v61, %v8465_v20  ;;  %v20477_v36 = vrot.slane %v10698_v45, %v24451_v51  ;;  %v10627_v62 = vrot.slane %v10599_v28, %v24451_v51 }
 0x496   : > { %v9648_v24 = vcombine.high %v8990_v61, %v15745_v44  ;;  %v10540_v7 = vrot.slane %v10530_v32, %v24451_v51  ;;  %v8993_v23 = vsel %vm1890_vm9, %v16236_v46, %v8781_v37  ;;  %v10598_v35 = vcombine.low %v20402_v43, %v10595_v55 }
 0x497   : > { %v9655_v5 = vrot.slane %v15777_v17, %v24451_v51  ;;  %v10613_v40 = vrot.slane %v10597_v11, %v24451_v51  ;;  %v10596_v21 = vcombine.low %v20388_v57, %v20399_v53  ;;  %v10663_v34 = vcombine.high %v20440_v47, %v20450_v58 }
 0x498   : > { %v9662_v52 = vrot.slane %v9648_v24, %v24451_v51  ;;  %v10562_v27 = vcombine.low %v10540_v7, %v10554_v8  ;;  %v10665_v18 = vcombine.high %v20443_v15, %v20453_v26  ;;  %v15778_v13 = vcombine.low %v8993_v23, %v8467_v60  ;;  %v8470_v8 = vld [vmem:[#allocation2 + $0x98] sm:$0x1] }
 0x499   : > { %v9663_v14 = vcombine.high %v9655_v5, %v9655_v5  ;;  %v9671_v9 = vrot.slane %v9655_v5, %v24451_v51  ;;  %v10629_v59 = vcombine.low %v10613_v40, %v10627_v62  ;;  %v20495_v39 = vrot.slane %v15800_v3, %v24451_v51 }
 0x49a   : > { %v9664_v43 = vcombine.high %v9662_v52, %v9662_v52  ;;  %v9678_v12 = vrot.slane %v9662_v52, %v24451_v51  ;;  %v10620_v31 = vrot.slane %v10598_v35, %v24451_v51  ;;  %v10679_v49 = vrot.slane %v10663_v34, %v24451_v51 }
 0x49b   : > { %11575 = vmatmul.mubr.bf16.gmra.mxu1 %v10562_v27  ;;  %v9685_v57 = vrot.slane %v9663_v14, %v24451_v51  ;;  %v9693_v53 = vcombine.high %v9671_v9, %v9671_v9  ;;  %v10693_v29 = vrot.slane %v10665_v18, %v24451_v51  ;;  %v10606_v48 = vrot.slane %v10596_v21, %v24451_v51  ;;  %v8472_v18 = vld [vmem:[#allocation2 + $0xa0] sm:$0xf] }
 0x49c   : > { %15838 = vmatprep.mubr.msk.bf16.mxu1 %vm1890_vm9, %v10629_v59  ;;  %v9692_v16 = vrot.slane %v9664_v43, %v24451_v51  ;;  %v9694_v0 = vcombine.high %v9678_v12, %v9678_v12  ;;  %v10662_v55 = vcombine.low %v20440_v47, %v20450_v58  ;;  %v10664_v19 = vcombine.low %v20443_v15, %v20453_v26  ;;  %v8468_v47 = vld [vmem:[#allocation2 + $0x90] sm:$0xf]  ;;  %v16237_v58 = vld [vmem:[#allocation2 + $0x78] sm:$0xff]   ;;  %v8787_v59 = vpop.permute.xlu1 %8786 }
 0x49d   : > { %v9695_v33 = vcombine.high %v9685_v57, %v9685_v57  ;;  %v9646_v1 = vrot.slane %v20457_v63, %v24451_v51  ;;  %v10763_v10 = vcombine.low %v9685_v57, %v9693_v53  ;;  %v9704_v6 = vrot.slane %v15778_v13, %v24451_v51  ;;  %v16239_v63 = vld [vmem:[#allocation2 + $0x80] ss:$0 sps:$4 sm:$0x11]   ;;  %v16240_v53 = vld [vmem:[#allocation2 + $0x84] sm:$0xff]  }
 0x49e   : > { %v10628_v30 = vcombine.low %v10606_v48, %v10620_v31  ;;  %v10729_v45 = vcombine.high %v20469_v2, %v20474_v54  ;;  %v10731_v41 = vcombine.high %v20477_v36, %v20495_v39  ;;  %v10765_v26 = vcombine.low %v9692_v16, %v9694_v0  ;;  %v8789_v31 = vpop.permute.xlu0 %8788  ;;  %v16242_v0 = vld [vmem:[#allocation2 + $0x8c] ss:$0 sps:$4 sm:$0x11]  }
 0x49f   : > { %v10764_v56 = vcombine.low %v9695_v33, %v9678_v12  ;;  %v10762_v15 = vcombine.low %v9646_v1, %v9671_v9  ;;  %v10695_v32 = vcombine.low %v10679_v49, %v10693_v29  ;;  %v15747_v25 = vcombine.low %v8468_v47, %v8469_v42 }
 0x4a0   : > { %v9696_v20 = vcombine.high %v9692_v16, %v9692_v16  ;;  %v10672_v11 = vrot.slane %v10662_v55, %v24451_v51  ;;  %v10686_v28 = vrot.slane %v10664_v19, %v24451_v51  ;;  %v8996_v44 = vsel %vm1890_vm9, %v16237_v58, %v8783_v38  ;;  %v8471_v16 = vld [vmem:[#allocation2 + $0x9c] sm:$0xf]  ;;  %v8473_v58 = vld [vmem:[#allocation2 + $0xa4] sm:$0x1] }
 0x4a1   : > { %v20519_v61 = vrot.slane %v10763_v10, %v24451_v51  ;;  %v15779_v37 = vcombine.low %v8996_v44, %v8468_v47  ;;  %v9713_v3 = vcombine.high %v8996_v44, %v15747_v25  ;;  %v8999_v17 = vsel %vm1890_vm9, %v16239_v63, %v8785_v22 }
 0x4a2   : > { %v20523_v46 = vrot.slane %v10764_v56, %v24451_v51  ;;  %v10745_v62 = vrot.slane %v10729_v45, %v24451_v51  ;;  %v10759_v24 = vrot.slane %v10731_v41, %v24451_v51  ;;  %v15780_v7 = vcombine.low %v8999_v17, %v8470_v8 }
 0x4a3   : > { %11585 = vmatmul.mubr.bf16.gmra.mxu1 %v10628_v30  ;;  %v9711_v5 = vrot.slane %v9704_v6, %v24451_v51  ;;  %v9720_v23 = vrot.slane %v15779_v37, %v24451_v51  ;;  %v9727_v35 = vrot.slane %v9713_v3, %v24451_v51  ;;  %v10772_v40 = vrot.slane %v10762_v15, %v24451_v51 }
 0x4a4   : > { %15839 = vmatprep.mubr.msk.bf16.mxu1 %vm1890_vm9, %v10695_v32  ;;  %v20533_v52 = vrot.slane %v10765_v26, %v24451_v51  ;;  %v10728_v21 = vcombine.low %v20469_v2, %v20474_v54  ;;  %v10730_v34 = vcombine.low %v20477_v36, %v20495_v39  ;;  %v10694_v14 = vcombine.low %v10672_v11, %v10686_v28 }
 0x4a5   : > { %v10828_v27 = vcombine.low %v9696_v20, %v9711_v5  ;;  %v9728_v9 = vcombine.high %v9720_v23, %v9720_v23  ;;  %v9729_v60 = vcombine.high %v9727_v35, %v9727_v35  ;;  %v10761_v43 = vcombine.low %v10745_v62, %v10759_v24 }
 0x4a6   : > { %v9769_v12 = vrot.slane %v15780_v7, %v24451_v51  ;;  %v10795_v13 = vcombine.high %v10772_v40, %v20519_v61  ;;  %v10797_v57 = vcombine.high %v20523_v46, %v20533_v52  ;;  %v9736_v2 = vrot.slane %v9720_v23, %v24451_v51 }
 0x4a7   : > { %v9743_v54 = vrot.slane %v9727_v35, %v24451_v51  ;;  %v9750_v36 = vrot.slane %v9728_v9, %v24451_v51  ;;  %v9757_v39 = vrot.slane %v9729_v60, %v24451_v51  ;;  %v10738_v49 = vrot.slane %v10728_v21, %v24451_v51  ;;  %v8475_v35 = vld [vmem:[#allocation2 + $0xac] sm:$0xf] }
 0x4a8   : > { %v10752_v29 = vrot.slane %v10730_v34, %v24451_v51  ;;  %v15749_v33 = vcombine.low %v8471_v16, %v8472_v18  ;;  %v9002_v48 = vsel %vm1890_vm9, %v16240_v53, %v8787_v59  ;;  %v9005_v1 = vsel %vm1890_vm9, %v16242_v0, %v8789_v31 }
 0x4a9   : > { %v10829_v55 = vcombine.low %v9736_v2, %v9750_v36  ;;  %v15801_v19 = vcombine.high %v9736_v2, %v9750_v36  ;;  %v10831_v42 = vcombine.low %v9743_v54, %v9757_v39  ;;  %v10838_v10 = vrot.slane %v10828_v27, %v24451_v51  ;;  %v16243_v27 = vld [vmem:[#allocation2 + $0x90] sm:$0xff]  }
 0x4aa   : > { %v10794_v6 = vcombine.low %v10772_v40, %v20519_v61  ;;  %v15781_v38 = vcombine.low %v9002_v48, %v8471_v16  ;;  %v9778_v56 = vcombine.high %v9002_v48, %v15749_v33  ;;  %v10825_v47 = vrot.slane %v10797_v57, %v24451_v51 }
 0x4ab   : > { %11595 = vmatmul.mubr.bf16.gmra.mxu1 %v10694_v14  ;;  %v10845_v30 = vrot.slane %v10829_v55, %v24451_v51  ;;  %v10852_v45 = vrot.slane %v15801_v19, %v24451_v51  ;;  %v10859_v41 = vrot.slane %v10831_v42, %v24451_v51  ;;  %v9776_v22 = vrot.slane %v9769_v12, %v24451_v51  ;;  %v8793_v14 = vpop.permute.xlu0 %8792  ;;  %v16245_v12 = vld [vmem:[#allocation2 + $0x98] ss:$0 sps:$4 sm:$0x11]  }
 0x4ac   : > { %15840 = vmatprep.mubr.msk.bf16.mxu1 %vm1890_vm9, %v10761_v43  ;;  %v9785_v15 = vrot.slane %v15781_v38, %v24451_v51  ;;  %v9792_v26 = vrot.slane %v9778_v56, %v24451_v51  ;;  %v15782_v32 = vcombine.low %v9005_v1, %v8473_v58  ;;  %v15802_v25 = vcombine.high %v9743_v54, %v9757_v39  ;;  %v8474_v43 = vld [vmem:[#allocation2 + $0xa8] sm:$0xf]  ;;  %v8476_v1 = vld [vmem:[#allocation2 + $0xb0] sm:$0x1] }
 0x4ad   : > { %v10760_v63 = vcombine.low %v10738_v49, %v10752_v29  ;;  %v10811_v20 = vrot.slane %v10795_v13, %v24451_v51  ;;  %v10796_v11 = vcombine.low %v20523_v46, %v20533_v52  ;;  %v10804_v8 = vrot.slane %v10794_v6, %v24451_v51  ;;  %v8791_v46 = vpop.permute.xlu1 %8790 }
 0x4ae   : > { %v9793_v28 = vcombine.high %v9785_v15, %v9785_v15  ;;  %v9794_v44 = vcombine.high %v9792_v26, %v9792_v26  ;;  %v9801_v61 = vrot.slane %v9785_v15, %v24451_v51  ;;  %v9808_v37 = vrot.slane %v9792_v26, %v24451_v51 }
 0x4af   : > { %v10827_v3 = vcombine.low %v10811_v20, %v10825_v47  ;;  %v10861_v17 = vcombine.high %v10838_v10, %v10845_v30  ;;  %v10863_v62 = vcombine.high %v10852_v45, %v10859_v41  ;;  %v9834_v23 = vrot.slane %v15782_v32, %v24451_v51  ;;  %v8477_v32 = vld [vmem:[#allocation2 + $0xb4] sm:$0xf]  ;;  %v8478_v20 = vld [vmem:[#allocation2 + $0xb8] sm:$0xf] }
 0x4b0   : > { %v9815_v24 = vrot.slane %v9793_v28, %v24451_v51  ;;  %v9822_v7 = vrot.slane %v9794_v44, %v24451_v51  ;;  %v9823_v5 = vcombine.high %v9801_v61, %v9801_v61  ;;  %v20571_v40 = vrot.slane %v15802_v25, %v24451_v51 }
 0x4b1   : > { %v10818_v52 = vrot.slane %v10796_v11, %v24451_v51  ;;  %v10895_v21 = vcombine.low %v9776_v22, %v9801_v61  ;;  %v10860_v34 = vcombine.low %v10838_v10, %v10845_v30  ;;  %v9824_v9 = vcombine.high %v9808_v37, %v9808_v37  ;;  %v8795_v33 = vpop.permute.xlu1 %8794  ;;  %v16246_v10 = vld [vmem:[#allocation2 + $0x9c] sm:$0xff]  }
 0x4b2   : > { %v9825_v60 = vcombine.high %v9815_v24, %v9815_v24  ;;  %v10896_v18 = vcombine.low %v9815_v24, %v9823_v5  ;;  %v10862_v59 = vcombine.low %v10852_v45, %v10859_v41  ;;  %v10877_v13 = vrot.slane %v10861_v17, %v24451_v51 }
 0x4b3   : > { %11605 = vmatmul.mubr.bf16.gmra.mxu1 %v10760_v63  ;;  %v10891_v57 = vrot.slane %v10863_v62, %v24451_v51  ;;  %v15751_v53 = vcombine.low %v8474_v43, %v8475_v35  ;;  %v9008_v31 = vsel %vm1890_vm9, %v16243_v27, %v8791_v46  ;;  %v9826_v54 = vcombine.high %v9822_v7, %v9822_v7 }
 0x4b4   : > { %15841 = vmatprep.mubr.msk.bf16.mxu1 %vm1890_vm9, %v10827_v3  ;;  %v10897_v2 = vcombine.low %v9825_v60, %v9808_v37  ;;  %v9841_v36 = vrot.slane %v9834_v23, %v24451_v51  ;;  %v9011_v39 = vsel %vm1890_vm9, %v16245_v12, %v8793_v14  ;;  %v20581_v16 = vrot.slane %v10895_v21, %v24451_v51 }
 0x4b5   : > { %v10870_v0 = vrot.slane %v10860_v34, %v24451_v51  ;;  %v15783_v49 = vcombine.low %v9008_v31, %v8474_v43  ;;  %v9843_v29 = vcombine.high %v9008_v31, %v15751_v53  ;;  %v10918_v48 = vrot.slane %v10896_v18, %v24451_v51 }
 0x4b6   : > { %v10925_v55 = vrot.slane %v10897_v2, %v24451_v51  ;;  %v10960_v19 = vcombine.low %v9822_v7, %v9824_v9  ;;  %v10884_v42 = vrot.slane %v10862_v59, %v24451_v51  ;;  %v10893_v6 = vcombine.low %v10877_v13, %v10891_v57  ;;  %v8797_v2 = vpop.permute.xlu0 %8796 }
 0x4b7   : > { %v9850_v38 = vrot.slane %v15783_v49, %v24451_v51  ;;  %v9857_v56 = vrot.slane %v9843_v29, %v24451_v51  ;;  %v15784_v30 = vcombine.low %v9011_v39, %v8476_v1  ;;  %v10826_v45 = vcombine.low %v10804_v8, %v10818_v52 }
 0x4b8   : > { %v10961_v41 = vcombine.low %v9826_v54, %v9841_v36  ;;  %v10929_v47 = vcombine.high %v10918_v48, %v10925_v55  ;;  %v9014_v58 = vsel %vm1890_vm9, %v16246_v10, %v8795_v33  ;;  %v10927_v26 = vcombine.high %v20571_v40, %v20581_v16 }
 0x4b9   : > { %v9858_v22 = vcombine.high %v9850_v38, %v9850_v38  ;;  %v9859_v15 = vcombine.high %v9857_v56, %v9857_v56  ;;  %v20593_v25 = vrot.slane %v10960_v19, %v24451_v51  ;;  %v10892_v63 = vcombine.low %v10870_v0, %v10884_v42  ;;  %v16248_v0 = vld [vmem:[#allocation2 + $0xa4] ss:$0 sps:$4 sm:$0x11]  }
 0x4ba   : > { %v15785_v11 = vcombine.low %v9014_v58, %v8477_v32  ;;  %v9866_v28 = vrot.slane %v9850_v38, %v24451_v51  ;;  %v9899_v61 = vrot.slane %v15784_v30, %v24451_v51  ;;  %v10957_v37 = vrot.slane %v10929_v47, %v24451_v51  ;;  %v8479_v38 = vld [vmem:[#allocation2 + $0xbc] sm:$0x1] }
 0x4bb   : > { %11615 = vmatmul.mubr.bf16.gmra.mxu1 %v10826_v45  ;;  %v9880_v44 = vrot.slane %v9858_v22, %v24451_v51  ;;  %v10977_v3 = vrot.slane %v10961_v41, %v24451_v51  ;;  %v9887_v8 = vrot.slane %v9859_v15, %v24451_v51  ;;  %v10926_v17 = vcombine.low %v20571_v40, %v20581_v16  ;;  %v16249_v15 = vld [vmem:[#allocation2 + $0xa8] sm:$0xff]  }
 0x4bc   : > { %15842 = vmatprep.mubr.msk.bf16.mxu1 %vm1890_vm9, %v10893_v6  ;;  %v9915_v62 = vrot.slane %v15785_v11, %v24451_v51  ;;  %v10943_v5 = vrot.slane %v10927_v26, %v24451_v51  ;;  %v15753_v23 = vcombine.low %v8477_v32, %v8478_v20  ;;  %v9873_v35 = vrot.slane %v9857_v56, %v24451_v51  ;;  %v8480_v11 = vld [vmem:[#allocation2 + $0xc0] sm:$0xf] }
 0x4bd   : > { %v10962_v24 = vcombine.low %v9866_v28, %v9880_v44  ;;  %v15803_v7 = vcombine.high %v9866_v28, %v9880_v44  ;;  %v10928_v46 = vcombine.low %v10918_v48, %v10925_v55  ;;  %v9906_v14 = vrot.slane %v9899_v61, %v24451_v51 }
 0x4be   : > { %v9923_v52 = vcombine.high %v9915_v62, %v9915_v62  ;;  %v9931_v21 = vrot.slane %v9915_v62, %v24451_v51  ;;  %v10959_v40 = vcombine.low %v10943_v5, %v10957_v37  ;;  %v11026_v9 = vcombine.low %v9873_v35, %v9887_v8 }
 0x4bf   : > { %v10984_v34 = vrot.slane %v10962_v24, %v24451_v51  ;;  %v10991_v27 = vrot.slane %v15803_v7, %v24451_v51  ;;  %v9908_v60 = vcombine.high %v9014_v58, %v15753_v23  ;;  %v15804_v43 = vcombine.high %v9873_v35, %v9887_v8 }
 0x4c0   : > { %v9945_v18 = vrot.slane %v9923_v52, %v24451_v51  ;;  %v9953_v59 = vcombine.high %v9931_v21, %v9931_v21  ;;  %v11028_v12 = vcombine.low %v9906_v14, %v9931_v21  ;;  %v10993_v13 = vcombine.high %v20593_v25, %v10977_v3 }
 0x4c1   : > { %v10995_v57 = vcombine.high %v10984_v34, %v10991_v27  ;;  %v10950_v53 = vrot.slane %v10928_v46, %v24451_v51  ;;  %v10936_v36 = vrot.slane %v10926_v17, %v24451_v51  ;;  %v9922_v39 = vrot.slane %v9908_v60, %v24451_v51 }
 0x4c2   : > { %v11029_v31 = vcombine.low %v9945_v18, %v9953_v59  ;;  %v11036_v49 = vrot.slane %v11026_v9, %v24451_v51  ;;  %v11043_v29 = vrot.slane %v15804_v43, %v24451_v51  ;;  %v11050_v33 = vrot.slane %v11028_v12, %v24451_v51 }
 0x4c3   : > { %11625 = vmatmul.mubr.bf16.gmra.mxu1 %v10892_v63  ;;  %v11023_v54 = vrot.slane %v10995_v57, %v24451_v51  ;;  %v11009_v48 = vrot.slane %v10993_v13, %v24451_v51  ;;  %v10958_v55 = vcombine.low %v10936_v36, %v10950_v53  ;;  %v9017_v19 = vsel %vm1890_vm9, %v16248_v0, %v8797_v2 }
 0x4c4   : > { %15843 = vmatprep.mubr.msk.bf16.mxu1 %vm1890_vm9, %v10959_v40  ;;  %v11057_v16 = vrot.slane %v11029_v31, %v24451_v51  ;;  %v10994_v42 = vcombine.low %v10984_v34, %v10991_v27  ;;  %v9924_v6 = vcombine.high %v9922_v39, %v9922_v39  ;;  %v10992_v56 = vcombine.low %v20593_v25, %v10977_v3 }
 0x4c5   : > { %v11025_v1 = vcombine.low %v11009_v48, %v11023_v54  ;;  %v15786_v30 = vcombine.low %v9017_v19, %v8479_v38  ;;  %v11059_v45 = vcombine.high %v11036_v49, %v11043_v29  ;;  %v9938_v41 = vrot.slane %v9922_v39, %v24451_v51  ;;  %v16251_v48 = vld [vmem:[#allocation2 + $0xb0] ss:$0 sps:$4 sm:$0x11]   ;;  %v8483_v19 = vld [vmem:[#allocation2 + $0xcc] sm:$0xf] }
 0x4c6   : > { %v11061_v10 = vcombine.high %v11050_v33, %v11057_v16  ;;  %v11016_v47 = vrot.slane %v10994_v42, %v24451_v51  ;;  %v9955_v58 = vcombine.high %v9945_v18, %v9945_v18  ;;  %v9952_v26 = vrot.slane %v9924_v6, %v24451_v51  ;;  %v8484_v42 = vld [vmem:[#allocation2 + $0xd0] sm:$0xf]  ;;  %v8482_v6 = vld [vmem:[#allocation2 + $0xc8] sm:$0x1] }
 0x4c7   : > { %v11002_v32 = vrot.slane %v10992_v56, %v24451_v51  ;;  %v9964_v25 = vrot.slane %v15786_v30, %v24451_v51  ;;  %v11075_v20 = vrot.slane %v11059_v45, %v24451_v51  ;;  %v9954_v44 = vcombine.high %v9938_v41, %v9938_v41  ;;  %v16252_v38 = vld [vmem:[#allocation2 + $0xbc] ss:$0 sps:$4 sm:$0x11]  }
 0x4c8   : > { %v11089_v22 = vrot.slane %v11061_v10, %v24451_v51  ;;  %v11060_v37 = vcombine.low %v11050_v33, %v11057_v16  ;;  %v11092_v8 = vcombine.low %v9955_v58, %v9938_v41  ;;  %v9956_v62 = vcombine.high %v9952_v26, %v9952_v26  ;;  %v8481_v16 = vld [vmem:[#allocation2 + $0xc4] sm:$0xf]  ;;  %v8485_v10 = vld [vmem:[#allocation2 + $0xd4] sm:$0x1] }
 0x4c9   : > { %v11024_v61 = vcombine.low %v11002_v32, %v11016_v47  ;;  %v11058_v24 = vcombine.low %v11036_v49, %v11043_v29  ;;  %v11093_v5 = vcombine.low %v9952_v26, %v9954_v44  ;;  %v9971_v23 = vrot.slane %v9964_v25, %v24451_v51  ;;  %v16253_v47 = vld [vmem:[#allocation2 + $0xb4] sm:$0xff]  }
 0x4ca   : > { %v11091_v17 = vcombine.low %v11075_v20, %v11089_v22  ;;  %v11082_v35 = vrot.slane %v11060_v37, %v24451_v51  ;;  %v11102_v52 = vrot.slane %v11092_v8, %v24451_v51  ;;  %v15755_v0 = vcombine.low %v8480_v11, %v8481_v16 }
 0x4cb   : > { %11635 = vmatmul.mubr.bf16.gmra.mxu1 %v10958_v55  ;;  %v8799_v63 = vpop.permute.xlu1 %8798  ;;  %v11094_v21 = vcombine.low %v9956_v62, %v9971_v23  ;;  %v11068_v34 = vrot.slane %v11058_v24, %v24451_v51  ;;  %v11109_v40 = vrot.slane %v11093_v5, %v24451_v51  ;;  %v15757_v56 = vcombine.low %v8483_v19, %v8484_v42 }
 0x4cc   : > { %15844 = vmatprep.mubr.msk.bf16.mxu1 %vm1890_vm9, %v11025_v1  ;;  %v9020_v28 = vsel %vm1890_vm9, %v16249_v15, %v8799_v63 }
 0x4cd   : > { %v15787_v3 = vcombine.low %v9020_v28, %v8480_v11  ;;  %v11090_v9 = vcombine.low %v11068_v34, %v11082_v35  ;;  %v11116_v18 = vrot.slane %v11094_v21, %v24451_v51  ;;  %v11125_v43 = vcombine.high %v11102_v52, %v11109_v40 }
 0x4ce   : > { %v11124_v12 = vcombine.low %v11102_v52, %v11109_v40  ;;  %v9973_v49 = vcombine.high %v9020_v28, %v15755_v0 }
 0x4cf   : > { %v9980_v7 = vrot.slane %v15787_v3, %v24451_v51  ;;  %v11141_v53 = vrot.slane %v11125_v43, %v24451_v51 }
 0x4d0   : > { %v11134_v2 = vrot.slane %v11124_v12, %v24451_v51  ;;  %v9987_v29 = vrot.slane %v9973_v49, %v24451_v51  ;;  %v8801_v33 = vpop.permute.xlu1 %8800 }
 0x4d1   : > { %v9988_v46 = vcombine.high %v9980_v7, %v9980_v7  ;;  %v9996_v27 = vrot.slane %v9980_v7, %v24451_v51  ;;  %v9023_v1 = vsel %vm1890_vm9, %v16251_v48, %v8801_v33 }
 0x4d2   : > { %v9989_v55 = vcombine.high %v9987_v29, %v9987_v29  ;;  %v15788_v45 = vcombine.low %v9023_v1, %v8482_v6  ;;  %v10003_v15 = vrot.slane %v9987_v29, %v24451_v51 }
 0x4d3   : > { %11645 = vmatmul.mubr.bf16.gmra.mxu1 %v11024_v61  ;;  %v10010_v14 = vrot.slane %v9988_v46, %v24451_v51 }
 0x4d4   : > { %15845 = vmatprep.mubr.msk.bf16.mxu1 %vm1890_vm9, %v11091_v17  ;;  %v10017_v30 = vrot.slane %v9989_v55, %v24451_v51  ;;  %v10029_v28 = vrot.slane %v15788_v45, %v24451_v51 }
 0x4d5   : > { %v11095_v60 = vcombine.low %v9996_v27, %v10010_v14  ;;  %v15805_v20 = vcombine.high %v9996_v27, %v10010_v14 }
 0x4d6   : > { %v11159_v11 = vcombine.low %v10003_v15, %v10017_v30  ;;  %v15806_v24 = vcombine.high %v10003_v15, %v10017_v30  ;;  %v10036_v23 = vrot.slane %v10029_v28, %v24451_v51 }
 0x4d7   : > { %v11123_v59 = vrot.slane %v11095_v60, %v24451_v51  ;;  %v11168_v7 = vrot.slane %v15805_v20, %v24451_v51 }
 0x4d8   : > { %v11175_v5 = vrot.slane %v11159_v11, %v24451_v51 }
 0x4d9   : > { %v11127_v13 = vcombine.high %v11116_v18, %v11123_v59  ;;  %v11126_v57 = vcombine.low %v11116_v18, %v11123_v59  ;;  %v11182_v18 = vrot.slane %v15806_v24, %v24451_v51 }
 0x4da   : > { %v11191_v43 = vcombine.high %v11168_v7, %v11175_v5  ;;  %v11190_v12 = vcombine.low %v11168_v7, %v11175_v5 }
 0x4db   : > { %11655 = vmatmul.mubr.bf16.gmra.mxu1 %v11090_v9  ;;  %v11155_v31 = vrot.slane %v11127_v13, %v24451_v51  ;;  %v11148_v54 = vrot.slane %v11126_v57, %v24451_v51 }
 0x4dc   : > { %v11207_v16 = vrot.slane %v11191_v43, %v24451_v51  ;;  %v11200_v49 = vrot.slane %v11190_v12, %v24451_v51 }
 0x4dd   : > { %v11157_v36 = vcombine.low %v11141_v53, %v11155_v31  ;;  %v11156_v39 = vcombine.low %v11134_v2, %v11148_v54 }
 0x4df   : > { %15846 = vmatprep.mubr.msk.bf16.mxu1 %vm1890_vm9, %v11157_v36 }
 0x4e3   : > { %11665 = vmatmul.mubr.bf16.gmra.mxu1 %v11156_v39 }
 0x4f9   : > { %v8805_v41 = vpop.permute.xlu1 %8804 }
 0x4fa   : > { %v9029_v58 = vsel %vm1890_vm9, %v16252_v38, %v8805_v41  ;;  %v8803_v22 = vpop.permute.xlu0 %8802 }
 0x4fb   : > { %v15790_v26 = vcombine.low %v9029_v58, %v8485_v10  ;;  %v9026_v32 = vsel %vm1890_vm9, %v16253_v47, %v8803_v22 }
 0x4fc   : > { %v15789_v63 = vcombine.low %v9026_v32, %v8483_v19  ;;  %v10038_v25 = vcombine.high %v9026_v32, %v15757_v56 }
 0x4fd   : > { %v10094_v37 = vrot.slane %v15790_v26, %v24451_v51 }
 0x4fe   : > { %v10045_v44 = vrot.slane %v15789_v63, %v24451_v51  ;;  %v10052_v61 = vrot.slane %v10038_v25, %v24451_v51 }
 0x4ff   : > { %v10101_v34 = vrot.slane %v10094_v37, %v24451_v51 }
 0x500   : > { %v10053_v3 = vcombine.high %v10045_v44, %v10045_v44  ;;  %v10054_v8 = vcombine.high %v10052_v61, %v10052_v61  ;;  %v10061_v17 = vrot.slane %v10045_v44, %v24451_v51  ;;  %v10068_v62 = vrot.slane %v10052_v61, %v24451_v51 }
 0x502   : > { %v10075_v35 = vrot.slane %v10053_v3, %v24451_v51  ;;  %v10082_v46 = vrot.slane %v10054_v8, %v24451_v51  ;;  %v10083_v52 = vcombine.high %v10061_v17, %v10061_v17  ;;  %v10084_v21 = vcombine.high %v10068_v62, %v10068_v62 }
 0x503   : > { %v11161_v27 = vcombine.low %v10036_v23, %v10061_v17 }
 0x504   : > { %v10085_v14 = vcombine.high %v10075_v35, %v10075_v35  ;;  %v10086_v40 = vcombine.high %v10082_v46, %v10082_v46  ;;  %v11224_v9 = vcombine.low %v10075_v35, %v10083_v52  ;;  %v11226_v60 = vcombine.low %v10082_v46, %v10084_v21 }
 0x505   : > { %v11189_v59 = vrot.slane %v11161_v27, %v24451_v51 }
 0x506   : > { %v11225_v13 = vcombine.low %v10085_v14, %v10068_v62  ;;  %v11227_v57 = vcombine.low %v10086_v40, %v10101_v34  ;;  %v11234_v2 = vrot.slane %v11224_v9, %v24451_v51  ;;  %v11248_v36 = vrot.slane %v11226_v60, %v24451_v51 }
 0x507   : > { %v11193_v53 = vcombine.high %v11182_v18, %v11189_v59  ;;  %v11192_v31 = vcombine.low %v11182_v18, %v11189_v59 }
 0x508   : > { %v11241_v54 = vrot.slane %v11225_v13, %v24451_v51  ;;  %v11255_v39 = vrot.slane %v11227_v57, %v24451_v51 }
 0x509   : > { %v11221_v0 = vrot.slane %v11193_v53, %v24451_v51  ;;  %v11214_v29 = vrot.slane %v11192_v31, %v24451_v51 }
 0x50a   : > { %v11257_v33 = vcombine.high %v11234_v2, %v11241_v54  ;;  %v11259_v48 = vcombine.high %v11248_v36, %v11255_v39  ;;  %v11256_v10 = vcombine.low %v11234_v2, %v11241_v54  ;;  %v11258_v6 = vcombine.low %v11248_v36, %v11255_v39 }
 0x50b   : > { %v11223_v55 = vcombine.low %v11207_v16, %v11221_v0  ;;  %v11222_v19 = vcombine.low %v11200_v49, %v11214_v29 }
 0x50c   : > { %v11273_v42 = vrot.slane %v11257_v33, %v24451_v51  ;;  %v11287_v1 = vrot.slane %v11259_v48, %v24451_v51  ;;  %v11266_v30 = vrot.slane %v11256_v10, %v24451_v51  ;;  %v11280_v45 = vrot.slane %v11258_v6, %v24451_v51 }
 0x50d   : > { %15847 = vmatprep.mubr.msk.bf16.mxu1 %vm1890_vm9, %v11223_v55 }
 0x50e   : > { %11675 = vmatmul.mubr.bf16.gmra.mxu1 %v11222_v19  ;;  %v11289_v38 = vcombine.low %v11273_v42, %v11287_v1  ;;  %v11288_v32 = vcombine.low %v11266_v30, %v11280_v45 }
 0x50f   : > { %v11516_v56 = vpop.f32.mrf.mxu1 }
 0x510   : > { %15848 = vmatprep.mubr.msk.bf16.mxu1 %vm1890_vm9, %v11289_v38 }
 0x511   : > { %v11518_v41 = vpop.f32.mrf.mxu1 }
 0x512   : > { %v11767_v47 = vcombine.low %v11516_v56, %v11518_v41  ;;  %v11768_v58 = vcombine.high %v11516_v56, %v11518_v41 }
 0x513   : > { %v11520_v22 = vpop.f32.mrf.mxu1 }
 0x514   : > { %v20685_v15 = vrot.slane %v11767_v47, %v16806_v50  ;;  %v20688_v26 = vrot.slane %v11768_v58, %v16806_v50 }
 0x515   : > { %v11522_v63 = vpop.f32.mrf.mxu1 }
 0x516   : > { %v20692_v25 = vcombine.high %v20685_v15, %v20685_v15  ;;  %v20696_v20 = vcombine.high %v20688_v26, %v20688_v26  ;;  %11685 = vmatmul.mubr.bf16.gmra.mxu1 %v11288_v32  ;;  %v11785_v51 = vcombine.low %v11520_v22, %v11522_v63  ;;  %v11786_v11 = vcombine.high %v11520_v22, %v11522_v63 }
 0x517   : > { %v15849_v28 = vrot.slane %v20685_v15, 9  ;;  %v12548_v44 = vrot.slane %v20688_v26, 7 }
 0x518   : > { %v20701_v61 = vrot.slane %v11785_v51, %v16806_v50  ;;  %v20704_v37 = vrot.slane %v11786_v11, %v16806_v50  ;;  %v12545_v3 = vrot.slane %v20692_v25, 7  ;;  %v12551_v8 = vrot.slane %v20696_v20, 7 }
 0x519   : > { %v12550_v7 = vrot.slane %v12548_v44, 2 }
 0x51a   : > { %v20710_v17 = vcombine.high %v20701_v61, %v20701_v61  ;;  %v12546_v62 = vsel %vm17974_vm0, %v15849_v28, %v12545_v3  ;;  %v12547_v24 = vrot.slane %v12545_v3, 2  ;;  %v20716_v5 = vcombine.high %v20704_v37, %v20704_v37 }
 0x51b   : > { %12943 = vrot.lane.b32.xlu0 %v12546_v62, %s16459_s24  ;;  %v12554_v23 = vrot.slane %v20701_v61, 7  ;;  %v12553_v46 = vrot.slane %v12551_v8, 2  ;;  %v12552_v34 = vsel %vm17974_vm0, %v12550_v7, %v12551_v8  ;;  %v12560_v14 = vrot.slane %v20704_v37, 7 }
 0x51c   : > { %v12549_v35 = vsel %vm17974_vm0, %v12547_v24, %v12548_v44  ;;  %v12557_v52 = vrot.slane %v20710_v17, 7  ;;  %v12563_v60 = vrot.slane %v20716_v5, 7 }
 0x51d   : > { %v11526_v21 = vpop.f32.mrf.mxu1  ;;  %12945 = vrot.lane.b32.xlu1 %v12549_v35, %s16459_s24  ;;  %v12556_v27 = vrot.slane %v12554_v23, 2  ;;  %v12555_v43 = vsel %vm17974_vm0, %v12553_v46, %v12554_v23  ;;  %v12562_v31 = vrot.slane %v12560_v14, 2 }
 0x51e   : > { %v12559_v9 = vrot.slane %v12557_v52, 2  ;;  %v12565_v36 = vrot.slane %v12563_v60, 2 }
 0x51f   : > { %v11528_v40 = vpop.f32.mrf.mxu1  ;;  %12947 = vrot.lane.b32.xlu0 %v12552_v34, %s16459_s24  ;;  %v12558_v53 = vsel %vm17974_vm0, %v12556_v27, %v12557_v52  ;;  %v12564_v55 = vsel %vm17974_vm0, %v12562_v31, %v12563_v60 }
 0x520   : > { %v11803_v18 = vcombine.low %v11526_v21, %v11528_v40  ;;  %v11804_v59 = vcombine.high %v11526_v21, %v11528_v40  ;;  %v12561_v54 = vsel %vm17974_vm0, %v12559_v9, %v12560_v14 }
 0x521   : > { %v11530_v12 = vpop.f32.mrf.mxu1  ;;  %12949 = vrot.lane.b32.xlu1 %v12555_v43, %s16459_s24 }
 0x522   : > { %v20733_v13 = vrot.slane %v11803_v18, %v16806_v50  ;;  %v20736_v57 = vrot.slane %v11804_v59, %v16806_v50 }
 0x523   : > { %v11532_v2 = vpop.f32.mrf.mxu1  ;;  %12951 = vrot.lane.b32.xlu0 %v12558_v53, %s16459_s24 }
 0x524   : > { %24462 = vst [vmem:[#allocation24_spill] sm:$0xff] %v20736_v57  ;;  %v20745_v39 = vcombine.high %v20733_v13, %v20733_v13  ;;  %v20749_v16 = vcombine.high %v20736_v57, %v20736_v57  ;;  %v11821_v0 = vcombine.low %v11530_v12, %v11532_v2  ;;  %v11822_v49 = vcombine.high %v11530_v12, %v11532_v2 }
 0x525   : > { %12953 = vrot.lane.b32.xlu1 %v12561_v54, %s16459_s24  ;;  %v12566_v29 = vrot.slane %v20733_v13, 7  ;;  %v12570_v33 = vrot.slane %v20736_v57, 7 }
 0x526   : > { %24463 = vst [vmem:[#allocation26_spill] sm:$0xff] %v20745_v39  ;;  %v20755_v48 = vrot.slane %v11821_v0, %v16806_v50  ;;  %v15850_v19 = vrot.slane %v20745_v39, 9  ;;  %v12573_v42 = vrot.slane %v20749_v16, 7  ;;  %v20762_v1 = vrot.slane %v11822_v49, %v16806_v50 }
 0x527   : > { %12955 = vrot.lane.b32.xlu0 %v12564_v55, %s16459_s24  ;;  %v12567_v6 = vsel %vm17974_vm0, %v12565_v36, %v12566_v29  ;;  %v12572_v38 = vrot.slane %v12570_v33, 2 }
 0x528   : > { %24464 = vst [vmem:[#allocation25_spill] sm:$0xff] %v20762_v1  ;;  %v20767_v10 = vcombine.high %v20755_v48, %v20755_v48  ;;  %v12576_v56 = vrot.slane %v20755_v48, 7  ;;  %v12571_v30 = vsel %vm17974_vm0, %v15850_v19, %v12570_v33  ;;  %v12575_v45 = vrot.slane %v12573_v42, 2 }
 0x529   : > { %12957 = vrot.lane.b32.xlu1 %v12567_v6, %s16459_s24  ;;  %v20778_v47 = vcombine.high %v20762_v1, %v20762_v1  ;;  %v12582_v58 = vrot.slane %v20762_v1, 7  ;;  %v12574_v22 = vsel %vm17974_vm0, %v12572_v38, %v12573_v42 }
 0x52a   : > { %24465 = vst [vmem:[#allocation90_spill] sm:$0xff] %v20767_v10  ;;  %v12579_v41 = vrot.slane %v20767_v10, 7  ;;  %v12578_v32 = vrot.slane %v12576_v56, 2  ;;  %v12577_v51 = vsel %vm17974_vm0, %v12575_v45, %v12576_v56 }
 0x52b   : > { %24466 = vst [vmem:[#allocation29_spill] sm:$0xff] %v20778_v47  ;;  %12959 = vrot.lane.b32.xlu0 %v12571_v30, %s16459_s24  ;;  %v12584_v44 = vrot.slane %v12582_v58, 2  ;;  %v12585_v3 = vrot.slane %v20778_v47, 7 }
 0x52c   : > { %v12581_v11 = vrot.slane %v12579_v41, 2  ;;  %v12580_v24 = vsel %vm17974_vm0, %v12578_v32, %v12579_v41 }
 0x52d   : > { %v11536_v63 = vpop.f32.mrf.mxu1  ;;  %12961 = vrot.lane.b32.xlu1 %v12574_v22, %s16459_s24  ;;  %v12586_v21 = vsel %vm17974_vm0, %v12584_v44, %v12585_v3  ;;  %v12587_v34 = vrot.slane %v12585_v3, 2 }
 0x52e   : > { %v12583_v46 = vsel %vm17974_vm0, %v12581_v11, %v12582_v58 }
 0x52f   : > { %v11538_v28 = vpop.f32.mrf.mxu1  ;;  %12963 = vrot.lane.b32.xlu0 %v12577_v51, %s16459_s24 }
 0x530   : > { %v11839_v8 = vcombine.low %v11536_v63, %v11538_v28  ;;  %v11840_v62 = vcombine.high %v11536_v63, %v11538_v28 }
 0x531   : > { %v11540_v7 = vpop.f32.mrf.mxu1  ;;  %12965 = vrot.lane.b32.xlu1 %v12580_v24, %s16459_s24 }
 0x532   : > { %v20793_v23 = vrot.slane %v11839_v8, %v16806_v50  ;;  %v20796_v35 = vrot.slane %v11840_v62, %v16806_v50 }
 0x533   : > { %v11542_v52 = vpop.f32.mrf.mxu1  ;;  %12967 = vrot.lane.b32.xlu0 %v12583_v46, %s16459_s24 }
 0x534   : > { %24467 = vst [vmem:[#allocation27_spill] sm:$0xff] %v20796_v35  ;;  %v20805_v27 = vcombine.high %v20796_v35, %v20796_v35  ;;  %v11857_v14 = vcombine.low %v11540_v7, %v11542_v52  ;;  %v11858_v40 = vcombine.high %v11540_v7, %v11542_v52  ;;  %v12588_v9 = vrot.slane %v20793_v23, 7 }
 0x535   : > { %12969 = vrot.lane.b32.xlu1 %v12586_v21, %s16459_s24  ;;  %v20811_v60 = vcombine.high %v20793_v23, %v20793_v23  ;;  %v15851_v54 = vrot.slane %v20796_v35, 9 }
 0x536   : > { %24468 = vst [vmem:[#allocation30_spill] sm:$0xff] %v20805_v27  ;;  %v20814_v18 = vrot.slane %v11857_v14, %v16806_v50  ;;  %v20817_v59 = vrot.slane %v11858_v40, %v16806_v50  ;;  %v12589_v43 = vsel %vm17974_vm0, %v12587_v34, %v12588_v9  ;;  %v12590_v12 = vrot.slane %v12588_v9, 2 }
 0x537   : > { %12971 = vrot.lane.b32.xlu0 %v12589_v43, %s16459_s24  ;;  %v12591_v53 = vrot.slane %v20811_v60, 7  ;;  %v12595_v31 = vrot.slane %v20805_v27, 7 }
 0x538   : > { %24469 = vst [vmem:[#allocation28_spill] sm:$0xff] %v20814_v18  ;;  %24470 = vst [vmem:[#allocation31_spill] sm:$0xff] %v20817_v59  ;;  %v20826_v2 = vcombine.high %v20814_v18, %v20814_v18  ;;  %v12598_v36 = vrot.slane %v20814_v18, 7  ;;  %v20832_v0 = vcombine.high %v20817_v59, %v20817_v59  ;;  %v12604_v42 = vrot.slane %v20817_v59, 7 }
 0x539   : > { %v12592_v49 = vsel %vm17974_vm0, %v12590_v12, %v12591_v53  ;;  %v12597_v29 = vrot.slane %v12595_v31, 2  ;;  %v12596_v33 = vsel %vm17974_vm0, %v15851_v54, %v12595_v31 }
 0x53a   : > { %24471 = vst [vmem:[#allocation32_spill] sm:$0xff] %v20826_v2  ;;  %24472 = vst [vmem:[#allocation34_spill] sm:$0xff] %v20832_v0  ;;  %12973 = vrot.lane.b32.xlu1 %v12592_v49, %s16459_s24  ;;  %v12600_v55 = vrot.slane %v12598_v36, 2  ;;  %v12601_v19 = vrot.slane %v20826_v2, 7  ;;  %v12606_v41 = vrot.slane %v12604_v42, 2  ;;  %v12607_v58 = vrot.slane %v20832_v0, 7 }
 0x53b   : > { %12975 = vrot.lane.b32.xlu0 %v12596_v33, %s16459_s24  ;;  %v12599_v38 = vsel %vm17974_vm0, %v12597_v29, %v12598_v36 }
 0x53c   : > { %v11546_v6 = vpop.f32.mrf.mxu1  ;;  %v12603_v56 = vrot.slane %v12601_v19, 2  ;;  %v12602_v45 = vsel %vm17974_vm0, %v12600_v55, %v12601_v19  ;;  %v12608_v3 = vsel %vm17974_vm0, %v12606_v41, %v12607_v58  ;;  %v12609_v8 = vrot.slane %v12607_v58, 2 }
 0x53e   : > { %v11548_v30 = vpop.f32.mrf.mxu1  ;;  %12977 = vrot.lane.b32.xlu1 %v12599_v38, %s16459_s24  ;;  %v12605_v11 = vsel %vm17974_vm0, %v12603_v56, %v12604_v42 }
 0x53f   : > { %v11875_v22 = vcombine.low %v11546_v6, %v11548_v30  ;;  %v11876_v32 = vcombine.high %v11546_v6, %v11548_v30  ;;  %12979 = vrot.lane.b32.xlu0 %v12602_v45, %s16459_s24 }
 0x540   : > { %v11550_v63 = vpop.f32.mrf.mxu1 }
 0x541   : > { %v20850_v51 = vrot.slane %v11875_v22, %v16806_v50  ;;  %v20855_v28 = vrot.slane %v11876_v32, %v16806_v50 }
 0x542   : > { %v11552_v44 = vpop.f32.mrf.mxu1  ;;  %12981 = vrot.lane.b32.xlu1 %v12605_v11, %s16459_s24 }
 0x543   : > { %24473 = vst [vmem:[#allocation33_spill] sm:$0xff] %v20850_v51  ;;  %24474 = vst [vmem:[#allocation35_spill] sm:$0xff] %v20855_v28  ;;  %v20862_v62 = vcombine.high %v20850_v51, %v20850_v51  ;;  %v11893_v24 = vcombine.low %v11550_v63, %v11552_v44  ;;  %v11894_v7 = vcombine.high %v11550_v63, %v11552_v44  ;;  %12983 = vrot.lane.b32.xlu0 %v12608_v3, %s16459_s24 }
 0x544   : > { %v12610_v46 = vrot.slane %v20850_v51, 7  ;;  %v20875_v14 = vcombine.high %v20855_v28, %v20855_v28  ;;  %v12616_v36 = vrot.slane %v20855_v28, 7 }
 0x545   : > { %24475 = vst [vmem:[#allocation98_spill] sm:$0xff] %v20862_v62  ;;  %v20867_v52 = vrot.slane %v11893_v24, %v16806_v50  ;;  %v20870_v21 = vrot.slane %v11894_v7, %v16806_v50  ;;  %v12613_v34 = vrot.slane %v20862_v62, 7 }
 0x546   : > { %24478 = vst [vmem:[#allocation37_spill] sm:$0xff] %v20875_v14  ;;  %v12611_v40 = vsel %vm17974_vm0, %v12609_v8, %v12610_v46  ;;  %v12612_v9 = vrot.slane %v12610_v46, 2  ;;  %v15852_v55 = vrot.slane %v20875_v14, 9 }
 0x547   : > { %24476 = vst [vmem:[#allocation36_spill] sm:$0xff] %v20867_v52  ;;  %24477 = vst [vmem:[#allocation38_spill] sm:$0xff] %v20870_v21  ;;  %v20881_v43 = vcombine.high %v20867_v52, %v20867_v52  ;;  %12985 = vrot.lane.b32.xlu1 %v12611_v40, %s16459_s24  ;;  %v12615_v12 = vrot.slane %v12613_v34, 2  ;;  %v12620_v53 = vrot.slane %v20867_v52, 7  ;;  %v20887_v31 = vcombine.high %v20870_v21, %v20870_v21 }
 0x548   : > { %v12614_v54 = vsel %vm17974_vm0, %v12612_v9, %v12613_v34  ;;  %v12626_v42 = vrot.slane %v20870_v21, 7 }
 0x549   : > { %24479 = vst [vmem:[#allocation39_spill] sm:$0xff] %v20881_v43  ;;  %24480 = vst [vmem:[#allocation40_spill] sm:$0xff] %v20887_v31  ;;  %12987 = vrot.lane.b32.xlu0 %v12614_v54, %s16459_s24  ;;  %v12623_v49 = vrot.slane %v20881_v43, 7  ;;  %v12617_v33 = vsel %vm17974_vm0, %v12615_v12, %v12616_v36  ;;  %v12622_v19 = vrot.slane %v12620_v53, 2  ;;  %v12621_v38 = vsel %vm17974_vm0, %v15852_v55, %v12620_v53 }
 0x54a   : > { %v11556_v29 = vpop.f32.mrf.mxu1  ;;  %v12629_v30 = vrot.slane %v20887_v31, 7  ;;  %v12628_v32 = vrot.slane %v12626_v42, 2 }
 0x54b   : > { %12989 = vrot.lane.b32.xlu1 %v12617_v33, %s16459_s24  ;;  %v12625_v56 = vrot.slane %v12623_v49, 2  ;;  %v12624_v22 = vsel %vm17974_vm0, %v12622_v19, %v12623_v49 }
 0x54c   : > { %v11558_v6 = vpop.f32.mrf.mxu1  ;;  %v12631_v8 = vrot.slane %v12629_v30, 2  ;;  %v12630_v9 = vsel %vm17974_vm0, %v12628_v32, %v12629_v30 }
 0x54d   : > { %v11911_v45 = vcombine.low %v11556_v29, %v11558_v6  ;;  %v11912_v41 = vcombine.high %v11556_v29, %v11558_v6  ;;  %12991 = vrot.lane.b32.xlu0 %v12621_v38, %s16459_s24  ;;  %v12627_v3 = vsel %vm17974_vm0, %v12625_v56, %v12626_v42 }
 0x54e   : > { %v11560_v58 = vpop.f32.mrf.mxu1 }
 0x54f   : > { %v20906_v63 = vrot.slane %v11911_v45, %v16806_v50  ;;  %v20909_v11 = vrot.slane %v11912_v41, %v16806_v50  ;;  %12993 = vrot.lane.b32.xlu1 %v12624_v22, %s16459_s24 }
 0x550   : > { %v11562_v44 = vpop.f32.mrf.mxu1 }
 0x551   : > { %24481 = vst [vmem:[#allocation42_spill] sm:$0xff] %v20906_v63  ;;  %24482 = vst [vmem:[#allocation41_spill] sm:$0xff] %v20909_v11  ;;  %v20916_v24 = vcombine.high %v20906_v63, %v20906_v63  ;;  %v11929_v7 = vcombine.low %v11560_v58, %v11562_v44  ;;  %v11930_v46 = vcombine.high %v11560_v58, %v11562_v44  ;;  %12995 = vrot.lane.b32.xlu0 %v12627_v3, %s16459_s24 }
 0x552   : > { %v12632_v34 = vrot.slane %v20906_v63, 7  ;;  %v12638_v12 = vrot.slane %v20909_v11, 7  ;;  %v20925_v53 = vcombine.high %v20909_v11, %v20909_v11 }
 0x553   : > { %24483 = vst [vmem:[#allocation43_spill] sm:$0xff] %v20916_v24  ;;  %v11566_v40 = vpop.f32.mrf.mxu1  ;;  %v20928_v54 = vrot.slane %v11929_v7, %v16806_v50  ;;  %v20931_v36 = vrot.slane %v11930_v46, %v16806_v50  ;;  %12997 = vrot.lane.b32.xlu1 %v12630_v9, %s16459_s24  ;;  %v12635_v55 = vrot.slane %v20916_v24, 7 }
 0x554   : > { %24484 = vst [vmem:[#allocation44_spill] sm:$0xff] %v20925_v53  ;;  %v12634_v49 = vrot.slane %v12632_v34, 2  ;;  %v12633_v33 = vsel %vm17974_vm0, %v12631_v8, %v12632_v34  ;;  %v12640_v6 = vrot.slane %v12638_v12, 2  ;;  %v12641_v38 = vrot.slane %v20925_v53, 7 }
 0x555   : > { %24485 = vst [vmem:[#allocation46_spill] sm:$0xff] %v20928_v54  ;;  %24486 = vst [vmem:[#allocation45_spill] sm:$0xff] %v20931_v36  ;;  %v11568_v29 = vpop.f32.mrf.mxu1  ;;  %v20939_v19 = vcombine.high %v20928_v54, %v20928_v54  ;;  %12999 = vrot.lane.b32.xlu0 %v12633_v33, %s16459_s24  ;;  %v20945_v56 = vcombine.high %v20931_v36, %v20931_v36  ;;  %v12637_v58 = vrot.slane %v12635_v55, 2  ;;  %v12648_v8 = vrot.slane %v20931_v36, 7 }
 0x556   : > { %v11947_v42 = vcombine.low %v11566_v40, %v11568_v29  ;;  %v11948_v30 = vcombine.high %v11566_v40, %v11568_v29  ;;  %v12636_v41 = vsel %vm17974_vm0, %v12634_v49, %v12635_v55  ;;  %v12642_v7 = vsel %vm17974_vm0, %v12640_v6, %v12641_v38 }
 0x557   : > { %24487 = vst [vmem:[#allocation47_spill] sm:$0xff] %v20939_v19  ;;  %24488 = vst [vmem:[#allocation48_spill] sm:$0xff] %v20945_v56  ;;  %v11570_v45 = vpop.f32.mrf.mxu1  ;;  %13001 = vrot.lane.b32.xlu1 %v12636_v41, %s16459_s24  ;;  %v12645_v32 = vrot.slane %v20939_v19, 7  ;;  %v12639_v3 = vsel %vm17974_vm0, %v12637_v58, %v12638_v12  ;;  %v15853_v46 = vrot.slane %v20928_v54, 9  ;;  %v12651_v12 = vrot.slane %v20945_v56, 7 }
 0x558   : > { %v20950_v22 = vrot.slane %v11947_v42, %v16806_v50  ;;  %v20962_v34 = vrot.slane %v11948_v30, %v16806_v50  ;;  %v12650_v6 = vrot.slane %v12648_v8, 2 }
 0x559   : > { %v11572_v44 = vpop.f32.mrf.mxu1  ;;  %13003 = vrot.lane.b32.xlu0 %v12639_v3, %s16459_s24  ;;  %v12647_v49 = vrot.slane %v12645_v32, 2  ;;  %v12646_v42 = vsel %vm17974_vm0, %v15853_v46, %v12645_v32 }
 0x55a   : > { %24489 = vst [vmem:[#allocation50_spill] sm:$0xff] %v20950_v22  ;;  %24490 = vst [vmem:[#allocation49_spill] sm:$0xff] %v20962_v34  ;;  %v20966_v40 = vcombine.high %v20950_v22, %v20950_v22  ;;  %v11965_v29 = vcombine.low %v11570_v45, %v11572_v44  ;;  %v11966_v33 = vcombine.high %v11570_v45, %v11572_v44  ;;  %v12654_v38 = vrot.slane %v20950_v22, 7 }
 0x55b   : > { %v11576_v9 = vpop.f32.mrf.mxu1  ;;  %13005 = vrot.lane.b32.xlu1 %v12642_v7, %s16459_s24  ;;  %v20976_v30 = vcombine.high %v20962_v34, %v20962_v34  ;;  %v12649_v58 = vsel %vm17974_vm0, %v12647_v49, %v12648_v8  ;;  %v12653_v45 = vrot.slane %v12651_v12, 2  ;;  %v12660_v22 = vrot.slane %v20962_v34, 7 }
 0x55c   : > { %24491 = vst [vmem:[#allocation51_spill] sm:$0xff] %v20966_v40  ;;  %v12657_v44 = vrot.slane %v20966_v40, 7  ;;  %v20982_v3 = vrot.slane %v11965_v29, %v16806_v50  ;;  %v20985_v32 = vrot.slane %v11966_v33, %v16806_v50  ;;  %v12656_v54 = vrot.slane %v12654_v38, 2 }
 0x55d   : > { %v11578_v55 = vpop.f32.mrf.mxu1  ;;  %13007 = vrot.lane.b32.xlu0 %v12646_v42, %s16459_s24  ;;  %24492 = vst [vmem:[#allocation52_spill] sm:$0xff] %v20976_v30  ;;  %v12652_v42 = vsel %vm17974_vm0, %v12650_v6, %v12651_v12  ;;  %v12655_v49 = vsel %vm17974_vm0, %v12653_v45, %v12654_v38  ;;  %v12663_v33 = vrot.slane %v20976_v30, 7  ;;  %v12662_v45 = vrot.slane %v12660_v22, 2 }
 0x55e   : > { %24493 = vst [vmem:[#allocation55_spill] sm:$0xff] %v20982_v3  ;;  %24494 = vst [vmem:[#allocation54_spill] sm:$0xff] %v20985_v32  ;;  %v11983_v7 = vcombine.low %v11576_v9, %v11578_v55  ;;  %v12659_v29 = vrot.slane %v12657_v44, 2  ;;  %v11984_v40 = vcombine.high %v11576_v9, %v11578_v55  ;;  %v21004_v12 = vcombine.high %v20985_v32, %v20985_v32 }
 0x55f   : > { %v11580_v41 = vpop.f32.mrf.mxu1  ;;  %13009 = vrot.lane.b32.xlu1 %v12649_v58, %s16459_s24  ;;  %v20999_v58 = vcombine.high %v20982_v3, %v20982_v3  ;;  %v12658_v38 = vsel %vm17974_vm0, %v12656_v54, %v12657_v44  ;;  %v12665_v55 = vrot.slane %v12663_v33, 2  ;;  %v12670_v34 = vrot.slane %v20985_v32, 7 }
 0x560   : > { %24496 = vst [vmem:[#allocation110_spill] sm:$0xff] %v21004_v12  ;;  %v21007_v6 = vrot.slane %v11983_v7, %v16806_v50  ;;  %v12661_v9 = vsel %vm17974_vm0, %v12659_v29, %v12660_v22  ;;  %v21021_v7 = vrot.slane %v11984_v40, %v16806_v50  ;;  %v12673_v29 = vrot.slane %v21004_v12, 7 }
 0x561   : > { %v11582_v46 = vpop.f32.mrf.mxu1  ;;  %13011 = vrot.lane.b32.xlu0 %v12652_v42, %s16459_s24  ;;  %24495 = vst [vmem:[#allocation53_spill] sm:$0xff] %v20999_v58  ;;  %v15854_v22 = vrot.slane %v20999_v58, 9  ;;  %v12672_v36 = vrot.slane %v12670_v34, 2 }
 0x562   : > { %24497 = vst [vmem:[#allocation56_spill] sm:$0xff] %v21007_v6  ;;  %24498 = vst [vmem:[#allocation58_spill] sm:$0xff] %v21021_v7  ;;  %v21026_v54 = vcombine.high %v21007_v6, %v21007_v6  ;;  %v12676_v40 = vrot.slane %v21007_v6, 7  ;;  %v12001_v32 = vcombine.low %v11580_v41, %v11582_v46  ;;  %v12675_v58 = vrot.slane %v12673_v29, 2 }
 0x563   : > { %v20992_v8 = vpop.f32.mrf.mxu1  ;;  %13013 = vrot.lane.b32.xlu1 %v12655_v49, %s16459_s24  ;;  %v12666_v49 = vrot.slane %v20982_v3, 7  ;;  %v12002_v3 = vcombine.high %v11580_v41, %v11582_v46 }
 0x564   : > { %24499 = vst [vmem:[#allocation57_spill] sm:$0xff] %v21026_v54  ;;  %v12679_v41 = vrot.slane %v21026_v54, 7 }
 0x565   : > { %v21009_v42 = vpop.f32.mrf.mxu1  ;;  %13015 = vrot.lane.b32.xlu0 %v12658_v38, %s16459_s24  ;;  %v12664_v38 = vsel %vm17974_vm0, %v12662_v45, %v12663_v33  ;;  %v12667_v56 = vsel %vm17974_vm0, %v12665_v55, %v12666_v49  ;;  %v21043_v33 = vcombine.high %v21021_v7, %v21021_v7  ;;  %v21051_v46 = vrot.slane %v12002_v3, %v16806_v50 }
 0x566   : > { %v12678_v55 = vrot.slane %v12676_v40, 2  ;;  %v12019_v49 = vcombine.low %v20992_v8, %v21009_v42  ;;  %v12681_v54 = vrot.slane %v12679_v41, 2 }
 0x567   : > { %v21014_v30 = vpop.f32.mrf.mxu1  ;;  %13017 = vrot.lane.b32.xlu1 %v12661_v9, %s16459_s24  ;;  %24500 = vst [vmem:[#allocation114_spill] sm:$0xff] %v21043_v33  ;;  %24501 = vst [vmem:[#allocation61_spill] sm:$0xff] %v21051_v46  ;;  %v21073_v14 = vcombine.high %v21051_v46, %v21051_v46 }
 0x569   : > { %v21028_v44 = vpop.f32.mrf.mxu1  ;;  %13019 = vrot.lane.b32.xlu0 %v12664_v38, %s16459_s24  ;;  %v12671_v38 = vsel %vm17974_vm0, %v15854_v22, %v12670_v34  ;;  %v12674_v34 = vsel %vm17974_vm0, %v12672_v36, %v12673_v29  ;;  %v12682_v22 = vrot.slane %v21021_v7, 7  ;;  %24503 = vst [vmem:[#allocation62_spill] sm:$0xff] %v21073_v14  ;;  %v12020_v36 = vcombine.high %v20992_v8, %v21009_v42 }
 0x56a   : > { %v12680_v29 = vsel %vm17974_vm0, %v12678_v55, %v12679_v41  ;;  %v12037_v42 = vcombine.low %v21014_v30, %v21028_v44  ;;  %v12695_v55 = vrot.slane %v21073_v14, 7  ;;  %v15855_v14 = vrot.slane %v21051_v46, 9 }
 0x56b   : > { %v21036_v9 = vpop.f32.mrf.mxu1  ;;  %13021 = vrot.lane.b32.xlu1 %v12667_v56, %s16459_s24  ;;  %v21055_v56 = vrot.slane %v12001_v32, %v16806_v50  ;;  %v12685_v32 = vrot.slane %v21043_v33, 7  ;;  %v12684_v12 = vrot.slane %v12682_v22, 2 }
 0x56c   : > { %v21136_v8 = vrot.slane %v12037_v42, %v16806_v50  ;;  %v12696_v47 = vsel %vm17974_vm0, %v15855_v14, %v12695_v55 }
 0x56d   : > { %v21045_v45 = vpop.f32.mrf.mxu1  ;;  %13023 = vrot.lane.b32.xlu0 %v12671_v38, %s16459_s24  ;;  %24502 = vst [vmem:[#allocation59_spill] sm:$0xff] %v21055_v56  ;;  %v12677_v38 = vsel %vm17974_vm0, %v12675_v58, %v12676_v40  ;;  %v21082_v58 = vrot.slane %v12019_v49, %v16806_v50  ;;  %v12688_v33 = vrot.slane %v21055_v56, 7  ;;  %v21089_v7 = vcombine.high %v21055_v56, %v21055_v56 }
 0x56e   : > { %v12686_v35 = vsel %vm17974_vm0, %v12684_v12, %v12685_v32  ;;  %24509 = vst [vmem:[#allocation65_spill] sm:$0xff] %v21136_v8  ;;  %v12056_v42 = vcombine.high %v21036_v9, %v21045_v45 }
 0x56f   : > { %v21059_v6 = vpop.f32.mrf.mxu1  ;;  %13025 = vrot.lane.b32.xlu1 %v12674_v34, %s16459_s24  ;;  %24504 = vst [vmem:[#allocation60_spill] sm:$0xff] %v21082_v58  ;;  %24505 = vst [vmem:[#allocation63_spill] sm:$0xff] %v21089_v7  ;;  %v12687_v34 = vrot.slane %v12685_v32, 2  ;;  %v12691_v56 = vrot.slane %v21089_v7, 7  ;;  %v12698_v12 = vrot.slane %v21082_v58, 7  ;;  %v12697_v32 = vrot.slane %v12695_v55, 2 }
 0x571   : > { %v21065_v3 = vpop.f32.mrf.mxu1  ;;  %13027 = vrot.lane.b32.xlu0 %v12677_v38, %s16459_s24  ;;  %v12683_v38 = vsel %vm17974_vm0, %v12681_v54, %v12682_v22  ;;  %v21112_v54 = vcombine.high %v21082_v58, %v21082_v58  ;;  %v12689_v39 = vsel %vm17974_vm0, %v12687_v34, %v12688_v33 }
 0x572   : > { %v12074_v46 = vcombine.high %v21059_v6, %v21065_v3 }
 0x573   : > { %v21084_v40 = vpop.f32.mrf.mxu1  ;;  %13029 = vrot.lane.b32.xlu1 %v12680_v29, %s16459_s24  ;;  %v21103_v29 = vrot.slane %v12020_v36, %v16806_v50  ;;  %24507 = vst [vmem:[#allocation69_spill] sm:$0xff] %v21112_v54  ;;  %v12690_v36 = vrot.slane %v12688_v33, 2  ;;  %v12055_v33 = vcombine.low %v21036_v9, %v21045_v45  ;;  %v12038_v9 = vcombine.high %v21014_v30, %v21028_v44 }
 0x574   : > { %v21178_v44 = vrot.slane %v12056_v42, %v16806_v50  ;;  %v12073_v45 = vcombine.low %v21059_v6, %v21065_v3  ;;  %v12710_v42 = vrot.slane %v21136_v8, 7 }
 0x575   : > { %v21096_v49 = vpop.f32.mrf.mxu1  ;;  %24506 = vst [vmem:[#allocation66_spill] sm:$0xff] %v21103_v29  ;;  %13031 = vrot.lane.b32.xlu0 %v12683_v38, %s16459_s24  ;;  %v12692_v7 = vsel %vm17974_vm0, %v12690_v36, %v12691_v56  ;;  %v12701_v38 = vrot.slane %v21112_v54, 7  ;;  %v12700_v56 = vrot.slane %v12698_v12, 2  ;;  %v12704_v36 = vrot.slane %v21103_v29, 7 }
 0x576   : > { %v21170_v14 = vrot.slane %v12055_v33, %v16806_v50  ;;  %v12699_v54 = vsel %vm17974_vm0, %v12697_v32, %v12698_v12  ;;  %24512 = vst [vmem:[#allocation68_spill] sm:$0xff] %v21178_v44  ;;  %v12092_v28 = vcombine.high %v21084_v40, %v21096_v49  ;;  %v12712_v62 = vrot.slane %v12710_v42, 2 }
 0x577   : > { %v21114_v22 = vpop.f32.mrf.mxu1  ;;  %13033 = vrot.lane.b32.xlu1 %v12686_v35, %s16459_s24  ;;  %v21133_v35 = vcombine.high %v21103_v29, %v21103_v29  ;;  %v12703_v41 = vrot.slane %v12701_v38, 2  ;;  %v12702_v12 = vsel %vm17974_vm0, %v12700_v56, %v12701_v38  ;;  %v12706_v32 = vrot.slane %v12704_v36, 2 }
 0x578   : > { %24511 = vst [vmem:[#allocation70_spill] sm:$0xff] %v21170_v14  ;;  %v21200_v33 = vcombine.high %v21170_v14, %v21170_v14  ;;  %v12091_v38 = vcombine.low %v21084_v40, %v21096_v49  ;;  %v21217_v29 = vrot.slane %v12073_v45, %v16806_v50 }
 0x579   : > { %v21124_v57 = vpop.f32.mrf.mxu1  ;;  %24508 = vst [vmem:[#allocation64_spill] sm:$0xff] %v21133_v35  ;;  %13035 = vrot.lane.b32.xlu0 %v12689_v39, %s16459_s24  ;;  %v12707_v30 = vrot.slane %v21133_v35, 7  ;;  %v21192_v35 = vrot.slane %v12038_v9, %v16806_v50  ;;  %v12705_v9 = vsel %vm17974_vm0, %v12703_v41, %v12704_v36 }
 0x57a   : > { %24514 = vst [vmem:[#allocation73_spill] sm:$0xff] %v21200_v33  ;;  %24516 = vst [vmem:[#allocation20_spill] sm:$0xff] %v21217_v29  ;;  %v21234_v40 = vrot.slane %v12091_v38, %v16806_v50  ;;  %v12109_v6 = vcombine.low %v21114_v22, %v21124_v57  ;;  %v12110_v38 = vcombine.high %v21114_v22, %v21124_v57  ;;  %v12732_v22 = vrot.slane %v21217_v29, 7 }
 0x57b   : > { %v21143_v34 = vpop.f32.mrf.mxu1  ;;  %13037 = vrot.lane.b32.xlu1 %v12692_v7, %s16459_s24  ;;  %v21164_v7 = vcombine.high %v21136_v8, %v21136_v8  ;;  %24513 = vst [vmem:[#allocation75_spill] sm:$0xff] %v21192_v35  ;;  %v12709_v8 = vrot.slane %v12707_v30, 2  ;;  %v12708_v36 = vsel %vm17974_vm0, %v12706_v32, %v12707_v30  ;;  %v12723_v32 = vrot.slane %v21200_v33, 7 }
 0x57c   : > { %24518 = vst [vmem:[#allocation74_spill] sm:$0xff] %v21234_v40  ;;  %v12716_v3 = vrot.slane %v21192_v35, 7  ;;  %v21261_v33 = vrot.slane %v12074_v46, %v16806_v50 }
 0x57d   : > { %v21154_v58 = vpop.f32.mrf.mxu1  ;;  %24510 = vst [vmem:[#allocation67_spill] sm:$0xff] %v21164_v7  ;;  %13039 = vrot.lane.b32.xlu0 %v12696_v47, %s16459_s24  ;;  %v12711_v30 = vsel %vm17974_vm0, %v12709_v8, %v12710_v42  ;;  %v12726_v47 = vrot.slane %v21178_v44, 7  ;;  %v21253_v8 = vrot.slane %v12092_v28, %v16806_v50  ;;  %v21269_v28 = vcombine.high %v21234_v40, %v21234_v40 }
 0x57e   : > { %24521 = vst [vmem:[#allocation77_spill] sm:$0xff] %v21261_v33  ;;  %v12127_v19 = vcombine.low %v21143_v34, %v21154_v58 }
 0x57f   : > { %v21172_v55 = vpop.f32.mrf.mxu1  ;;  %13041 = vrot.lane.b32.xlu1 %v12699_v54, %s16459_s24  ;;  %v12713_v54 = vrot.slane %v21164_v7, 7  ;;  %v12720_v7 = vrot.slane %v21170_v14, 7  ;;  %v21250_v14 = vcombine.high %v21217_v29, %v21217_v29  ;;  %24520 = vst [vmem:[#allocation78_spill] sm:$0xff] %v21253_v8  ;;  %24522 = vst [vmem:[#allocation79_spill] sm:$0xff] %v21269_v28  ;;  %v12728_v46 = vrot.slane %v12726_v47, 2 }
 0x580   : > { %v21303_v29 = vcombine.high %v21261_v33, %v21261_v33  ;;  %v12748_v24 = vrot.slane %v21253_v8, 7  ;;  %v21342_v31 = vrot.slane %v12127_v19, %v16806_v50 }
 0x581   : > { %v21186_v39 = vpop.f32.mrf.mxu1  ;;  %13043 = vrot.lane.b32.xlu0 %v12702_v12, %s16459_s24  ;;  %v21210_v12 = vcombine.high %v21178_v44, %v21178_v44  ;;  %v12715_v45 = vrot.slane %v12713_v54, 2  ;;  %24519 = vst [vmem:[#allocation76_spill] sm:$0xff] %v21250_v14  ;;  %v12714_v44 = vsel %vm17974_vm0, %v12712_v62, %v12713_v54  ;;  %v12725_v54 = vrot.slane %v12723_v32, 2 }
 0x582   : > { %v12735_v11 = vrot.slane %v21250_v14, 7  ;;  %24526 = vst [vmem:[#allocation83_spill] sm:$0xff] %v21303_v29  ;;  %24530 = vst [vmem:[#allocation87_spill] sm:$0xff] %v21342_v31  ;;  %v12750_v19 = vrot.slane %v12748_v24, 2  ;;  %v21377_v43 = vcombine.high %v21342_v31, %v21342_v31 }
 0x583   : > { %v21204_v56 = vpop.f32.mrf.mxu1  ;;  %24515 = vst [vmem:[#allocation71_spill] sm:$0xff] %v21210_v12  ;;  %13045 = vrot.lane.b32.xlu1 %v12705_v9, %s16459_s24  ;;  %v21227_v9 = vcombine.high %v21192_v35, %v21192_v35  ;;  %v12722_v35 = vrot.slane %v12720_v7, 2  ;;  %v12717_v62 = vsel %vm17974_vm0, %v12715_v45, %v12716_v3  ;;  %v12128_v45 = vcombine.high %v21143_v34, %v21154_v58 }
 0x584   : > { %v12734_v34 = vrot.slane %v12732_v22, 2  ;;  %24533 = vst [vmem:[#allocation23_spill] sm:$0xff] %v21377_v43 }
 0x585   : > { %v21221_v41 = vpop.f32.mrf.mxu1  ;;  %24517 = vst [vmem:[#allocation72_spill] sm:$0xff] %v21227_v9  ;;  %13047 = vrot.lane.b32.xlu0 %v12708_v36, %s16459_s24  ;;  %v15856_v36 = vrot.slane %v21227_v9, 9  ;;  %v21285_v9 = vcombine.high %v21253_v8, %v21253_v8 }
 0x587   : > { %v21236_v49 = vpop.f32.mrf.mxu1  ;;  %13049 = vrot.lane.b32.xlu1 %v12711_v30, %s16459_s24  ;;  %v12729_v30 = vrot.slane %v21210_v12, 7  ;;  %v21276_v12 = vrot.slane %v12109_v6, %v16806_v50  ;;  %v12721_v57 = vsel %vm17974_vm0, %v15856_v36, %v12720_v7  ;;  %24524 = vst [vmem:[#allocation81_spill] sm:$0xff] %v21285_v9  ;;  %v12724_v7 = vsel %vm17974_vm0, %v12722_v35, %v12723_v32 }
 0x588   : > { %v12745_v35 = vrot.slane %v21269_v28, 7  ;;  %v12751_v28 = vrot.slane %v21285_v9, 7  ;;  %v15857_v9 = vrot.slane %v21234_v40, 9 }
 0x589   : > { %v21255_v42 = vpop.f32.mrf.mxu1  ;;  %13051 = vrot.lane.b32.xlu0 %v12714_v44, %s16459_s24  ;;  %24523 = vst [vmem:[#allocation80_spill] sm:$0xff] %v21276_v12  ;;  %v12731_v6 = vrot.slane %v12729_v30, 2  ;;  %v12738_v44 = vrot.slane %v21261_v33, 7  ;;  %v21316_v32 = vcombine.high %v21276_v12, %v21276_v12  ;;  %v12145_v33 = vcombine.low %v21172_v55, %v21186_v39 }
 0x58a   : > { %v12754_v51 = vrot.slane %v21276_v12, 7  ;;  %v12747_v0 = vrot.slane %v12745_v35, 2  ;;  %v12736_v12 = vsel %vm17974_vm0, %v12734_v34, %v12735_v11  ;;  %v12753_v40 = vrot.slane %v12751_v28, 2 }
 0x58b   : > { %v21271_v53 = vpop.f32.mrf.mxu1  ;;  %13053 = vrot.lane.b32.xlu1 %v12717_v62, %s16459_s24  ;;  %v21293_v62 = vrot.slane %v12110_v38, %v16806_v50  ;;  %v12727_v38 = vsel %vm17974_vm0, %v12725_v54, %v12726_v47  ;;  %24527 = vst [vmem:[#allocation84_spill] sm:$0xff] %v21316_v32  ;;  %v21325_v47 = vrot.slane %v12128_v45, %v16806_v50  ;;  %v12740_v8 = vrot.slane %v12738_v44, 2 }
 0x58c   : > { %v12733_v54 = vsel %vm17974_vm0, %v12731_v6, %v12732_v22  ;;  %v12741_v45 = vrot.slane %v21303_v29, 7  ;;  %v12146_v22 = vcombine.high %v21172_v55, %v21186_v39  ;;  %v12757_v29 = vrot.slane %v21316_v32, 7 }
 0x58d   : > { %v21289_v3 = vpop.f32.mrf.mxu1  ;;  %24525 = vst [vmem:[#allocation82_spill] sm:$0xff] %v21293_v62  ;;  %13055 = vrot.lane.b32.xlu0 %v12721_v57, %s16459_s24  ;;  %v21298_v36 = vpop.permute.xlu0 %12943  ;;  %v12730_v57 = vsel %vm17974_vm0, %v12728_v46, %v12729_v30  ;;  %24528 = vst [vmem:[#allocation86_spill] sm:$0xff] %v21325_v47  ;;  %v12737_v46 = vrot.slane %v12735_v11, 2  ;;  %v21334_v63 = vcombine.high %v21293_v62, %v21293_v62  ;;  %v12756_v34 = vrot.slane %v12754_v51, 2 }
 0x58e   : > { %v21360_v39 = vcombine.high %v21325_v47, %v21325_v47  ;;  %v12742_v11 = vsel %vm17974_vm0, %v12740_v8, %v12741_v45  ;;  %v12760_v32 = vrot.slane %v21293_v62, 7  ;;  %v12749_v8 = vsel %vm17974_vm0, %v12747_v0, %v12748_v24 }
 0x58f   : > { %v21307_v14 = vpop.f32.mrf.mxu1  ;;  %13057 = vrot.lane.b32.xlu1 %v12724_v7, %s16459_s24  ;;  %v21321_v58 = vpop.permute.xlu1 %12945  ;;  %24529 = vst [vmem:[#allocation85_spill] sm:$0xff] %v21334_v63  ;;  %v12763_v2 = vrot.slane %v21334_v63, 7  ;;  %v12752_v45 = vsel %vm17974_vm0, %v12750_v19, %v12751_v28  ;;  %v12770_v63 = vrot.slane %v21325_v47, 7  ;;  %v12163_v62 = vcombine.low %v21204_v56, %v21221_v41 }
 0x590   : > { %24532 = vst [vmem:[#allocation128_spill] sm:$0xff] %v21360_v39  ;;  %v12755_v0 = vsel %vm17974_vm0, %v12753_v40, %v12754_v51  ;;  %v12773_v24 = vrot.slane %v21360_v39, 7  ;;  %v21411_v28 = vsel %vm17974_vm0, %v12756_v34, %v12757_v29  ;;  %v12762_v19 = vrot.slane %v12760_v32, 2 }
 0x591   : > { %v21327_v30 = vpop.f32.mrf.mxu1  ;;  %13059 = vrot.lane.b32.xlu0 %v12727_v38, %s16459_s24  ;;  %v21337_v7 = vpop.permute.xlu0 %12947  ;;  %v21350_v38 = vrot.slane %v12145_v33, %v16806_v50  ;;  %v12739_v33 = vsel %vm17974_vm0, %v12737_v46, %v12738_v44  ;;  %v21380_v44 = vrot.slane %v12146_v22, %v16806_v50  ;;  %v12759_v22 = vrot.slane %v12757_v29, 2 }
 0x592   : > { %v12182_v51 = vcombine.high %v21236_v49, %v21255_v42 }
 0x593   : > { %v21346_v6 = vpop.f32.mrf.mxu1  ;;  %24531 = vst [vmem:[#allocation88_spill] sm:$0xff] %v21350_v38  ;;  %13061 = vrot.lane.b32.xlu1 %v12730_v57, %s16459_s24  ;;  %v21353_v59 = vpop.permute.xlu1 %12949  ;;  %v12746_v57 = vsel %vm17974_vm0, %v15857_v9, %v12745_v35  ;;  %24534 = vst [vmem:[#allocation89_spill] sm:$0xff] %v21380_v44  ;;  %v12164_v9 = vcombine.high %v21204_v56, %v21221_v41  ;;  %v12776_v52 = vrot.slane %v21350_v38, 7  ;;  %v12765_v56 = vrot.slane %v12763_v2, 2 }
 0x594   : > { %v21424_v39 = vcombine.high %v21380_v44, %v21380_v44  ;;  %v12761_v34 = vsel %vm17974_vm0, %v12759_v22, %v12760_v32  ;;  %v12782_v27 = vrot.slane %v21380_v44, 7  ;;  %v12200_v32 = vcombine.high %v21271_v53, %v21289_v3 }
 0x595   : > { %v21362_v55 = vpop.f32.mrf.mxu1  ;;  %13063 = vrot.lane.b32.xlu0 %v12733_v54, %s16459_s24  ;;  %v21369_v21 = vpop.permute.xlu0 %12951  ;;  %v21390_v54 = vcombine.high %v21350_v38, %v21350_v38  ;;  %v21414_v41 = vrot.slane %v12164_v9, %v16806_v50  ;;  %v12766_v38 = vrot.slane %v21342_v31, 7  ;;  %v12772_v9 = vrot.slane %v12770_v63, 2 }
 0x596   : > { %24537 = vst [vmem:[#allocation92_spill] sm:$0xff] %v21424_v39  ;;  %v12778_v31 = vrot.slane %v12776_v52, 2 }
 0x597   : > { %v21384_v35 = vpop.f32.mrf.mxu1  ;;  %24535 = vst [vmem:[#allocation91_spill] sm:$0xff] %v21390_v54  ;;  %13065 = vrot.lane.b32.xlu1 %v12736_v12, %s16459_s24  ;;  %v21393_v46 = vpop.permute.xlu1 %12953  ;;  %v12181_v12 = vcombine.low %v21236_v49, %v21255_v42  ;;  %24536 = vst [vmem:[#allocation93_spill] sm:$0xff] %v21414_v41  ;;  %v12779_v49 = vrot.slane %v21390_v54, 7  ;;  %v21433_v42 = vrot.slane %v12163_v62, %v16806_v50 }
 0x598   : > { %v12764_v62 = vsel %vm17974_vm0, %v12762_v19, %v12763_v2  ;;  %v21452_v54 = vcombine.high %v21414_v41, %v21414_v41  ;;  %v21459_v44 = vsel %vm17974_vm0, %v12765_v56, %v12766_v38  ;;  %v12217_v38 = vcombine.low %v21307_v14, %v21327_v30 }
 0x599   : > { %13067 = vrot.lane.b32.xlu0 %v12739_v33, %s16459_s24  ;;  %v21407_v18 = vpop.permute.xlu0 %12955  ;;  %v21418_v40 = vpop.f32.mrf.mxu1  ;;  %v15858_v33 = vrot.slane %v21377_v43, 9  ;;  %24538 = vst [vmem:[#allocation94_spill] sm:$0xff] %v21433_v42  ;;  %v12775_v43 = vrot.slane %v12773_v24, 2  ;;  %v21439_v1 = vrot.slane %v12181_v12, %v16806_v50  ;;  %v21455_v12 = vrot.slane %v12182_v51, %v16806_v50 }
 0x59a   : > { %24540 = vst [vmem:[#allocation95_spill] sm:$0xff] %v21452_v54  ;;  %v12781_v19 = vrot.slane %v12779_v49, 2  ;;  %v12785_v51 = vrot.slane %v21424_v39, 7  ;;  %v21527_v10 = vrot.slane %v12217_v38, %v16806_v50 }
 0x59b   : > { %13069 = vrot.lane.b32.xlu1 %v12742_v11, %s16459_s24  ;;  %v21427_v29 = vpop.permute.xlu1 %12957  ;;  %v21435_v47 = vpop.f32.mrf.mxu1  ;;  %24539 = vst [vmem:[#allocation96_spill] sm:$0xff] %v21439_v1  ;;  %v12199_v11 = vcombine.low %v21271_v53, %v21289_v3  ;;  %24541 = vst [vmem:[#allocation99_spill] sm:$0xff] %v21455_v12  ;;  %v21463_v53 = vsel %vm17974_vm0, %v15858_v33, %v12770_v63  ;;  %v13327_v3 = vadd.f32 %v21298_v36, %v20685_v15 }
 0x59c   : > { %v21481_v63 = vsel %vm17974_vm0, %v12775_v43, %v12776_v52  ;;  %v21485_v15 = vsel %vm17974_vm0, %v12778_v31, %v12779_v49  ;;  %v12784_v36 = vrot.slane %v12782_v27, 2  ;;  %v21495_v33 = vrot.slane %v12200_v32, %v16806_v50  ;;  %24549 = vst [vmem:[#allocation104_spill] sm:$0xff] %v21527_v10 }
 0x59d   : > { %13071 = vrot.lane.b32.xlu0 %v12746_v57, %s16459_s24  ;;  %v21446_v22 = vpop.permute.xlu0 %12959  ;;  %v21472_v57 = vsel %vm17974_vm0, %v12772_v9, %v12773_v24  ;;  %v21477_v56 = vpop.f32.mrf.mxu1  ;;  %v21492_v24 = vrot.slane %v12199_v11, %v16806_v50  ;;  %v12218_v9 = vcombine.high %v21307_v14, %v21327_v30  ;;  %v21504_v43 = vcombine.high %v21455_v12, %v21455_v12 }
 0x59e   : > { %24544 = vst [vmem:[#allocation100_spill] sm:$0xff] %v21495_v33  ;;  %v13328_v31 = vadd.f32 %v21321_v58, %v20692_v25  ;;  %v12788_v49 = vrot.slane %v21433_v42, 7  ;;  %v21511_v11 = vcombine.high %v21433_v42, %v21433_v42  ;;  %v24547_v32 = vrot.slane %v20692_v25, 2 }
 0x59f   : > { %13073 = vrot.lane.b32.xlu1 %v12749_v8, %s16459_s24  ;;  %v21468_v2 = vpop.permute.xlu1 %12961  ;;  %v21489_v8 = vcombine.high %v21439_v1, %v21439_v1  ;;  %24543 = vst [vmem:[#allocation102_spill] sm:$0xff] %v21492_v24  ;;  %24545 = vst [vmem:[#allocation101_spill] sm:$0xff] %v21504_v43  ;;  %v13329_v30 = vadd.f32 %v21337_v7, %v20688_v26  ;;  %v21524_v58 = vsel %vm17974_vm0, %v12781_v19, %v12782_v27 }
 0x5a0   : > { %24546 = vst [vmem:[#allocation103_spill] sm:$0xff] %v21511_v11  ;;  %v21515_v14 = vadd.f32 %v24547_v32, %v13327_v3  ;;  %v12787_v39 = vrot.slane %v12785_v51, 2  ;;  %v12235_v25 = vcombine.low %v21346_v6, %v21362_v55  ;;  %v21531_v3 = vpop.f32.mrf.mxu1  ;;  %v21535_v7 = vsel %vm17974_vm0, %v12784_v36, %v12785_v51 }
 0x5a1   : > { %24542 = vst [vmem:[#allocation97_spill] sm:$0xff] %v21489_v8  ;;  %13075 = vrot.lane.b32.xlu0 %v12752_v45, %s16459_s24  ;;  %v21500_v52 = vpop.permute.xlu0 %12963  ;;  %24550 = vst [vmem:[#allocation106_spill] sm:$0xff] %v21535_v7  ;;  %v21540_v32 = vcombine.high %v21492_v24, %v21492_v24  ;;  %v21544_v27 = vcombine.high %v21495_v33, %v21495_v33  ;;  %v21547_v19 = vrot.slane %v12218_v9, %v16806_v50 }
 0x5a2   : > { %24548 = vst [vmem:[#allocation105_spill] sm:$0xff] %v21515_v14  ;;  %v12795_v51 = vrot.slane %v21452_v54, 7  ;;  %v24554_v36 = vrot.slane %v20688_v26, 2  ;;  %v13330_v42 = vadd.f32 %v21353_v59, %v20696_v20  ;;  %v12790_v7 = vrot.slane %v12788_v49, 2 }
 0x5a3   : > { %13077 = vrot.lane.b32.xlu1 %v12755_v0, %s16459_s24  ;;  %v21520_v45 = vpop.permute.xlu1 %12965  ;;  %v15859_v0 = vrot.slane %v21414_v41, 9  ;;  %24551 = vst [vmem:[#allocation107_spill] sm:$0xff] %v21540_v32  ;;  %24552 = vst [vmem:[#allocation109_spill] sm:$0xff] %v21544_v27  ;;  %v12791_v27 = vrot.slane %v21511_v11, 7  ;;  %v12236_v9 = vcombine.high %v21346_v6, %v21362_v55  ;;  %v24555_v14 = vrot.slane %v20696_v20, 2  ;;  %v21584_v55 = vpop.f32.mrf.mxu1 }
 0x5a4   : > { %24553 = vst [vmem:[#allocation108_spill] sm:$0xff] %v21547_v19  ;;  %v21556_v41 = vadd.f32 %v24554_v36, %v13328_v31  ;;  %v21572_v26 = vsel %vm17974_vm0, %v12787_v39, %v12788_v49  ;;  %v12798_v59 = vrot.slane %v21439_v1, 7  ;;  %v21577_v31 = vcombine.high %v21527_v10, %v21527_v10 }
 0x5a5   : > { %13079 = vrot.lane.b32.xlu0 %v21411_v28, %s16459_s24  ;;  %v21551_v38 = vpop.permute.xlu0 %12967  ;;  %v21565_v28 = vadd.f32 %v24555_v14, %v13329_v30  ;;  %v21580_v6 = vrot.slane %v12235_v25, %v16806_v50  ;;  %v13331_v20 = vadd.f32 %v21369_v21, %v20701_v61  ;;  %v21589_v39 = vcombine.high %v21547_v19, %v21547_v19  ;;  %v21604_v1 = vpop.f32.mrf.mxu1 }
 0x5a6   : > { %24556 = vst [vmem:[#allocation113_spill] sm:$0xff] %v21577_v31  ;;  %v12253_v49 = vcombine.low %v21384_v35, %v21418_v40  ;;  %v13332_v14 = vadd.f32 %v21393_v46, %v20710_v17  ;;  %v12797_v25 = vrot.slane %v12795_v51, 2  ;;  %v12254_v21 = vcombine.high %v21384_v35, %v21418_v40 }
 0x5a7   : > { %13081 = vrot.lane.b32.xlu1 %v12761_v34, %s16459_s24  ;;  %v21568_v54 = vpop.permute.xlu1 %12969  ;;  %24557 = vst [vmem:[#allocation111_spill] sm:$0xff] %v21580_v6  ;;  %v12801_v34 = vrot.slane %v21489_v8, 7  ;;  %24558 = vst [vmem:[#allocation112_spill] sm:$0xff] %v21589_v39  ;;  %v24559_v36 = vrot.slane %v20701_v61, 2  ;;  %v21608_v11 = vsel %vm17974_vm0, %v12790_v7, %v12791_v27  ;;  %v12804_v46 = vrot.slane %v21455_v12, 7 }
 0x5a8   : > { %v13334_v39 = vadd.f32 %v21427_v29, %v20716_v5  ;;  %v21620_v61 = vsel %vm17974_vm0, %v15859_v0, %v12795_v51  ;;  %v12800_v35 = vrot.slane %v12798_v59, 2  ;;  %v21624_v40 = vcombine.high %v21580_v6, %v21580_v6 }
 0x5a9   : > { %13083 = vrot.lane.b32.xlu0 %v12764_v62, %s16459_s24  ;;  %v21596_v30 = vpop.permute.xlu0 %12971  ;;  %v21602_v8 = vadd.f32 %v24559_v36, %v13330_v42  ;;  %v21612_v62 = vrot.slane %v12236_v9, %v16806_v50  ;;  %v24562_v42 = vrot.slane %v20710_v17, 2  ;;  %v13333_v27 = vadd.f32 %v21407_v18, %v20704_v37 }
 0x5aa   : > { %24561 = vst [vmem:[#allocation118_spill] sm:$0xff] %v21624_v40  ;;  %v12803_v9 = vrot.slane %v12801_v34, 2  ;;  %v24564_v0 = vrot.slane %v20704_v37, 2  ;;  %v21649_v18 = vrot.slane %v12254_v21, %v16806_v50  ;;  %v21653_v37 = vpop.f32.mrf.mxu1  ;;  %v24568_v21 = vrot.slane %v20811_v60, 2 }
 0x5ab   : > { %24560 = vst [vmem:[#allocation115_spill] sm:$0xff] %v21612_v62  ;;  %13085 = vrot.lane.b32.xlu1 %v21459_v44, %s16459_s24  ;;  %v21628_v7 = vadd.f32 %v24562_v42, %v13331_v20  ;;  %v21633_v44 = vrot.slane %v12253_v49, %v16806_v50  ;;  %v21646_v20 = vsel %vm17974_vm0, %v12797_v25, %v12798_v59  ;;  %v12807_v42 = vrot.slane %v21504_v43, 7  ;;  %v24567_v59 = vld [vmem:[#allocation26_spill] sm:$0xff] }
 0x5ac   : > { %v12974_v29 = vpop.permute.xlu1 %12973  ;;  %v21637_v51 = vadd.f32 %v24564_v0, %v13332_v14  ;;  %24565 = vst [vmem:[#allocation116_spill] sm:$0xff] %v21649_v18  ;;  %v12271_v49 = vcombine.low %v21435_v47, %v21477_v56  ;;  %v12806_v14 = vrot.slane %v12804_v46, 2  ;;  %v12272_v0 = vcombine.high %v21435_v47, %v21477_v56 }
 0x5ad   : > { %24563 = vst [vmem:[#allocation117_spill] sm:$0xff] %v21633_v44  ;;  %v13342_v36 = vadd.f32 %v12974_v29, %v20793_v23  ;;  %13087 = vrot.lane.b32.xlu0 %v21463_v53, %s16459_s24  ;;  %v21642_v17 = vpop.permute.xlu0 %12975  ;;  %v24566_v29 = vrot.slane %v20733_v13, 2  ;;  %v13335_v25 = vadd.f32 %v21446_v22, %v24567_v59  ;;  %v24569_v62 = vrot.slane %v20716_v5, 2 }
 0x5ae   : > { %v21682_v47 = vsel %vm17974_vm0, %v12803_v9, %v12804_v46  ;;  %v12810_v60 = vrot.slane %v21492_v24, 7  ;;  %v21687_v22 = vcombine.high %v21633_v44, %v21633_v44  ;;  %v12813_v46 = vrot.slane %v21540_v32, 7 }
 0x5af   : > { %v21658_v53 = vadd.f32 %v24566_v29, %v13334_v39  ;;  %v21666_v12 = vadd.f32 %v24568_v21, %v13342_v36  ;;  %13089 = vrot.lane.b32.xlu1 %v21472_v57, %s16459_s24  ;;  %v21672_v43 = vadd.f32 %v24569_v62, %v13333_v27  ;;  %v21678_v39 = vsel %vm17974_vm0, %v12800_v35, %v12801_v34  ;;  %v24571_v57 = vld [vmem:[#allocation24_spill] sm:$0xff]  ;;  %v21707_v27 = vpop.f32.mrf.mxu1  ;;  %v24576_v21 = vld [vmem:[#allocation90_spill] sm:$0xff] }
 0x5b0   : > { %v21674_v13 = vpop.permute.xlu1 %12977  ;;  %24570 = vst [vmem:[#allocation119_spill] sm:$0xff] %v21687_v22  ;;  %v13336_v5 = vadd.f32 %v21468_v2, %v24571_v57  ;;  %v21700_v62 = vcombine.high %v21649_v18, %v21649_v18  ;;  %v21703_v35 = vrot.slane %v12271_v49, %v16806_v50  ;;  %v13337_v2 = vadd.f32 %v21500_v52, %v20749_v16 }
 0x5b1   : > { %13091 = vrot.lane.b32.xlu0 %v21481_v63, %s16459_s24  ;;  %v21695_v34 = vpop.permute.xlu0 %12979  ;;  %v21711_v9 = vsel %vm17974_vm0, %v12806_v14, %v12807_v42  ;;  %v21714_v63 = vrot.slane %v12272_v0, %v16806_v50  ;;  %v24575_v36 = vrot.slane %v24571_v57, 2  ;;  %v13338_v59 = vadd.f32 %v21520_v45, %v20755_v48 }
 0x5b2   : > { %24572 = vst [vmem:[#allocation120_spill] sm:$0xff] %v21700_v62  ;;  %24573 = vst [vmem:[#allocation19_spill] sm:$0xff] %v21703_v35  ;;  %v12809_v49 = vrot.slane %v12807_v42, 2  ;;  %v12289_v52 = vcombine.low %v21531_v3, %v21584_v55  ;;  %v12290_v14 = vcombine.high %v21531_v3, %v21584_v55  ;;  %v13339_v0 = vadd.f32 %v21551_v38, %v24576_v21  ;;  %v24583_v62 = vld [vmem:[#allocation25_spill] sm:$0xff] }
 0x5b3   : > { %24574 = vst [vmem:[#allocation121_spill] sm:$0xff] %v21714_v63  ;;  %v13719_v29 = vadd.f32 %v24575_v36, %v13335_v25  ;;  %13093 = vrot.lane.b32.xlu1 %v21485_v15, %s16459_s24  ;;  %v12812_v57 = vrot.slane %v12810_v60, 2  ;;  %v24577_v25 = vrot.slane %v20749_v16, 2  ;;  %v12815_v42 = vrot.slane %v12813_v46, 2 }
 0x5b4   : > { %v21728_v56 = vpop.permute.xlu1 %12981  ;;  %v21738_v45 = vsel %vm17974_vm0, %v12809_v49, %v12810_v60  ;;  %v12816_v3 = vrot.slane %v21495_v33, 7  ;;  %v21743_v38 = vcombine.high %v21703_v35, %v21703_v35  ;;  %v24579_v55 = vrot.slane %v20755_v48, 2  ;;  %v24581_v49 = vld [vmem:[#allocation105_spill] sm:$0xff] }
 0x5b5   : > { %v13720_v36 = vadd.f32 %v24577_v25, %v13336_v5  ;;  %13095 = vrot.lane.b32.xlu0 %v21524_v58, %s16459_s24  ;;  %v21734_v15 = vpop.permute.xlu0 %12983  ;;  %v12307_v5 = vcombine.low %v21604_v1, %v21653_v37  ;;  %v12308_v58 = vcombine.high %v21604_v1, %v21653_v37  ;;  %v11672_v25 = vpop.f32.mrf.mxu1  ;;  %v21753_v60 = vcombine.high %v21714_v63, %v21714_v63 }
 0x5b6   : > { %24578 = vst [vmem:[#allocation122_spill] sm:$0xff] %v21743_v38  ;;  %v13721_v16 = vadd.f32 %v24579_v55, %v13337_v2  ;;  %v13839_v33 = vcombine.low %v24581_v49, %v13719_v29  ;;  %v24582_v32 = vrot.slane %v24576_v21, 2  ;;  %v13340_v48 = vadd.f32 %v21568_v54, %v24583_v62  ;;  %v24584_v2 = vld [vmem:[#allocation106_spill] sm:$0xff]  ;;  %v24590_v21 = vld [vmem:[#allocation109_spill] sm:$0xff] }
 0x5b7   : > { %24580 = vst [vmem:[#allocation123_spill] sm:$0xff] %v21753_v60  ;;  %13097 = vrot.lane.b32.xlu1 %v24584_v2, %s16459_s24  ;;  %v21763_v55 = vrot.slane %v12289_v52, %v16806_v50  ;;  %v21766_v1 = vrot.slane %v12290_v14, %v16806_v50  ;;  %v24587_v37 = vrot.slane %v24583_v62, 2  ;;  %v21772_v29 = vsel %vm17974_vm0, %v12812_v57, %v12813_v46  ;;  %v24600_v2 = vld [vmem:[#allocation27_spill] sm:$0xff] }
 0x5b8   : > { %v13722_v24 = vadd.f32 %v24582_v32, %v13338_v59  ;;  %v13911_v32 = vcombine.low %v21556_v41, %v13720_v36  ;;  %v12326_v54 = vcombine.high %v21707_v27, %v11672_v25  ;;  %v21782_v52 = vsel %vm17974_vm0, %v12815_v42, %v12816_v3  ;;  %v24591_v36 = vld [vmem:[#allocation29_spill] sm:$0xff] }
 0x5b9   : > { %24585 = vst [vmem:[#allocation125_spill] sm:$0xff] %v21763_v55  ;;  %24586 = vst [vmem:[#allocation124_spill] sm:$0xff] %v21766_v1  ;;  %v13723_v60 = vadd.f32 %v24587_v37, %v13339_v0  ;;  %v21776_v59 = vpop.permute.xlu1 %12985  ;;  %13099 = vrot.lane.b32.xlu0 %v21572_v26, %s16459_s24  ;;  %v12820_v62 = vrot.slane %v21527_v10, 7  ;;  %v13983_v14 = vcombine.low %v21565_v28, %v13721_v16  ;;  %v15860_v0 = vrot.slane %v24590_v21, 9  ;;  %v24593_v16 = vld [vmem:[#allocation18_spill] sm:$0xff] }
 0x5ba   : > { %v21787_v46 = vrot.slane %v12307_v5, %v16806_v50  ;;  %v21790_v41 = vrot.slane %v12308_v58, %v16806_v50  ;;  %v14055_v57 = vcombine.low %v21602_v8, %v13722_v24  ;;  %v24592_v26 = vrot.slane %v24591_v36, 2 }
 0x5bb   : > { %v13341_v42 = vadd.f32 %v21596_v30, %v24591_v36  ;;  %v12325_v3 = vcombine.low %v21707_v27, %v11672_v25  ;;  %13101 = vrot.lane.b32.xlu1 %v21608_v11, %s16459_s24  ;;  %v21801_v28 = vpop.permute.xlu0 %12987  ;;  %v21804_v5 = vrot.slane %v13839_v33, %v24593_v16  ;;  %v21808_v58 = vcombine.high %v21763_v55, %v21763_v55 }
 0x5bc   : > { %24588 = vst [vmem:[#allocation22_spill] sm:$0xff] %v21787_v46  ;;  %24589 = vst [vmem:[#allocation126_spill] sm:$0xff] %v21790_v41  ;;  %v13724_v49 = vadd.f32 %v24592_v26, %v13340_v48  ;;  %v21812_v8 = vcombine.high %v21766_v1, %v21766_v1  ;;  %v14127_v24 = vcombine.low %v21628_v7, %v13723_v60  ;;  %v12822_v33 = vrot.slane %v12820_v62, 2 }
 0x5bd   : > { %24594 = vst [vmem:[#allocation127_spill] sm:$0xff] %v21804_v5  ;;  %24595 = vst [vmem:[#allocation21_spill] sm:$0xff] %v21808_v58  ;;  %v21816_v30 = vrot.slane %v13911_v32, %v24593_v16  ;;  %v21819_v11 = vrot.slane %v12326_v54, %v16806_v50  ;;  %v21821_v27 = vpop.permute.xlu1 %12989  ;;  %13103 = vrot.lane.b32.xlu0 %v21620_v61, %s16459_s24  ;;  %v12823_v25 = vrot.slane %v21577_v31, 7  ;;  %v24604_v54 = vrot.slane %v20793_v23, 2  ;;  %v24609_v23 = vld [vmem:[#allocation28_spill] sm:$0xff] }
 0x5be   : > { %24596 = vst [vmem:[#allocation129_spill] sm:$0xff] %v21812_v8  ;;  %v21827_v48 = vrot.slane %v13983_v14, %v24593_v16  ;;  %v13343_v7 = vadd.f32 %v21642_v17, %v24600_v2  ;;  %v21833_v60 = vcombine.high %v21787_v46, %v21787_v46  ;;  %v21837_v37 = vcombine.high %v21790_v41, %v21790_v41  ;;  %v24607_v2 = vld [vmem:[#allocation30_spill] sm:$0xff] }
 0x5bf   : > { %24597 = vst [vmem:[#allocation26_spill] sm:$0xff] %v21816_v30  ;;  %24598 = vst [vmem:[#allocation24_spill] sm:$0xff] %v21819_v11  ;;  %v21840_v32 = vrot.slane %v14055_v57, %v24593_v16  ;;  %v14199_v61 = vcombine.low %v21637_v51, %v13724_v49  ;;  %v13725_v14 = vadd.f32 %v24604_v54, %v13341_v42  ;;  %13105 = vrot.lane.b32.xlu1 %v21646_v20, %s16459_s24  ;;  %v12992_v17 = vpop.permute.xlu0 %12991  ;;  %v24608_v57 = vld [vmem:[#allocation37_spill] sm:$0xff]  ;;  %v24613_v54 = vld [vmem:[#allocation36_spill] sm:$0xff] }
 0x5c0   : > { %24599 = vst [vmem:[#allocation90_spill] sm:$0xff] %v21827_v48  ;;  %24601 = vst [vmem:[#allocation105_spill] sm:$0xff] %v21833_v60  ;;  %v21846_v36 = vrot.slane %v12325_v3, %v16806_v50  ;;  %v21851_v26 = vrot.slane %v14127_v24, %v24593_v16  ;;  %v13344_v31 = vadd.f32 %v21674_v13, %v24607_v2  ;;  %v24611_v3 = vld [vmem:[#allocation45_spill] sm:$0xff]  ;;  %v12825_v10 = vrot.slane %v12823_v25, 2 }
 0x5c1   : > { %24602 = vst [vmem:[#allocation25_spill] sm:$0xff] %v21837_v37  ;;  %24603 = vst [vmem:[#allocation106_spill] sm:$0xff] %v21840_v32  ;;  %v13351_v21 = vadd.f32 %v12992_v17, %v24608_v57  ;;  %v21858_v51 = vsel %vm17974_vm0, %v15860_v0, %v12820_v62  ;;  %v13345_v49 = vadd.f32 %v21695_v34, %v24609_v23  ;;  %v12994_v20 = vpop.permute.xlu1 %12993  ;;  %13107 = vrot.lane.b32.xlu0 %v21678_v39, %s16459_s24 }
 0x5c2   : > { %24605 = vst [vmem:[#allocation29_spill] sm:$0xff] %v21846_v36  ;;  %24606 = vst [vmem:[#allocation27_spill] sm:$0xff] %v21851_v26  ;;  %v21864_v42 = vcombine.high %v21819_v11, %v21819_v11  ;;  %v21870_v13 = vsel %vm17974_vm0, %v12822_v33, %v12823_v25  ;;  %v24612_v62 = vrot.slane %v24607_v2, 2  ;;  %v24614_v17 = vrot.slane %v24613_v54, 2  ;;  %v24616_v11 = vld [vmem:[#allocation112_spill] sm:$0xff] }
 0x5c3   : > { %v13352_v57 = vadd.f32 %v12994_v20, %v24613_v54  ;;  %v14271_v39 = vcombine.low %v21672_v43, %v13725_v14  ;;  %13109 = vrot.lane.b32.xlu1 %v21682_v47, %s16459_s24  ;;  %v12996_v33 = vpop.permute.xlu0 %12995  ;;  %v12826_v24 = vrot.slane %v21547_v19, 7  ;;  %v12829_v2 = vrot.slane %v24616_v11, 7  ;;  %v24620_v54 = vld [vmem:[#allocation32_spill] sm:$0xff]  ;;  %v24641_v19 = vld [vmem:[#allocation43_spill] sm:$0xff] }
 0x5c4   : > { %24610 = vst [vmem:[#allocation30_spill] sm:$0xff] %v21864_v42  ;;  %v13727_v0 = vadd.f32 %v24612_v62, %v13343_v7  ;;  %v13735_v34 = vadd.f32 %v24614_v17, %v13351_v21  ;;  %v21879_v42 = vrot.slane %v14199_v61, %v24593_v16  ;;  %v24617_v7 = vrot.slane %v24609_v23, 2  ;;  %v24618_v17 = vld [vmem:[#allocation39_spill] sm:$0xff]  ;;  %v24622_v11 = vld [vmem:[#allocation48_spill] sm:$0xff]  ;;  %v24623_v23 = vld [vmem:[#allocation50_spill] sm:$0xff] }
 0x5c5   : > { %v24619_v20 = vrot.slane %v24618_v17, 2  ;;  %v13353_v61 = vadd.f32 %v12996_v33, %v24618_v17  ;;  %v24621_v36 = vrot.slane %v24620_v54, 2  ;;  %v13346_v47 = vadd.f32 %v21728_v56, %v24620_v54  ;;  %v12998_v14 = vpop.permute.xlu1 %12997  ;;  %13111 = vrot.lane.b32.xlu0 %v21711_v9, %s16459_s24  ;;  %v24628_v56 = vld [vmem:[#allocation31_spill] sm:$0xff]  ;;  %v24629_v9 = vld [vmem:[#allocation34_spill] sm:$0xff] }
 0x5c6   : > { %24615 = vst [vmem:[#allocation37_spill] sm:$0xff] %v21879_v42  ;;  %v13728_v62 = vadd.f32 %v24617_v7, %v13344_v31  ;;  %v13848_v21 = vcombine.low %v13727_v0, %v13735_v34  ;;  %v13347_v17 = vadd.f32 %v21734_v15, %v24628_v56  ;;  %v12828_v54 = vrot.slane %v12826_v24, 2 }
 0x5c7   : > { %v13736_v25 = vadd.f32 %v24619_v20, %v13352_v57  ;;  %v13729_v43 = vadd.f32 %v24621_v36, %v13345_v49  ;;  %v24625_v57 = vld [vmem:[#allocation38_spill] sm:$0xff]  ;;  %v21906_v49 = vrot.slane %v14271_v39, %v24593_v16  ;;  %v13348_v20 = vadd.f32 %v21776_v59, %v24629_v9  ;;  %13113 = vrot.lane.b32.xlu1 %v21738_v45, %s16459_s24 }
 0x5c8   : > { %v21900_v0 = vrot.slane %v13848_v21, %v24593_v16  ;;  %v24626_v33 = vrot.slane %v24625_v57, 2  ;;  %v13354_v36 = vadd.f32 %v12998_v14, %v24625_v57  ;;  %v13000_v21 = vpop.permute.xlu0 %12999  ;;  %v24631_v15 = vrot.slane %v24628_v56, 2  ;;  %v24632_v57 = vld [vmem:[#allocation40_spill] sm:$0xff] }
 0x5c9   : > { %v13920_v34 = vcombine.low %v13728_v62, %v13736_v25  ;;  %24627 = vst [vmem:[#allocation45_spill] sm:$0xff] %v21906_v49  ;;  %v12827_v62 = vsel %vm17974_vm0, %v12825_v10, %v12826_v24  ;;  %v24633_v59 = vrot.slane %v24632_v57, 2  ;;  %v13355_v45 = vadd.f32 %v13000_v21, %v24632_v57  ;;  %v13002_v31 = vpop.permute.xlu1 %13001  ;;  %13115 = vrot.lane.b32.xlu0 %v21772_v29, %s16459_s24  ;;  %v24634_v25 = vld [vmem:[#allocation33_spill] sm:$0xff]  ;;  %v24640_v24 = vld [vmem:[#allocation98_spill] sm:$0xff] }
 0x5ca   : > { %24624 = vst [vmem:[#allocation28_spill] sm:$0xff] %v21900_v0  ;;  %v13737_v7 = vadd.f32 %v24626_v33, %v13353_v61  ;;  %v13730_v14 = vadd.f32 %v24631_v15, %v13346_v47  ;;  %v12832_v10 = vrot.slane %v21580_v6, 7  ;;  %v24636_v47 = vld [vmem:[#allocation42_spill] sm:$0xff]  ;;  %v24638_v21 = vrot.slane %v24634_v25, 2 }
 0x5cb   : > { %v21919_v61 = vrot.slane %v13920_v34, %v24593_v16  ;;  %v13738_v33 = vadd.f32 %v24633_v59, %v13354_v36  ;;  %v13349_v34 = vadd.f32 %v21801_v28, %v24634_v25  ;;  %v24637_v36 = vrot.slane %v24629_v9, 2  ;;  %13117 = vrot.lane.b32.xlu1 %v21782_v52, %s16459_s24  ;;  %v24664_v6 = vld [vmem:[#allocation54_spill] sm:$0xff] }
 0x5cc   : > { %v13992_v39 = vcombine.low %v13729_v43, %v13737_v7  ;;  %v13356_v7 = vadd.f32 %v13002_v31, %v24636_v47  ;;  %v13732_v15 = vadd.f32 %v24638_v21, %v13348_v20  ;;  %v24639_v57 = vrot.slane %v24636_v47, 2  ;;  %v13004_v28 = vpop.permute.xlu0 %13003 }
 0x5cd   : > { %24630 = vst [vmem:[#allocation36_spill] sm:$0xff] %v21919_v61  ;;  %v13731_v56 = vadd.f32 %v24637_v36, %v13347_v17  ;;  %v14064_v29 = vcombine.low %v13730_v14, %v13738_v33  ;;  %v24642_v9 = vrot.slane %v24641_v19, 2  ;;  %v13357_v25 = vadd.f32 %v13004_v28, %v24641_v19  ;;  %v13006_v33 = vpop.permute.xlu1 %13005  ;;  %13119 = vrot.lane.b32.xlu0 %v21858_v51, %s16459_s24 }
 0x5ce   : > { %v21934_v43 = vrot.slane %v13992_v39, %v24593_v16  ;;  %v13739_v59 = vadd.f32 %v24639_v57, %v13355_v45  ;;  %v13350_v39 = vadd.f32 %v21821_v27, %v24640_v24  ;;  %v12830_v52 = vsel %vm17974_vm0, %v12828_v54, %v12829_v2  ;;  %v21961_v21 = vpop.f32.mrf.mxu1 }
 0x5cf   : > { %v13740_v17 = vadd.f32 %v24642_v9, %v13356_v7  ;;  %v21953_v20 = vrot.slane %v14064_v29, %v24593_v16  ;;  %v12831_v27 = vrot.slane %v12829_v2, 2  ;;  %v24644_v45 = vrot.slane %v24640_v24, 2  ;;  %v24645_v7 = vld [vmem:[#allocation41_spill] sm:$0xff]  ;;  %13121 = vrot.lane.b32.xlu1 %v21870_v13, %s16459_s24  ;;  %v24648_v24 = vld [vmem:[#allocation35_spill] sm:$0xff] }
 0x5d0   : > { %24635 = vst [vmem:[#allocation39_spill] sm:$0xff] %v21934_v43  ;;  %v14136_v14 = vcombine.low %v13731_v56, %v13739_v59  ;;  %v24646_v19 = vrot.slane %v24645_v7, 2  ;;  %v13358_v29 = vadd.f32 %v13006_v33, %v24645_v7  ;;  %v21973_v2 = vpop.permute.xlu0 %13007  ;;  %v12834_v54 = vrot.slane %v12832_v10, 2  ;;  %v24653_v13 = vld [vmem:[#allocation115_spill] sm:$0xff] }
 0x5d1   : > { %24643 = vst [vmem:[#allocation32_spill] sm:$0xff] %v21953_v20  ;;  %v13733_v47 = vadd.f32 %v24644_v45, %v13349_v34  ;;  %v14208_v36 = vcombine.low %v13732_v15, %v13740_v17  ;;  %v12835_v34 = vrot.slane %v21624_v40, 7  ;;  %v24649_v15 = vrot.slane %v24648_v24, 2  ;;  %v24651_v17 = vld [vmem:[#allocation44_spill] sm:$0xff]  ;;  %v21985_v45 = vpop.permute.xlu1 %13009  ;;  %13123 = vrot.lane.b32.xlu0 %v12827_v62, %s16459_s24  ;;  %v24656_v24 = vld [vmem:[#allocation51_spill] sm:$0xff] }
 0x5d2   : > { %v13741_v57 = vadd.f32 %v24646_v19, %v13357_v25  ;;  %v21969_v51 = vrot.slane %v14136_v14, %v24593_v16  ;;  %v24652_v25 = vrot.slane %v24651_v17, 2  ;;  %v12838_v7 = vrot.slane %v24653_v13, 7 }
 0x5d3   : > { %v13734_v59 = vadd.f32 %v24649_v15, %v13350_v39  ;;  %v21979_v28 = vrot.slane %v14208_v36, %v24593_v16  ;;  %v21991_v19 = vcombine.high %v24653_v13, %v24653_v13  ;;  %v12845_v39 = vrot.slane %v21687_v22, 7  ;;  %13125 = vrot.lane.b32.xlu1 %v12830_v52, %s16459_s24  ;;  %v24662_v22 = vld [vmem:[#allocation120_spill] sm:$0xff]  ;;  %v24663_v13 = vld [vmem:[#allocation55_spill] sm:$0xff] }
 0x5d4   : > { %24647 = vst [vmem:[#allocation48_spill] sm:$0xff] %v21969_v51  ;;  %v14280_v9 = vcombine.low %v13733_v47, %v13741_v57  ;;  %v13742_v33 = vadd.f32 %v24652_v25, %v13358_v29  ;;  %v21999_v29 = vpop.f32.mrf.mxu1  ;;  %v24657_v62 = vcombine.low %v21658_v53, %v21666_v12  ;;  %v22009_v25 = vpop.permute.xlu0 %13011  ;;  %v12833_v47 = vsel %vm17974_vm0, %v12831_v27, %v12832_v10  ;;  %v24661_v27 = vld [vmem:[#allocation52_spill] sm:$0xff] }
 0x5d5   : > { %24650 = vst [vmem:[#allocation50_spill] sm:$0xff] %v21979_v28  ;;  %24654 = vst [vmem:[#allocation38_spill] sm:$0xff] %v21991_v19  ;;  %v12836_v12 = vsel %vm17974_vm0, %v12834_v54, %v12835_v34  ;;  %v12837_v53 = vrot.slane %v12835_v34, 2  ;;  %v22022_v52 = vpop.permute.xlu1 %13013  ;;  %13127 = vrot.lane.b32.xlu0 %v12833_v47, %s16459_s24  ;;  %v12841_v10 = vrot.slane %v21991_v19, 7  ;;  %v12847_v14 = vrot.slane %v12845_v39, 2 }
 0x5d6   : > { %v21997_v36 = vrot.slane %v14280_v9, %v24593_v16  ;;  %v14352_v57 = vcombine.low %v13734_v59, %v13742_v33  ;;  %v22006_v17 = vrot.slane %v24657_v62, %v24593_v16  ;;  %v24659_v9 = vld [vmem:[#allocation49_spill] sm:$0xff]  ;;  %v12848_v59 = vrot.slane %v21649_v18, 7  ;;  %v22031_v15 = vpop.f32.mrf.mxu1 }
 0x5d7   : > { %v12840_v62 = vrot.slane %v12838_v7, 2  ;;  %v12854_v54 = vrot.slane %v21703_v35, 7  ;;  %v12857_v34 = vrot.slane %v21743_v38, 7  ;;  %13129 = vrot.lane.b32.xlu1 %v12836_v12, %s16459_s24  ;;  %v15861_v18 = vrot.slane %v21633_v44, 9  ;;  %v24667_v35 = vld [vmem:[#allocation56_spill] sm:$0xff] }
 0x5d8   : > { %24655 = vst [vmem:[#allocation31_spill] sm:$0xff] %v21997_v36  ;;  %24658 = vst [vmem:[#allocation34_spill] sm:$0xff] %v22006_v17  ;;  %v22018_v31 = vrot.slane %v14352_v57, %v24593_v16  ;;  %v22036_v47 = vpop.permute.xlu0 %13015  ;;  %v12850_v56 = vrot.slane %v12848_v59, 2  ;;  %v12851_v19 = vrot.slane %v24662_v22, 7  ;;  %v12860_v33 = vrot.slane %v21714_v63, 7  ;;  %v24666_v63 = vld [vmem:[#allocation110_spill] sm:$0xff] }
 0x5d9   : > { %v12839_v57 = vsel %vm17974_vm0, %v12837_v53, %v12838_v7  ;;  %v22046_v17 = vpop.permute.xlu1 %13017  ;;  %v12842_v12 = vsel %vm17974_vm0, %v12840_v62, %v12841_v10  ;;  %v12846_v44 = vsel %vm17974_vm0, %v15861_v18, %v12845_v39  ;;  %v12870_v7 = vrot.slane %v21766_v1, 7  ;;  %v22055_v53 = vpop.f32.mrf.mxu1  ;;  %v24676_v62 = vld [vmem:[#allocation66_spill] sm:$0xff] }
 0x5da   : > { %24660 = vst [vmem:[#allocation40_spill] sm:$0xff] %v22018_v31  ;;  %v24665_v31 = vld [vmem:[#allocation123_spill] sm:$0xff]  ;;  %13131 = vrot.lane.b32.xlu0 %v12839_v57, %s16459_s24  ;;  %v12849_v40 = vsel %vm17974_vm0, %v12847_v14, %v12848_v59  ;;  %v12856_v49 = vrot.slane %v12854_v54, 2  ;;  %v12859_v36 = vrot.slane %v12857_v34, 2  ;;  %v12852_v18 = vsel %vm17974_vm0, %v12850_v56, %v12851_v19 }
 0x5db   : > { %v12863_v38 = vrot.slane %v24665_v31, 7  ;;  %13133 = vrot.lane.b32.xlu1 %v12842_v12, %s16459_s24  ;;  %v12853_v39 = vrot.slane %v12851_v19, 2  ;;  %v12862_v22 = vrot.slane %v12860_v33, 2  ;;  %v12866_v42 = vrot.slane %v21763_v55, 7  ;;  %v22076_v28 = vpop.f32.mrf.mxu1 }
 0x5dc   : > { %v22061_v57 = vpop.permute.xlu0 %13019  ;;  %v12873_v14 = vrot.slane %v21812_v8, 7  ;;  %v12876_v59 = vrot.slane %v21787_v46, 7  ;;  %v15862_v56 = vrot.slane %v21808_v58, 9  ;;  %v12872_v19 = vrot.slane %v12870_v7, 2  ;;  %v24669_v8 = vld [vmem:[#allocation58_spill] sm:$0xff]  ;;  %v24671_v58 = vld [vmem:[#allocation59_spill] sm:$0xff] }
 0x5dd   : > { %v12865_v1 = vrot.slane %v12863_v38, 2  ;;  %v22069_v31 = vpop.permute.xlu1 %13021  ;;  %v12855_v12 = vsel %vm17974_vm0, %v12853_v39, %v12854_v54  ;;  %v12879_v10 = vrot.slane %v21833_v60, 7  ;;  %v12858_v55 = vsel %vm17974_vm0, %v12856_v49, %v12857_v34  ;;  %v11688_v34 = vpop.f32.mrf.mxu1 }
 0x5de   : > { %13135 = vrot.lane.b32.xlu0 %v12846_v44, %s16459_s24  ;;  %v12861_v46 = vsel %vm17974_vm0, %v12859_v36, %v12860_v33  ;;  %v12864_v39 = vsel %vm17974_vm0, %v12862_v22, %v12863_v38  ;;  %v12882_v49 = vrot.slane %v21790_v41, 7  ;;  %v24673_v33 = vld [vmem:[#allocation62_spill] sm:$0xff]  ;;  %v12875_v26 = vrot.slane %v12873_v14, 2 }
 0x5df   : > { %13137 = vrot.lane.b32.xlu1 %v12849_v40, %s16459_s24  ;;  %v12867_v36 = vsel %vm17974_vm0, %v12865_v1, %v12866_v42  ;;  %v12878_v44 = vrot.slane %v12876_v59, 2  ;;  %v22100_v40 = vsel %vm17974_vm0, %v15862_v56, %v12870_v7  ;;  %v22104_v22 = vsel %vm17974_vm0, %v12872_v19, %v12873_v14  ;;  %v24675_v7 = vld [vmem:[#allocation69_spill] sm:$0xff]  ;;  %v24677_v41 = vld [vmem:[#allocation46_spill] sm:$0xff] }
 0x5e0   : > { %v22085_v54 = vpop.permute.xlu0 %13023  ;;  %v12881_v60 = vrot.slane %v12879_v10, 2  ;;  %v12343_v1 = vcombine.low %v21961_v21, %v21999_v29  ;;  %v12344_v42 = vcombine.high %v21961_v21, %v21999_v29  ;;  %v12361_v14 = vcombine.low %v22031_v15, %v22055_v53  ;;  %v24678_v21 = vld [vmem:[#allocation64_spill] sm:$0xff] }
 0x5e1   : > { %v22095_v51 = vpop.permute.xlu1 %13025  ;;  %v12884_v16 = vrot.slane %v12882_v49, 2  ;;  %v12885_v38 = vrot.slane %v21837_v37, 7  ;;  %v12362_v29 = vcombine.high %v22031_v15, %v22055_v53  ;;  %v13359_v56 = vadd.f32 %v21973_v2, %v24677_v41  ;;  %v11690_v41 = vpop.f32.mrf.mxu1  ;;  %v24682_v2 = vld [vmem:[#allocation65_spill] sm:$0xff] }
 0x5e2   : > { %13139 = vrot.lane.b32.xlu0 %v12852_v18, %s16459_s24  ;;  %v22113_v18 = vsel %vm17974_vm0, %v12875_v26, %v12876_v59  ;;  %v22131_v59 = vsel %vm17974_vm0, %v12878_v44, %v12879_v10  ;;  %v22142_v26 = vsel %vm17974_vm0, %v12881_v60, %v12882_v49  ;;  %v22146_v53 = vrot.slane %v12343_v1, %v16806_v50  ;;  %v24681_v44 = vld [vmem:[#allocation47_spill] sm:$0xff] }
 0x5e3   : > { %13141 = vrot.lane.b32.xlu1 %v12855_v12, %s16459_s24  ;;  %v22149_v10 = vrot.slane %v12344_v42, %v16806_v50  ;;  %v13360_v12 = vadd.f32 %v21985_v45, %v24681_v44  ;;  %v22157_v60 = vrot.slane %v12361_v14, %v16806_v50  ;;  %v13361_v49 = vadd.f32 %v22009_v25, %v24611_v3 }
 0x5e4   : > { %v22119_v19 = vpop.permute.xlu0 %13027  ;;  %24679 = vst [vmem:[#allocation33_spill] sm:$0xff] %v22146_v53  ;;  %v22166_v42 = vsel %vm17974_vm0, %v12884_v16, %v12885_v38  ;;  %v22169_v45 = vrot.slane %v12362_v29, %v16806_v50  ;;  %v12379_v14 = vcombine.low %v22076_v28, %v11688_v34  ;;  %v13363_v43 = vadd.f32 %v22036_v47, %v24623_v23  ;;  %v24686_v29 = vld [vmem:[#allocation29_spill] sm:$0xff] }
 0x5e5   : > { %v22137_v37 = vpop.permute.xlu1 %13029  ;;  %24680 = vst [vmem:[#allocation42_spill] sm:$0xff] %v22149_v10  ;;  %24683 = vst [vmem:[#allocation98_spill] sm:$0xff] %v22157_v60  ;;  %v24685_v25 = vrot.slane %v24681_v44, 2  ;;  %v12380_v15 = vcombine.high %v22076_v28, %v11688_v34  ;;  %v12887_v16 = vrot.slane %v12885_v38, 2  ;;  %v12888_v32 = vrot.slane %v24686_v29, 7  ;;  %v11692_v28 = vpop.f32.mrf.mxu1 }
 0x5e6   : > { %13143 = vrot.lane.b32.xlu0 %v12858_v55, %s16459_s24  ;;  %24684 = vst [vmem:[#allocation43_spill] sm:$0xff] %v22169_v45  ;;  %v13362_v55 = vadd.f32 %v22022_v52, %v24622_v11  ;;  %v22187_v52 = vcombine.high %v22146_v53, %v22146_v53  ;;  %v22191_v47 = vcombine.high %v22149_v10, %v22149_v10  ;;  %v24692_v38 = vrot.slane %v24622_v11, 2 }
 0x5e7   : > { %13145 = vrot.lane.b32.xlu1 %v12861_v46, %s16459_s24  ;;  %v22178_v46 = vadd.f32 %v24685_v25, %v13359_v56  ;;  %v24689_v56 = vrot.slane %v24611_v3, 2  ;;  %v22199_v34 = vcombine.high %v24686_v29, %v24686_v29  ;;  %v13364_v48 = vadd.f32 %v22046_v17, %v24656_v24 }
 0x5e8   : > { %v22162_v1 = vpop.permute.xlu0 %13031  ;;  %24687 = vst [vmem:[#allocation41_spill] sm:$0xff] %v22187_v52  ;;  %24688 = vst [vmem:[#allocation35_spill] sm:$0xff] %v22191_v47  ;;  %v22207_v25 = vadd.f32 %v24692_v38, %v13361_v49  ;;  %v22217_v29 = vcombine.high %v22169_v45, %v22169_v45  ;;  %v24695_v61 = vrot.slane %v24623_v23, 2  ;;  %v22224_v11 = vrot.slane %v12379_v14, %v16806_v50 }
 0x5e9   : > { %v22181_v20 = vpop.permute.xlu1 %13033  ;;  %v22195_v44 = vadd.f32 %v24689_v56, %v13360_v12  ;;  %24690 = vst [vmem:[#allocation44_spill] sm:$0xff] %v22199_v34  ;;  %v24693_v12 = vld [vmem:[#allocation67_spill] sm:$0xff]  ;;  %v24697_v49 = vrot.slane %v24656_v24, 2  ;;  %v12397_v38 = vcombine.low %v11690_v41, %v11692_v28  ;;  %v13365_v56 = vadd.f32 %v22061_v57, %v24659_v9 }
 0x5ea   : > { %13147 = vrot.lane.b32.xlu0 %v12864_v39, %s16459_s24  ;;  %v22203_v39 = vcombine.high %v22157_v60, %v22157_v60  ;;  %24694 = vst [vmem:[#allocation49_spill] sm:$0xff] %v22217_v29  ;;  %v22221_v30 = vadd.f32 %v24695_v61, %v13362_v55  ;;  %24696 = vst [vmem:[#allocation52_spill] sm:$0xff] %v22224_v11  ;;  %v12889_v23 = vsel %vm17974_vm0, %v12887_v16, %v12888_v32  ;;  %v24699_v55 = vld [vmem:[#allocation53_spill] sm:$0xff] }
 0x5eb   : > { %13149 = vrot.lane.b32.xlu1 %v12867_v36, %s16459_s24  ;;  %v22228_v17 = vadd.f32 %v24697_v49, %v13363_v43  ;;  %v22231_v36 = vrot.slane %v12380_v15, %v16806_v50  ;;  %v12398_v61 = vcombine.high %v11690_v41, %v11692_v28  ;;  %v13367_v43 = vadd.f32 %v22085_v54, %v24699_v55  ;;  %v24704_v55 = vld [vmem:[#allocation30_spill] sm:$0xff] }
 0x5ec   : > { %24691 = vst [vmem:[#allocation51_spill] sm:$0xff] %v22203_v39  ;;  %v22212_v3 = vpop.permute.xlu0 %13035  ;;  %v12890_v24 = vrot.slane %v12888_v32, 2  ;;  %v12891_v15 = vrot.slane %v22199_v34, 7  ;;  %v24700_v14 = vrot.slane %v24659_v9, 2  ;;  %v13366_v57 = vadd.f32 %v22069_v31, %v24661_v27  ;;  %v24703_v9 = vld [vmem:[#allocation24_spill] sm:$0xff] }
 0x5ed   : > { %24698 = vst [vmem:[#allocation55_spill] sm:$0xff] %v22231_v36  ;;  %v22235_v0 = vpop.permute.xlu1 %13037  ;;  %v12898_v28 = vrot.slane %v22146_v53, 7  ;;  %v22258_v32 = vcombine.high %v22224_v11, %v22224_v11  ;;  %v15863_v54 = vrot.slane %v24703_v9, 9  ;;  %v12895_v31 = vrot.slane %v24704_v55, 7 }
 0x5ee   : > { %13151 = vrot.lane.b32.xlu0 %v22100_v40, %s16459_s24  ;;  %v22246_v49 = vadd.f32 %v24700_v14, %v13364_v48  ;;  %v13368_v48 = vadd.f32 %v22095_v51, %v24664_v6  ;;  %v22269_v14 = vrot.slane %v12397_v38, %v16806_v50  ;;  %v24707_v41 = vrot.slane %v24661_v27, 2 }
 0x5ef   : > { %13153 = vrot.lane.b32.xlu1 %v22104_v22, %s16459_s24  ;;  %24702 = vst [vmem:[#allocation54_spill] sm:$0xff] %v22258_v32  ;;  %v22266_v22 = vcombine.high %v22231_v36, %v22231_v36  ;;  %v12901_v51 = vrot.slane %v22187_v52, 7  ;;  %v22281_v9 = vrot.slane %v12398_v61, %v16806_v50  ;;  %v24709_v55 = vrot.slane %v24664_v6, 2  ;;  %v24711_v61 = vld [vmem:[#allocation70_spill] sm:$0xff]  ;;  %v24716_v52 = vld [vmem:[#allocation73_spill] sm:$0xff] }
 0x5f0   : > { %v22252_v40 = vpop.permute.xlu0 %13039  ;;  %24706 = vst [vmem:[#allocation56_spill] sm:$0xff] %v22269_v14  ;;  %v22273_v53 = vadd.f32 %v24707_v41, %v13365_v56  ;;  %v13369_v38 = vadd.f32 %v22119_v19, %v24666_v63  ;;  %v12892_v27 = vsel %vm17974_vm0, %v12890_v24, %v12891_v15  ;;  %v24710_v56 = vrot.slane %v24663_v13, 2 }
 0x5f1   : > { %24705 = vst [vmem:[#allocation110_spill] sm:$0xff] %v22266_v22  ;;  %v22275_v34 = vpop.permute.xlu1 %13041  ;;  %24708 = vst [vmem:[#allocation58_spill] sm:$0xff] %v22281_v9  ;;  %v13751_v5 = vadd.f32 %v24709_v55, %v13367_v43  ;;  %v12900_v50 = vrot.slane %v12898_v28, 2  ;;  %v12904_v6 = vrot.slane %v22149_v10, 7  ;;  %v24712_v43 = vrot.slane %v24666_v63, 2 }
 0x5f2   : > { %13155 = vrot.lane.b32.xlu0 %v22113_v18, %s16459_s24  ;;  %v22291_v41 = vadd.f32 %v24710_v56, %v13366_v57  ;;  %v13370_v24 = vadd.f32 %v22137_v37, %v24667_v35  ;;  %v12896_v13 = vsel %vm17974_vm0, %v15863_v54, %v12895_v31  ;;  %v12907_v15 = vrot.slane %v22191_v47, 7  ;;  %v24714_v57 = vld [vmem:[#allocation57_spill] sm:$0xff] }
 0x5f3   : > { %13157 = vrot.lane.b32.xlu1 %v22131_v59, %s16459_s24  ;;  %v13752_v19 = vadd.f32 %v24712_v43, %v13368_v48  ;;  %v22308_v59 = vcombine.high %v22269_v14, %v22269_v14  ;;  %v13371_v55 = vadd.f32 %v22162_v1, %v24714_v57  ;;  %v12897_v63 = vrot.slane %v12895_v31, 2 }
 0x5f4   : > { %v22295_v18 = vpop.permute.xlu0 %13043  ;;  %v12903_v48 = vrot.slane %v12901_v51, 2  ;;  %v13857_v37 = vcombine.low %v22178_v46, %v13751_v5  ;;  %v24715_v54 = vrot.slane %v24667_v35, 2  ;;  %v12910_v10 = vrot.slane %v22157_v60, 7 }
 0x5f5   : > { %24713 = vst [vmem:[#allocation59_spill] sm:$0xff] %v22308_v59  ;;  %v22312_v56 = vpop.permute.xlu1 %13045  ;;  %v13372_v9 = vadd.f32 %v22181_v20, %v24669_v8  ;;  %v12902_v5 = vsel %vm17974_vm0, %v12900_v50, %v12901_v51  ;;  %v12906_v35 = vrot.slane %v12904_v6, 2  ;;  %v13929_v46 = vcombine.low %v22195_v44, %v13752_v19  ;;  %v24720_v50 = vld [vmem:[#allocation71_spill] sm:$0xff]  ;;  %v24721_v19 = vld [vmem:[#allocation18_spill] sm:$0xff] }
 0x5f6   : > { %13159 = vrot.lane.b32.xlu0 %v22142_v26, %s16459_s24  ;;  %v13753_v43 = vadd.f32 %v24715_v54, %v13369_v38  ;;  %v12899_v26 = vsel %vm17974_vm0, %v12897_v63, %v12898_v28  ;;  %v24717_v31 = vrot.slane %v24714_v57, 2  ;;  %v24718_v54 = vld [vmem:[#allocation68_spill] sm:$0xff]  ;;  %v12909_v20 = vrot.slane %v12907_v15, 2 }
 0x5f7   : > { %13161 = vrot.lane.b32.xlu1 %v22166_v42, %s16459_s24  ;;  %v24719_v60 = vrot.slane %v24669_v8, 2  ;;  %v12905_v28 = vsel %vm17974_vm0, %v12903_v48, %v12904_v6  ;;  %v12913_v44 = vrot.slane %v22203_v39, 7  ;;  %v22345_v57 = vrot.slane %v13857_v37, %v24721_v19  ;;  %v24722_v63 = vld [vmem:[#allocation20_spill] sm:$0xff] }
 0x5f8   : > { %v22325_v1 = vpop.permute.xlu0 %13047  ;;  %v13754_v38 = vadd.f32 %v24717_v31, %v13370_v24  ;;  %v14001_v24 = vcombine.low %v22207_v25, %v13753_v43  ;;  %v12912_v8 = vrot.slane %v12910_v10, 2  ;;  %v12908_v48 = vsel %vm17974_vm0, %v12906_v35, %v12907_v15  ;;  %v24725_v37 = vld [vmem:[#allocation76_spill] sm:$0xff]  ;;  %v24726_v15 = vld [vmem:[#allocation77_spill] sm:$0xff] }
 0x5f9   : > { %v13755_v42 = vadd.f32 %v24719_v60, %v13371_v55  ;;  %v22337_v16 = vpop.permute.xlu1 %13049  ;;  %v24723_v60 = vld [vmem:[#allocation114_spill] sm:$0xff]  ;;  %v22360_v25 = vrot.slane %v13929_v46, %v24721_v19  ;;  %v12920_v51 = vrot.slane %v22224_v11, 7  ;;  %v13374_v35 = vadd.f32 %v22235_v0, %v24671_v58 }
 0x5fa   : > { %13163 = vrot.lane.b32.xlu0 %v12889_v23, %s16459_s24  ;;  %v24724_v55 = vrot.slane %v24723_v60, 2  ;;  %v13373_v23 = vadd.f32 %v22212_v3, %v24723_v60  ;;  %v14073_v43 = vcombine.low %v22221_v30, %v13754_v38  ;;  %v12915_v60 = vrot.slane %v12913_v44, 2  ;;  %v24727_v30 = vld [vmem:[#allocation61_spill] sm:$0xff] }
 0x5fb   : > { %13165 = vrot.lane.b32.xlu1 %v12892_v27, %s16459_s24  ;;  %v14145_v3 = vcombine.low %v22228_v17, %v13755_v42  ;;  %v22373_v46 = vrot.slane %v14001_v24, %v24721_v19  ;;  %v13375_v38 = vadd.f32 %v22252_v40, %v24727_v30  ;;  %v12923_v11 = vrot.slane %v22258_v32, 7 }
 0x5fc   : > { %v13756_v47 = vadd.f32 %v24724_v55, %v13372_v9  ;;  %v22354_v6 = vpop.permute.xlu0 %13051  ;;  %v12911_v9 = vsel %vm17974_vm0, %v12909_v20, %v12910_v10  ;;  %v12916_v55 = vrot.slane %v22169_v45, 7  ;;  %v12914_v10 = vsel %vm17974_vm0, %v12912_v8, %v12913_v44  ;;  %v24728_v20 = vld [vmem:[#allocation83_spill] sm:$0xff]  ;;  %v24730_v8 = vld [vmem:[#allocation72_spill] sm:$0xff] }
 0x5fd   : > { %v22367_v27 = vpop.permute.xlu1 %13053  ;;  %v22388_v40 = vrot.slane %v14073_v43, %v24721_v19  ;;  %v13376_v44 = vadd.f32 %v22275_v34, %v24673_v33  ;;  %v12922_v43 = vrot.slane %v12920_v51, 2  ;;  %v24779_v45 = vld [vmem:[#allocation36_spill] sm:$0xff] }
 0x5fe   : > { %13167 = vrot.lane.b32.xlu0 %v12896_v13, %s16459_s24  ;;  %v14217_v42 = vcombine.low %v22246_v49, %v13756_v47  ;;  %v24729_v13 = vrot.slane %v24671_v58, 2  ;;  %v15864_v47 = vrot.slane %v22217_v29, 9  ;;  %v22395_v49 = vrot.slane %v14145_v3, %v24721_v19  ;;  %v24735_v29 = vld [vmem:[#allocation63_spill] sm:$0xff] }
 0x5ff   : > { %13169 = vrot.lane.b32.xlu1 %v12899_v26, %s16459_s24  ;;  %v12917_v26 = vsel %vm17974_vm0, %v12915_v60, %v12916_v55  ;;  %v24736_v32 = vrot.slane %v24735_v29, 2  ;;  %v12925_v60 = vrot.slane %v12923_v11, 2  ;;  %v13378_v29 = vadd.f32 %v22312_v56, %v24675_v7 }
 0x600   : > { %v13757_v31 = vadd.f32 %v24729_v13, %v13373_v23  ;;  %v13056_v24 = vpop.permute.xlu0 %13055  ;;  %24731 = vst [vmem:[#allocation62_spill] sm:$0xff] %v22395_v49  ;;  %v24732_v23 = vld [vmem:[#allocation60_spill] sm:$0xff]  ;;  %v24733_v13 = vrot.slane %v24673_v33, 2  ;;  %v12921_v3 = vsel %vm17974_vm0, %v15864_v47, %v12920_v51  ;;  %v24739_v47 = vrot.slane %v24675_v7, 2 }
 0x601   : > { %v13383_v30 = vadd.f32 %v13056_v24, %v24730_v8  ;;  %v13377_v58 = vadd.f32 %v22295_v18, %v24732_v23  ;;  %v13058_v0 = vpop.permute.xlu1 %13057  ;;  %v24734_v24 = vrot.slane %v24711_v61, 2  ;;  %v22410_v18 = vrot.slane %v14217_v42, %v24721_v19 }
 0x602   : > { %13171 = vrot.lane.b32.xlu0 %v12902_v5, %s16459_s24  ;;  %v13759_v34 = vadd.f32 %v24733_v13, %v13375_v38  ;;  %v13384_v17 = vadd.f32 %v13058_v0, %v24711_v61  ;;  %v14289_v5 = vcombine.low %v22273_v53, %v13757_v31  ;;  %v22415_v55 = vadd.f32 %v24736_v32, %v13374_v35 }
 0x603   : > { %v13767_v8 = vadd.f32 %v24734_v24, %v13383_v30  ;;  %13173 = vrot.lane.b32.xlu1 %v12905_v28, %s16459_s24  ;;  %v24737_v38 = vrot.slane %v24732_v23, 2  ;;  %v24738_v0 = vrot.slane %v24716_v52, 2  ;;  %v13761_v53 = vadd.f32 %v24739_v47, %v13377_v58 }
 0x604   : > { %v13060_v33 = vpop.permute.xlu0 %13059  ;;  %v12924_v28 = vsel %vm17974_vm0, %v12922_v43, %v12923_v11  ;;  %v12926_v31 = vrot.slane %v22231_v36, 7  ;;  %v22438_v58 = vrot.slane %v14289_v5, %v24721_v19  ;;  %v13379_v7 = vadd.f32 %v22325_v1, %v24676_v62  ;;  %v24778_v36 = vld [vmem:[#allocation26_spill] sm:$0xff] }
 0x605   : > { %v13760_v30 = vadd.f32 %v24737_v38, %v13376_v44  ;;  %v13866_v61 = vcombine.low %v13759_v34, %v13767_v8  ;;  %v13768_v51 = vadd.f32 %v24738_v0, %v13384_v17  ;;  %v13385_v42 = vadd.f32 %v13060_v33, %v24716_v52  ;;  %v13062_v32 = vpop.permute.xlu1 %13061 }
 0x606   : > { %13175 = vrot.lane.b32.xlu0 %v12908_v48, %s16459_s24  ;;  %v24740_v52 = vrot.slane %v24718_v54, 2  ;;  %v13386_v23 = vadd.f32 %v13062_v32, %v24718_v54  ;;  %v13380_v11 = vadd.f32 %v22337_v16, %v24678_v21  ;;  %v12929_v48 = vrot.slane %v22266_v22, 7  ;;  %v24776_v22 = vld [vmem:[#allocation128_spill] sm:$0xff] }
 0x607   : > { %v22432_v35 = vrot.slane %v13866_v61, %v24721_v19  ;;  %v13938_v17 = vcombine.low %v13760_v30, %v13768_v51  ;;  %13177 = vrot.lane.b32.xlu1 %v12911_v9, %s16459_s24  ;;  %v14361_v43 = vcombine.low %v22291_v41, %v22415_v55  ;;  %v24741_v1 = vrot.slane %v24676_v62, 2 }
 0x608   : > { %v13769_v44 = vadd.f32 %v24740_v52, %v13385_v42  ;;  %v13064_v56 = vpop.permute.xlu0 %13063  ;;  %v24742_v16 = vrot.slane %v24720_v50, 2  ;;  %v12927_v41 = vsel %vm17974_vm0, %v12925_v60, %v12926_v31  ;;  %v13381_v55 = vadd.f32 %v22354_v6, %v24682_v2 }
 0x609   : > { %v22451_v13 = vrot.slane %v13938_v17, %v24721_v19  ;;  %v13762_v24 = vadd.f32 %v24741_v1, %v13378_v29  ;;  %v13387_v9 = vadd.f32 %v13064_v56, %v24720_v50  ;;  %v13066_v5 = vpop.permute.xlu1 %13065  ;;  %v24743_v30 = vrot.slane %v24678_v21, 2 }
 0x60a   : > { %v14010_v34 = vcombine.low %v13761_v53, %v13769_v44  ;;  %v13770_v8 = vadd.f32 %v24742_v16, %v13386_v23  ;;  %13179 = vrot.lane.b32.xlu0 %v12914_v10, %s16459_s24  ;;  %v13388_v38 = vadd.f32 %v13066_v5, %v24722_v63  ;;  %v24744_v61 = vrot.slane %v24682_v2, 2 }
 0x60b   : > { %v13763_v50 = vadd.f32 %v24743_v30, %v13379_v7  ;;  %v24745_v60 = vrot.slane %v24722_v63, 2  ;;  %13181 = vrot.lane.b32.xlu1 %v12917_v26, %s16459_s24  ;;  %v13382_v42 = vadd.f32 %v22367_v27, %v24693_v12  ;;  %v24746_v53 = vrot.slane %v24725_v37, 2  ;;  %v24753_v30 = vld [vmem:[#allocation58_spill] sm:$0xff] }
 0x60c   : > { %v22466_v62 = vrot.slane %v14010_v34, %v24721_v19  ;;  %v13764_v10 = vadd.f32 %v24744_v61, %v13380_v11  ;;  %v14082_v0 = vcombine.low %v13762_v24, %v13770_v8  ;;  %v13068_v6 = vpop.permute.xlu0 %13067  ;;  %v12928_v26 = vrot.slane %v12926_v31, 2  ;;  %v24750_v34 = vld [vmem:[#allocation75_spill] sm:$0xff]  ;;  %v24768_v61 = vld [vmem:[#allocation84_spill] sm:$0xff] }
 0x60d   : > { %v13771_v51 = vadd.f32 %v24745_v60, %v13387_v9  ;;  %v13772_v21 = vadd.f32 %v24746_v53, %v13388_v38  ;;  %v13389_v29 = vadd.f32 %v13068_v6, %v24725_v37  ;;  %v13070_v63 = vpop.permute.xlu1 %13069  ;;  %v12932_v17 = vrot.slane %v22269_v14, 7  ;;  %v24755_v60 = vld [vmem:[#allocation48_spill] sm:$0xff]  ;;  %v24775_v14 = vld [vmem:[#allocation86_spill] sm:$0xff] }
 0x60e   : > { %v22484_v2 = vrot.slane %v14082_v0, %v24721_v19  ;;  %13183 = vrot.lane.b32.xlu0 %v12921_v3, %s16459_s24  ;;  %v24747_v27 = vrot.slane %v24693_v12, 2  ;;  %v24748_v23 = vrot.slane %v24726_v15, 2  ;;  %v13390_v11 = vadd.f32 %v13070_v63, %v24726_v15 }
 0x60f   : > { %v14154_v32 = vcombine.low %v13763_v50, %v13771_v51  ;;  %v14226_v44 = vcombine.low %v13764_v10, %v13772_v21  ;;  %13185 = vrot.lane.b32.xlu1 %v12924_v28, %s16459_s24  ;;  %v12931_v31 = vrot.slane %v12929_v48, 2  ;;  %v12935_v12 = vrot.slane %v22308_v59, 7  ;;  %v24756_v51 = vld [vmem:[#allocation27_spill] sm:$0xff] }
 0x610   : > { %v13765_v52 = vadd.f32 %v24747_v27, %v13381_v55  ;;  %v13773_v7 = vadd.f32 %v24748_v23, %v13389_v29  ;;  %v22499_v3 = vpop.permute.xlu0 %13071  ;;  %v24751_v1 = vrot.slane %v24750_v34, 2  ;;  %v24752_v8 = vrot.slane %v24728_v20, 2  ;;  %v24763_v23 = vld [vmem:[#allocation79_spill] sm:$0xff] }
 0x611   : > { %v22496_v56 = vrot.slane %v14154_v32, %v24721_v19  ;;  %v22505_v16 = vrot.slane %v14226_v44, %v24721_v19  ;;  %v22511_v55 = vpop.permute.xlu1 %13073  ;;  %v12930_v28 = vsel %vm17974_vm0, %v12928_v26, %v12929_v48  ;;  %v12934_v38 = vrot.slane %v12932_v17, 2 }
 0x612   : > { %v13766_v24 = vadd.f32 %v24751_v1, %v13382_v42  ;;  %v14298_v15 = vcombine.low %v13765_v52, %v13773_v7  ;;  %v13774_v9 = vadd.f32 %v24752_v8, %v13390_v11  ;;  %13187 = vrot.lane.b32.xlu0 %v12927_v41, %s16459_s24  ;;  %v12938_v50 = vrot.slane %v24753_v30, 7  ;;  %v24764_v8 = vld [vmem:[#allocation78_spill] sm:$0xff] }
 0x613   : > { %24749 = vst [vmem:[#allocation69_spill] sm:$0xff] %v22496_v56  ;;  %v22524_v0 = vcombine.high %v24753_v30, %v24753_v30  ;;  %v15881_v41 = vcombine.high %v24756_v51, %v24755_v60  ;;  %v22531_v53 = vrot.slane %v14361_v43, %v24721_v19  ;;  %v15866_v21 = vcombine.high %v22345_v57, %v22432_v35  ;;  %v24793_v42 = vld [vmem:[#allocation94_spill] sm:$0xff] }
 0x614   : > { %v22520_v10 = vrot.slane %v14298_v15, %v24721_v19  ;;  %v14370_v20 = vcombine.low %v13766_v24, %v13774_v9  ;;  %13189 = vrot.lane.b32.xlu1 %v12930_v28, %s16459_s24  ;;  %v22536_v29 = vpop.permute.xlu0 %13075  ;;  %v12933_v26 = vsel %vm17974_vm0, %v12931_v31, %v12932_v17  ;;  %v12937_v27 = vrot.slane %v12935_v12, 2  ;;  %v24765_v28 = vld [vmem:[#allocation81_spill] sm:$0xff] }
 0x615   : > { %24754 = vst [vmem:[#allocation66_spill] sm:$0xff] %v22524_v0  ;;  %24759 = vst [vmem:[#allocation46_spill] sm:$0xff] %v22531_v53  ;;  %v13519_v7 = vrot.slane %v24763_v23, 2  ;;  %v22548_v11 = vpop.permute.xlu1 %13077  ;;  %v12936_v34 = vsel %vm17974_vm0, %v12934_v38, %v12935_v12  ;;  %v12940_v1 = vrot.slane %v12938_v50, 2  ;;  %v15870_v24 = vcombine.high %v22360_v25, %v22451_v13  ;;  %v24767_v38 = vld [vmem:[#allocation17_spill] sm:$0xff] }
 0x616   : > { %v22541_v63 = vrot.slane %v14370_v20, %v24721_v19  ;;  %13191 = vrot.lane.b32.xlu0 %v12933_v26, %s16459_s24  ;;  %v15874_v17 = vcombine.high %v22373_v46, %v22466_v62  ;;  %v12941_v15 = vrot.slane %v22524_v0, 7  ;;  %v13520_v9 = vrot.slane %v24764_v8, 2  ;;  %v24766_v26 = vld [vmem:[#allocation80_spill] sm:$0xff]  ;;  %v24782_v19 = vld [vmem:[#allocation74_spill] sm:$0xff]  ;;  %v24791_v31 = vld [vmem:[#allocation89_spill] sm:$0xff] }
 0x617   : > { %v14482_v48 = vrot.slane %v15866_v21, %v24767_v38  ;;  %v15878_v32 = vcombine.high %v22388_v40, %v22484_v2  ;;  %v12939_v37 = vsel %vm17974_vm0, %v12937_v27, %v12938_v50  ;;  %v24772_v21 = vld [vmem:[#allocation127_spill] sm:$0xff]  ;;  %v24773_v0 = vld [vmem:[#allocation28_spill] sm:$0xff]  ;;  %v13527_v5 = vrot.slane %v24775_v14, 2 }
 0x618   : > { %24760 = vst [vmem:[#allocation64_spill] sm:$0xff] %v22541_v63  ;;  %13193 = vrot.lane.b32.xlu1 %v12936_v34, %s16459_s24  ;;  %v22564_v12 = vpop.permute.xlu0 %13079  ;;  %v24774_v30 = vcombine.high %v24772_v21, %v24773_v0  ;;  %v12942_v47 = vsel %vm17974_vm0, %v12940_v1, %v12941_v15  ;;  %v13528_v50 = vrot.slane %v24776_v22, 2  ;;  %v14574_v27 = vrot.slane %v15870_v24, %v24767_v38  ;;  %v24781_v15 = vld [vmem:[#allocation88_spill] sm:$0xff]  ;;  %v24784_v63 = vld [vmem:[#allocation90_spill] sm:$0xff] }
 0x619   : > { %v22573_v33 = vpop.permute.xlu1 %13081  ;;  %v15882_v54 = vcombine.high %v22395_v49, %v22496_v56  ;;  %v24780_v4 = vcombine.high %v24778_v36, %v24779_v45  ;;  %v13529_v39 = vrot.slane %v24781_v15, 2  ;;  %v13391_v24 = vadd.f32 %v22499_v3, %v24782_v19  ;;  %v24792_v3 = vld [vmem:[#allocation92_spill] sm:$0xff] }
 0x61a   : > { %13195 = vrot.lane.b32.xlu0 %v12939_v37, %s16459_s24  ;;  %v14475_v59 = vrot.slane %v24774_v30, %v24767_v38  ;;  %v22588_v37 = vrot.slane %v15874_v17, %v24767_v38  ;;  %v24783_v17 = vld [vmem:[#allocation91_spill] sm:$0xff]  ;;  %v14758_v53 = vrot.slane %v15878_v32, %v24767_v38  ;;  %v13531_v19 = vrot.slane %v24791_v31, 2 }
 0x61b   : > { %v14567_v1 = vrot.slane %v24780_v4, %v24767_v38  ;;  %v13530_v20 = vrot.slane %v24783_v17, 2  ;;  %v24789_v4 = vld [vmem:[#allocation32_spill] sm:$0xff]  ;;  %v15886_v17 = vcombine.high %v22410_v18, %v22505_v16  ;;  %v24794_v32 = vcombine.low %v24772_v21, %v24773_v0  ;;  %v24859_v21 = vld [vmem:[#allocation99_spill] sm:$0xff] }
 0x61c   : > { %13197 = vrot.lane.b32.xlu1 %v12942_v47, %s16459_s24  ;;  %v22593_v34 = vpop.permute.xlu0 %13083  ;;  %v14483_v30 = vcombine.low %v14475_v59, %v14482_v48  ;;  %v24785_v47 = vld [vmem:[#allocation39_spill] sm:$0xff]  ;;  %v24788_v48 = vld [vmem:[#allocation106_spill] sm:$0xff] }
 0x61d   : > { %24777 = vst [vmem:[#allocation47_spill] sm:$0xff] %v22593_v34  ;;  %v24786_v44 = vcombine.high %v24784_v63, %v24785_v47  ;;  %v22608_v59 = vpop.permute.xlu1 %13085  ;;  %v24790_v43 = vcombine.high %v24788_v48, %v24789_v4  ;;  %v14575_v56 = vcombine.low %v14567_v1, %v14574_v27  ;;  %v22633_v6 = vrot.slane %v24794_v32, %v24767_v38 }
 0x61e   : > { %24787 = vst [vmem:[#allocation65_spill] sm:$0xff] %v22608_v59  ;;  %14501 = vrot.lane.b32.xlu0 %v14483_v30, %s16459_s24  ;;  %v22622_v59 = vrot.slane %v15881_v41, %v24767_v38  ;;  %v13392_v30 = vadd.f32 %v22511_v55, %v24763_v23  ;;  %v15890_v41 = vcombine.high %v22438_v58, %v22520_v10  ;;  %v24798_v23 = vld [vmem:[#allocation23_spill] sm:$0xff] }
 0x61f   : > { %v14659_v52 = vrot.slane %v24786_v44, %v24767_v38  ;;  %v14751_v34 = vrot.slane %v24790_v43, %v24767_v38  ;;  %v22627_v43 = vrot.slane %v15882_v54, %v24767_v38  ;;  %24795 = vst [vmem:[#allocation67_spill] sm:$0xff] %v22633_v6  ;;  %v22643_v55 = vadd.f32 %v13519_v7, %v13391_v24 }
 0x620   : > { %v13088_v49 = vpop.permute.xlu0 %13087  ;;  %v13393_v1 = vadd.f32 %v22536_v29, %v24764_v8 }
 0x621   : > { %v14667_v44 = vcombine.low %v14659_v52, %v22588_v37  ;;  %v24796_v52 = vcombine.low %v22345_v57, %v22432_v35  ;;  %v13399_v54 = vadd.f32 %v13088_v49, %v24798_v23  ;;  %v14759_v37 = vcombine.low %v14751_v34, %v14758_v53  ;;  %v13090_v0 = vpop.permute.xlu1 %13089  ;;  %v24814_v23 = vld [vmem:[#allocation62_spill] sm:$0xff] }
 0x622   : > { %14593 = vrot.lane.b32.xlu0 %v14575_v56, %s16459_s24  ;;  %v24799_v57 = vcombine.low %v24778_v36, %v24779_v45  ;;  %v24801_v49 = vcombine.low %v22360_v25, %v22451_v13  ;;  %v13400_v29 = vadd.f32 %v13090_v0, %v24775_v14  ;;  %v24803_v56 = vcombine.low %v24788_v48, %v24789_v4 }
 0x623   : > { %v22639_v27 = vrot.slane %v24796_v52, %v24767_v38  ;;  %v22663_v7 = vadd.f32 %v13527_v5, %v13399_v54  ;;  %v24805_v45 = vcombine.low %v22388_v40, %v22484_v2  ;;  %v22678_v34 = vadd.f32 %v13520_v9, %v13392_v30  ;;  %v24815_v54 = vld [vmem:[#allocation69_spill] sm:$0xff] }
 0x624   : > { %v22655_v35 = vrot.slane %v24799_v57, %v24767_v38  ;;  %v22661_v53 = vrot.slane %v24801_v49, %v24767_v38  ;;  %v22670_v8 = vrot.slane %v24803_v56, %v24767_v38  ;;  %v13394_v25 = vadd.f32 %v22548_v11, %v24765_v28  ;;  %v13092_v13 = vpop.permute.xlu0 %13091  ;;  %v24819_v57 = vld [vmem:[#allocation91_spill] sm:$0xff]  ;;  %v24858_v5 = vld [vmem:[#allocation97_spill] sm:$0xff] }
 0x625   : > { %24797 = vst [vmem:[#allocation53_spill] sm:$0xff] %v22639_v27  ;;  %v22676_v36 = vrot.slane %v24805_v45, %v24767_v38  ;;  %v14851_v14 = vcombine.low %v22622_v59, %v22627_v43  ;;  %v22688_v48 = vadd.f32 %v13528_v50, %v13400_v29  ;;  %v13401_v40 = vadd.f32 %v13092_v13, %v24776_v22  ;;  %v13094_v9 = vpop.permute.xlu1 %13093  ;;  %v24822_v45 = vld [vmem:[#allocation50_spill] sm:$0xff] }
 0x626   : > { %24800 = vst [vmem:[#allocation70_spill] sm:$0xff] %v22655_v35  ;;  %24802 = vst [vmem:[#allocation57_spill] sm:$0xff] %v22661_v53  ;;  %v13395_v11 = vadd.f32 %v22564_v12, %v24766_v26  ;;  %14777 = vrot.lane.b32.xlu0 %v14759_v37, %s16459_s24  ;;  %v14942_v59 = vrot.slane %v15886_v17, %v24767_v38  ;;  %v24807_v4 = vcombine.low %v24784_v63, %v24785_v47 }
 0x627   : > { %24804 = vst [vmem:[#allocation73_spill] sm:$0xff] %v22670_v8  ;;  %24806 = vst [vmem:[#allocation68_spill] sm:$0xff] %v22676_v36  ;;  %v24809_v22 = vcombine.low %v22373_v46, %v22466_v62  ;;  %v24811_v30 = vrot.slane %v24765_v28, 2  ;;  %v22715_v17 = vadd.f32 %v13529_v39, %v13401_v40  ;;  %v13402_v52 = vadd.f32 %v13094_v9, %v24781_v15  ;;  %v24869_v36 = vld [vmem:[#allocation111_spill] sm:$0xff] }
 0x628   : > { %v22701_v32 = vrot.slane %v24807_v4, %v24767_v38  ;;  %v13396_v63 = vadd.f32 %v22573_v33, %v24768_v61  ;;  %v13096_v47 = vpop.permute.xlu0 %13095  ;;  %v24812_v62 = vcombine.low %v24756_v51, %v24755_v60  ;;  %v24816_v39 = vcombine.low %v24814_v23, %v24815_v54  ;;  %v24864_v33 = vld [vmem:[#allocation109_spill] sm:$0xff] }
 0x629   : > { %v22707_v50 = vrot.slane %v24809_v22, %v24767_v38  ;;  %v22711_v12 = vadd.f32 %v24811_v30, %v13393_v1  ;;  %v24818_v15 = vrot.slane %v24766_v26, 2  ;;  %v22740_v0 = vadd.f32 %v13530_v20, %v13402_v52  ;;  %v13098_v29 = vpop.permute.xlu1 %13097  ;;  %v24821_v26 = vld [vmem:[#allocation37_spill] sm:$0xff] }
 0x62a   : > { %24808 = vst [vmem:[#allocation71_spill] sm:$0xff] %v22701_v32  ;;  %v22726_v28 = vrot.slane %v24812_v62, %v24767_v38  ;;  %v22732_v37 = vrot.slane %v24816_v39, %v24767_v38  ;;  %v13403_v49 = vadd.f32 %v13096_v47, %v24819_v57  ;;  %v24820_v60 = vrot.slane %v24768_v61, 2  ;;  %14685 = vrot.lane.b32.xlu0 %v14667_v44, %s16459_s24  ;;  %v24827_v61 = vld [vmem:[#allocation82_spill] sm:$0xff]  ;;  %v24831_v62 = vld [vmem:[#allocation31_spill] sm:$0xff]  ;;  %v24863_v57 = vld [vmem:[#allocation104_spill] sm:$0xff] }
 0x62b   : > { %24810 = vst [vmem:[#allocation20_spill] sm:$0xff] %v22707_v50  ;;  %v22736_v1 = vadd.f32 %v24818_v15, %v13394_v25  ;;  %v24823_v25 = vcombine.low %v24821_v26, %v24822_v45  ;;  %v24825_v20 = vcombine.low %v22410_v18, %v22505_v16  ;;  %v13404_v22 = vadd.f32 %v13098_v29, %v24791_v31  ;;  %v24830_v16 = vld [vmem:[#allocation45_spill] sm:$0xff] }
 0x62c   : > { %24813 = vst [vmem:[#allocation114_spill] sm:$0xff] %v22726_v28  ;;  %24817 = vst [vmem:[#allocation76_spill] sm:$0xff] %v22732_v37  ;;  %v22745_v51 = vadd.f32 %v24820_v60, %v13395_v11  ;;  %v24828_v11 = vld [vmem:[#allocation47_spill] sm:$0xff]  ;;  %v22766_v4 = vadd.f32 %v13531_v19, %v13403_v49  ;;  %v24829_v30 = vrot.slane %v24827_v61, 2  ;;  %v13100_v47 = vpop.permute.xlu0 %13099  ;;  %v24832_v23 = vcombine.low %v24830_v16, %v24831_v62  ;;  %v24836_v31 = vld [vmem:[#allocation85_spill] sm:$0xff] }
 0x62d   : > { %v22754_v13 = vrot.slane %v24823_v25, %v24767_v38  ;;  %v22760_v40 = vrot.slane %v24825_v20, %v24767_v38  ;;  %v13397_v9 = vadd.f32 %v24828_v11, %v24827_v61  ;;  %v24834_v19 = vcombine.low %v22438_v58, %v22520_v10  ;;  %v24837_v15 = vld [vmem:[#allocation65_spill] sm:$0xff]  ;;  %v24839_v25 = vld [vmem:[#allocation64_spill] sm:$0xff]  ;;  %v24840_v20 = vld [vmem:[#allocation46_spill] sm:$0xff] }
 0x62e   : > { %v22771_v52 = vadd.f32 %v24829_v30, %v13396_v63  ;;  %v22779_v54 = vrot.slane %v24832_v23, %v24767_v38  ;;  %v13398_v63 = vadd.f32 %v24837_v15, %v24836_v31  ;;  %v24838_v49 = vrot.slane %v24792_v3, 2  ;;  %v24841_v11 = vld [vmem:[#allocation103_spill] sm:$0xff]  ;;  %v13102_v23 = vpop.permute.xlu1 %13101  ;;  %14869 = vrot.lane.b32.xlu0 %v14851_v14, %s16459_s24  ;;  %v24860_v58 = vld [vmem:[#allocation101_spill] sm:$0xff] }
 0x62f   : > { %24824 = vst [vmem:[#allocation77_spill] sm:$0xff] %v22754_v13  ;;  %24826 = vst [vmem:[#allocation61_spill] sm:$0xff] %v22760_v40  ;;  %v22785_v39 = vrot.slane %v24834_v19, %v24767_v38  ;;  %v13405_v29 = vadd.f32 %v13100_v47, %v24792_v3  ;;  %v15894_v61 = vcombine.high %v24840_v20, %v24839_v25  ;;  %v13534_v30 = vrot.slane %v24841_v11, 2 }
 0x630   : > { %24833 = vst [vmem:[#allocation83_spill] sm:$0xff] %v22779_v54  ;;  %v22793_v60 = vadd.f32 %v24838_v49, %v13404_v22  ;;  %v24842_v19 = vcombine.high %v24821_v26, %v24822_v45  ;;  %v24843_v22 = vrot.slane %v24836_v31, 2  ;;  %v24844_v47 = vrot.slane %v24793_v42, 2  ;;  %v13104_v56 = vpop.permute.xlu0 %13103  ;;  %v24845_v45 = vld [vmem:[#allocation34_spill] sm:$0xff]  ;;  %v24867_v54 = vld [vmem:[#allocation108_spill] sm:$0xff] }
 0x631   : > { %24835 = vst [vmem:[#allocation72_spill] sm:$0xff] %v22785_v39  ;;  %v13406_v14 = vadd.f32 %v13102_v23, %v24793_v42  ;;  %v15034_v26 = vrot.slane %v15890_v41, %v24767_v38  ;;  %v24851_v42 = vld [vmem:[#allocation87_spill] sm:$0xff]  ;;  %v13543_v44 = vrot.slane %v24863_v57, 2  ;;  %v13545_v40 = vrot.slane %v24867_v54, 2 }
 0x632   : > { %v14935_v15 = vrot.slane %v24842_v19, %v24767_v38  ;;  %v22808_v49 = vadd.f32 %v24843_v22, %v13397_v9  ;;  %v22814_v11 = vadd.f32 %v24844_v47, %v13405_v29  ;;  %v24846_v9 = vld [vmem:[#allocation40_spill] sm:$0xff]  ;;  %v24849_v29 = vcombine.low %v24840_v20, %v24839_v25  ;;  %v13106_v41 = vpop.permute.xlu1 %13105  ;;  %v24855_v25 = vld [vmem:[#allocation95_spill] sm:$0xff] }
 0x633   : > { %v24847_v31 = vcombine.low %v24845_v45, %v24846_v9  ;;  %v24852_v23 = vrot.slane %v24851_v42, 2  ;;  %v22839_v10 = vadd.f32 %v13534_v30, %v13406_v14  ;;  %v13535_v18 = vrot.slane %v24855_v25, 2 }
 0x634   : > { %v14943_v46 = vcombine.low %v14935_v15, %v14942_v59  ;;  %v22831_v22 = vrot.slane %v24849_v29, %v24767_v38  ;;  %v24853_v15 = vcombine.high %v24830_v16, %v24831_v62  ;;  %v13108_v20 = vpop.permute.xlu0 %13107  ;;  %v15126_v29 = vrot.slane %v15894_v61, %v24767_v38  ;;  %v24857_v61 = vld [vmem:[#allocation96_spill] sm:$0xff] }
 0x635   : > { %v22825_v19 = vrot.slane %v24847_v31, %v24767_v38  ;;  %v22835_v59 = vadd.f32 %v24852_v23, %v13398_v63  ;;  %v13536_v2 = vrot.slane %v24857_v61, 2  ;;  %v13538_v63 = vrot.slane %v24859_v21, 2 }
 0x636   : > { %24850 = vst [vmem:[#allocation63_spill] sm:$0xff] %v22831_v22  ;;  %14961 = vrot.lane.b32.xlu0 %v14943_v46, %s16459_s24  ;;  %v15027_v47 = vrot.slane %v24853_v15, %v24767_v38  ;;  %v13110_v30 = vpop.permute.xlu1 %13109  ;;  %v24854_v46 = vcombine.high %v24845_v45, %v24846_v9  ;;  %v13539_v45 = vrot.slane %v24860_v58, 2  ;;  %v24861_v9 = vld [vmem:[#allocation102_spill] sm:$0xff]  ;;  %v24866_v22 = vld [vmem:[#allocation113_spill] sm:$0xff] }
 0x637   : > { %24848 = vst [vmem:[#allocation60_spill] sm:$0xff] %v22825_v19  ;;  %v13544_v19 = vrot.slane %v24866_v22, 2  ;;  %v13410_v50 = vadd.f32 %v13110_v30, %v24858_v5  ;;  %v24874_v30 = vld [vmem:[#allocation38_spill] sm:$0xff] }
 0x638   : > { %v15035_v31 = vcombine.low %v15027_v47, %v15034_v26  ;;  %v15119_v14 = vrot.slane %v24854_v46, %v24767_v38  ;;  %v13112_v16 = vpop.permute.xlu0 %13111  ;;  %v24856_v26 = vld [vmem:[#allocation93_spill] sm:$0xff]  ;;  %v13540_v46 = vrot.slane %v24861_v9, 2 }
 0x639   : > { %v13407_v47 = vadd.f32 %v13104_v56, %v24856_v26  ;;  %v13409_v56 = vadd.f32 %v13108_v20, %v24857_v61  ;;  %v24865_v26 = vld [vmem:[#allocation100_spill] sm:$0xff]  ;;  %v24871_v61 = vld [vmem:[#allocation115_spill] sm:$0xff] }
 0x63a   : > { %15053 = vrot.lane.b32.xlu0 %v15035_v31, %s16459_s24  ;;  %v15127_v62 = vcombine.low %v15119_v14, %v15126_v29  ;;  %v13114_v42 = vpop.permute.xlu1 %13113  ;;  %v13537_v31 = vrot.slane %v24858_v5, 2  ;;  %v13408_v14 = vadd.f32 %v13106_v41, %v24855_v25  ;;  %v24868_v41 = vld [vmem:[#allocation112_spill] sm:$0xff]  ;;  %v13549_v24 = vrot.slane %v24871_v61, 2 }
 0x63b   : > { %v13791_v13 = vadd.f32 %v13535_v18, %v13407_v47  ;;  %v13546_v25 = vrot.slane %v24868_v41, 2  ;;  %v24872_v18 = vld [vmem:[#allocation18_spill] sm:$0xff]  ;;  %v13411_v5 = vadd.f32 %v13112_v16, %v24859_v21  ;;  %v13550_v47 = vrot.slane %v24874_v30, 2 }
 0x63c   : > { %v13116_v23 = vpop.permute.xlu0 %13115  ;;  %v13792_v8 = vadd.f32 %v13536_v2, %v13408_v14  ;;  %v24876_v21 = vcombine.low %v22711_v12, %v22715_v17 }
 0x63e   : > { %15145 = vrot.lane.b32.xlu0 %v15127_v62, %s16459_s24  ;;  %v13118_v15 = vpop.permute.xlu1 %13117  ;;  %v24862_v62 = vld [vmem:[#allocation107_spill] sm:$0xff] }
 0x63f   : > { %v13541_v3 = vrot.slane %v24862_v62, 2 }
 0x640   : > { %v13120_v29 = vpop.permute.xlu0 %13119 }
 0x641   : > { %v13415_v43 = vadd.f32 %v13120_v29, %v24864_v33  ;;  %v13547_v33 = vrot.slane %v24869_v36, 2  ;;  %v24870_v29 = vld [vmem:[#allocation118_spill] sm:$0xff] }
 0x642   : > { %v13122_v39 = vpop.permute.xlu1 %13121  ;;  %v13548_v20 = vrot.slane %v24870_v29, 2 }
 0x643   : > { %v13799_v37 = vadd.f32 %v13543_v44, %v13415_v43  ;;  %v13416_v28 = vadd.f32 %v13122_v39, %v24863_v57  ;;  %v24873_v43 = vcombine.low %v22643_v55, %v22663_v7  ;;  %v13793_v39 = vadd.f32 %v13537_v31, %v13409_v56 }
 0x644   : > { %v13124_v32 = vpop.permute.xlu0 %13123  ;;  %v22901_v7 = vrot.slane %v24876_v21, %v24872_v18 }
 0x645   : > { %v13884_v53 = vcombine.low %v13791_v13, %v13799_v37  ;;  %v13800_v35 = vadd.f32 %v13544_v19, %v13416_v28  ;;  %v13417_v27 = vadd.f32 %v13124_v32, %v24866_v22  ;;  %v22883_v44 = vrot.slane %v24873_v43, %v24872_v18  ;;  %v23046_v22 = vld [vmem:[#allocation9] sm:$0xff] }
 0x646   : > { %v13126_v57 = vpop.permute.xlu1 %13125  ;;  %v24875_v32 = vcombine.low %v22678_v34, %v22688_v48  ;;  %v13794_v13 = vadd.f32 %v13538_v63, %v13410_v50  ;;  %v13795_v48 = vadd.f32 %v13539_v45, %v13411_v5  ;;  %24922 = vst [vmem:[#allocation36_spill] sm:$0xff] %v23046_v22 }
 0x647   : > { %v22888_v6 = vrot.slane %v13884_v53, %v24872_v18  ;;  %v13956_v2 = vcombine.low %v13792_v8, %v13800_v35  ;;  %v13801_v37 = vadd.f32 %v13545_v40, %v13417_v27  ;;  %v13418_v28 = vadd.f32 %v13126_v57, %v24867_v54 }
 0x648   : > { %v22895_v55 = vrot.slane %v24875_v32, %v24872_v18  ;;  %v13412_v53 = vadd.f32 %v13114_v42, %v24860_v58  ;;  %v13128_v19 = vpop.permute.xlu0 %13127  ;;  %v13413_v40 = vadd.f32 %v13116_v23, %v24861_v9  ;;  %v13414_v42 = vadd.f32 %v13118_v15, %v24862_v62 }
 0x649   : > { %v22909_v8 = vrot.slane %v13956_v2, %v24872_v18  ;;  %v14028_v34 = vcombine.low %v13793_v39, %v13801_v37  ;;  %v13802_v12 = vadd.f32 %v13546_v25, %v13418_v28  ;;  %v13419_v17 = vadd.f32 %v13128_v19, %v24868_v41  ;;  %v24904_v28 = vld [vmem:[#allocation22_spill] sm:$0xff] }
 0x64a   : > { %v13130_v50 = vpop.permute.xlu1 %13129  ;;  %v13796_v16 = vadd.f32 %v13540_v46, %v13412_v53  ;;  %v24877_v25 = vcombine.low %v22736_v1, %v22740_v0  ;;  %v24879_v15 = vcombine.low %v22745_v51, %v22766_v4  ;;  %v24882_v1 = vcombine.low %v22771_v52, %v22793_v60  ;;  %v24905_v51 = vld [vmem:[#allocation105_spill] sm:$0xff] }
 0x64b   : > { %v22918_v58 = vrot.slane %v14028_v34, %v24872_v18  ;;  %v13420_v63 = vadd.f32 %v13130_v50, %v24869_v36  ;;  %v14100_v31 = vcombine.low %v13794_v13, %v13802_v12  ;;  %v13803_v23 = vadd.f32 %v13547_v33, %v13419_v17  ;;  %v24902_v17 = vld [vmem:[#allocation124_spill] sm:$0xff]  ;;  %v24903_v34 = vld [vmem:[#allocation129_spill] sm:$0xff]  ;;  %v24906_v50 = vld [vmem:[#allocation126_spill] sm:$0xff] }
 0x64c   : > { %v13132_v45 = vpop.permute.xlu0 %13131  ;;  %v22931_v36 = vrot.slane %v24877_v25, %v24872_v18  ;;  %v22937_v46 = vrot.slane %v24879_v15, %v24872_v18  ;;  %v22947_v0 = vrot.slane %v24882_v1, %v24872_v18  ;;  %v24887_v2 = vcombine.low %v22808_v49, %v22814_v11  ;;  %v24893_v25 = vld [vmem:[#allocation119_spill] sm:$0xff]  ;;  %v24897_v1 = vld [vmem:[#allocation122_spill] sm:$0xff] }
 0x64d   : > { %v13804_v56 = vadd.f32 %v13548_v20, %v13420_v63  ;;  %v13421_v41 = vadd.f32 %v13132_v45, %v24870_v29  ;;  %v22940_v62 = vrot.slane %v14100_v31, %v24872_v18  ;;  %v14172_v33 = vcombine.low %v13795_v48, %v13803_v23  ;;  %v24928_v48 = vld [vmem:[#allocation59_spill] sm:$0xff] }
 0x64e   : > { %24878 = vst [vmem:[#allocation75_spill] sm:$0xff] %v22931_v36  ;;  %24880 = vst [vmem:[#allocation48_spill] sm:$0xff] %v22937_v46  ;;  %v13134_v43 = vpop.permute.xlu1 %13133  ;;  %v13797_v20 = vadd.f32 %v13541_v3, %v13413_v40  ;;  %v22967_v37 = vrot.slane %v24887_v2, %v24872_v18  ;;  %v24890_v53 = vcombine.low %v22835_v59, %v22839_v10  ;;  %v24900_v2 = vld [vmem:[#allocation123_spill] sm:$0xff]  ;;  %v13561_v9 = vrot.slane %v24904_v28, 2  ;;  %v24930_v36 = vld [vmem:[#allocation66_spill] sm:$0xff] }
 0x64f   : > { %24881 = vst [vmem:[#allocation27_spill] sm:$0xff] %v22940_v62  ;;  %v14244_v39 = vcombine.low %v13796_v16, %v13804_v56  ;;  %v13805_v29 = vadd.f32 %v13549_v24, %v13421_v41  ;;  %v13422_v5 = vadd.f32 %v13134_v43, %v24871_v61  ;;  %24883 = vst [vmem:[#allocation79_spill] sm:$0xff] %v22947_v0  ;;  %v24885_v24 = vrot.slane %v24865_v26, 2 }
 0x650   : > { %v22954_v57 = vrot.slane %v14172_v33, %v24872_v18  ;;  %v22956_v3 = vpop.permute.xlu0 %13135  ;;  %24888 = vst [vmem:[#allocation80_spill] sm:$0xff] %v22967_v37  ;;  %v22988_v19 = vrot.slane %v24890_v53, %v24872_v18  ;;  %v24894_v33 = vld [vmem:[#allocation116_spill] sm:$0xff]  ;;  %v13560_v26 = vrot.slane %v24903_v34, 2  ;;  %v13562_v54 = vrot.slane %v24905_v51, 2  ;;  %v24925_v37 = vld [vmem:[#allocation55_spill] sm:$0xff] }
 0x651   : > { %v13798_v61 = vadd.f32 %v24885_v24, %v13414_v42  ;;  %v22961_v30 = vrot.slane %v14244_v39, %v24872_v18  ;;  %v14316_v52 = vcombine.low %v13797_v20, %v13805_v29  ;;  %v13806_v60 = vadd.f32 %v13550_v47, %v13422_v5  ;;  %v24895_v20 = vld [vmem:[#allocation120_spill] sm:$0xff]  ;;  %v24896_v29 = vld [vmem:[#allocation19_spill] sm:$0xff]  ;;  %v24908_v24 = vld [vmem:[#allocation25_spill] sm:$0xff] }
 0x652   : > { %24884 = vst [vmem:[#allocation78_spill] sm:$0xff] %v22954_v57  ;;  %v22973_v21 = vpop.permute.xlu1 %13137  ;;  %24891 = vst [vmem:[#allocation84_spill] sm:$0xff] %v22988_v19  ;;  %v13559_v47 = vrot.slane %v24902_v17, 2  ;;  %v13564_v5 = vrot.slane %v24908_v24, 2  ;;  %v24926_v39 = vld [vmem:[#allocation110_spill] sm:$0xff] }
 0x653   : > { %24886 = vst [vmem:[#allocation81_spill] sm:$0xff] %v22961_v30  ;;  %v22980_v13 = vrot.slane %v14316_v52, %v24872_v18  ;;  %v14388_v49 = vcombine.low %v13798_v61, %v13806_v60  ;;  %v24899_v52 = vld [vmem:[#allocation121_spill] sm:$0xff] }
 0x654   : > { %v22982_v11 = vpop.permute.xlu0 %13139 }
 0x655   : > { %24889 = vst [vmem:[#allocation17_spill] sm:$0xff] %v22980_v13  ;;  %v22995_v40 = vrot.slane %v14388_v49, %v24872_v18  ;;  %v24918_v18 = vld [vmem:[#allocation16_spill] sm:$0xff] }
 0x656   : > { %v22997_v12 = vpop.permute.xlu1 %13141  ;;  %v15171_v53 = vsub.s32 0, %v24918_v18  ;;  %v15175_v60 = vsub.s32 1, %v24918_v18  ;;  %v15183_v49 = vsub.s32 3, %v24918_v18  ;;  %v15179_v30 = vsub.s32 2, %v24918_v18  ;;  %v24923_v13 = vld [vmem:[#allocation52_spill] sm:$0xff] }
 0x657   : > { %24892 = vst [vmem:[#allocation127_spill] sm:$0xff] %v22995_v40  ;;  %v15187_v32 = vsub.s32 4, %v24918_v18  ;;  %v24924_v40 = vld [vmem:[#allocation54_spill] sm:$0xff] }
 0x658   : > { %v23003_v59 = vpop.permute.xlu0 %13143  ;;  %v23062_v19 = vrot.slane %v23046_v22, %v15171_v53  ;;  %v23065_v0 = vrot.slane %v23046_v22, %v15175_v60  ;;  %v23068_v57 = vrot.slane %v23046_v22, %v15183_v49  ;;  %v23075_v62 = vrot.slane %v23046_v22, %v15179_v30 }
 0x659   : > { %v13424_v60 = vadd.f32 %v22973_v21, %v24893_v25  ;;  %v13426_v21 = vadd.f32 %v22997_v12, %v24895_v20  ;;  %v24936_v12 = vcombine.high %v22895_v55, %v22909_v8 }
 0x65a   : > { %v23005_v10 = vpop.permute.xlu1 %13145 }
 0x65c   : > { %v23007_v63 = vpop.permute.xlu0 %13147 }
 0x65e   : > { %v23009_v16 = vpop.permute.xlu1 %13149 }
 0x660   : > { %v13152_v42 = vpop.permute.xlu0 %13151 }
 0x662   : > { %v13154_v31 = vpop.permute.xlu1 %13153 }
 0x663   : > { %v13432_v35 = vadd.f32 %v13154_v31, %v24902_v17  ;;  %v23112_v17 = vrot.slane %v24936_v12, %v24767_v38 }
 0x664   : > { %v13156_v23 = vpop.permute.xlu0 %13155 }
 0x665   : > { %v13433_v43 = vadd.f32 %v13156_v23, %v24903_v34  ;;  %v13425_v34 = vadd.f32 %v22982_v11, %v24894_v33 }
 0x666   : > { %v13158_v45 = vpop.permute.xlu1 %13157 }
 0x667   : > { %v13434_v49 = vadd.f32 %v13158_v45, %v24904_v28  ;;  %v13427_v28 = vadd.f32 %v23003_v59, %v24896_v29 }
 0x668   : > { %v13160_v56 = vpop.permute.xlu0 %13159 }
 0x669   : > { %v13435_v31 = vadd.f32 %v13160_v56, %v24905_v51  ;;  %v24935_v51 = vcombine.low %v22883_v44, %v22888_v6  ;;  %v13428_v56 = vadd.f32 %v23005_v10, %v24897_v1  ;;  %v24939_v10 = vcombine.high %v22901_v7, %v22918_v58 }
 0x66a   : > { %v13162_v41 = vpop.permute.xlu1 %13161 }
 0x66b   : > { %v13436_v30 = vadd.f32 %v13162_v41, %v24906_v50  ;;  %v23104_v11 = vrot.slane %v24935_v51, %v24767_v38  ;;  %v13816_v41 = vadd.f32 %v13560_v26, %v13432_v35  ;;  %v23122_v35 = vrot.slane %v24939_v10, %v24767_v38 }
 0x66c   : > { %v23016_v61 = vpop.permute.xlu0 %13163  ;;  %v24941_v51 = vrot.slane %v24906_v50, 2 }
 0x66d   : > { %24898 = vst [vmem:[#allocation28_spill] sm:$0xff] %v23016_v61  ;;  %v24931_v61 = vld [vmem:[#allocation21_spill] sm:$0xff] }
 0x66e   : > { %v23026_v4 = vpop.permute.xlu1 %13165  ;;  %v13431_v24 = vadd.f32 %v13152_v42, %v24931_v61  ;;  %v23078_v42 = vrot.slane %v23046_v22, %v15187_v32  ;;  %v24933_v61 = vld [vmem:[#allocation117_spill] sm:$0xff]  ;;  %v24934_v32 = vcombine.high %v22883_v44, %v22888_v6  ;;  %v13818_v44 = vadd.f32 %v13562_v54, %v13434_v49 }
 0x66f   : > { %24907 = vst [vmem:[#allocation86_spill] sm:$0xff] %v23026_v4  ;;  %v24929_v4 = vld [vmem:[#allocation58_spill] sm:$0xff]  ;;  %v13423_v53 = vadd.f32 %v22956_v3, %v24933_v61  ;;  %v13817_v61 = vadd.f32 %v13561_v9, %v13433_v43  ;;  %v24940_v9 = vrot.slane %v24895_v20, 2  ;;  %v13429_v43 = vadd.f32 %v23007_v63, %v24899_v52  ;;  %v24963_v22 = vld [vmem:[#allocation49_spill] sm:$0xff] }
 0x670   : > { %v23032_v15 = vpop.permute.xlu0 %13167  ;;  %24932 = vst [vmem:[#allocation88_spill] sm:$0xff] %v23078_v42  ;;  %v23094_v3 = vrot.slane %v24934_v32, %v24767_v38  ;;  %v13815_v45 = vadd.f32 %v13559_v47, %v13431_v24  ;;  %v24937_v47 = vrot.slane %v24893_v25, 2  ;;  %v24938_v24 = vrot.slane %v24894_v33, 2 }
 0x671   : > { %24912 = vst [vmem:[#allocation128_spill] sm:$0xff] %v23032_v15  ;;  %v13809_v26 = vadd.f32 %v24940_v9, %v13425_v34  ;;  %v13819_v25 = vadd.f32 %v24941_v51, %v13435_v31  ;;  %v24942_v33 = vrot.slane %v24896_v29, 2  ;;  %v24944_v20 = vrot.slane %v24899_v52, 2  ;;  %v24945_v9 = vld [vmem:[#allocation25_spill] sm:$0xff]  ;;  %v24947_v51 = vld [vmem:[#allocation24_spill] sm:$0xff]  ;;  %v24953_v52 = vld [vmem:[#allocation78_spill] sm:$0xff] }
 0x672   : > { %v23042_v14 = vpop.permute.xlu1 %13169  ;;  %v13807_v59 = vadd.f32 %v24937_v47, %v13423_v53  ;;  %v13808_v6 = vadd.f32 %v24938_v24, %v13424_v60  ;;  %v13820_v53 = vadd.f32 %v13564_v5, %v13436_v30  ;;  %v24943_v60 = vrot.slane %v24897_v1, 2  ;;  %v24949_v1 = vld [vmem:[#allocation75_spill] sm:$0xff] }
 0x673   : > { %24919 = vst [vmem:[#allocation26_spill] sm:$0xff] %v23042_v14  ;;  %v24927_v14 = vld [vmem:[#allocation56_spill] sm:$0xff]  ;;  %v13810_v54 = vadd.f32 %v24942_v33, %v13426_v21  ;;  %v13430_v47 = vadd.f32 %v23009_v16, %v24900_v2  ;;  %v13812_v34 = vadd.f32 %v24944_v20, %v13428_v56  ;;  %v14037_v63 = vcombine.low %v13809_v26, %v13817_v61 }
 0x674   : > { %v23054_v46 = vpop.permute.xlu0 %13171  ;;  %v13811_v49 = vadd.f32 %v24943_v60, %v13427_v28  ;;  %v13893_v24 = vcombine.low %v13807_v59, %v13815_v45  ;;  %v13965_v10 = vcombine.low %v13808_v6, %v13816_v41  ;;  %v24946_v50 = vld [vmem:[#allocation28_spill] sm:$0xff]  ;;  %v24948_v29 = vmov %v23032_v15  ;;  %v24950_v28 = vld [vmem:[#allocation27_spill] sm:$0xff]  ;;  %v24961_v15 = vld [vmem:[#allocation30_spill] sm:$0xff] }
 0x675   : > { %v13437_v31 = vadd.f32 %v24946_v50, %v24945_v9  ;;  %v14109_v30 = vcombine.low %v13810_v54, %v13818_v44  ;;  %v13439_v21 = vadd.f32 %v24948_v29, %v24947_v51  ;;  %v24951_v33 = vcombine.high %v24949_v1, %v24950_v28  ;;  %v24952_v16 = vld [vmem:[#allocation48_spill] sm:$0xff]  ;;  %v24956_v44 = vld [vmem:[#allocation29_spill] sm:$0xff]  ;;  %v24960_v29 = vld [vmem:[#allocation18_spill] sm:$0xff] }
 0x676   : > { %v23072_v27 = vpop.permute.xlu1 %13173  ;;  %v24954_v45 = vcombine.high %v24952_v16, %v24953_v52  ;;  %v24955_v41 = vrot.slane %v24900_v2, 2  ;;  %v14181_v59 = vcombine.low %v13811_v49, %v13819_v25  ;;  %v14253_v6 = vcombine.low %v13812_v34, %v13820_v53  ;;  %v24957_v26 = vld [vmem:[#allocation86_spill] sm:$0xff]  ;;  %v24958_v9 = vld [vmem:[#allocation125_spill] sm:$0xff] }
 0x677   : > { %v23146_v60 = vrot.slane %v24951_v33, %v24767_v38  ;;  %v13438_v54 = vadd.f32 %v24957_v26, %v24956_v44  ;;  %v24959_v50 = vrot.slane %v24958_v9, 2  ;;  %v23165_v33 = vrot.slane %v13893_v24, %v24960_v29 }
 0x678   : > { %v13176_v23 = vpop.permute.xlu0 %13175  ;;  %v23152_v56 = vrot.slane %v24954_v45, %v24767_v38  ;;  %v23156_v61 = vadd.f32 %v24955_v41, %v13429_v43  ;;  %v23171_v43 = vrot.slane %v13965_v10, %v24960_v29  ;;  %v23174_v25 = vrot.slane %v14037_v63, %v24960_v29 }
 0x679   : > { %v23162_v51 = vadd.f32 %v24959_v50, %v13430_v47  ;;  %v24964_v53 = vrot.slane %v24956_v44, 2  ;;  %v24965_v47 = vld [vmem:[#allocation33_spill] sm:$0xff]  ;;  %v23183_v41 = vrot.slane %v14109_v30, %v24960_v29  ;;  %v24966_v26 = vrot.slane %v24961_v15, 2  ;;  %v24968_v44 = vld [vmem:[#allocation44_spill] sm:$0xff] }
 0x67a   : > { %v13178_v32 = vpop.permute.xlu1 %13177  ;;  %v24962_v45 = vld [vmem:[#allocation26_spill] sm:$0xff]  ;;  %v13441_v34 = vadd.f32 %v23054_v46, %v24965_v47  ;;  %v24967_v10 = vrot.slane %v24923_v13, 2  ;;  %v23191_v9 = vrot.slane %v14181_v59, %v24960_v29  ;;  %v24969_v46 = vrot.slane %v24968_v44, 2  ;;  %v24970_v30 = vld [vmem:[#allocation41_spill] sm:$0xff] }
 0x67b   : > { %v13440_v42 = vadd.f32 %v24962_v45, %v24961_v15  ;;  %v23178_v49 = vadd.f32 %v24964_v53, %v13437_v31  ;;  %v23194_v31 = vrot.slane %v14253_v6, %v24960_v29  ;;  %v13442_v45 = vadd.f32 %v23072_v27, %v24970_v30 }
 0x67c   : > { %v13180_v12 = vpop.permute.xlu0 %13179  ;;  %v23198_v50 = vadd.f32 %v24969_v46, %v13438_v54  ;;  %v24975_v46 = vld [vmem:[#allocation35_spill] sm:$0xff] }
 0x67d   : > { %v14325_v6 = vcombine.low %v23156_v61, %v23178_v49  ;;  %v13444_v27 = vadd.f32 %v13178_v32, %v24975_v46 }
 0x67e   : > { %v13182_v5 = vpop.permute.xlu1 %13181 }
 0x680   : > { %v13184_v20 = vpop.permute.xlu0 %13183 }
 0x681   : > { %v13447_v2 = vadd.f32 %v13184_v20, %v24963_v22  ;;  %v13823_v22 = vadd.f32 %v24966_v26, %v13439_v21  ;;  %v24971_v21 = vrot.slane %v24965_v47, 2  ;;  %v24973_v26 = vrot.slane %v24970_v30, 2 }
 0x682   : > { %v13186_v24 = vpop.permute.xlu1 %13185 }
 0x683   : > { %v13831_v20 = vadd.f32 %v24967_v10, %v13447_v2  ;;  %v13448_v63 = vadd.f32 %v13186_v24, %v24923_v13  ;;  %v13824_v53 = vadd.f32 %v24971_v21, %v13440_v42  ;;  %v24972_v13 = vrot.slane %v24924_v40, 2  ;;  %v24974_v10 = vld [vmem:[#allocation42_spill] sm:$0xff] }
 0x684   : > { %v13188_v15 = vpop.permute.xlu0 %13187  ;;  %v13825_v54 = vadd.f32 %v24973_v26, %v13441_v34  ;;  %v13443_v44 = vadd.f32 %v13176_v23, %v24974_v10  ;;  %v24977_v61 = vrot.slane %v24974_v10, 2  ;;  %v24978_v34 = vld [vmem:[#allocation98_spill] sm:$0xff]  ;;  %v24979_v23 = vld [vmem:[#allocation51_spill] sm:$0xff] }
 0x685   : > { %v13902_v2 = vcombine.low %v13823_v22, %v13831_v20  ;;  %v13832_v24 = vadd.f32 %v24972_v13, %v13448_v63  ;;  %v13449_v59 = vadd.f32 %v13188_v15, %v24924_v40  ;;  %v24976_v22 = vrot.slane %v24925_v37, 2 }
 0x686   : > { %v13190_v18 = vpop.permute.xlu1 %13189  ;;  %v14397_v40 = vcombine.low %v23162_v51, %v23198_v50  ;;  %v13826_v49 = vadd.f32 %v24977_v61, %v13442_v45  ;;  %v13445_v30 = vadd.f32 %v13180_v12, %v24978_v34  ;;  %v13446_v15 = vadd.f32 %v13182_v5, %v24979_v23 }
 0x687   : > { %v13909_v47 = vrot.slane %v13902_v2, %v24960_v29  ;;  %v13974_v42 = vcombine.low %v13824_v53, %v13832_v24  ;;  %v13833_v20 = vadd.f32 %v24976_v22, %v13449_v59  ;;  %v13450_v63 = vadd.f32 %v13190_v18, %v24925_v37  ;;  %v24985_v22 = vld [vmem:[#allocation43_spill] sm:$0xff] }
 0x688   : > { %v13192_v32 = vpop.permute.xlu0 %13191  ;;  %v24980_v18 = vrot.slane %v24975_v46, 2  ;;  %v24981_v51 = vrot.slane %v24978_v34, 2  ;;  %v24982_v45 = vrot.slane %v24926_v39, 2  ;;  %v24983_v10 = vrot.slane %v24979_v23, 2 }
 0x689   : > { %v14441_v21 = vcombine.low %v23165_v33, %v13909_v47  ;;  %v15868_v53 = vcombine.high %v23165_v33, %v13909_v47  ;;  %v23226_v2 = vrot.slane %v13974_v42, %v24960_v29  ;;  %v14046_v13 = vcombine.low %v13825_v54, %v13833_v20 }
 0x68a   : > { %v13827_v37 = vadd.f32 %v24980_v18, %v13443_v44  ;;  %v13828_v50 = vadd.f32 %v24981_v51, %v13444_v27  ;;  %v13834_v12 = vadd.f32 %v24982_v45, %v13450_v63  ;;  %v13451_v5 = vadd.f32 %v13192_v32, %v24926_v39  ;;  %v13194_v24 = vpop.permute.xlu1 %13193 }
 0x68b   : > { %v14533_v59 = vcombine.low %v23171_v43, %v23226_v2  ;;  %v15872_v33 = vcombine.high %v23171_v43, %v23226_v2  ;;  %v23240_v26 = vrot.slane %v14046_v13, %v24960_v29  ;;  %v13452_v54 = vadd.f32 %v13194_v24, %v24927_v14  ;;  %v24990_v24 = vld [vmem:[#allocation67_spill] sm:$0xff] }
 0x68c   : > { %v13829_v44 = vadd.f32 %v24983_v10, %v13445_v30  ;;  %v14118_v46 = vcombine.low %v13826_v49, %v13834_v12  ;;  %v24984_v27 = vrot.slane %v24927_v14, 2  ;;  %v13196_v39 = vpop.permute.xlu0 %13195  ;;  %v14499_v42 = vrot.slane %v15868_v53, %v24767_v38 }
 0x68d   : > { %v24986_v20 = vrot.slane %v24985_v22, 2  ;;  %v14625_v43 = vcombine.low %v23174_v25, %v23240_v26  ;;  %v24987_v61 = vrot.slane %v24928_v48, 2  ;;  %v13453_v32 = vadd.f32 %v13196_v39, %v24928_v48 }
 0x68e   : > { %v13835_v47 = vadd.f32 %v24984_v27, %v13451_v5  ;;  %v14125_v30 = vrot.slane %v14118_v46, %v24960_v29  ;;  %v13198_v23 = vpop.permute.xlu1 %13197  ;;  %v14500_v14 = vcombine.low %v23094_v3, %v14499_v42  ;;  %v14591_v2 = vrot.slane %v15872_v33, %v24767_v38  ;;  %v24991_v33 = vld [vmem:[#allocation53_spill] sm:$0xff] }
 0x68f   : > { %v13830_v63 = vadd.f32 %v24986_v20, %v13446_v15  ;;  %v13836_v34 = vadd.f32 %v24987_v61, %v13452_v54  ;;  %v24988_v13 = vrot.slane %v24929_v4, 2  ;;  %v13454_v18 = vadd.f32 %v13198_v23, %v24929_v4  ;;  %v16255_v20 = vld [vmem:[%s16637_s8] sm:$0xff] }
 0x690   : > { %v14190_v49 = vcombine.low %v13827_v37, %v13835_v47  ;;  %v23262_v51 = vrot.slane %v14441_v21, %v24767_v38  ;;  %v15876_v48 = vcombine.high %v23174_v25, %v23240_v26  ;;  %v14717_v45 = vcombine.low %v23183_v41, %v14125_v30  ;;  %14503 = vrot.lane.b32.xlu1 %v14500_v14, %s16459_s24  ;;  %v24996_v14 = vld [vmem:[#allocation70_spill] sm:$0xff] }
 0x691   : > { %v14262_v53 = vcombine.low %v13828_v50, %v13836_v34  ;;  %v13837_v15 = vadd.f32 %v24988_v13, %v13453_v32  ;;  %v15880_v37 = vcombine.high %v23183_v41, %v14125_v30  ;;  %v14502_v50 = vpop.permute.xlu0 %14501  ;;  %v24989_v21 = vrot.slane %v24930_v36, 2  ;;  %v24994_v32 = vld [vmem:[#allocation127_spill] sm:$0xff] }
 0x692   : > { %v14197_v3 = vrot.slane %v14190_v49, %v24960_v29  ;;  %v24992_v54 = vcombine.low %v24990_v24, %v24991_v33  ;;  %v14592_v27 = vcombine.low %v23112_v17, %v14591_v2  ;;  %v23284_v39 = vrot.slane %v14325_v6, %v24960_v29  ;;  %v24993_v6 = vld [vmem:[#allocation84_spill] sm:$0xff]  ;;  %v24997_v2 = vld [vmem:[#allocation57_spill] sm:$0xff] }
 0x693   : > { %v23271_v12 = vrot.slane %v14262_v53, %v24960_v29  ;;  %v14334_v4 = vcombine.low %v13829_v44, %v13837_v15  ;;  %v13838_v5 = vadd.f32 %v24989_v21, %v13454_v18  ;;  %v14775_v47 = vrot.slane %v15880_v37, %v24767_v38  ;;  %v25001_v24 = vld [vmem:[#allocation73_spill] sm:$0xff] }
 0x694   : > { %v15151_v10 = vsel %vm1890_vm9, %v24992_v54, %v14502_v50  ;;  %v14809_v41 = vcombine.low %v23191_v9, %v14197_v3  ;;  %v23292_v22 = vrot.slane %v14397_v40, %v24960_v29  ;;  %14595 = vrot.lane.b32.xlu1 %v14592_v27, %s16459_s24  ;;  %v14683_v34 = vrot.slane %v15876_v48, %v24767_v38 }
 0x695   : > { %v15209_v46 = vadd.f32 %v23062_v19, %v15151_v10  ;;  %v14901_v36 = vcombine.low %v23194_v31, %v23271_v12  ;;  %v23289_v44 = vrot.slane %v14334_v4, %v24960_v29  ;;  %v14406_v42 = vcombine.low %v13830_v63, %v13838_v5  ;;  %v14594_v17 = vpop.permute.xlu0 %14593 }
 0x696   : > { %v24995_v30 = vcombine.high %v24993_v6, %v24994_v32  ;;  %v15884_v23 = vcombine.high %v23191_v9, %v14197_v3  ;;  %v24998_v53 = vcombine.low %v24996_v14, %v24997_v2  ;;  %v14776_v18 = vcombine.low %v23146_v60, %v14775_v47  ;;  %v16256_v60 = vld [vmem:[%s16637_s8 + $0x8] sm:$0xff]  ;;  %v25013_v14 = vld [vmem:[#allocation17_spill] sm:$0xff] }
 0x697   : > { %v15225_v61 = vadd.f32 %v16255_v20, %v15209_v46  ;;  %v14993_v40 = vcombine.low %v23284_v39, %v23289_v44  ;;  %v14413_v63 = vrot.slane %v14406_v42, %v24960_v29  ;;  %v14456_v9 = vcombine.low %v23104_v11, %v23262_v51 }
 0x698   : > { %v23301_v49 = vrot.slane %v24995_v30, %v24767_v38  ;;  %v15153_v13 = vsel %vm1890_vm9, %v24998_v53, %v14594_v17  ;;  %v24999_v29 = vcombine.low %v22895_v55, %v22909_v8  ;;  %v15888_v37 = vcombine.high %v23194_v31, %v23271_v12  ;;  %14779 = vrot.lane.b32.xlu1 %v14776_v18, %s16459_s24 }
 0x699   : > { %15241 = vst [vmem:[%s23313_s15] sm:$0xff] %v15225_v61  ;;  %v15210_v15 = vadd.f32 %v23065_v0, %v15153_v13  ;;  %v15085_v3 = vcombine.low %v23292_v22, %v14413_v63  ;;  %v15896_v50 = vcombine.high %v23292_v22, %v14413_v63  ;;  %v23331_v4 = vrot.slane %v14533_v59, %v24767_v38  ;;  %v14778_v5 = vpop.permute.xlu0 %14777  ;;  %v25002_v59 = vld [vmem:[#allocation68_spill] sm:$0xff]  ;;  %v16257_v61 = vld [vmem:[%s16637_s8 + $0x18] sm:$0xff] }
 0x69a   : > { %v23324_v48 = vrot.slane %v24999_v29, %v24767_v38  ;;  %v14684_v55 = vcombine.low %v23122_v35, %v14683_v34  ;;  %v25000_v8 = vcombine.low %v24949_v1, %v24950_v28  ;;  %v23343_v12 = vrot.slane %v14717_v45, %v24767_v38  ;;  %v25012_v63 = vld [vmem:[#allocation80_spill] sm:$0xff] }
 0x69b   : > { %v15226_v21 = vadd.f32 %v16256_v60, %v15210_v15  ;;  %v25003_v33 = vcombine.low %v25001_v24, %v25002_v59  ;;  %v14867_v10 = vrot.slane %v15884_v23, %v24767_v38  ;;  %v23351_v46 = vrot.slane %v15896_v50, %v24767_v38  ;;  %v16258_v60 = vld [vmem:[%s16637_s8 + $0x10] sm:$0xff]  ;;  %v25017_v24 = vld [vmem:[#allocation114_spill] sm:$0xff]  ;;  %v25018_v59 = vld [vmem:[#allocation76_spill] sm:$0xff] }
 0x69c   : > { %v23340_v31 = vrot.slane %v25000_v8, %v24767_v38  ;;  %v14548_v35 = vcombine.low %v23324_v48, %v23331_v4  ;;  %v25004_v45 = vcombine.low %v22901_v7, %v22918_v58  ;;  %v23369_v47 = vrot.slane %v14625_v43, %v24767_v38  ;;  %14687 = vrot.lane.b32.xlu1 %v14684_v55, %s16459_s24  ;;  %v16265_v48 = vld [vmem:[%s16637_s8 + $0x58] sm:$0xff] }
 0x69d   : > { %v15157_v54 = vsel %vm1890_vm9, %v25003_v33, %v14778_v5  ;;  %15242 = vst [vmem:[%s23313_s15 + $0x8] sm:$0xff] %v15226_v21  ;;  %v15892_v42 = vcombine.high %v23284_v39, %v23289_v44  ;;  %v15144_v22 = vcombine.low %v23301_v49, %v23351_v46  ;;  %v25005_v20 = vcombine.low %v24952_v16, %v24953_v52  ;;  %v14686_v26 = vpop.permute.xlu0 %14685  ;;  %v25006_v39 = vld [vmem:[#allocation79_spill] sm:$0xff]  ;;  %v25007_v44 = vld [vmem:[#allocation81_spill] sm:$0xff] }
 0x69e   : > { %v15212_v1 = vadd.f32 %v23068_v57, %v15157_v54  ;;  %v14732_v28 = vcombine.low %v23340_v31, %v23343_v12  ;;  %v23363_v27 = vrot.slane %v25004_v45, %v24767_v38  ;;  %v23382_v58 = vrot.slane %v14809_v41, %v24767_v38  ;;  %v25009_v52 = vld [vmem:[#allocation71_spill] sm:$0xff]  ;;  %v25010_v41 = vld [vmem:[#allocation20_spill] sm:$0xff]  ;;  %v16266_v31 = vld [vmem:[%s16637_s8 + $0x50] sm:$0xff] }
 0x69f   : > { %v23379_v7 = vrot.slane %v25005_v20, %v24767_v38  ;;  %v25008_v17 = vcombine.low %v25006_v39, %v25007_v44  ;;  %v23395_v16 = vrot.slane %v14901_v36, %v24767_v38  ;;  %v25011_v30 = vcombine.low %v25009_v52, %v25010_v41  ;;  %v25025_v41 = vld [vmem:[#allocation77_spill] sm:$0xff] }
 0x6a0   : > { %v15228_v25 = vadd.f32 %v16257_v61, %v15212_v1  ;;  %v14640_v43 = vcombine.low %v23363_v27, %v23369_v47  ;;  %v25014_v2 = vcombine.low %v25012_v63, %v25013_v14  ;;  %v23410_v13 = vrot.slane %v14993_v40, %v24767_v38  ;;  %v25022_v1 = vld [vmem:[#allocation36_spill] sm:$0xff]  ;;  %v16267_v27 = vld [vmem:[%s16637_s8 + $0x60] sm:$0xff] }
 0x6a1   : > { %v23392_v34 = vrot.slane %v25008_v17, %v24767_v38  ;;  %v15155_v49 = vsel %vm1890_vm9, %v25011_v30, %v14686_v26  ;;  %v14824_v23 = vcombine.low %v23379_v7, %v23382_v58  ;;  %v14868_v15 = vcombine.low %v23152_v56, %v14867_v10  ;;  %v14870_v40 = vpop.permute.xlu0 %14869  ;;  %v25020_v10 = vld [vmem:[#allocation16_spill] sm:$0xff]  ;;  %v16259_v26 = vld [vmem:[%s16637_s8 + $0x20] sm:$0xff]  ;;  %v25026_v30 = vld [vmem:[#allocation61_spill] sm:$0xff] }
 0x6a2   : > { %v23407_v53 = vrot.slane %v25014_v2, %v24767_v38  ;;  %15244 = vst [vmem:[%s23313_s15 + $0x18] sm:$0xff] %v15228_v25  ;;  %v15211_v36 = vadd.f32 %v23075_v62, %v15155_v49  ;;  %v14959_v18 = vrot.slane %v15888_v37, %v24767_v38  ;;  %v25015_v5 = vcombine.high %v25006_v39, %v25007_v44  ;;  %v16268_v58 = vld [vmem:[%s16637_s8 + $0x68] sm:$0xff] }
 0x6a3   : > { %v14916_v29 = vcombine.low %v23392_v34, %v23395_v16  ;;  %14871 = vrot.lane.b32.xlu1 %v14868_v15, %s16459_s24  ;;  %v25016_v56 = vcombine.low %v24993_v6, %v24994_v32  ;;  %v23433_v8 = vrot.slane %v15085_v3, %v24767_v38  ;;  %v25019_v33 = vcombine.low %v25017_v24, %v25018_v59  ;;  %v25023_v6 = vld [vmem:[#allocation88_spill] sm:$0xff]  ;;  %v16261_v24 = vld [vmem:[%s16637_s8 + $0x30] sm:$0xff] }
 0x6a4   : > { %v15008_v50 = vcombine.low %v23407_v53, %v23410_v13  ;;  %v15227_v21 = vadd.f32 %v16258_v60, %v15211_v36  ;;  %v14952_v55 = vrot.slane %v25015_v5, %v24767_v38  ;;  %v25021_v46 = vsub.s32 5, %v25020_v10  ;;  %v16260_v60 = vld [vmem:[%s16637_s8 + $0x28] sm:$0xff]  ;;  %v16269_v34 = vld [vmem:[%s16637_s8 + $0x70] sm:$0xff]  ;;  %v16270_v53 = vld [vmem:[%s16637_s8 + $0x78] sm:$0xff] }
 0x6a5   : > { %v23430_v37 = vrot.slane %v25016_v56, %v24767_v38  ;;  %v15159_v54 = vsel %vm1890_vm9, %v25019_v33, %v14870_v40  ;;  %v15195_v20 = vsub.s32 6, %v25020_v10  ;;  %v15051_v3 = vrot.slane %v15892_v42, %v24767_v38 }
 0x6a6   : > { %v23442_v45 = vrot.slane %v25022_v1, %v25021_v46  ;;  %15243 = vst [vmem:[%s23313_s15 + $0x10] sm:$0xff] %v15227_v21  ;;  %v15213_v32 = vadd.f32 %v25023_v6, %v15159_v54  ;;  %v14960_v61 = vcombine.low %v14952_v55, %v14959_v18  ;;  %v25024_v17 = vcombine.high %v25012_v63, %v25013_v14  ;;  %v25028_v63 = vld [vmem:[#allocation83_spill] sm:$0xff]  ;;  %v25029_v14 = vld [vmem:[#allocation72_spill] sm:$0xff] }
 0x6a7   : > { %v15100_v25 = vcombine.low %v23430_v37, %v23433_v8  ;;  %v25027_v49 = vcombine.low %v25025_v41, %v25026_v30  ;;  %v15196_v15 = vrot.slane %v25022_v1, %v15195_v20  ;;  %v15199_v18 = vsub.s32 7, %v25020_v10  ;;  %v25031_v54 = vld [vmem:[#allocation60_spill] sm:$0xff]  ;;  %v25032_v10 = vld [vmem:[#allocation63_spill] sm:$0xff] }
 0x6a8   : > { %v15229_v39 = vadd.f32 %v16259_v26, %v15213_v32  ;;  %14963 = vrot.lane.b32.xlu1 %v14960_v61, %s16459_s24  ;;  %v14962_v44 = vpop.permute.xlu0 %14961  ;;  %v15044_v52 = vrot.slane %v25024_v17, %v24767_v38  ;;  %v25030_v40 = vcombine.low %v25028_v63, %v25029_v14  ;;  %v25033_v46 = vcombine.low %v25031_v54, %v25032_v10  ;;  %v16262_v61 = vld [vmem:[%s16637_s8 + $0x38] sm:$0xff]  ;;  %v16264_v30 = vld [vmem:[%s16637_s8 + $0x48] sm:$0xff] }
 0x6a9   : > { %v15161_v42 = vsel %vm1890_vm9, %v25027_v49, %v14962_v44  ;;  %v15200_v56 = vrot.slane %v25022_v1, %v15199_v18 }
 0x6aa   : > { %15245 = vst [vmem:[%s23313_s15 + $0x20] sm:$0xff] %v15229_v39  ;;  %v15214_v2 = vadd.f32 %v23442_v45, %v15161_v42  ;;  %v15052_v36 = vcombine.low %v15044_v52, %v15051_v3  ;;  %v16263_v39 = vld [vmem:[%s16637_s8 + $0x40] sm:$0xff] }
 0x6ac   : > { %v15230_v21 = vadd.f32 %v16260_v60, %v15214_v2  ;;  %15055 = vrot.lane.b32.xlu1 %v15052_v36, %s16459_s24  ;;  %v15054_v38 = vpop.permute.xlu0 %15053 }
 0x6ad   : > { %v15163_v5 = vsel %vm1890_vm9, %v25030_v40, %v15054_v38 }
 0x6ae   : > { %15246 = vst [vmem:[%s23313_s15 + $0x28] sm:$0xff] %v15230_v21  ;;  %v15215_v55 = vadd.f32 %v15196_v15, %v15163_v5 }
 0x6b0   : > { %v15231_v59 = vadd.f32 %v16261_v24, %v15215_v55  ;;  %15147 = vrot.lane.b32.xlu1 %v15144_v22, %s16459_s24  ;;  %v15146_v33 = vpop.permute.xlu0 %15145 }
 0x6b1   : > { %v15165_v20 = vsel %vm1890_vm9, %v25033_v46, %v15146_v33 }
 0x6b2   : > { %15247 = vst [vmem:[%s23313_s15 + $0x30] sm:$0xff] %v15231_v59  ;;  %v15216_v32 = vadd.f32 %v15200_v56, %v15165_v20 }
 0x6b4   : > { %v15232_v3 = vadd.f32 %v16262_v61, %v15216_v32 }
 0x6b6   : > { %15248 = vst [vmem:[%s23313_s15 + $0x38] sm:$0xff] %v15232_v3 }
 0x702   : > { %v14504_v1 = vpop.permute.xlu1 %14503 }
 0x703   : > { %v15152_v22 = vsel %vm1890_vm9, %v14456_v9, %v14504_v1 }
 0x704   : > { %v15217_v26 = vadd.f32 %v23062_v19, %v15152_v22 }
 0x706   : > { %v15233_v44 = vadd.f32 %v16263_v39, %v15217_v26  ;;  %v14596_v17 = vpop.permute.xlu1 %14595 }
 0x707   : > { %v15154_v52 = vsel %vm1890_vm9, %v14548_v35, %v14596_v17 }
 0x708   : > { %15249 = vst [vmem:[%s23313_s15 + $0x40] sm:$0xff] %v15233_v44  ;;  %v15218_v41 = vadd.f32 %v23065_v0, %v15154_v52 }
 0x70a   : > { %v15234_v11 = vadd.f32 %v16264_v30, %v15218_v41  ;;  %v14780_v51 = vpop.permute.xlu1 %14779 }
 0x70b   : > { %v15158_v19 = vsel %vm1890_vm9, %v14732_v28, %v14780_v51 }
 0x70c   : > { %15250 = vst [vmem:[%s23313_s15 + $0x48] sm:$0xff] %v15234_v11  ;;  %v15220_v9 = vadd.f32 %v23068_v57, %v15158_v19 }
 0x70e   : > { %v15236_v4 = vadd.f32 %v16265_v48, %v15220_v9  ;;  %v14688_v35 = vpop.permute.xlu1 %14687 }
 0x70f   : > { %v15156_v0 = vsel %vm1890_vm9, %v14640_v43, %v14688_v35 }
 0x710   : > { %15252 = vst [vmem:[%s23313_s15 + $0x58] sm:$0xff] %v15236_v4  ;;  %v15219_v49 = vadd.f32 %v23075_v62, %v15156_v0 }
 0x712   : > { %v15235_v12 = vadd.f32 %v16266_v31, %v15219_v49 }
 0x714   : > { %15251 = vst [vmem:[%s23313_s15 + $0x50] sm:$0xff] %v15235_v12 }
 0x715   : > { %v14872_v28 = vpop.permute.xlu1 %14871 }
 0x716   : > { %v15160_v57 = vsel %vm1890_vm9, %v14824_v23, %v14872_v28 }
 0x717   : > { %v15221_v42 = vadd.f32 %v25023_v6, %v15160_v57 }
 0x719   : > { %v15237_v47 = vadd.f32 %v16267_v27, %v15221_v42 }
 0x71a   : > { %v14964_v43 = vpop.permute.xlu1 %14963 }
 0x71b   : > { %v15162_v62 = vsel %vm1890_vm9, %v14916_v29, %v14964_v43  ;;  %15253 = vst [vmem:[%s23313_s15 + $0x60] sm:$0xff] %v15237_v47 }
 0x71c   : > { %v15222_v7 = vadd.f32 %v23442_v45, %v15162_v62 }
 0x71e   : > { %v15238_v23 = vadd.f32 %v16268_v58, %v15222_v7  ;;  %v15056_v2 = vpop.permute.xlu1 %15055 }
 0x71f   : > { %v15164_v6 = vsel %vm1890_vm9, %v15008_v50, %v15056_v2 }
 0x720   : > { %15254 = vst [vmem:[%s23313_s15 + $0x68] sm:$0xff] %v15238_v23  ;;  %v15223_v36 = vadd.f32 %v15196_v15, %v15164_v6 }
 0x722   : > { %v15239_v16 = vadd.f32 %v16269_v34, %v15223_v36  ;;  %v15148_v29 = vpop.permute.xlu1 %15147 }
 0x723   : > { %v15166_v45 = vsel %vm1890_vm9, %v15100_v25, %v15148_v29 }
 0x724   : > { %15255 = vst [vmem:[%s23313_s15 + $0x70] sm:$0xff] %v15239_v16  ;;  %v15224_v18 = vadd.f32 %v15200_v56, %v15166_v45 }
 0x726   : > { %v15240_v13 = vadd.f32 %v16270_v53, %v15224_v18 }
 0x728   : > { %15256 = vst [vmem:[%s23313_s15 + $0x78] sm:$0xff] %v15240_v13 }
 0x729   : > { %16390 = shalt.err (!%p16387_p9)
}
 0x72a   : > { %s16391_s10 = scalar_lea.hbm %s23538_s12, 2048  ;;  %s16395_s13 = scalar_lea.hbm %s23591_s5, 4096 }
 0x72b   : > { %p16392_p1 = scmp.ne.s32.totalorder %s23538_s12, %s16391_s10  ;;  %p16396_p11 = scmp.lt.s32.totalorder %s23538_s12, %s23591_s5 }
 0x72c   : > { %p16397_p13 = scmp.lt.s32.totalorder %s16395_s13, %s16391_s10 }
 0x72d   : > { %p16393_p8 = pnand %p16392_p1, %p25034_p6 }
 0x72e   : > { %p16398_p2 = por %p16397_p13, %p16396_p11 }
 0x72f   : > { %p16394_p10 = pneg %p16393_p8 }
 0x731   : > { %p16399_p4 = pnand %p16398_p2, %p16394_p10 }
 0x733   : > { %16402 = shalt.err (!%p16399_p4)
}
 0x734   : > { %s16465_s9 = smov 1024  }
 0x735   : > { %15950 = dma.vmem_to_hbm [thread:$0]  (%p25034_p6), %s23541_s17, 2048, %s23538_s12, %s15258_s22, %s16465_s9, %s16465_s9, %s16459_s24  }
 0x736 PF: > { %s15286_s11 = sand.u32 1, %s16437_s18   ;;  %p25035_p12 = scmp.ne.s32.totalorder %s24119_s25, 0 }
 0x737   : > { %p25036_p0 = scmp.ge.s32.totalorder %s16449_s21, 2  ;;  %s15287_s14 = scalar_lea.sflag [#allocation5], %s15286_s11 }
 0x739   : > { %p15967_p5 = pnand %p25036_p0, %p25035_p12 }
 0x73b   : > { %p15968_p3 = pneg %p15967_p5 }
 0x73d   : > { %16432 = dma.done.wait (%p15968_p3), %s15287_s14, 2048  }
 0x73e   : > { %16434 = vsyncadd (%p15968_p3), %s15287_s14, 4294965248  ;;  %p20_p7 = scmp.ge.s32.totalorder %s16576_s28, 4   ;;  %s25037_s18 = smov %s16441_s19 }
 0x73f   : > { %s25038_s19 = smov %s16445_s20  ;;  %s25039_s20 = smov %s16586_s6 }
 0x740   : > { %s25040_s21 = smov %s16576_s28  ;;  %22 = sbr.rel (!%p20_p7) target bundleno = 7 (0x7), region = 100 }
 0x745   :  { %15292 = vsyncpa [#allocation4], 1 }
 0x746   :  { %15294 = vsyncpa [#allocation4 + $0x1], 1 }
 0x747   :  { %15295 = vsyncpa [#allocation7], 1 }
 0x748   :  { %15296 = vsyncpa [#allocation10], 1 }
 0x749   :  { %15297 = vsyncpa [#allocation5], 1 }
 0x74a   :  { %15299 = vsyncpa [#allocation5 + $0x1], 1 }

</bundles_post_ra>
